<compile_context>
chip_gen: v7x
topology: tpu7x:2x2x1
jax: 0.10.0
libtpu: 0.0.40
codegen_flags: <defaults>
</compile_context>

<pallas_src>
import functools

import jax
import jax.numpy as jnp
from jax import lax
from jax.experimental import pallas as pl
from jax.experimental.pallas import tpu as pltpu

LANES = 128


# ----------------------------------------------------------------------------
# In-kernel building blocks (Python helpers traced inside the single kernel)
# ----------------------------------------------------------------------------
def _conv_pool_stage(src_ref, pad, H, W, K, w_ref, b_ref, ys_ref,
                     dst_ref, dst_pad, n_img):
    """3x3 SAME conv + bias + ReLU + 2x2 maxpool, fully VMEM-resident.

    src_ref : (n_img*H*W + 2*pad, 128) f32; rows in (n, h, w) order with `pad`
              zero rows before/after the data; lanes >= K valid, rest zero.
    w_ref   : (9, K, 128) bf16 packed conv weight (tap-major, zero padded).
    b_ref   : (1, 128) f32 bias (zero padded).
    ys_ref  : (>= n_img*H*W, 128) f32 staging scratch for the conv output.
    dst_ref : pooled rows written at row offset dst_pad in (n, h', w') order.
    """
    HW = H * W
    M = n_img * HW

    r = lax.broadcasted_iota(jnp.int32, (M, 1), 0)
    t_idx = jnp.bitwise_and(r, HW - 1)          # index within the image
    w_idx = jnp.bitwise_and(r, W - 1)           # column index

    acc = jnp.zeros((M, LANES), jnp.float32)
    for oh in (-1, 0, 1):
        for ow in (-1, 0, 1):
            shift = oh * W + ow
            x = src_ref[pl.ds(pad + shift, M), :]
            x = x[:, :K]
            conds = []
            if oh == -1:
                conds.append(t_idx >= W)            # h > 0
            elif oh == 1:
                conds.append(t_idx < HW - W)        # h < H-1
            if ow == -1:
                conds.append(w_idx >= 1)            # w > 0
            elif ow == 1:
                conds.append(w_idx < W - 1)         # w < W-1
            if conds:
                m = conds[0]
                for c in conds[1:]:
                    m = jnp.logical_and(m, c)
                x = jnp.where(m, x, 0.0)
            tap = (oh + 1) * 3 + (ow + 1)
            acc = acc + jnp.dot(x.astype(jnp.bfloat16), w_ref[tap],
                                preferred_element_type=jnp.float32)

    y = jnp.maximum(acc + b_ref[...], 0.0)          # (M, 128), pad lanes stay 0
    ys_ref[pl.ds(0, M), :] = y

    # 2x2 max pool.  Horizontal: adjacent flat rows are horizontally adjacent
    # pixels -> stride-2 row max.  Vertical: static block maxes per image row.
    Wp = W // 2
    hp = jnp.maximum(ys_ref[pl.ds(0, M // 2, stride=2), :],
                     ys_ref[pl.ds(1, M // 2, stride=2), :])   # rows (n, h, w')
    for n in range(n_img):
        for hh in range(H // 2):
            a0 = (n * H + 2 * hh) * Wp
            blk = jnp.maximum(hp[a0:a0 + Wp, :], hp[a0 + Wp:a0 + 2 * Wp, :])
            d0 = dst_pad + (n * (H // 2) + hh) * Wp
            dst_ref[pl.ds(d0, Wp), :] = blk


def _tconv_stage(src_ref, K, Hi, Wi, w_ref, b_ref, dst_ref, act, n_img):
    """ConvTranspose2d(kernel=2, stride=2) + activation + in-kernel d2s."""
    x = src_ref[...]
    x = x[:, :K]
    z = jnp.dot(x.astype(jnp.bfloat16), w_ref[...],
                preferred_element_type=jnp.float32) + b_ref[...]
    if act == "relu":
        y = jnp.maximum(z, 0.0)
    else:  # sigmoid: exp on the EUP + approximate reciprocal
        y = pl.reciprocal(1.0 + jnp.exp(-z), approx=True)

    Wo = 2 * Wi
    HoWo = 4 * Hi * Wi
    for n in range(n_img):
        for hi in range(Hi):
            s0 = (n * Hi + hi) * Wi
            for di in (0, 1):
                for dj in (0, 1):
                    g = 2 * di + dj
                    slab = y[s0:s0 + Wi, g * LANES:(g + 1) * LANES]
                    d0 = n * HoWo + (2 * hi + di) * Wo + dj
                    dst_ref[pl.ds(d0, Wi, stride=2), :] = slab


def _ae_kernel(x_ref, w1, b1, w2, b2, w3, b3, tw1, tb1, tw2, tb2, tw3, tb3,
               o_ref, b2s, b3s, ys, a3, t1o, t2o, *, n_img):
    # Padded conv-input buffers: pad rows must read as zeros.
    b2s[...] = jnp.zeros(b2s.shape, b2s.dtype)
    b3s[...] = jnp.zeros(b3s.shape, b3s.dtype)

    # ---- encoder: conv3x3+ReLU then 2x2 maxpool, three stages --------------
    _conv_pool_stage(x_ref, 17, 16, 16, 8,  w1, b1, ys, b2s, 9, n_img)
    _conv_pool_stage(b2s,   9,  8,  8,  32, w2, b2, ys, b3s, 5, n_img)
    _conv_pool_stage(b3s,   5,  4,  4,  64, w3, b3, ys, a3,  0, n_img)

    # ---- decoder: ConvTranspose2d(2, stride=2) x3 ---------------------------
    _tconv_stage(a3,  128, 2, 2, tw1, tb1, t1o,   "relu",    n_img)
    _tconv_stage(t1o, 64,  4, 4, tw2, tb2, t2o,   "relu",    n_img)
    _tconv_stage(t2o, 32,  8, 8, tw3, tb3, o_ref, "sigmoid", n_img)


# ----------------------------------------------------------------------------
# Wrapper: one-time weight packing + the single pallas_call
# ----------------------------------------------------------------------------
def pack_params(p):
    """Repack PyTorch-layout params once (outside the per-forward path)."""
    def pack_conv(w, b, k_pad):
        cout, cin = w.shape[0], w.shape[1]
        wt = jnp.transpose(w, (2, 3, 1, 0)).reshape(9, cin, cout)
        wt = jnp.pad(wt, ((0, 0), (0, k_pad - cin), (0, LANES - cout)))
        bp = jnp.pad(b, (0, LANES - cout)).reshape(1, LANES)
        return wt.astype(jnp.bfloat16), bp.astype(jnp.float32)

    def pack_tconv(w, b):
        cin, cout = w.shape[0], w.shape[1]
        wt = jnp.transpose(w, (0, 2, 3, 1))                      # (cin,2,2,cout)
        wt = jnp.pad(wt, ((0, 0), (0, 0), (0, 0), (0, LANES - cout)))
        wt = wt.reshape(cin, 4 * LANES)
        bp = jnp.tile(jnp.pad(b, (0, LANES - cout)), 4).reshape(1, 4 * LANES)
        return wt.astype(jnp.bfloat16), bp.astype(jnp.float32)

    pk = {}
    pk["w1"], pk["b1"] = pack_conv(p["conv1_w"], p["conv1_b"], 8)
    pk["w2"], pk["b2"] = pack_conv(p["conv2_w"], p["conv2_b"], 32)
    pk["w3"], pk["b3"] = pack_conv(p["conv3_w"], p["conv3_b"], 64)
    pk["tw1"], pk["tb1"] = pack_tconv(p["t1_w"], p["t1_b"])
    pk["tw2"], pk["tb2"] = pack_tconv(p["t2_w"], p["t2_b"])
    pk["tw3"], pk["tb3"] = pack_tconv(p["t3_w"], p["t3_b"])
    return pk


def _fullspec(shape):
    zeros = (0,) * len(shape)
    return pl.BlockSpec(shape, lambda i, _z=zeros: _z)


def autoencoder_forward(x_nchw, pk):
    N = x_nchw.shape[0]
    M1 = N * 16 * 16
    # NCHW -> flat (n,h,w) rows x 128 zero-padded channel lanes, with W+1=17
    # zero rows of spatial padding before/after the data region.
    x = jnp.transpose(x_nchw, (0, 2, 3, 1)).reshape(M1, 3).astype(jnp.float32)
    x = jnp.pad(x, ((17, 17), (0, LANES - 3)))

    args = (x, pk["w1"], pk["b1"], pk["w2"], pk["b2"], pk["w3"], pk["b3"],
            pk["tw1"], pk["tb1"], pk["tw2"], pk["tb2"], pk["tw3"], pk["tb3"])

    out = pl.pallas_call(
        functools.partial(_ae_kernel, n_img=N),
        grid=(1,),
        in_specs=[_fullspec(a.shape) for a in args],
        out_specs=pl.BlockSpec((M1, LANES), lambda i: (0, 0)),
        out_shape=jax.ShapeDtypeStruct((M1, LANES), jnp.float32),
        scratch_shapes=[
            pltpu.VMEM((N * 64 + 18, LANES), jnp.float32),   # conv2 padded input
            pltpu.VMEM((N * 16 + 10, LANES), jnp.float32),   # conv3 padded input
            pltpu.VMEM((M1, LANES), jnp.float32),            # conv output staging
            pltpu.VMEM((N * 4, LANES), jnp.float32),         # encoder out (2x2)
            pltpu.VMEM((N * 16, LANES), jnp.float32),        # t_conv1 out (4x4)
            pltpu.VMEM((N * 64, LANES), jnp.float32),        # t_conv2 out (8x8)
        ],
        compiler_params=pltpu.CompilerParams(
            dimension_semantics=("arbitrary",)),
    )(*args)

    y = out[:, :3].reshape(N, 16, 16, 3)
    return jnp.transpose(y, (0, 3, 1, 2))  # NHWC -> NCHW


# ----------------------------------------------------------------------------
# Pure-JAX reference (correctness check only)
# ----------------------------------------------------------------------------
def reference_forward(x, p):
    dn = ("NCHW", "OIHW", "NCHW")

    def conv_relu(x, w, b):
        y = jax.lax.conv_general_dilated(x, w, (1, 1), "SAME",
                                         dimension_numbers=dn)
        return jax.nn.relu(y + b[None, :, None, None])

    def pool(x):
        return jax.lax.reduce_window(
            x, -jnp.inf, jax.lax.max, (1, 1, 2, 2), (1, 1, 2, 2), "VALID")

    def tconv(x, w, b, act):
        N, C, H, W = x.shape
        Cout = w.shape[1]
        y = jnp.einsum("nchw,codk->nohdwk", x, w).reshape(N, Cout, 2 * H, 2 * W)
        return act(y + b[None, :, None, None])

    x = pool(conv_relu(x, p["conv1_w"], p["conv1_b"]))
    x = pool(conv_relu(x, p["conv2_w"], p["conv2_b"]))
    x = pool(conv_relu(x, p["conv3_w"], p["conv3_b"]))
    x = tconv(x, p["t1_w"], p["t1_b"], jax.nn.relu)
    x = tconv(x, p["t2_w"], p["t2_b"], jax.nn.relu)
    x = tconv(x, p["t3_w"], p["t3_b"], jax.nn.sigmoid)
    return x


# ----------------------------------------------------------------------------
# Deterministic parameter init (PyTorch-default-like uniform)
# ----------------------------------------------------------------------------
def init_params(key):
    def u(key, shape, fan_in):
        bound = 1.0 / jnp.sqrt(jnp.float32(fan_in))
        return jax.random.uniform(key, shape, jnp.float32, -bound, bound)

    keys = jax.random.split(key, 12)
    p = {}
    p["conv1_w"] = u(keys[0], (32, 3, 3, 3), 3 * 9)
    p["conv1_b"] = u(keys[1], (32,), 3 * 9)
    p["conv2_w"] = u(keys[2], (64, 32, 3, 3), 32 * 9)
    p["conv2_b"] = u(keys[3], (64,), 32 * 9)
    p["conv3_w"] = u(keys[4], (128, 64, 3, 3), 64 * 9)
    p["conv3_b"] = u(keys[5], (128,), 64 * 9)
    p["t1_w"] = u(keys[6], (128, 64, 2, 2), 128 * 4)
    p["t1_b"] = u(keys[7], (64,), 128 * 4)
    p["t2_w"] = u(keys[8], (64, 32, 2, 2), 64 * 4)
    p["t2_b"] = u(keys[9], (32,), 64 * 4)
    p["t3_w"] = u(keys[10], (32, 3, 2, 2), 32 * 4)
    p["t3_b"] = u(keys[11], (3,), 32 * 4)
    return p


if __name__ == "__main__":
    key = jax.random.PRNGKey(0)
    k_x, k_p = jax.random.split(key)

    # Input in NCHW, matching the PyTorch module: (batch=2, channels=3, 16, 16)
    x = jax.random.uniform(k_x, (2, 3, 16, 16), jnp.float32)
    params = init_params(k_p)
    packed = pack_params(params)            # one-time weight repack (bf16)

    fwd = jax.jit(autoencoder_forward)
    out = jax.block_until_ready(fwd(x, packed))
    assert out.shape == (2, 3, 16, 16), out.shape

    ref = jax.block_until_ready(reference_forward(x, params))
    err = float(jnp.max(jnp.abs(out - ref)))
    # bf16 MXU operands -> tolerance loosened vs. the f32 XLA reference
    assert err < 3e-2, err

    print("KERNEL_OK")
</pallas_src>

<mosaic_0001>
module attributes {stable_mosaic.version = 11 : i64} {
  func.func @_ae_kernel(%arg0: i32, %arg1: memref<546x128xf32, #tpu.memory_space<vmem>>, %arg2: memref<9x8x128xbf16, #tpu.memory_space<vmem>>, %arg3: memref<1x128xf32, #tpu.memory_space<vmem>>, %arg4: memref<9x32x128xbf16, #tpu.memory_space<vmem>>, %arg5: memref<1x128xf32, #tpu.memory_space<vmem>>, %arg6: memref<9x64x128xbf16, #tpu.memory_space<vmem>>, %arg7: memref<1x128xf32, #tpu.memory_space<vmem>>, %arg8: memref<128x512xbf16, #tpu.memory_space<vmem>>, %arg9: memref<1x512xf32, #tpu.memory_space<vmem>>, %arg10: memref<64x512xbf16, #tpu.memory_space<vmem>>, %arg11: memref<1x512xf32, #tpu.memory_space<vmem>>, %arg12: memref<32x512xbf16, #tpu.memory_space<vmem>>, %arg13: memref<1x512xf32, #tpu.memory_space<vmem>>, %arg14: memref<512x128xf32, #tpu.memory_space<vmem>>, %arg15: memref<146x128xf32, #tpu.memory_space<vmem>>, %arg16: memref<42x128xf32, #tpu.memory_space<vmem>>, %arg17: memref<512x128xf32, #tpu.memory_space<vmem>>, %arg18: memref<8x128xf32, #tpu.memory_space<vmem>>, %arg19: memref<32x128xf32, #tpu.memory_space<vmem>>, %arg20: memref<128x128xf32, #tpu.memory_space<vmem>>) attributes {dimension_semantics = [#tpu.dimension_semantics<arbitrary>], iteration_bounds = array<i64: 1>, scalar_prefetch = 0 : i64, scratch_operands = 6 : i64, tpu.core_type = #tpu.core_type<tc>, window_params = [{pipeline_mode = #tpu.pipeline_mode<synchronous>, transform_indices = @transform_0, window_bounds = array<i64: 546, 128>}, {pipeline_mode = #tpu.pipeline_mode<synchronous>, transform_indices = @transform_1, window_bounds = array<i64: 9, 8, 128>}, {pipeline_mode = #tpu.pipeline_mode<synchronous>, transform_indices = @transform_2, window_bounds = array<i64: 1, 128>}, {pipeline_mode = #tpu.pipeline_mode<synchronous>, transform_indices = @transform_3, window_bounds = array<i64: 9, 32, 128>}, {pipeline_mode = #tpu.pipeline_mode<synchronous>, transform_indices = @transform_4, window_bounds = array<i64: 1, 128>}, {pipeline_mode = #tpu.pipeline_mode<synchronous>, transform_indices = @transform_5, window_bounds = array<i64: 9, 64, 128>}, {pipeline_mode = #tpu.pipeline_mode<synchronous>, transform_indices = @transform_6, window_bounds = array<i64: 1, 128>}, {pipeline_mode = #tpu.pipeline_mode<synchronous>, transform_indices = @transform_7, window_bounds = array<i64: 128, 512>}, {pipeline_mode = #tpu.pipeline_mode<synchronous>, transform_indices = @transform_8, window_bounds = array<i64: 1, 512>}, {pipeline_mode = #tpu.pipeline_mode<synchronous>, transform_indices = @transform_9, window_bounds = array<i64: 64, 512>}, {pipeline_mode = #tpu.pipeline_mode<synchronous>, transform_indices = @transform_10, window_bounds = array<i64: 1, 512>}, {pipeline_mode = #tpu.pipeline_mode<synchronous>, transform_indices = @transform_11, window_bounds = array<i64: 32, 512>}, {pipeline_mode = #tpu.pipeline_mode<synchronous>, transform_indices = @transform_12, window_bounds = array<i64: 1, 512>}, {pipeline_mode = #tpu.pipeline_mode<synchronous>, transform_indices = @transform_13, window_bounds = array<i64: 512, 128>}]} {
    %cst = arith.constant 0.000000e+00 : f32
    %0 = vector.broadcast %cst : f32 to vector<146x128xf32>
    %c0 = arith.constant 0 : index
    %c0_0 = arith.constant 0 : index
    %1 = vector.load %arg15[%c0, %c0_0] : memref<146x128xf32, #tpu.memory_space<vmem>>, vector<146x128xf32>
    tpu.vector_store %arg15[%c0, %c0_0], %0 {strides = array<i32>} : memref<146x128xf32, #tpu.memory_space<vmem>>, vector<146x128xf32>,
    %cst_1 = arith.constant 0.000000e+00 : f32
    %2 = vector.broadcast %cst_1 : f32 to vector<42x128xf32>
    %c0_2 = arith.constant 0 : index
    %c0_3 = arith.constant 0 : index
    %3 = vector.load %arg16[%c0_2, %c0_3] : memref<42x128xf32, #tpu.memory_space<vmem>>, vector<42x128xf32>
    tpu.vector_store %arg16[%c0_2, %c0_3], %2 {strides = array<i32>} : memref<42x128xf32, #tpu.memory_space<vmem>>, vector<42x128xf32>,
    %4 = tpu.iota {dimensions = array<i32: 0>} : vector<512x1xi32>
    %c255_i32 = arith.constant 255 : i32
    %5 = vector.broadcast %c255_i32 : i32 to vector<512x1xi32>
    %6 = arith.andi %4, %5 : vector<512x1xi32>
    %c15_i32 = arith.constant 15 : i32
    %7 = vector.broadcast %c15_i32 : i32 to vector<512x1xi32>
    %8 = arith.andi %4, %7 : vector<512x1xi32>
    %cst_4 = arith.constant 0.000000e+00 : f32
    %9 = vector.broadcast %cst_4 : f32 to vector<512x128xf32>
    %c0_5 = arith.constant 0 : index
    %c0_6 = arith.constant 0 : index
    %10 = vector.load %arg1[%c0_5, %c0_6] : memref<546x128xf32, #tpu.memory_space<vmem>>, vector<512x128xf32>
    %11 = vector.extract_strided_slice %10 {offsets = [0, 0], sizes = [512, 8], strides = [1, 1]} : vector<512x128xf32> to vector<512x8xf32>
    %c16_i32 = arith.constant 16 : i32
    %12 = vector.broadcast %c16_i32 : i32 to vector<512x1xi32>
    %13 = arith.cmpi sge, %6, %12 : vector<512x1xi32>
    %c1_i32 = arith.constant 1 : i32
    %14 = vector.broadcast %c1_i32 : i32 to vector<512x1xi32>
    %15 = arith.cmpi sge, %8, %14 : vector<512x1xi32>
    %16 = arith.andi %13, %15 : vector<512x1xi1>
    %cst_7 = arith.constant 0.000000e+00 : f32
    %17 = vector.shape_cast %16 : vector<512x1xi1> to vector<512x1xi1>
    %18 = vector.broadcast %17 : vector<512x1xi1> to vector<512x8xi1>
    %19 = vector.broadcast %cst_7 : f32 to vector<512x8xf32>
    %20 = arith.select %18, %11, %19 : vector<512x8xi1>, vector<512x8xf32>
    %21 = arith.truncf %20 : vector<512x8xf32> to vector<512x8xbf16>
    %c0_8 = arith.constant 0 : index
    %c0_9 = arith.constant 0 : index
    %c0_10 = arith.constant 0 : index
    %22 = vector.load %arg2[%c0_8, %c0_9, %c0_10] : memref<9x8x128xbf16, #tpu.memory_space<vmem>>, vector<1x8x128xbf16>
    %23 = vector.shape_cast %22 : vector<1x8x128xbf16> to vector<8x128xbf16>
    %cst_11 = arith.constant dense<0.000000e+00> : vector<512x128xf32>
    %24 = tpu.matmul %21, %23, %cst_11 {dimension_numbers = #tpu.dot_dimension_numbers<[1], [0], [0], [1], [0, 0, 1, 1], [], []>} : vector<512x8xbf16>, vector<8x128xbf16>, vector<512x128xf32> -> vector<512x128xf32>
    %25 = arith.addf %9, %24 : vector<512x128xf32>
    %c1 = arith.constant 1 : index
    %c0_12 = arith.constant 0 : index
    %26 = vector.load %arg1[%c1, %c0_12] : memref<546x128xf32, #tpu.memory_space<vmem>>, vector<512x128xf32>
    %27 = vector.extract_strided_slice %26 {offsets = [0, 0], sizes = [512, 8], strides = [1, 1]} : vector<512x128xf32> to vector<512x8xf32>
    %c16_i32_13 = arith.constant 16 : i32
    %28 = vector.broadcast %c16_i32_13 : i32 to vector<512x1xi32>
    %29 = arith.cmpi sge, %6, %28 : vector<512x1xi32>
    %cst_14 = arith.constant 0.000000e+00 : f32
    %30 = vector.shape_cast %29 : vector<512x1xi1> to vector<512x1xi1>
    %31 = vector.broadcast %30 : vector<512x1xi1> to vector<512x8xi1>
    %32 = vector.broadcast %cst_14 : f32 to vector<512x8xf32>
    %33 = arith.select %31, %27, %32 : vector<512x8xi1>, vector<512x8xf32>
    %34 = arith.truncf %33 : vector<512x8xf32> to vector<512x8xbf16>
    %c1_15 = arith.constant 1 : index
    %c0_16 = arith.constant 0 : index
    %c0_17 = arith.constant 0 : index
    %35 = vector.load %arg2[%c1_15, %c0_16, %c0_17] : memref<9x8x128xbf16, #tpu.memory_space<vmem>>, vector<1x8x128xbf16>
    %36 = vector.shape_cast %35 : vector<1x8x128xbf16> to vector<8x128xbf16>
    %cst_18 = arith.constant dense<0.000000e+00> : vector<512x128xf32>
    %37 = tpu.matmul %34, %36, %cst_18 {dimension_numbers = #tpu.dot_dimension_numbers<[1], [0], [0], [1], [0, 0, 1, 1], [], []>} : vector<512x8xbf16>, vector<8x128xbf16>, vector<512x128xf32> -> vector<512x128xf32>
    %38 = arith.addf %25, %37 : vector<512x128xf32>
    %c2 = arith.constant 2 : index
    %c0_19 = arith.constant 0 : index
    %39 = vector.load %arg1[%c2, %c0_19] : memref<546x128xf32, #tpu.memory_space<vmem>>, vector<512x128xf32>
    %40 = vector.extract_strided_slice %39 {offsets = [0, 0], sizes = [512, 8], strides = [1, 1]} : vector<512x128xf32> to vector<512x8xf32>
    %c16_i32_20 = arith.constant 16 : i32
    %41 = vector.broadcast %c16_i32_20 : i32 to vector<512x1xi32>
    %42 = arith.cmpi sge, %6, %41 : vector<512x1xi32>
    %c15_i32_21 = arith.constant 15 : i32
    %43 = vector.broadcast %c15_i32_21 : i32 to vector<512x1xi32>
    %44 = arith.cmpi slt, %8, %43 : vector<512x1xi32>
    %45 = arith.andi %42, %44 : vector<512x1xi1>
    %cst_22 = arith.constant 0.000000e+00 : f32
    %46 = vector.shape_cast %45 : vector<512x1xi1> to vector<512x1xi1>
    %47 = vector.broadcast %46 : vector<512x1xi1> to vector<512x8xi1>
    %48 = vector.broadcast %cst_22 : f32 to vector<512x8xf32>
    %49 = arith.select %47, %40, %48 : vector<512x8xi1>, vector<512x8xf32>
    %50 = arith.truncf %49 : vector<512x8xf32> to vector<512x8xbf16>
    %c2_23 = arith.constant 2 : index
    %c0_24 = arith.constant 0 : index
    %c0_25 = arith.constant 0 : index
    %51 = vector.load %arg2[%c2_23, %c0_24, %c0_25] : memref<9x8x128xbf16, #tpu.memory_space<vmem>>, vector<1x8x128xbf16>
    %52 = vector.shape_cast %51 : vector<1x8x128xbf16> to vector<8x128xbf16>
    %cst_26 = arith.constant dense<0.000000e+00> : vector<512x128xf32>
    %53 = tpu.matmul %50, %52, %cst_26 {dimension_numbers = #tpu.dot_dimension_numbers<[1], [0], [0], [1], [0, 0, 1, 1], [], []>} : vector<512x8xbf16>, vector<8x128xbf16>, vector<512x128xf32> -> vector<512x128xf32>
    %54 = arith.addf %38, %53 : vector<512x128xf32>
    %c16 = arith.constant 16 : index
    %c0_27 = arith.constant 0 : index
    %55 = vector.load %arg1[%c16, %c0_27] : memref<546x128xf32, #tpu.memory_space<vmem>>, vector<512x128xf32>
    %56 = vector.extract_strided_slice %55 {offsets = [0, 0], sizes = [512, 8], strides = [1, 1]} : vector<512x128xf32> to vector<512x8xf32>
    %c1_i32_28 = arith.constant 1 : i32
    %57 = vector.broadcast %c1_i32_28 : i32 to vector<512x1xi32>
    %58 = arith.cmpi sge, %8, %57 : vector<512x1xi32>
    %cst_29 = arith.constant 0.000000e+00 : f32
    %59 = vector.shape_cast %58 : vector<512x1xi1> to vector<512x1xi1>
    %60 = vector.broadcast %59 : vector<512x1xi1> to vector<512x8xi1>
    %61 = vector.broadcast %cst_29 : f32 to vector<512x8xf32>
    %62 = arith.select %60, %56, %61 : vector<512x8xi1>, vector<512x8xf32>
    %63 = arith.truncf %62 : vector<512x8xf32> to vector<512x8xbf16>
    %c3 = arith.constant 3 : index
    %c0_30 = arith.constant 0 : index
    %c0_31 = arith.constant 0 : index
    %64 = vector.load %arg2[%c3, %c0_30, %c0_31] : memref<9x8x128xbf16, #tpu.memory_space<vmem>>, vector<1x8x128xbf16>
    %65 = vector.shape_cast %64 : vector<1x8x128xbf16> to vector<8x128xbf16>
    %cst_32 = arith.constant dense<0.000000e+00> : vector<512x128xf32>
    %66 = tpu.matmul %63, %65, %cst_32 {dimension_numbers = #tpu.dot_dimension_numbers<[1], [0], [0], [1], [0, 0, 1, 1], [], []>} : vector<512x8xbf16>, vector<8x128xbf16>, vector<512x128xf32> -> vector<512x128xf32>
    %67 = arith.addf %54, %66 : vector<512x128xf32>
    %c17 = arith.constant 17 : index
    %c0_33 = arith.constant 0 : index
    %68 = vector.load %arg1[%c17, %c0_33] : memref<546x128xf32, #tpu.memory_space<vmem>>, vector<512x128xf32>
    %69 = vector.extract_strided_slice %68 {offsets = [0, 0], sizes = [512, 8], strides = [1, 1]} : vector<512x128xf32> to vector<512x8xf32>
    %70 = arith.truncf %69 : vector<512x8xf32> to vector<512x8xbf16>
    %c4 = arith.constant 4 : index
    %c0_34 = arith.constant 0 : index
    %c0_35 = arith.constant 0 : index
    %71 = vector.load %arg2[%c4, %c0_34, %c0_35] : memref<9x8x128xbf16, #tpu.memory_space<vmem>>, vector<1x8x128xbf16>
    %72 = vector.shape_cast %71 : vector<1x8x128xbf16> to vector<8x128xbf16>
    %cst_36 = arith.constant dense<0.000000e+00> : vector<512x128xf32>
    %73 = tpu.matmul %70, %72, %cst_36 {dimension_numbers = #tpu.dot_dimension_numbers<[1], [0], [0], [1], [0, 0, 1, 1], [], []>} : vector<512x8xbf16>, vector<8x128xbf16>, vector<512x128xf32> -> vector<512x128xf32>
    %74 = arith.addf %67, %73 : vector<512x128xf32>
    %c18 = arith.constant 18 : index
    %c0_37 = arith.constant 0 : index
    %75 = vector.load %arg1[%c18, %c0_37] : memref<546x128xf32, #tpu.memory_space<vmem>>, vector<512x128xf32>
    %76 = vector.extract_strided_slice %75 {offsets = [0, 0], sizes = [512, 8], strides = [1, 1]} : vector<512x128xf32> to vector<512x8xf32>
    %c15_i32_38 = arith.constant 15 : i32
    %77 = vector.broadcast %c15_i32_38 : i32 to vector<512x1xi32>
    %78 = arith.cmpi slt, %8, %77 : vector<512x1xi32>
    %cst_39 = arith.constant 0.000000e+00 : f32
    %79 = vector.shape_cast %78 : vector<512x1xi1> to vector<512x1xi1>
    %80 = vector.broadcast %79 : vector<512x1xi1> to vector<512x8xi1>
    %81 = vector.broadcast %cst_39 : f32 to vector<512x8xf32>
    %82 = arith.select %80, %76, %81 : vector<512x8xi1>, vector<512x8xf32>
    %83 = arith.truncf %82 : vector<512x8xf32> to vector<512x8xbf16>
    %c5 = arith.constant 5 : index
    %c0_40 = arith.constant 0 : index
    %c0_41 = arith.constant 0 : index
    %84 = vector.load %arg2[%c5, %c0_40, %c0_41] : memref<9x8x128xbf16, #tpu.memory_space<vmem>>, vector<1x8x128xbf16>
    %85 = vector.shape_cast %84 : vector<1x8x128xbf16> to vector<8x128xbf16>
    %cst_42 = arith.constant dense<0.000000e+00> : vector<512x128xf32>
    %86 = tpu.matmul %83, %85, %cst_42 {dimension_numbers = #tpu.dot_dimension_numbers<[1], [0], [0], [1], [0, 0, 1, 1], [], []>} : vector<512x8xbf16>, vector<8x128xbf16>, vector<512x128xf32> -> vector<512x128xf32>
    %87 = arith.addf %74, %86 : vector<512x128xf32>
    %c32 = arith.constant 32 : index
    %c0_43 = arith.constant 0 : index
    %88 = vector.load %arg1[%c32, %c0_43] : memref<546x128xf32, #tpu.memory_space<vmem>>, vector<512x128xf32>
    %89 = vector.extract_strided_slice %88 {offsets = [0, 0], sizes = [512, 8], strides = [1, 1]} : vector<512x128xf32> to vector<512x8xf32>
    %c240_i32 = arith.constant 240 : i32
    %90 = vector.broadcast %c240_i32 : i32 to vector<512x1xi32>
    %91 = arith.cmpi slt, %6, %90 : vector<512x1xi32>
    %c1_i32_44 = arith.constant 1 : i32
    %92 = vector.broadcast %c1_i32_44 : i32 to vector<512x1xi32>
    %93 = arith.cmpi sge, %8, %92 : vector<512x1xi32>
    %94 = arith.andi %91, %93 : vector<512x1xi1>
    %cst_45 = arith.constant 0.000000e+00 : f32
    %95 = vector.shape_cast %94 : vector<512x1xi1> to vector<512x1xi1>
    %96 = vector.broadcast %95 : vector<512x1xi1> to vector<512x8xi1>
    %97 = vector.broadcast %cst_45 : f32 to vector<512x8xf32>
    %98 = arith.select %96, %89, %97 : vector<512x8xi1>, vector<512x8xf32>
    %99 = arith.truncf %98 : vector<512x8xf32> to vector<512x8xbf16>
    %c6 = arith.constant 6 : index
    %c0_46 = arith.constant 0 : index
    %c0_47 = arith.constant 0 : index
    %100 = vector.load %arg2[%c6, %c0_46, %c0_47] : memref<9x8x128xbf16, #tpu.memory_space<vmem>>, vector<1x8x128xbf16>
    %101 = vector.shape_cast %100 : vector<1x8x128xbf16> to vector<8x128xbf16>
    %cst_48 = arith.constant dense<0.000000e+00> : vector<512x128xf32>
    %102 = tpu.matmul %99, %101, %cst_48 {dimension_numbers = #tpu.dot_dimension_numbers<[1], [0], [0], [1], [0, 0, 1, 1], [], []>} : vector<512x8xbf16>, vector<8x128xbf16>, vector<512x128xf32> -> vector<512x128xf32>
    %103 = arith.addf %87, %102 : vector<512x128xf32>
    %c33 = arith.constant 33 : index
    %c0_49 = arith.constant 0 : index
    %104 = vector.load %arg1[%c33, %c0_49] : memref<546x128xf32, #tpu.memory_space<vmem>>, vector<512x128xf32>
    %105 = vector.extract_strided_slice %104 {offsets = [0, 0], sizes = [512, 8], strides = [1, 1]} : vector<512x128xf32> to vector<512x8xf32>
    %c240_i32_50 = arith.constant 240 : i32
    %106 = vector.broadcast %c240_i32_50 : i32 to vector<512x1xi32>
    %107 = arith.cmpi slt, %6, %106 : vector<512x1xi32>
    %cst_51 = arith.constant 0.000000e+00 : f32
    %108 = vector.shape_cast %107 : vector<512x1xi1> to vector<512x1xi1>
    %109 = vector.broadcast %108 : vector<512x1xi1> to vector<512x8xi1>
    %110 = vector.broadcast %cst_51 : f32 to vector<512x8xf32>
    %111 = arith.select %109, %105, %110 : vector<512x8xi1>, vector<512x8xf32>
    %112 = arith.truncf %111 : vector<512x8xf32> to vector<512x8xbf16>
    %c7 = arith.constant 7 : index
    %c0_52 = arith.constant 0 : index
    %c0_53 = arith.constant 0 : index
    %113 = vector.load %arg2[%c7, %c0_52, %c0_53] : memref<9x8x128xbf16, #tpu.memory_space<vmem>>, vector<1x8x128xbf16>
    %114 = vector.shape_cast %113 : vector<1x8x128xbf16> to vector<8x128xbf16>
    %cst_54 = arith.constant dense<0.000000e+00> : vector<512x128xf32>
    %115 = tpu.matmul %112, %114, %cst_54 {dimension_numbers = #tpu.dot_dimension_numbers<[1], [0], [0], [1], [0, 0, 1, 1], [], []>} : vector<512x8xbf16>, vector<8x128xbf16>, vector<512x128xf32> -> vector<512x128xf32>
    %116 = arith.addf %103, %115 : vector<512x128xf32>
    %c34 = arith.constant 34 : index
    %c0_55 = arith.constant 0 : index
    %117 = vector.load %arg1[%c34, %c0_55] : memref<546x128xf32, #tpu.memory_space<vmem>>, vector<512x128xf32>
    %118 = vector.extract_strided_slice %117 {offsets = [0, 0], sizes = [512, 8], strides = [1, 1]} : vector<512x128xf32> to vector<512x8xf32>
    %c240_i32_56 = arith.constant 240 : i32
    %119 = vector.broadcast %c240_i32_56 : i32 to vector<512x1xi32>
    %120 = arith.cmpi slt, %6, %119 : vector<512x1xi32>
    %c15_i32_57 = arith.constant 15 : i32
    %121 = vector.broadcast %c15_i32_57 : i32 to vector<512x1xi32>
    %122 = arith.cmpi slt, %8, %121 : vector<512x1xi32>
    %123 = arith.andi %120, %122 : vector<512x1xi1>
    %cst_58 = arith.constant 0.000000e+00 : f32
    %124 = vector.shape_cast %123 : vector<512x1xi1> to vector<512x1xi1>
    %125 = vector.broadcast %124 : vector<512x1xi1> to vector<512x8xi1>
    %126 = vector.broadcast %cst_58 : f32 to vector<512x8xf32>
    %127 = arith.select %125, %118, %126 : vector<512x8xi1>, vector<512x8xf32>
    %128 = arith.truncf %127 : vector<512x8xf32> to vector<512x8xbf16>
    %c8 = arith.constant 8 : index
    %c0_59 = arith.constant 0 : index
    %c0_60 = arith.constant 0 : index
    %129 = vector.load %arg2[%c8, %c0_59, %c0_60] : memref<9x8x128xbf16, #tpu.memory_space<vmem>>, vector<1x8x128xbf16>
    %130 = vector.shape_cast %129 : vector<1x8x128xbf16> to vector<8x128xbf16>
    %cst_61 = arith.constant dense<0.000000e+00> : vector<512x128xf32>
    %131 = tpu.matmul %128, %130, %cst_61 {dimension_numbers = #tpu.dot_dimension_numbers<[1], [0], [0], [1], [0, 0, 1, 1], [], []>} : vector<512x8xbf16>, vector<8x128xbf16>, vector<512x128xf32> -> vector<512x128xf32>
    %132 = arith.addf %116, %131 : vector<512x128xf32>
    %c0_62 = arith.constant 0 : index
    %c0_63 = arith.constant 0 : index
    %133 = vector.load %arg3[%c0_62, %c0_63] : memref<1x128xf32, #tpu.memory_space<vmem>>, vector<1x128xf32>
    %134 = vector.broadcast %133 : vector<1x128xf32> to vector<512x128xf32>
    %135 = arith.addf %132, %134 : vector<512x128xf32>
    %cst_64 = arith.constant 0.000000e+00 : f32
    %136 = vector.broadcast %cst_64 : f32 to vector<512x128xf32>
    %137 = arith.maximumf %135, %136 : vector<512x128xf32>
    %c0_65 = arith.constant 0 : index
    %c0_66 = arith.constant 0 : index
    %138 = vector.load %arg17[%c0_65, %c0_66] : memref<512x128xf32, #tpu.memory_space<vmem>>, vector<512x128xf32>
    tpu.vector_store %arg17[%c0_65, %c0_66], %137 {strides = array<i32>} : memref<512x128xf32, #tpu.memory_space<vmem>>, vector<512x128xf32>,
    %c0_67 = arith.constant 0 : index
    %c0_68 = arith.constant 0 : index
    %139 = tpu.strided_load %arg17[%c0_67, %c0_68] {strides = array<i32: 2, 1>} : memref<512x128xf32, #tpu.memory_space<vmem>>, vector<256x128xf32>
    %c1_69 = arith.constant 1 : index
    %c0_70 = arith.constant 0 : index
    %140 = tpu.strided_load %arg17[%c1_69, %c0_70] {strides = array<i32: 2, 1>} : memref<512x128xf32, #tpu.memory_space<vmem>>, vector<256x128xf32>
    %141 = arith.maximumf %139, %140 : vector<256x128xf32>
    %142 = vector.extract_strided_slice %141 {offsets = [0, 0], sizes = [8, 128], strides = [1, 1]} : vector<256x128xf32> to vector<8x128xf32>
    %143 = vector.extract_strided_slice %141 {offsets = [8, 0], sizes = [8, 128], strides = [1, 1]} : vector<256x128xf32> to vector<8x128xf32>
    %144 = arith.maximumf %142, %143 : vector<8x128xf32>
    %c9 = arith.constant 9 : index
    %c0_71 = arith.constant 0 : index
    %145 = vector.load %arg15[%c9, %c0_71] : memref<146x128xf32, #tpu.memory_space<vmem>>, vector<8x128xf32>
    tpu.vector_store %arg15[%c9, %c0_71], %144 {strides = array<i32>} : memref<146x128xf32, #tpu.memory_space<vmem>>, vector<8x128xf32>,
    %146 = vector.extract_strided_slice %141 {offsets = [16, 0], sizes = [8, 128], strides = [1, 1]} : vector<256x128xf32> to vector<8x128xf32>
    %147 = vector.extract_strided_slice %141 {offsets = [24, 0], sizes = [8, 128], strides = [1, 1]} : vector<256x128xf32> to vector<8x128xf32>
    %148 = arith.maximumf %146, %147 : vector<8x128xf32>
    %c17_72 = arith.constant 17 : index
    %c0_73 = arith.constant 0 : index
    %149 = vector.load %arg15[%c17_72, %c0_73] : memref<146x128xf32, #tpu.memory_space<vmem>>, vector<8x128xf32>
    tpu.vector_store %arg15[%c17_72, %c0_73], %148 {strides = array<i32>} : memref<146x128xf32, #tpu.memory_space<vmem>>, vector<8x128xf32>,
    %150 = vector.extract_strided_slice %141 {offsets = [32, 0], sizes = [8, 128], strides = [1, 1]} : vector<256x128xf32> to vector<8x128xf32>
    %151 = vector.extract_strided_slice %141 {offsets = [40, 0], sizes = [8, 128], strides = [1, 1]} : vector<256x128xf32> to vector<8x128xf32>
    %152 = arith.maximumf %150, %151 : vector<8x128xf32>
    %c25 = arith.constant 25 : index
    %c0_74 = arith.constant 0 : index
    %153 = vector.load %arg15[%c25, %c0_74] : memref<146x128xf32, #tpu.memory_space<vmem>>, vector<8x128xf32>
    tpu.vector_store %arg15[%c25, %c0_74], %152 {strides = array<i32>} : memref<146x128xf32, #tpu.memory_space<vmem>>, vector<8x128xf32>,
    %154 = vector.extract_strided_slice %141 {offsets = [48, 0], sizes = [8, 128], strides = [1, 1]} : vector<256x128xf32> to vector<8x128xf32>
    %155 = vector.extract_strided_slice %141 {offsets = [56, 0], sizes = [8, 128], strides = [1, 1]} : vector<256x128xf32> to vector<8x128xf32>
    %156 = arith.maximumf %154, %155 : vector<8x128xf32>
    %c33_75 = arith.constant 33 : index
    %c0_76 = arith.constant 0 : index
    %157 = vector.load %arg15[%c33_75, %c0_76] : memref<146x128xf32, #tpu.memory_space<vmem>>, vector<8x128xf32>
    tpu.vector_store %arg15[%c33_75, %c0_76], %156 {strides = array<i32>} : memref<146x128xf32, #tpu.memory_space<vmem>>, vector<8x128xf32>,
    %158 = vector.extract_strided_slice %141 {offsets = [64, 0], sizes = [8, 128], strides = [1, 1]} : vector<256x128xf32> to vector<8x128xf32>
    %159 = vector.extract_strided_slice %141 {offsets = [72, 0], sizes = [8, 128], strides = [1, 1]} : vector<256x128xf32> to vector<8x128xf32>
    %160 = arith.maximumf %158, %159 : vector<8x128xf32>
    %c41 = arith.constant 41 : index
    %c0_77 = arith.constant 0 : index
    %161 = vector.load %arg15[%c41, %c0_77] : memref<146x128xf32, #tpu.memory_space<vmem>>, vector<8x128xf32>
    tpu.vector_store %arg15[%c41, %c0_77], %160 {strides = array<i32>} : memref<146x128xf32, #tpu.memory_space<vmem>>, vector<8x128xf32>,
    %162 = vector.extract_strided_slice %141 {offsets = [80, 0], sizes = [8, 128], strides = [1, 1]} : vector<256x128xf32> to vector<8x128xf32>
    %163 = vector.extract_strided_slice %141 {offsets = [88, 0], sizes = [8, 128], strides = [1, 1]} : vector<256x128xf32> to vector<8x128xf32>
    %164 = arith.maximumf %162, %163 : vector<8x128xf32>
    %c49 = arith.constant 49 : index
    %c0_78 = arith.constant 0 : index
    %165 = vector.load %arg15[%c49, %c0_78] : memref<146x128xf32, #tpu.memory_space<vmem>>, vector<8x128xf32>
    tpu.vector_store %arg15[%c49, %c0_78], %164 {strides = array<i32>} : memref<146x128xf32, #tpu.memory_space<vmem>>, vector<8x128xf32>,
    %166 = vector.extract_strided_slice %141 {offsets = [96, 0], sizes = [8, 128], strides = [1, 1]} : vector<256x128xf32> to vector<8x128xf32>
    %167 = vector.extract_strided_slice %141 {offsets = [104, 0], sizes = [8, 128], strides = [1, 1]} : vector<256x128xf32> to vector<8x128xf32>
    %168 = arith.maximumf %166, %167 : vector<8x128xf32>
    %c57 = arith.constant 57 : index
    %c0_79 = arith.constant 0 : index
    %169 = vector.load %arg15[%c57, %c0_79] : memref<146x128xf32, #tpu.memory_space<vmem>>, vector<8x128xf32>
    tpu.vector_store %arg15[%c57, %c0_79], %168 {strides = array<i32>} : memref<146x128xf32, #tpu.memory_space<vmem>>, vector<8x128xf32>,
    %170 = vector.extract_strided_slice %141 {offsets = [112, 0], sizes = [8, 128], strides = [1, 1]} : vector<256x128xf32> to vector<8x128xf32>
    %171 = vector.extract_strided_slice %141 {offsets = [120, 0], sizes = [8, 128], strides = [1, 1]} : vector<256x128xf32> to vector<8x128xf32>
    %172 = arith.maximumf %170, %171 : vector<8x128xf32>
    %c65 = arith.constant 65 : index
    %c0_80 = arith.constant 0 : index
    %173 = vector.load %arg15[%c65, %c0_80] : memref<146x128xf32, #tpu.memory_space<vmem>>, vector<8x128xf32>
    tpu.vector_store %arg15[%c65, %c0_80], %172 {strides = array<i32>} : memref<146x128xf32, #tpu.memory_space<vmem>>, vector<8x128xf32>,
    %174 = vector.extract_strided_slice %141 {offsets = [128, 0], sizes = [8, 128], strides = [1, 1]} : vector<256x128xf32> to vector<8x128xf32>
    %175 = vector.extract_strided_slice %141 {offsets = [136, 0], sizes = [8, 128], strides = [1, 1]} : vector<256x128xf32> to vector<8x128xf32>
    %176 = arith.maximumf %174, %175 : vector<8x128xf32>
    %c73 = arith.constant 73 : index
    %c0_81 = arith.constant 0 : index
    %177 = vector.load %arg15[%c73, %c0_81] : memref<146x128xf32, #tpu.memory_space<vmem>>, vector<8x128xf32>
    tpu.vector_store %arg15[%c73, %c0_81], %176 {strides = array<i32>} : memref<146x128xf32, #tpu.memory_space<vmem>>, vector<8x128xf32>,
    %178 = vector.extract_strided_slice %141 {offsets = [144, 0], sizes = [8, 128], strides = [1, 1]} : vector<256x128xf32> to vector<8x128xf32>
    %179 = vector.extract_strided_slice %141 {offsets = [152, 0], sizes = [8, 128], strides = [1, 1]} : vector<256x128xf32> to vector<8x128xf32>
    %180 = arith.maximumf %178, %179 : vector<8x128xf32>
    %c81 = arith.constant 81 : index
    %c0_82 = arith.constant 0 : index
    %181 = vector.load %arg15[%c81, %c0_82] : memref<146x128xf32, #tpu.memory_space<vmem>>, vector<8x128xf32>
    tpu.vector_store %arg15[%c81, %c0_82], %180 {strides = array<i32>} : memref<146x128xf32, #tpu.memory_space<vmem>>, vector<8x128xf32>,
    %182 = vector.extract_strided_slice %141 {offsets = [160, 0], sizes = [8, 128], strides = [1, 1]} : vector<256x128xf32> to vector<8x128xf32>
    %183 = vector.extract_strided_slice %141 {offsets = [168, 0], sizes = [8, 128], strides = [1, 1]} : vector<256x128xf32> to vector<8x128xf32>
    %184 = arith.maximumf %182, %183 : vector<8x128xf32>
    %c89 = arith.constant 89 : index
    %c0_83 = arith.constant 0 : index
    %185 = vector.load %arg15[%c89, %c0_83] : memref<146x128xf32, #tpu.memory_space<vmem>>, vector<8x128xf32>
    tpu.vector_store %arg15[%c89, %c0_83], %184 {strides = array<i32>} : memref<146x128xf32, #tpu.memory_space<vmem>>, vector<8x128xf32>,
    %186 = vector.extract_strided_slice %141 {offsets = [176, 0], sizes = [8, 128], strides = [1, 1]} : vector<256x128xf32> to vector<8x128xf32>
    %187 = vector.extract_strided_slice %141 {offsets = [184, 0], sizes = [8, 128], strides = [1, 1]} : vector<256x128xf32> to vector<8x128xf32>
    %188 = arith.maximumf %186, %187 : vector<8x128xf32>
    %c97 = arith.constant 97 : index
    %c0_84 = arith.constant 0 : index
    %189 = vector.load %arg15[%c97, %c0_84] : memref<146x128xf32, #tpu.memory_space<vmem>>, vector<8x128xf32>
    tpu.vector_store %arg15[%c97, %c0_84], %188 {strides = array<i32>} : memref<146x128xf32, #tpu.memory_space<vmem>>, vector<8x128xf32>,
    %190 = vector.extract_strided_slice %141 {offsets = [192, 0], sizes = [8, 128], strides = [1, 1]} : vector<256x128xf32> to vector<8x128xf32>
    %191 = vector.extract_strided_slice %141 {offsets = [200, 0], sizes = [8, 128], strides = [1, 1]} : vector<256x128xf32> to vector<8x128xf32>
    %192 = arith.maximumf %190, %191 : vector<8x128xf32>
    %c105 = arith.constant 105 : index
    %c0_85 = arith.constant 0 : index
    %193 = vector.load %arg15[%c105, %c0_85] : memref<146x128xf32, #tpu.memory_space<vmem>>, vector<8x128xf32>
    tpu.vector_store %arg15[%c105, %c0_85], %192 {strides = array<i32>} : memref<146x128xf32, #tpu.memory_space<vmem>>, vector<8x128xf32>,
    %194 = vector.extract_strided_slice %141 {offsets = [208, 0], sizes = [8, 128], strides = [1, 1]} : vector<256x128xf32> to vector<8x128xf32>
    %195 = vector.extract_strided_slice %141 {offsets = [216, 0], sizes = [8, 128], strides = [1, 1]} : vector<256x128xf32> to vector<8x128xf32>
    %196 = arith.maximumf %194, %195 : vector<8x128xf32>
    %c113 = arith.constant 113 : index
    %c0_86 = arith.constant 0 : index
    %197 = vector.load %arg15[%c113, %c0_86] : memref<146x128xf32, #tpu.memory_space<vmem>>, vector<8x128xf32>
    tpu.vector_store %arg15[%c113, %c0_86], %196 {strides = array<i32>} : memref<146x128xf32, #tpu.memory_space<vmem>>, vector<8x128xf32>,
    %198 = vector.extract_strided_slice %141 {offsets = [224, 0], sizes = [8, 128], strides = [1, 1]} : vector<256x128xf32> to vector<8x128xf32>
    %199 = vector.extract_strided_slice %141 {offsets = [232, 0], sizes = [8, 128], strides = [1, 1]} : vector<256x128xf32> to vector<8x128xf32>
    %200 = arith.maximumf %198, %199 : vector<8x128xf32>
    %c121 = arith.constant 121 : index
    %c0_87 = arith.constant 0 : index
    %201 = vector.load %arg15[%c121, %c0_87] : memref<146x128xf32, #tpu.memory_space<vmem>>, vector<8x128xf32>
    tpu.vector_store %arg15[%c121, %c0_87], %200 {strides = array<i32>} : memref<146x128xf32, #tpu.memory_space<vmem>>, vector<8x128xf32>,
    %202 = vector.extract_strided_slice %141 {offsets = [240, 0], sizes = [8, 128], strides = [1, 1]} : vector<256x128xf32> to vector<8x128xf32>
    %203 = vector.extract_strided_slice %141 {offsets = [248, 0], sizes = [8, 128], strides = [1, 1]} : vector<256x128xf32> to vector<8x128xf32>
    %204 = arith.maximumf %202, %203 : vector<8x128xf32>
    %c129 = arith.constant 129 : index
    %c0_88 = arith.constant 0 : index
    %205 = vector.load %arg15[%c129, %c0_88] : memref<146x128xf32, #tpu.memory_space<vmem>>, vector<8x128xf32>
    tpu.vector_store %arg15[%c129, %c0_88], %204 {strides = array<i32>} : memref<146x128xf32, #tpu.memory_space<vmem>>, vector<8x128xf32>,
    %206 = tpu.iota {dimensions = array<i32: 0>} : vector<128x1xi32>
    %c63_i32 = arith.constant 63 : i32
    %207 = vector.broadcast %c63_i32 : i32 to vector<128x1xi32>
    %208 = arith.andi %206, %207 : vector<128x1xi32>
    %c7_i32 = arith.constant 7 : i32
    %209 = vector.broadcast %c7_i32 : i32 to vector<128x1xi32>
    %210 = arith.andi %206, %209 : vector<128x1xi32>
    %cst_89 = arith.constant 0.000000e+00 : f32
    %211 = vector.broadcast %cst_89 : f32 to vector<128x128xf32>
    %c0_90 = arith.constant 0 : index
    %c0_91 = arith.constant 0 : index
    %212 = vector.load %arg15[%c0_90, %c0_91] : memref<146x128xf32, #tpu.memory_space<vmem>>, vector<128x128xf32>
    %213 = vector.extract_strided_slice %212 {offsets = [0, 0], sizes = [128, 32], strides = [1, 1]} : vector<128x128xf32> to vector<128x32xf32>
    %c8_i32 = arith.constant 8 : i32
    %214 = vector.broadcast %c8_i32 : i32 to vector<128x1xi32>
    %215 = arith.cmpi sge, %208, %214 : vector<128x1xi32>
    %c1_i32_92 = arith.constant 1 : i32
    %216 = vector.broadcast %c1_i32_92 : i32 to vector<128x1xi32>
    %217 = arith.cmpi sge, %210, %216 : vector<128x1xi32>
    %218 = arith.andi %215, %217 : vector<128x1xi1>
    %cst_93 = arith.constant 0.000000e+00 : f32
    %219 = vector.shape_cast %218 : vector<128x1xi1> to vector<128x1xi1>
    %220 = vector.broadcast %219 : vector<128x1xi1> to vector<128x32xi1>
    %221 = vector.broadcast %cst_93 : f32 to vector<128x32xf32>
    %222 = arith.select %220, %213, %221 : vector<128x32xi1>, vector<128x32xf32>
    %223 = arith.truncf %222 : vector<128x32xf32> to vector<128x32xbf16>
    %c0_94 = arith.constant 0 : index
    %c0_95 = arith.constant 0 : index
    %c0_96 = arith.constant 0 : index
    %224 = vector.load %arg4[%c0_94, %c0_95, %c0_96] : memref<9x32x128xbf16, #tpu.memory_space<vmem>>, vector<1x32x128xbf16>
    %225 = vector.shape_cast %224 : vector<1x32x128xbf16> to vector<32x128xbf16>
    %cst_97 = arith.constant dense<0.000000e+00> : vector<128x128xf32>
    %226 = tpu.matmul %223, %225, %cst_97 {dimension_numbers = #tpu.dot_dimension_numbers<[1], [0], [0], [1], [0, 0, 1, 1], [], []>} : vector<128x32xbf16>, vector<32x128xbf16>, vector<128x128xf32> -> vector<128x128xf32>
    %227 = arith.addf %211, %226 : vector<128x128xf32>
    %c1_98 = arith.constant 1 : index
    %c0_99 = arith.constant 0 : index
    %228 = vector.load %arg15[%c1_98, %c0_99] : memref<146x128xf32, #tpu.memory_space<vmem>>, vector<128x128xf32>
    %229 = vector.extract_strided_slice %228 {offsets = [0, 0], sizes = [128, 32], strides = [1, 1]} : vector<128x128xf32> to vector<128x32xf32>
    %c8_i32_100 = arith.constant 8 : i32
    %230 = vector.broadcast %c8_i32_100 : i32 to vector<128x1xi32>
    %231 = arith.cmpi sge, %208, %230 : vector<128x1xi32>
    %cst_101 = arith.constant 0.000000e+00 : f32
    %232 = vector.shape_cast %231 : vector<128x1xi1> to vector<128x1xi1>
    %233 = vector.broadcast %232 : vector<128x1xi1> to vector<128x32xi1>
    %234 = vector.broadcast %cst_101 : f32 to vector<128x32xf32>
    %235 = arith.select %233, %229, %234 : vector<128x32xi1>, vector<128x32xf32>
    %236 = arith.truncf %235 : vector<128x32xf32> to vector<128x32xbf16>
    %c1_102 = arith.constant 1 : index
    %c0_103 = arith.constant 0 : index
    %c0_104 = arith.constant 0 : index
    %237 = vector.load %arg4[%c1_102, %c0_103, %c0_104] : memref<9x32x128xbf16, #tpu.memory_space<vmem>>, vector<1x32x128xbf16>
    %238 = vector.shape_cast %237 : vector<1x32x128xbf16> to vector<32x128xbf16>
    %cst_105 = arith.constant dense<0.000000e+00> : vector<128x128xf32>
    %239 = tpu.matmul %236, %238, %cst_105 {dimension_numbers = #tpu.dot_dimension_numbers<[1], [0], [0], [1], [0, 0, 1, 1], [], []>} : vector<128x32xbf16>, vector<32x128xbf16>, vector<128x128xf32> -> vector<128x128xf32>
    %240 = arith.addf %227, %239 : vector<128x128xf32>
    %c2_106 = arith.constant 2 : index
    %c0_107 = arith.constant 0 : index
    %241 = vector.load %arg15[%c2_106, %c0_107] : memref<146x128xf32, #tpu.memory_space<vmem>>, vector<128x128xf32>
    %242 = vector.extract_strided_slice %241 {offsets = [0, 0], sizes = [128, 32], strides = [1, 1]} : vector<128x128xf32> to vector<128x32xf32>
    %c8_i32_108 = arith.constant 8 : i32
    %243 = vector.broadcast %c8_i32_108 : i32 to vector<128x1xi32>
    %244 = arith.cmpi sge, %208, %243 : vector<128x1xi32>
    %c7_i32_109 = arith.constant 7 : i32
    %245 = vector.broadcast %c7_i32_109 : i32 to vector<128x1xi32>
    %246 = arith.cmpi slt, %210, %245 : vector<128x1xi32>
    %247 = arith.andi %244, %246 : vector<128x1xi1>
    %cst_110 = arith.constant 0.000000e+00 : f32
    %248 = vector.shape_cast %247 : vector<128x1xi1> to vector<128x1xi1>
    %249 = vector.broadcast %248 : vector<128x1xi1> to vector<128x32xi1>
    %250 = vector.broadcast %cst_110 : f32 to vector<128x32xf32>
    %251 = arith.select %249, %242, %250 : vector<128x32xi1>, vector<128x32xf32>
    %252 = arith.truncf %251 : vector<128x32xf32> to vector<128x32xbf16>
    %c2_111 = arith.constant 2 : index
    %c0_112 = arith.constant 0 : index
    %c0_113 = arith.constant 0 : index
    %253 = vector.load %arg4[%c2_111, %c0_112, %c0_113] : memref<9x32x128xbf16, #tpu.memory_space<vmem>>, vector<1x32x128xbf16>
    %254 = vector.shape_cast %253 : vector<1x32x128xbf16> to vector<32x128xbf16>
    %cst_114 = arith.constant dense<0.000000e+00> : vector<128x128xf32>
    %255 = tpu.matmul %252, %254, %cst_114 {dimension_numbers = #tpu.dot_dimension_numbers<[1], [0], [0], [1], [0, 0, 1, 1], [], []>} : vector<128x32xbf16>, vector<32x128xbf16>, vector<128x128xf32> -> vector<128x128xf32>
    %256 = arith.addf %240, %255 : vector<128x128xf32>
    %c8_115 = arith.constant 8 : index
    %c0_116 = arith.constant 0 : index
    %257 = vector.load %arg15[%c8_115, %c0_116] : memref<146x128xf32, #tpu.memory_space<vmem>>, vector<128x128xf32>
    %258 = vector.extract_strided_slice %257 {offsets = [0, 0], sizes = [128, 32], strides = [1, 1]} : vector<128x128xf32> to vector<128x32xf32>
    %c1_i32_117 = arith.constant 1 : i32
    %259 = vector.broadcast %c1_i32_117 : i32 to vector<128x1xi32>
    %260 = arith.cmpi sge, %210, %259 : vector<128x1xi32>
    %cst_118 = arith.constant 0.000000e+00 : f32
    %261 = vector.shape_cast %260 : vector<128x1xi1> to vector<128x1xi1>
    %262 = vector.broadcast %261 : vector<128x1xi1> to vector<128x32xi1>
    %263 = vector.broadcast %cst_118 : f32 to vector<128x32xf32>
    %264 = arith.select %262, %258, %263 : vector<128x32xi1>, vector<128x32xf32>
    %265 = arith.truncf %264 : vector<128x32xf32> to vector<128x32xbf16>
    %c3_119 = arith.constant 3 : index
    %c0_120 = arith.constant 0 : index
    %c0_121 = arith.constant 0 : index
    %266 = vector.load %arg4[%c3_119, %c0_120, %c0_121] : memref<9x32x128xbf16, #tpu.memory_space<vmem>>, vector<1x32x128xbf16>
    %267 = vector.shape_cast %266 : vector<1x32x128xbf16> to vector<32x128xbf16>
    %cst_122 = arith.constant dense<0.000000e+00> : vector<128x128xf32>
    %268 = tpu.matmul %265, %267, %cst_122 {dimension_numbers = #tpu.dot_dimension_numbers<[1], [0], [0], [1], [0, 0, 1, 1], [], []>} : vector<128x32xbf16>, vector<32x128xbf16>, vector<128x128xf32> -> vector<128x128xf32>
    %269 = arith.addf %256, %268 : vector<128x128xf32>
    %c9_123 = arith.constant 9 : index
    %c0_124 = arith.constant 0 : index
    %270 = vector.load %arg15[%c9_123, %c0_124] : memref<146x128xf32, #tpu.memory_space<vmem>>, vector<128x128xf32>
    %271 = vector.extract_strided_slice %270 {offsets = [0, 0], sizes = [128, 32], strides = [1, 1]} : vector<128x128xf32> to vector<128x32xf32>
    %272 = arith.truncf %271 : vector<128x32xf32> to vector<128x32xbf16>
    %c4_125 = arith.constant 4 : index
    %c0_126 = arith.constant 0 : index
    %c0_127 = arith.constant 0 : index
    %273 = vector.load %arg4[%c4_125, %c0_126, %c0_127] : memref<9x32x128xbf16, #tpu.memory_space<vmem>>, vector<1x32x128xbf16>
    %274 = vector.shape_cast %273 : vector<1x32x128xbf16> to vector<32x128xbf16>
    %cst_128 = arith.constant dense<0.000000e+00> : vector<128x128xf32>
    %275 = tpu.matmul %272, %274, %cst_128 {dimension_numbers = #tpu.dot_dimension_numbers<[1], [0], [0], [1], [0, 0, 1, 1], [], []>} : vector<128x32xbf16>, vector<32x128xbf16>, vector<128x128xf32> -> vector<128x128xf32>
    %276 = arith.addf %269, %275 : vector<128x128xf32>
    %c10 = arith.constant 10 : index
    %c0_129 = arith.constant 0 : index
    %277 = vector.load %arg15[%c10, %c0_129] : memref<146x128xf32, #tpu.memory_space<vmem>>, vector<128x128xf32>
    %278 = vector.extract_strided_slice %277 {offsets = [0, 0], sizes = [128, 32], strides = [1, 1]} : vector<128x128xf32> to vector<128x32xf32>
    %c7_i32_130 = arith.constant 7 : i32
    %279 = vector.broadcast %c7_i32_130 : i32 to vector<128x1xi32>
    %280 = arith.cmpi slt, %210, %279 : vector<128x1xi32>
    %cst_131 = arith.constant 0.000000e+00 : f32
    %281 = vector.shape_cast %280 : vector<128x1xi1> to vector<128x1xi1>
    %282 = vector.broadcast %281 : vector<128x1xi1> to vector<128x32xi1>
    %283 = vector.broadcast %cst_131 : f32 to vector<128x32xf32>
    %284 = arith.select %282, %278, %283 : vector<128x32xi1>, vector<128x32xf32>
    %285 = arith.truncf %284 : vector<128x32xf32> to vector<128x32xbf16>
    %c5_132 = arith.constant 5 : index
    %c0_133 = arith.constant 0 : index
    %c0_134 = arith.constant 0 : index
    %286 = vector.load %arg4[%c5_132, %c0_133, %c0_134] : memref<9x32x128xbf16, #tpu.memory_space<vmem>>, vector<1x32x128xbf16>
    %287 = vector.shape_cast %286 : vector<1x32x128xbf16> to vector<32x128xbf16>
    %cst_135 = arith.constant dense<0.000000e+00> : vector<128x128xf32>
    %288 = tpu.matmul %285, %287, %cst_135 {dimension_numbers = #tpu.dot_dimension_numbers<[1], [0], [0], [1], [0, 0, 1, 1], [], []>} : vector<128x32xbf16>, vector<32x128xbf16>, vector<128x128xf32> -> vector<128x128xf32>
    %289 = arith.addf %276, %288 : vector<128x128xf32>
    %c16_136 = arith.constant 16 : index
    %c0_137 = arith.constant 0 : index
    %290 = vector.load %arg15[%c16_136, %c0_137] : memref<146x128xf32, #tpu.memory_space<vmem>>, vector<128x128xf32>
    %291 = vector.extract_strided_slice %290 {offsets = [0, 0], sizes = [128, 32], strides = [1, 1]} : vector<128x128xf32> to vector<128x32xf32>
    %c56_i32 = arith.constant 56 : i32
    %292 = vector.broadcast %c56_i32 : i32 to vector<128x1xi32>
    %293 = arith.cmpi slt, %208, %292 : vector<128x1xi32>
    %c1_i32_138 = arith.constant 1 : i32
    %294 = vector.broadcast %c1_i32_138 : i32 to vector<128x1xi32>
    %295 = arith.cmpi sge, %210, %294 : vector<128x1xi32>
    %296 = arith.andi %293, %295 : vector<128x1xi1>
    %cst_139 = arith.constant 0.000000e+00 : f32
    %297 = vector.shape_cast %296 : vector<128x1xi1> to vector<128x1xi1>
    %298 = vector.broadcast %297 : vector<128x1xi1> to vector<128x32xi1>
    %299 = vector.broadcast %cst_139 : f32 to vector<128x32xf32>
    %300 = arith.select %298, %291, %299 : vector<128x32xi1>, vector<128x32xf32>
    %301 = arith.truncf %300 : vector<128x32xf32> to vector<128x32xbf16>
    %c6_140 = arith.constant 6 : index
    %c0_141 = arith.constant 0 : index
    %c0_142 = arith.constant 0 : index
    %302 = vector.load %arg4[%c6_140, %c0_141, %c0_142] : memref<9x32x128xbf16, #tpu.memory_space<vmem>>, vector<1x32x128xbf16>
    %303 = vector.shape_cast %302 : vector<1x32x128xbf16> to vector<32x128xbf16>
    %cst_143 = arith.constant dense<0.000000e+00> : vector<128x128xf32>
    %304 = tpu.matmul %301, %303, %cst_143 {dimension_numbers = #tpu.dot_dimension_numbers<[1], [0], [0], [1], [0, 0, 1, 1], [], []>} : vector<128x32xbf16>, vector<32x128xbf16>, vector<128x128xf32> -> vector<128x128xf32>
    %305 = arith.addf %289, %304 : vector<128x128xf32>
    %c17_144 = arith.constant 17 : index
    %c0_145 = arith.constant 0 : index
    %306 = vector.load %arg15[%c17_144, %c0_145] : memref<146x128xf32, #tpu.memory_space<vmem>>, vector<128x128xf32>
    %307 = vector.extract_strided_slice %306 {offsets = [0, 0], sizes = [128, 32], strides = [1, 1]} : vector<128x128xf32> to vector<128x32xf32>
    %c56_i32_146 = arith.constant 56 : i32
    %308 = vector.broadcast %c56_i32_146 : i32 to vector<128x1xi32>
    %309 = arith.cmpi slt, %208, %308 : vector<128x1xi32>
    %cst_147 = arith.constant 0.000000e+00 : f32
    %310 = vector.shape_cast %309 : vector<128x1xi1> to vector<128x1xi1>
    %311 = vector.broadcast %310 : vector<128x1xi1> to vector<128x32xi1>
    %312 = vector.broadcast %cst_147 : f32 to vector<128x32xf32>
    %313 = arith.select %311, %307, %312 : vector<128x32xi1>, vector<128x32xf32>
    %314 = arith.truncf %313 : vector<128x32xf32> to vector<128x32xbf16>
    %c7_148 = arith.constant 7 : index
    %c0_149 = arith.constant 0 : index
    %c0_150 = arith.constant 0 : index
    %315 = vector.load %arg4[%c7_148, %c0_149, %c0_150] : memref<9x32x128xbf16, #tpu.memory_space<vmem>>, vector<1x32x128xbf16>
    %316 = vector.shape_cast %315 : vector<1x32x128xbf16> to vector<32x128xbf16>
    %cst_151 = arith.constant dense<0.000000e+00> : vector<128x128xf32>
    %317 = tpu.matmul %314, %316, %cst_151 {dimension_numbers = #tpu.dot_dimension_numbers<[1], [0], [0], [1], [0, 0, 1, 1], [], []>} : vector<128x32xbf16>, vector<32x128xbf16>, vector<128x128xf32> -> vector<128x128xf32>
    %318 = arith.addf %305, %317 : vector<128x128xf32>
    %c18_152 = arith.constant 18 : index
    %c0_153 = arith.constant 0 : index
    %319 = vector.load %arg15[%c18_152, %c0_153] : memref<146x128xf32, #tpu.memory_space<vmem>>, vector<128x128xf32>
    %320 = vector.extract_strided_slice %319 {offsets = [0, 0], sizes = [128, 32], strides = [1, 1]} : vector<128x128xf32> to vector<128x32xf32>
    %c56_i32_154 = arith.constant 56 : i32
    %321 = vector.broadcast %c56_i32_154 : i32 to vector<128x1xi32>
    %322 = arith.cmpi slt, %208, %321 : vector<128x1xi32>
    %c7_i32_155 = arith.constant 7 : i32
    %323 = vector.broadcast %c7_i32_155 : i32 to vector<128x1xi32>
    %324 = arith.cmpi slt, %210, %323 : vector<128x1xi32>
    %325 = arith.andi %322, %324 : vector<128x1xi1>
    %cst_156 = arith.constant 0.000000e+00 : f32
    %326 = vector.shape_cast %325 : vector<128x1xi1> to vector<128x1xi1>
    %327 = vector.broadcast %326 : vector<128x1xi1> to vector<128x32xi1>
    %328 = vector.broadcast %cst_156 : f32 to vector<128x32xf32>
    %329 = arith.select %327, %320, %328 : vector<128x32xi1>, vector<128x32xf32>
    %330 = arith.truncf %329 : vector<128x32xf32> to vector<128x32xbf16>
    %c8_157 = arith.constant 8 : index
    %c0_158 = arith.constant 0 : index
    %c0_159 = arith.constant 0 : index
    %331 = vector.load %arg4[%c8_157, %c0_158, %c0_159] : memref<9x32x128xbf16, #tpu.memory_space<vmem>>, vector<1x32x128xbf16>
    %332 = vector.shape_cast %331 : vector<1x32x128xbf16> to vector<32x128xbf16>
    %cst_160 = arith.constant dense<0.000000e+00> : vector<128x128xf32>
    %333 = tpu.matmul %330, %332, %cst_160 {dimension_numbers = #tpu.dot_dimension_numbers<[1], [0], [0], [1], [0, 0, 1, 1], [], []>} : vector<128x32xbf16>, vector<32x128xbf16>, vector<128x128xf32> -> vector<128x128xf32>
    %334 = arith.addf %318, %333 : vector<128x128xf32>
    %c0_161 = arith.constant 0 : index
    %c0_162 = arith.constant 0 : index
    %335 = vector.load %arg5[%c0_161, %c0_162] : memref<1x128xf32, #tpu.memory_space<vmem>>, vector<1x128xf32>
    %336 = vector.broadcast %335 : vector<1x128xf32> to vector<128x128xf32>
    %337 = arith.addf %334, %336 : vector<128x128xf32>
    %cst_163 = arith.constant 0.000000e+00 : f32
    %338 = vector.broadcast %cst_163 : f32 to vector<128x128xf32>
    %339 = arith.maximumf %337, %338 : vector<128x128xf32>
    %c0_164 = arith.constant 0 : index
    %c0_165 = arith.constant 0 : index
    %340 = vector.load %arg17[%c0_164, %c0_165] : memref<512x128xf32, #tpu.memory_space<vmem>>, vector<128x128xf32>
    tpu.vector_store %arg17[%c0_164, %c0_165], %339 {strides = array<i32>} : memref<512x128xf32, #tpu.memory_space<vmem>>, vector<128x128xf32>,
    %c0_166 = arith.constant 0 : index
    %c0_167 = arith.constant 0 : index
    %341 = tpu.strided_load %arg17[%c0_166, %c0_167] {strides = array<i32: 2, 1>} : memref<512x128xf32, #tpu.memory_space<vmem>>, vector<64x128xf32>
    %c1_168 = arith.constant 1 : index
    %c0_169 = arith.constant 0 : index
    %342 = tpu.strided_load %arg17[%c1_168, %c0_169] {strides = array<i32: 2, 1>} : memref<512x128xf32, #tpu.memory_space<vmem>>, vector<64x128xf32>
    %343 = arith.maximumf %341, %342 : vector<64x128xf32>
    %344 = vector.extract_strided_slice %343 {offsets = [0, 0], sizes = [4, 128], strides = [1, 1]} : vector<64x128xf32> to vector<4x128xf32>
    %345 = vector.extract_strided_slice %343 {offsets = [4, 0], sizes = [4, 128], strides = [1, 1]} : vector<64x128xf32> to vector<4x128xf32>
    %346 = arith.maximumf %344, %345 : vector<4x128xf32>
    %c5_170 = arith.constant 5 : index
    %c0_171 = arith.constant 0 : index
    %347 = vector.load %arg16[%c5_170, %c0_171] : memref<42x128xf32, #tpu.memory_space<vmem>>, vector<4x128xf32>
    tpu.vector_store %arg16[%c5_170, %c0_171], %346 {strides = array<i32>} : memref<42x128xf32, #tpu.memory_space<vmem>>, vector<4x128xf32>,
    %348 = vector.extract_strided_slice %343 {offsets = [8, 0], sizes = [4, 128], strides = [1, 1]} : vector<64x128xf32> to vector<4x128xf32>
    %349 = vector.extract_strided_slice %343 {offsets = [12, 0], sizes = [4, 128], strides = [1, 1]} : vector<64x128xf32> to vector<4x128xf32>
    %350 = arith.maximumf %348, %349 : vector<4x128xf32>
    %c9_172 = arith.constant 9 : index
    %c0_173 = arith.constant 0 : index
    %351 = vector.load %arg16[%c9_172, %c0_173] : memref<42x128xf32, #tpu.memory_space<vmem>>, vector<4x128xf32>
    tpu.vector_store %arg16[%c9_172, %c0_173], %350 {strides = array<i32>} : memref<42x128xf32, #tpu.memory_space<vmem>>, vector<4x128xf32>,
    %352 = vector.extract_strided_slice %343 {offsets = [16, 0], sizes = [4, 128], strides = [1, 1]} : vector<64x128xf32> to vector<4x128xf32>
    %353 = vector.extract_strided_slice %343 {offsets = [20, 0], sizes = [4, 128], strides = [1, 1]} : vector<64x128xf32> to vector<4x128xf32>
    %354 = arith.maximumf %352, %353 : vector<4x128xf32>
    %c13 = arith.constant 13 : index
    %c0_174 = arith.constant 0 : index
    %355 = vector.load %arg16[%c13, %c0_174] : memref<42x128xf32, #tpu.memory_space<vmem>>, vector<4x128xf32>
    tpu.vector_store %arg16[%c13, %c0_174], %354 {strides = array<i32>} : memref<42x128xf32, #tpu.memory_space<vmem>>, vector<4x128xf32>,
    %356 = vector.extract_strided_slice %343 {offsets = [24, 0], sizes = [4, 128], strides = [1, 1]} : vector<64x128xf32> to vector<4x128xf32>
    %357 = vector.extract_strided_slice %343 {offsets = [28, 0], sizes = [4, 128], strides = [1, 1]} : vector<64x128xf32> to vector<4x128xf32>
    %358 = arith.maximumf %356, %357 : vector<4x128xf32>
    %c17_175 = arith.constant 17 : index
    %c0_176 = arith.constant 0 : index
    %359 = vector.load %arg16[%c17_175, %c0_176] : memref<42x128xf32, #tpu.memory_space<vmem>>, vector<4x128xf32>
    tpu.vector_store %arg16[%c17_175, %c0_176], %358 {strides = array<i32>} : memref<42x128xf32, #tpu.memory_space<vmem>>, vector<4x128xf32>,
    %360 = vector.extract_strided_slice %343 {offsets = [32, 0], sizes = [4, 128], strides = [1, 1]} : vector<64x128xf32> to vector<4x128xf32>
    %361 = vector.extract_strided_slice %343 {offsets = [36, 0], sizes = [4, 128], strides = [1, 1]} : vector<64x128xf32> to vector<4x128xf32>
    %362 = arith.maximumf %360, %361 : vector<4x128xf32>
    %c21 = arith.constant 21 : index
    %c0_177 = arith.constant 0 : index
    %363 = vector.load %arg16[%c21, %c0_177] : memref<42x128xf32, #tpu.memory_space<vmem>>, vector<4x128xf32>
    tpu.vector_store %arg16[%c21, %c0_177], %362 {strides = array<i32>} : memref<42x128xf32, #tpu.memory_space<vmem>>, vector<4x128xf32>,
    %364 = vector.extract_strided_slice %343 {offsets = [40, 0], sizes = [4, 128], strides = [1, 1]} : vector<64x128xf32> to vector<4x128xf32>
    %365 = vector.extract_strided_slice %343 {offsets = [44, 0], sizes = [4, 128], strides = [1, 1]} : vector<64x128xf32> to vector<4x128xf32>
    %366 = arith.maximumf %364, %365 : vector<4x128xf32>
    %c25_178 = arith.constant 25 : index
    %c0_179 = arith.constant 0 : index
    %367 = vector.load %arg16[%c25_178, %c0_179] : memref<42x128xf32, #tpu.memory_space<vmem>>, vector<4x128xf32>
    tpu.vector_store %arg16[%c25_178, %c0_179], %366 {strides = array<i32>} : memref<42x128xf32, #tpu.memory_space<vmem>>, vector<4x128xf32>,
    %368 = vector.extract_strided_slice %343 {offsets = [48, 0], sizes = [4, 128], strides = [1, 1]} : vector<64x128xf32> to vector<4x128xf32>
    %369 = vector.extract_strided_slice %343 {offsets = [52, 0], sizes = [4, 128], strides = [1, 1]} : vector<64x128xf32> to vector<4x128xf32>
    %370 = arith.maximumf %368, %369 : vector<4x128xf32>
    %c29 = arith.constant 29 : index
    %c0_180 = arith.constant 0 : index
    %371 = vector.load %arg16[%c29, %c0_180] : memref<42x128xf32, #tpu.memory_space<vmem>>, vector<4x128xf32>
    tpu.vector_store %arg16[%c29, %c0_180], %370 {strides = array<i32>} : memref<42x128xf32, #tpu.memory_space<vmem>>, vector<4x128xf32>,
    %372 = vector.extract_strided_slice %343 {offsets = [56, 0], sizes = [4, 128], strides = [1, 1]} : vector<64x128xf32> to vector<4x128xf32>
    %373 = vector.extract_strided_slice %343 {offsets = [60, 0], sizes = [4, 128], strides = [1, 1]} : vector<64x128xf32> to vector<4x128xf32>
    %374 = arith.maximumf %372, %373 : vector<4x128xf32>
    %c33_181 = arith.constant 33 : index
    %c0_182 = arith.constant 0 : index
    %375 = vector.load %arg16[%c33_181, %c0_182] : memref<42x128xf32, #tpu.memory_space<vmem>>, vector<4x128xf32>
    tpu.vector_store %arg16[%c33_181, %c0_182], %374 {strides = array<i32>} : memref<42x128xf32, #tpu.memory_space<vmem>>, vector<4x128xf32>,
    %376 = tpu.iota {dimensions = array<i32: 0>} : vector<32x1xi32>
    %c15_i32_183 = arith.constant 15 : i32
    %377 = vector.broadcast %c15_i32_183 : i32 to vector<32x1xi32>
    %378 = arith.andi %376, %377 : vector<32x1xi32>
    %c3_i32 = arith.constant 3 : i32
    %379 = vector.broadcast %c3_i32 : i32 to vector<32x1xi32>
    %380 = arith.andi %376, %379 : vector<32x1xi32>
    %cst_184 = arith.constant 0.000000e+00 : f32
    %381 = vector.broadcast %cst_184 : f32 to vector<32x128xf32>
    %c0_185 = arith.constant 0 : index
    %c0_186 = arith.constant 0 : index
    %382 = vector.load %arg16[%c0_185, %c0_186] : memref<42x128xf32, #tpu.memory_space<vmem>>, vector<32x128xf32>
    %383 = vector.extract_strided_slice %382 {offsets = [0, 0], sizes = [32, 64], strides = [1, 1]} : vector<32x128xf32> to vector<32x64xf32>
    %c4_i32 = arith.constant 4 : i32
    %384 = vector.broadcast %c4_i32 : i32 to vector<32x1xi32>
    %385 = arith.cmpi sge, %378, %384 : vector<32x1xi32>
    %c1_i32_187 = arith.constant 1 : i32
    %386 = vector.broadcast %c1_i32_187 : i32 to vector<32x1xi32>
    %387 = arith.cmpi sge, %380, %386 : vector<32x1xi32>
    %388 = arith.andi %385, %387 : vector<32x1xi1>
    %cst_188 = arith.constant 0.000000e+00 : f32
    %389 = vector.shape_cast %388 : vector<32x1xi1> to vector<32x1xi1>
    %390 = vector.broadcast %389 : vector<32x1xi1> to vector<32x64xi1>
    %391 = vector.broadcast %cst_188 : f32 to vector<32x64xf32>
    %392 = arith.select %390, %383, %391 : vector<32x64xi1>, vector<32x64xf32>
    %393 = arith.truncf %392 : vector<32x64xf32> to vector<32x64xbf16>
    %c0_189 = arith.constant 0 : index
    %c0_190 = arith.constant 0 : index
    %c0_191 = arith.constant 0 : index
    %394 = vector.load %arg6[%c0_189, %c0_190, %c0_191] : memref<9x64x128xbf16, #tpu.memory_space<vmem>>, vector<1x64x128xbf16>
    %395 = vector.shape_cast %394 : vector<1x64x128xbf16> to vector<64x128xbf16>
    %cst_192 = arith.constant dense<0.000000e+00> : vector<32x128xf32>
    %396 = tpu.matmul %393, %395, %cst_192 {dimension_numbers = #tpu.dot_dimension_numbers<[1], [0], [0], [1], [0, 0, 1, 1], [], []>} : vector<32x64xbf16>, vector<64x128xbf16>, vector<32x128xf32> -> vector<32x128xf32>
    %397 = arith.addf %381, %396 : vector<32x128xf32>
    %c1_193 = arith.constant 1 : index
    %c0_194 = arith.constant 0 : index
    %398 = vector.load %arg16[%c1_193, %c0_194] : memref<42x128xf32, #tpu.memory_space<vmem>>, vector<32x128xf32>
    %399 = vector.extract_strided_slice %398 {offsets = [0, 0], sizes = [32, 64], strides = [1, 1]} : vector<32x128xf32> to vector<32x64xf32>
    %c4_i32_195 = arith.constant 4 : i32
    %400 = vector.broadcast %c4_i32_195 : i32 to vector<32x1xi32>
    %401 = arith.cmpi sge, %378, %400 : vector<32x1xi32>
    %cst_196 = arith.constant 0.000000e+00 : f32
    %402 = vector.shape_cast %401 : vector<32x1xi1> to vector<32x1xi1>
    %403 = vector.broadcast %402 : vector<32x1xi1> to vector<32x64xi1>
    %404 = vector.broadcast %cst_196 : f32 to vector<32x64xf32>
    %405 = arith.select %403, %399, %404 : vector<32x64xi1>, vector<32x64xf32>
    %406 = arith.truncf %405 : vector<32x64xf32> to vector<32x64xbf16>
    %c1_197 = arith.constant 1 : index
    %c0_198 = arith.constant 0 : index
    %c0_199 = arith.constant 0 : index
    %407 = vector.load %arg6[%c1_197, %c0_198, %c0_199] : memref<9x64x128xbf16, #tpu.memory_space<vmem>>, vector<1x64x128xbf16>
    %408 = vector.shape_cast %407 : vector<1x64x128xbf16> to vector<64x128xbf16>
    %cst_200 = arith.constant dense<0.000000e+00> : vector<32x128xf32>
    %409 = tpu.matmul %406, %408, %cst_200 {dimension_numbers = #tpu.dot_dimension_numbers<[1], [0], [0], [1], [0, 0, 1, 1], [], []>} : vector<32x64xbf16>, vector<64x128xbf16>, vector<32x128xf32> -> vector<32x128xf32>
    %410 = arith.addf %397, %409 : vector<32x128xf32>
    %c2_201 = arith.constant 2 : index
    %c0_202 = arith.constant 0 : index
    %411 = vector.load %arg16[%c2_201, %c0_202] : memref<42x128xf32, #tpu.memory_space<vmem>>, vector<32x128xf32>
    %412 = vector.extract_strided_slice %411 {offsets = [0, 0], sizes = [32, 64], strides = [1, 1]} : vector<32x128xf32> to vector<32x64xf32>
    %c4_i32_203 = arith.constant 4 : i32
    %413 = vector.broadcast %c4_i32_203 : i32 to vector<32x1xi32>
    %414 = arith.cmpi sge, %378, %413 : vector<32x1xi32>
    %c3_i32_204 = arith.constant 3 : i32
    %415 = vector.broadcast %c3_i32_204 : i32 to vector<32x1xi32>
    %416 = arith.cmpi slt, %380, %415 : vector<32x1xi32>
    %417 = arith.andi %414, %416 : vector<32x1xi1>
    %cst_205 = arith.constant 0.000000e+00 : f32
    %418 = vector.shape_cast %417 : vector<32x1xi1> to vector<32x1xi1>
    %419 = vector.broadcast %418 : vector<32x1xi1> to vector<32x64xi1>
    %420 = vector.broadcast %cst_205 : f32 to vector<32x64xf32>
    %421 = arith.select %419, %412, %420 : vector<32x64xi1>, vector<32x64xf32>
    %422 = arith.truncf %421 : vector<32x64xf32> to vector<32x64xbf16>
    %c2_206 = arith.constant 2 : index
    %c0_207 = arith.constant 0 : index
    %c0_208 = arith.constant 0 : index
    %423 = vector.load %arg6[%c2_206, %c0_207, %c0_208] : memref<9x64x128xbf16, #tpu.memory_space<vmem>>, vector<1x64x128xbf16>
    %424 = vector.shape_cast %423 : vector<1x64x128xbf16> to vector<64x128xbf16>
    %cst_209 = arith.constant dense<0.000000e+00> : vector<32x128xf32>
    %425 = tpu.matmul %422, %424, %cst_209 {dimension_numbers = #tpu.dot_dimension_numbers<[1], [0], [0], [1], [0, 0, 1, 1], [], []>} : vector<32x64xbf16>, vector<64x128xbf16>, vector<32x128xf32> -> vector<32x128xf32>
    %426 = arith.addf %410, %425 : vector<32x128xf32>
    %c4_210 = arith.constant 4 : index
    %c0_211 = arith.constant 0 : index
    %427 = vector.load %arg16[%c4_210, %c0_211] : memref<42x128xf32, #tpu.memory_space<vmem>>, vector<32x128xf32>
    %428 = vector.extract_strided_slice %427 {offsets = [0, 0], sizes = [32, 64], strides = [1, 1]} : vector<32x128xf32> to vector<32x64xf32>
    %c1_i32_212 = arith.constant 1 : i32
    %429 = vector.broadcast %c1_i32_212 : i32 to vector<32x1xi32>
    %430 = arith.cmpi sge, %380, %429 : vector<32x1xi32>
    %cst_213 = arith.constant 0.000000e+00 : f32
    %431 = vector.shape_cast %430 : vector<32x1xi1> to vector<32x1xi1>
    %432 = vector.broadcast %431 : vector<32x1xi1> to vector<32x64xi1>
    %433 = vector.broadcast %cst_213 : f32 to vector<32x64xf32>
    %434 = arith.select %432, %428, %433 : vector<32x64xi1>, vector<32x64xf32>
    %435 = arith.truncf %434 : vector<32x64xf32> to vector<32x64xbf16>
    %c3_214 = arith.constant 3 : index
    %c0_215 = arith.constant 0 : index
    %c0_216 = arith.constant 0 : index
    %436 = vector.load %arg6[%c3_214, %c0_215, %c0_216] : memref<9x64x128xbf16, #tpu.memory_space<vmem>>, vector<1x64x128xbf16>
    %437 = vector.shape_cast %436 : vector<1x64x128xbf16> to vector<64x128xbf16>
    %cst_217 = arith.constant dense<0.000000e+00> : vector<32x128xf32>
    %438 = tpu.matmul %435, %437, %cst_217 {dimension_numbers = #tpu.dot_dimension_numbers<[1], [0], [0], [1], [0, 0, 1, 1], [], []>} : vector<32x64xbf16>, vector<64x128xbf16>, vector<32x128xf32> -> vector<32x128xf32>
    %439 = arith.addf %426, %438 : vector<32x128xf32>
    %c5_218 = arith.constant 5 : index
    %c0_219 = arith.constant 0 : index
    %440 = vector.load %arg16[%c5_218, %c0_219] : memref<42x128xf32, #tpu.memory_space<vmem>>, vector<32x128xf32>
    %441 = vector.extract_strided_slice %440 {offsets = [0, 0], sizes = [32, 64], strides = [1, 1]} : vector<32x128xf32> to vector<32x64xf32>
    %442 = arith.truncf %441 : vector<32x64xf32> to vector<32x64xbf16>
    %c4_220 = arith.constant 4 : index
    %c0_221 = arith.constant 0 : index
    %c0_222 = arith.constant 0 : index
    %443 = vector.load %arg6[%c4_220, %c0_221, %c0_222] : memref<9x64x128xbf16, #tpu.memory_space<vmem>>, vector<1x64x128xbf16>
    %444 = vector.shape_cast %443 : vector<1x64x128xbf16> to vector<64x128xbf16>
    %cst_223 = arith.constant dense<0.000000e+00> : vector<32x128xf32>
    %445 = tpu.matmul %442, %444, %cst_223 {dimension_numbers = #tpu.dot_dimension_numbers<[1], [0], [0], [1], [0, 0, 1, 1], [], []>} : vector<32x64xbf16>, vector<64x128xbf16>, vector<32x128xf32> -> vector<32x128xf32>
    %446 = arith.addf %439, %445 : vector<32x128xf32>
    %c6_224 = arith.constant 6 : index
    %c0_225 = arith.constant 0 : index
    %447 = vector.load %arg16[%c6_224, %c0_225] : memref<42x128xf32, #tpu.memory_space<vmem>>, vector<32x128xf32>
    %448 = vector.extract_strided_slice %447 {offsets = [0, 0], sizes = [32, 64], strides = [1, 1]} : vector<32x128xf32> to vector<32x64xf32>
    %c3_i32_226 = arith.constant 3 : i32
    %449 = vector.broadcast %c3_i32_226 : i32 to vector<32x1xi32>
    %450 = arith.cmpi slt, %380, %449 : vector<32x1xi32>
    %cst_227 = arith.constant 0.000000e+00 : f32
    %451 = vector.shape_cast %450 : vector<32x1xi1> to vector<32x1xi1>
    %452 = vector.broadcast %451 : vector<32x1xi1> to vector<32x64xi1>
    %453 = vector.broadcast %cst_227 : f32 to vector<32x64xf32>
    %454 = arith.select %452, %448, %453 : vector<32x64xi1>, vector<32x64xf32>
    %455 = arith.truncf %454 : vector<32x64xf32> to vector<32x64xbf16>
    %c5_228 = arith.constant 5 : index
    %c0_229 = arith.constant 0 : index
    %c0_230 = arith.constant 0 : index
    %456 = vector.load %arg6[%c5_228, %c0_229, %c0_230] : memref<9x64x128xbf16, #tpu.memory_space<vmem>>, vector<1x64x128xbf16>
    %457 = vector.shape_cast %456 : vector<1x64x128xbf16> to vector<64x128xbf16>
    %cst_231 = arith.constant dense<0.000000e+00> : vector<32x128xf32>
    %458 = tpu.matmul %455, %457, %cst_231 {dimension_numbers = #tpu.dot_dimension_numbers<[1], [0], [0], [1], [0, 0, 1, 1], [], []>} : vector<32x64xbf16>, vector<64x128xbf16>, vector<32x128xf32> -> vector<32x128xf32>
    %459 = arith.addf %446, %458 : vector<32x128xf32>
    %c8_232 = arith.constant 8 : index
    %c0_233 = arith.constant 0 : index
    %460 = vector.load %arg16[%c8_232, %c0_233] : memref<42x128xf32, #tpu.memory_space<vmem>>, vector<32x128xf32>
    %461 = vector.extract_strided_slice %460 {offsets = [0, 0], sizes = [32, 64], strides = [1, 1]} : vector<32x128xf32> to vector<32x64xf32>
    %c12_i32 = arith.constant 12 : i32
    %462 = vector.broadcast %c12_i32 : i32 to vector<32x1xi32>
    %463 = arith.cmpi slt, %378, %462 : vector<32x1xi32>
    %c1_i32_234 = arith.constant 1 : i32
    %464 = vector.broadcast %c1_i32_234 : i32 to vector<32x1xi32>
    %465 = arith.cmpi sge, %380, %464 : vector<32x1xi32>
    %466 = arith.andi %463, %465 : vector<32x1xi1>
    %cst_235 = arith.constant 0.000000e+00 : f32
    %467 = vector.shape_cast %466 : vector<32x1xi1> to vector<32x1xi1>
    %468 = vector.broadcast %467 : vector<32x1xi1> to vector<32x64xi1>
    %469 = vector.broadcast %cst_235 : f32 to vector<32x64xf32>
    %470 = arith.select %468, %461, %469 : vector<32x64xi1>, vector<32x64xf32>
    %471 = arith.truncf %470 : vector<32x64xf32> to vector<32x64xbf16>
    %c6_236 = arith.constant 6 : index
    %c0_237 = arith.constant 0 : index
    %c0_238 = arith.constant 0 : index
    %472 = vector.load %arg6[%c6_236, %c0_237, %c0_238] : memref<9x64x128xbf16, #tpu.memory_space<vmem>>, vector<1x64x128xbf16>
    %473 = vector.shape_cast %472 : vector<1x64x128xbf16> to vector<64x128xbf16>
    %cst_239 = arith.constant dense<0.000000e+00> : vector<32x128xf32>
    %474 = tpu.matmul %471, %473, %cst_239 {dimension_numbers = #tpu.dot_dimension_numbers<[1], [0], [0], [1], [0, 0, 1, 1], [], []>} : vector<32x64xbf16>, vector<64x128xbf16>, vector<32x128xf32> -> vector<32x128xf32>
    %475 = arith.addf %459, %474 : vector<32x128xf32>
    %c9_240 = arith.constant 9 : index
    %c0_241 = arith.constant 0 : index
    %476 = vector.load %arg16[%c9_240, %c0_241] : memref<42x128xf32, #tpu.memory_space<vmem>>, vector<32x128xf32>
    %477 = vector.extract_strided_slice %476 {offsets = [0, 0], sizes = [32, 64], strides = [1, 1]} : vector<32x128xf32> to vector<32x64xf32>
    %c12_i32_242 = arith.constant 12 : i32
    %478 = vector.broadcast %c12_i32_242 : i32 to vector<32x1xi32>
    %479 = arith.cmpi slt, %378, %478 : vector<32x1xi32>
    %cst_243 = arith.constant 0.000000e+00 : f32
    %480 = vector.shape_cast %479 : vector<32x1xi1> to vector<32x1xi1>
    %481 = vector.broadcast %480 : vector<32x1xi1> to vector<32x64xi1>
    %482 = vector.broadcast %cst_243 : f32 to vector<32x64xf32>
    %483 = arith.select %481, %477, %482 : vector<32x64xi1>, vector<32x64xf32>
    %484 = arith.truncf %483 : vector<32x64xf32> to vector<32x64xbf16>
    %c7_244 = arith.constant 7 : index
    %c0_245 = arith.constant 0 : index
    %c0_246 = arith.constant 0 : index
    %485 = vector.load %arg6[%c7_244, %c0_245, %c0_246] : memref<9x64x128xbf16, #tpu.memory_space<vmem>>, vector<1x64x128xbf16>
    %486 = vector.shape_cast %485 : vector<1x64x128xbf16> to vector<64x128xbf16>
    %cst_247 = arith.constant dense<0.000000e+00> : vector<32x128xf32>
    %487 = tpu.matmul %484, %486, %cst_247 {dimension_numbers = #tpu.dot_dimension_numbers<[1], [0], [0], [1], [0, 0, 1, 1], [], []>} : vector<32x64xbf16>, vector<64x128xbf16>, vector<32x128xf32> -> vector<32x128xf32>
    %488 = arith.addf %475, %487 : vector<32x128xf32>
    %c10_248 = arith.constant 10 : index
    %c0_249 = arith.constant 0 : index
    %489 = vector.load %arg16[%c10_248, %c0_249] : memref<42x128xf32, #tpu.memory_space<vmem>>, vector<32x128xf32>
    %490 = vector.extract_strided_slice %489 {offsets = [0, 0], sizes = [32, 64], strides = [1, 1]} : vector<32x128xf32> to vector<32x64xf32>
    %c12_i32_250 = arith.constant 12 : i32
    %491 = vector.broadcast %c12_i32_250 : i32 to vector<32x1xi32>
    %492 = arith.cmpi slt, %378, %491 : vector<32x1xi32>
    %c3_i32_251 = arith.constant 3 : i32
    %493 = vector.broadcast %c3_i32_251 : i32 to vector<32x1xi32>
    %494 = arith.cmpi slt, %380, %493 : vector<32x1xi32>
    %495 = arith.andi %492, %494 : vector<32x1xi1>
    %cst_252 = arith.constant 0.000000e+00 : f32
    %496 = vector.shape_cast %495 : vector<32x1xi1> to vector<32x1xi1>
    %497 = vector.broadcast %496 : vector<32x1xi1> to vector<32x64xi1>
    %498 = vector.broadcast %cst_252 : f32 to vector<32x64xf32>
    %499 = arith.select %497, %490, %498 : vector<32x64xi1>, vector<32x64xf32>
    %500 = arith.truncf %499 : vector<32x64xf32> to vector<32x64xbf16>
    %c8_253 = arith.constant 8 : index
    %c0_254 = arith.constant 0 : index
    %c0_255 = arith.constant 0 : index
    %501 = vector.load %arg6[%c8_253, %c0_254, %c0_255] : memref<9x64x128xbf16, #tpu.memory_space<vmem>>, vector<1x64x128xbf16>
    %502 = vector.shape_cast %501 : vector<1x64x128xbf16> to vector<64x128xbf16>
    %cst_256 = arith.constant dense<0.000000e+00> : vector<32x128xf32>
    %503 = tpu.matmul %500, %502, %cst_256 {dimension_numbers = #tpu.dot_dimension_numbers<[1], [0], [0], [1], [0, 0, 1, 1], [], []>} : vector<32x64xbf16>, vector<64x128xbf16>, vector<32x128xf32> -> vector<32x128xf32>
    %504 = arith.addf %488, %503 : vector<32x128xf32>
    %c0_257 = arith.constant 0 : index
    %c0_258 = arith.constant 0 : index
    %505 = vector.load %arg7[%c0_257, %c0_258] : memref<1x128xf32, #tpu.memory_space<vmem>>, vector<1x128xf32>
    %506 = vector.broadcast %505 : vector<1x128xf32> to vector<32x128xf32>
    %507 = arith.addf %504, %506 : vector<32x128xf32>
    %cst_259 = arith.constant 0.000000e+00 : f32
    %508 = vector.broadcast %cst_259 : f32 to vector<32x128xf32>
    %509 = arith.maximumf %507, %508 : vector<32x128xf32>
    %c0_260 = arith.constant 0 : index
    %c0_261 = arith.constant 0 : index
    %510 = vector.load %arg17[%c0_260, %c0_261] : memref<512x128xf32, #tpu.memory_space<vmem>>, vector<32x128xf32>
    tpu.vector_store %arg17[%c0_260, %c0_261], %509 {strides = array<i32>} : memref<512x128xf32, #tpu.memory_space<vmem>>, vector<32x128xf32>,
    %c0_262 = arith.constant 0 : index
    %c0_263 = arith.constant 0 : index
    %511 = tpu.strided_load %arg17[%c0_262, %c0_263] {strides = array<i32: 2, 1>} : memref<512x128xf32, #tpu.memory_space<vmem>>, vector<16x128xf32>
    %c1_264 = arith.constant 1 : index
    %c0_265 = arith.constant 0 : index
    %512 = tpu.strided_load %arg17[%c1_264, %c0_265] {strides = array<i32: 2, 1>} : memref<512x128xf32, #tpu.memory_space<vmem>>, vector<16x128xf32>
    %513 = arith.maximumf %511, %512 : vector<16x128xf32>
    %514 = vector.extract_strided_slice %513 {offsets = [0, 0], sizes = [2, 128], strides = [1, 1]} : vector<16x128xf32> to vector<2x128xf32>
    %515 = vector.extract_strided_slice %513 {offsets = [2, 0], sizes = [2, 128], strides = [1, 1]} : vector<16x128xf32> to vector<2x128xf32>
    %516 = arith.maximumf %514, %515 : vector<2x128xf32>
    %c0_266 = arith.constant 0 : index
    %c0_267 = arith.constant 0 : index
    %517 = vector.load %arg18[%c0_266, %c0_267] : memref<8x128xf32, #tpu.memory_space<vmem>>, vector<2x128xf32>
    tpu.vector_store %arg18[%c0_266, %c0_267], %516 {strides = array<i32>} : memref<8x128xf32, #tpu.memory_space<vmem>>, vector<2x128xf32>,
    %518 = vector.extract_strided_slice %513 {offsets = [4, 0], sizes = [2, 128], strides = [1, 1]} : vector<16x128xf32> to vector<2x128xf32>
    %519 = vector.extract_strided_slice %513 {offsets = [6, 0], sizes = [2, 128], strides = [1, 1]} : vector<16x128xf32> to vector<2x128xf32>
    %520 = arith.maximumf %518, %519 : vector<2x128xf32>
    %c2_268 = arith.constant 2 : index
    %c0_269 = arith.constant 0 : index
    %521 = vector.load %arg18[%c2_268, %c0_269] : memref<8x128xf32, #tpu.memory_space<vmem>>, vector<2x128xf32>
    tpu.vector_store %arg18[%c2_268, %c0_269], %520 {strides = array<i32>} : memref<8x128xf32, #tpu.memory_space<vmem>>, vector<2x128xf32>,
    %522 = vector.extract_strided_slice %513 {offsets = [8, 0], sizes = [2, 128], strides = [1, 1]} : vector<16x128xf32> to vector<2x128xf32>
    %523 = vector.extract_strided_slice %513 {offsets = [10, 0], sizes = [2, 128], strides = [1, 1]} : vector<16x128xf32> to vector<2x128xf32>
    %524 = arith.maximumf %522, %523 : vector<2x128xf32>
    %c4_270 = arith.constant 4 : index
    %c0_271 = arith.constant 0 : index
    %525 = vector.load %arg18[%c4_270, %c0_271] : memref<8x128xf32, #tpu.memory_space<vmem>>, vector<2x128xf32>
    tpu.vector_store %arg18[%c4_270, %c0_271], %524 {strides = array<i32>} : memref<8x128xf32, #tpu.memory_space<vmem>>, vector<2x128xf32>,
    %526 = vector.extract_strided_slice %513 {offsets = [12, 0], sizes = [2, 128], strides = [1, 1]} : vector<16x128xf32> to vector<2x128xf32>
    %527 = vector.extract_strided_slice %513 {offsets = [14, 0], sizes = [2, 128], strides = [1, 1]} : vector<16x128xf32> to vector<2x128xf32>
    %528 = arith.maximumf %526, %527 : vector<2x128xf32>
    %c6_272 = arith.constant 6 : index
    %c0_273 = arith.constant 0 : index
    %529 = vector.load %arg18[%c6_272, %c0_273] : memref<8x128xf32, #tpu.memory_space<vmem>>, vector<2x128xf32>
    tpu.vector_store %arg18[%c6_272, %c0_273], %528 {strides = array<i32>} : memref<8x128xf32, #tpu.memory_space<vmem>>, vector<2x128xf32>,
    %c0_274 = arith.constant 0 : index
    %c0_275 = arith.constant 0 : index
    %530 = vector.load %arg18[%c0_274, %c0_275] : memref<8x128xf32, #tpu.memory_space<vmem>>, vector<8x128xf32>
    %531 = arith.truncf %530 : vector<8x128xf32> to vector<8x128xbf16>
    %c0_276 = arith.constant 0 : index
    %c0_277 = arith.constant 0 : index
    %532 = vector.load %arg8[%c0_276, %c0_277] : memref<128x512xbf16, #tpu.memory_space<vmem>>, vector<128x512xbf16>
    %cst_278 = arith.constant dense<0.000000e+00> : vector<8x512xf32>
    %533 = tpu.matmul %531, %532, %cst_278 {dimension_numbers = #tpu.dot_dimension_numbers<[1], [0], [0], [1], [0, 0, 1, 1], [], []>} : vector<8x128xbf16>, vector<128x512xbf16>, vector<8x512xf32> -> vector<8x512xf32>
    %c0_279 = arith.constant 0 : index
    %c0_280 = arith.constant 0 : index
    %534 = vector.load %arg9[%c0_279, %c0_280] : memref<1x512xf32, #tpu.memory_space<vmem>>, vector<1x512xf32>
    %535 = vector.broadcast %534 : vector<1x512xf32> to vector<8x512xf32>
    %536 = arith.addf %533, %535 : vector<8x512xf32>
    %cst_281 = arith.constant 0.000000e+00 : f32
    %537 = vector.broadcast %cst_281 : f32 to vector<8x512xf32>
    %538 = arith.maximumf %536, %537 : vector<8x512xf32>
    %539 = vector.extract_strided_slice %538 {offsets = [0, 0], sizes = [2, 128], strides = [1, 1]} : vector<8x512xf32> to vector<2x128xf32>
    %c0_282 = arith.constant 0 : index
    %c0_283 = arith.constant 0 : index
    %540 = tpu.strided_load %arg19[%c0_282, %c0_283] {strides = array<i32: 2, 1>} : memref<32x128xf32, #tpu.memory_space<vmem>>, vector<2x128xf32>
    tpu.strided_store %arg19[%c0_282, %c0_283], %539 {strides = array<i32: 2, 1>} : memref<32x128xf32, #tpu.memory_space<vmem>>, vector<2x128xf32>
    %541 = vector.extract_strided_slice %538 {offsets = [0, 128], sizes = [2, 128], strides = [1, 1]} : vector<8x512xf32> to vector<2x128xf32>
    %c1_284 = arith.constant 1 : index
    %c0_285 = arith.constant 0 : index
    %542 = tpu.strided_load %arg19[%c1_284, %c0_285] {strides = array<i32: 2, 1>} : memref<32x128xf32, #tpu.memory_space<vmem>>, vector<2x128xf32>
    tpu.strided_store %arg19[%c1_284, %c0_285], %541 {strides = array<i32: 2, 1>} : memref<32x128xf32, #tpu.memory_space<vmem>>, vector<2x128xf32>
    %543 = vector.extract_strided_slice %538 {offsets = [0, 256], sizes = [2, 128], strides = [1, 1]} : vector<8x512xf32> to vector<2x128xf32>
    %c4_286 = arith.constant 4 : index
    %c0_287 = arith.constant 0 : index
    %544 = tpu.strided_load %arg19[%c4_286, %c0_287] {strides = array<i32: 2, 1>} : memref<32x128xf32, #tpu.memory_space<vmem>>, vector<2x128xf32>
    tpu.strided_store %arg19[%c4_286, %c0_287], %543 {strides = array<i32: 2, 1>} : memref<32x128xf32, #tpu.memory_space<vmem>>, vector<2x128xf32>
    %545 = vector.extract_strided_slice %538 {offsets = [0, 384], sizes = [2, 128], strides = [1, 1]} : vector<8x512xf32> to vector<2x128xf32>
    %c5_288 = arith.constant 5 : index
    %c0_289 = arith.constant 0 : index
    %546 = tpu.strided_load %arg19[%c5_288, %c0_289] {strides = array<i32: 2, 1>} : memref<32x128xf32, #tpu.memory_space<vmem>>, vector<2x128xf32>
    tpu.strided_store %arg19[%c5_288, %c0_289], %545 {strides = array<i32: 2, 1>} : memref<32x128xf32, #tpu.memory_space<vmem>>, vector<2x128xf32>
    %547 = vector.extract_strided_slice %538 {offsets = [2, 0], sizes = [2, 128], strides = [1, 1]} : vector<8x512xf32> to vector<2x128xf32>
    %c8_290 = arith.constant 8 : index
    %c0_291 = arith.constant 0 : index
    %548 = tpu.strided_load %arg19[%c8_290, %c0_291] {strides = array<i32: 2, 1>} : memref<32x128xf32, #tpu.memory_space<vmem>>, vector<2x128xf32>
    tpu.strided_store %arg19[%c8_290, %c0_291], %547 {strides = array<i32: 2, 1>} : memref<32x128xf32, #tpu.memory_space<vmem>>, vector<2x128xf32>
    %549 = vector.extract_strided_slice %538 {offsets = [2, 128], sizes = [2, 128], strides = [1, 1]} : vector<8x512xf32> to vector<2x128xf32>
    %c9_292 = arith.constant 9 : index
    %c0_293 = arith.constant 0 : index
    %550 = tpu.strided_load %arg19[%c9_292, %c0_293] {strides = array<i32: 2, 1>} : memref<32x128xf32, #tpu.memory_space<vmem>>, vector<2x128xf32>
    tpu.strided_store %arg19[%c9_292, %c0_293], %549 {strides = array<i32: 2, 1>} : memref<32x128xf32, #tpu.memory_space<vmem>>, vector<2x128xf32>
    %551 = vector.extract_strided_slice %538 {offsets = [2, 256], sizes = [2, 128], strides = [1, 1]} : vector<8x512xf32> to vector<2x128xf32>
    %c12 = arith.constant 12 : index
    %c0_294 = arith.constant 0 : index
    %552 = tpu.strided_load %arg19[%c12, %c0_294] {strides = array<i32: 2, 1>} : memref<32x128xf32, #tpu.memory_space<vmem>>, vector<2x128xf32>
    tpu.strided_store %arg19[%c12, %c0_294], %551 {strides = array<i32: 2, 1>} : memref<32x128xf32, #tpu.memory_space<vmem>>, vector<2x128xf32>
    %553 = vector.extract_strided_slice %538 {offsets = [2, 384], sizes = [2, 128], strides = [1, 1]} : vector<8x512xf32> to vector<2x128xf32>
    %c13_295 = arith.constant 13 : index
    %c0_296 = arith.constant 0 : index
    %554 = tpu.strided_load %arg19[%c13_295, %c0_296] {strides = array<i32: 2, 1>} : memref<32x128xf32, #tpu.memory_space<vmem>>, vector<2x128xf32>
    tpu.strided_store %arg19[%c13_295, %c0_296], %553 {strides = array<i32: 2, 1>} : memref<32x128xf32, #tpu.memory_space<vmem>>, vector<2x128xf32>
    %555 = vector.extract_strided_slice %538 {offsets = [4, 0], sizes = [2, 128], strides = [1, 1]} : vector<8x512xf32> to vector<2x128xf32>
    %c16_297 = arith.constant 16 : index
    %c0_298 = arith.constant 0 : index
    %556 = tpu.strided_load %arg19[%c16_297, %c0_298] {strides = array<i32: 2, 1>} : memref<32x128xf32, #tpu.memory_space<vmem>>, vector<2x128xf32>
    tpu.strided_store %arg19[%c16_297, %c0_298], %555 {strides = array<i32: 2, 1>} : memref<32x128xf32, #tpu.memory_space<vmem>>, vector<2x128xf32>
    %557 = vector.extract_strided_slice %538 {offsets = [4, 128], sizes = [2, 128], strides = [1, 1]} : vector<8x512xf32> to vector<2x128xf32>
    %c17_299 = arith.constant 17 : index
    %c0_300 = arith.constant 0 : index
    %558 = tpu.strided_load %arg19[%c17_299, %c0_300] {strides = array<i32: 2, 1>} : memref<32x128xf32, #tpu.memory_space<vmem>>, vector<2x128xf32>
    tpu.strided_store %arg19[%c17_299, %c0_300], %557 {strides = array<i32: 2, 1>} : memref<32x128xf32, #tpu.memory_space<vmem>>, vector<2x128xf32>
    %559 = vector.extract_strided_slice %538 {offsets = [4, 256], sizes = [2, 128], strides = [1, 1]} : vector<8x512xf32> to vector<2x128xf32>
    %c20 = arith.constant 20 : index
    %c0_301 = arith.constant 0 : index
    %560 = tpu.strided_load %arg19[%c20, %c0_301] {strides = array<i32: 2, 1>} : memref<32x128xf32, #tpu.memory_space<vmem>>, vector<2x128xf32>
    tpu.strided_store %arg19[%c20, %c0_301], %559 {strides = array<i32: 2, 1>} : memref<32x128xf32, #tpu.memory_space<vmem>>, vector<2x128xf32>
    %561 = vector.extract_strided_slice %538 {offsets = [4, 384], sizes = [2, 128], strides = [1, 1]} : vector<8x512xf32> to vector<2x128xf32>
    %c21_302 = arith.constant 21 : index
    %c0_303 = arith.constant 0 : index
    %562 = tpu.strided_load %arg19[%c21_302, %c0_303] {strides = array<i32: 2, 1>} : memref<32x128xf32, #tpu.memory_space<vmem>>, vector<2x128xf32>
    tpu.strided_store %arg19[%c21_302, %c0_303], %561 {strides = array<i32: 2, 1>} : memref<32x128xf32, #tpu.memory_space<vmem>>, vector<2x128xf32>
    %563 = vector.extract_strided_slice %538 {offsets = [6, 0], sizes = [2, 128], strides = [1, 1]} : vector<8x512xf32> to vector<2x128xf32>
    %c24 = arith.constant 24 : index
    %c0_304 = arith.constant 0 : index
    %564 = tpu.strided_load %arg19[%c24, %c0_304] {strides = array<i32: 2, 1>} : memref<32x128xf32, #tpu.memory_space<vmem>>, vector<2x128xf32>
    tpu.strided_store %arg19[%c24, %c0_304], %563 {strides = array<i32: 2, 1>} : memref<32x128xf32, #tpu.memory_space<vmem>>, vector<2x128xf32>
    %565 = vector.extract_strided_slice %538 {offsets = [6, 128], sizes = [2, 128], strides = [1, 1]} : vector<8x512xf32> to vector<2x128xf32>
    %c25_305 = arith.constant 25 : index
    %c0_306 = arith.constant 0 : index
    %566 = tpu.strided_load %arg19[%c25_305, %c0_306] {strides = array<i32: 2, 1>} : memref<32x128xf32, #tpu.memory_space<vmem>>, vector<2x128xf32>
    tpu.strided_store %arg19[%c25_305, %c0_306], %565 {strides = array<i32: 2, 1>} : memref<32x128xf32, #tpu.memory_space<vmem>>, vector<2x128xf32>
    %567 = vector.extract_strided_slice %538 {offsets = [6, 256], sizes = [2, 128], strides = [1, 1]} : vector<8x512xf32> to vector<2x128xf32>
    %c28 = arith.constant 28 : index
    %c0_307 = arith.constant 0 : index
    %568 = tpu.strided_load %arg19[%c28, %c0_307] {strides = array<i32: 2, 1>} : memref<32x128xf32, #tpu.memory_space<vmem>>, vector<2x128xf32>
    tpu.strided_store %arg19[%c28, %c0_307], %567 {strides = array<i32: 2, 1>} : memref<32x128xf32, #tpu.memory_space<vmem>>, vector<2x128xf32>
    %569 = vector.extract_strided_slice %538 {offsets = [6, 384], sizes = [2, 128], strides = [1, 1]} : vector<8x512xf32> to vector<2x128xf32>
    %c29_308 = arith.constant 29 : index
    %c0_309 = arith.constant 0 : index
    %570 = tpu.strided_load %arg19[%c29_308, %c0_309] {strides = array<i32: 2, 1>} : memref<32x128xf32, #tpu.memory_space<vmem>>, vector<2x128xf32>
    tpu.strided_store %arg19[%c29_308, %c0_309], %569 {strides = array<i32: 2, 1>} : memref<32x128xf32, #tpu.memory_space<vmem>>, vector<2x128xf32>
    %c0_310 = arith.constant 0 : index
    %c0_311 = arith.constant 0 : index
    %571 = vector.load %arg19[%c0_310, %c0_311] : memref<32x128xf32, #tpu.memory_space<vmem>>, vector<32x128xf32>
    %572 = vector.extract_strided_slice %571 {offsets = [0, 0], sizes = [32, 64], strides = [1, 1]} : vector<32x128xf32> to vector<32x64xf32>
    %573 = arith.truncf %572 : vector<32x64xf32> to vector<32x64xbf16>
    %c0_312 = arith.constant 0 : index
    %c0_313 = arith.constant 0 : index
    %574 = vector.load %arg10[%c0_312, %c0_313] : memref<64x512xbf16, #tpu.memory_space<vmem>>, vector<64x512xbf16>
    %cst_314 = arith.constant dense<0.000000e+00> : vector<32x512xf32>
    %575 = tpu.matmul %573, %574, %cst_314 {dimension_numbers = #tpu.dot_dimension_numbers<[1], [0], [0], [1], [0, 0, 1, 1], [], []>} : vector<32x64xbf16>, vector<64x512xbf16>, vector<32x512xf32> -> vector<32x512xf32>
    %c0_315 = arith.constant 0 : index
    %c0_316 = arith.constant 0 : index
    %576 = vector.load %arg11[%c0_315, %c0_316] : memref<1x512xf32, #tpu.memory_space<vmem>>, vector<1x512xf32>
    %577 = vector.broadcast %576 : vector<1x512xf32> to vector<32x512xf32>
    %578 = arith.addf %575, %577 : vector<32x512xf32>
    %cst_317 = arith.constant 0.000000e+00 : f32
    %579 = vector.broadcast %cst_317 : f32 to vector<32x512xf32>
    %580 = arith.maximumf %578, %579 : vector<32x512xf32>
    %581 = vector.extract_strided_slice %580 {offsets = [0, 0], sizes = [4, 128], strides = [1, 1]} : vector<32x512xf32> to vector<4x128xf32>
    %c0_318 = arith.constant 0 : index
    %c0_319 = arith.constant 0 : index
    %582 = tpu.strided_load %arg20[%c0_318, %c0_319] {strides = array<i32: 2, 1>} : memref<128x128xf32, #tpu.memory_space<vmem>>, vector<4x128xf32>
    tpu.strided_store %arg20[%c0_318, %c0_319], %581 {strides = array<i32: 2, 1>} : memref<128x128xf32, #tpu.memory_space<vmem>>, vector<4x128xf32>
    %583 = vector.extract_strided_slice %580 {offsets = [0, 128], sizes = [4, 128], strides = [1, 1]} : vector<32x512xf32> to vector<4x128xf32>
    %c1_320 = arith.constant 1 : index
    %c0_321 = arith.constant 0 : index
    %584 = tpu.strided_load %arg20[%c1_320, %c0_321] {strides = array<i32: 2, 1>} : memref<128x128xf32, #tpu.memory_space<vmem>>, vector<4x128xf32>
    tpu.strided_store %arg20[%c1_320, %c0_321], %583 {strides = array<i32: 2, 1>} : memref<128x128xf32, #tpu.memory_space<vmem>>, vector<4x128xf32>
    %585 = vector.extract_strided_slice %580 {offsets = [0, 256], sizes = [4, 128], strides = [1, 1]} : vector<32x512xf32> to vector<4x128xf32>
    %c8_322 = arith.constant 8 : index
    %c0_323 = arith.constant 0 : index
    %586 = tpu.strided_load %arg20[%c8_322, %c0_323] {strides = array<i32: 2, 1>} : memref<128x128xf32, #tpu.memory_space<vmem>>, vector<4x128xf32>
    tpu.strided_store %arg20[%c8_322, %c0_323], %585 {strides = array<i32: 2, 1>} : memref<128x128xf32, #tpu.memory_space<vmem>>, vector<4x128xf32>
    %587 = vector.extract_strided_slice %580 {offsets = [0, 384], sizes = [4, 128], strides = [1, 1]} : vector<32x512xf32> to vector<4x128xf32>
    %c9_324 = arith.constant 9 : index
    %c0_325 = arith.constant 0 : index
    %588 = tpu.strided_load %arg20[%c9_324, %c0_325] {strides = array<i32: 2, 1>} : memref<128x128xf32, #tpu.memory_space<vmem>>, vector<4x128xf32>
    tpu.strided_store %arg20[%c9_324, %c0_325], %587 {strides = array<i32: 2, 1>} : memref<128x128xf32, #tpu.memory_space<vmem>>, vector<4x128xf32>
    %589 = vector.extract_strided_slice %580 {offsets = [4, 0], sizes = [4, 128], strides = [1, 1]} : vector<32x512xf32> to vector<4x128xf32>
    %c16_326 = arith.constant 16 : index
    %c0_327 = arith.constant 0 : index
    %590 = tpu.strided_load %arg20[%c16_326, %c0_327] {strides = array<i32: 2, 1>} : memref<128x128xf32, #tpu.memory_space<vmem>>, vector<4x128xf32>
    tpu.strided_store %arg20[%c16_326, %c0_327], %589 {strides = array<i32: 2, 1>} : memref<128x128xf32, #tpu.memory_space<vmem>>, vector<4x128xf32>
    %591 = vector.extract_strided_slice %580 {offsets = [4, 128], sizes = [4, 128], strides = [1, 1]} : vector<32x512xf32> to vector<4x128xf32>
    %c17_328 = arith.constant 17 : index
    %c0_329 = arith.constant 0 : index
    %592 = tpu.strided_load %arg20[%c17_328, %c0_329] {strides = array<i32: 2, 1>} : memref<128x128xf32, #tpu.memory_space<vmem>>, vector<4x128xf32>
    tpu.strided_store %arg20[%c17_328, %c0_329], %591 {strides = array<i32: 2, 1>} : memref<128x128xf32, #tpu.memory_space<vmem>>, vector<4x128xf32>
    %593 = vector.extract_strided_slice %580 {offsets = [4, 256], sizes = [4, 128], strides = [1, 1]} : vector<32x512xf32> to vector<4x128xf32>
    %c24_330 = arith.constant 24 : index
    %c0_331 = arith.constant 0 : index
    %594 = tpu.strided_load %arg20[%c24_330, %c0_331] {strides = array<i32: 2, 1>} : memref<128x128xf32, #tpu.memory_space<vmem>>, vector<4x128xf32>
    tpu.strided_store %arg20[%c24_330, %c0_331], %593 {strides = array<i32: 2, 1>} : memref<128x128xf32, #tpu.memory_space<vmem>>, vector<4x128xf32>
    %595 = vector.extract_strided_slice %580 {offsets = [4, 384], sizes = [4, 128], strides = [1, 1]} : vector<32x512xf32> to vector<4x128xf32>
    %c25_332 = arith.constant 25 : index
    %c0_333 = arith.constant 0 : index
    %596 = tpu.strided_load %arg20[%c25_332, %c0_333] {strides = array<i32: 2, 1>} : memref<128x128xf32, #tpu.memory_space<vmem>>, vector<4x128xf32>
    tpu.strided_store %arg20[%c25_332, %c0_333], %595 {strides = array<i32: 2, 1>} : memref<128x128xf32, #tpu.memory_space<vmem>>, vector<4x128xf32>
    %597 = vector.extract_strided_slice %580 {offsets = [8, 0], sizes = [4, 128], strides = [1, 1]} : vector<32x512xf32> to vector<4x128xf32>
    %c32_334 = arith.constant 32 : index
    %c0_335 = arith.constant 0 : index
    %598 = tpu.strided_load %arg20[%c32_334, %c0_335] {strides = array<i32: 2, 1>} : memref<128x128xf32, #tpu.memory_space<vmem>>, vector<4x128xf32>
    tpu.strided_store %arg20[%c32_334, %c0_335], %597 {strides = array<i32: 2, 1>} : memref<128x128xf32, #tpu.memory_space<vmem>>, vector<4x128xf32>
    %599 = vector.extract_strided_slice %580 {offsets = [8, 128], sizes = [4, 128], strides = [1, 1]} : vector<32x512xf32> to vector<4x128xf32>
    %c33_336 = arith.constant 33 : index
    %c0_337 = arith.constant 0 : index
    %600 = tpu.strided_load %arg20[%c33_336, %c0_337] {strides = array<i32: 2, 1>} : memref<128x128xf32, #tpu.memory_space<vmem>>, vector<4x128xf32>
    tpu.strided_store %arg20[%c33_336, %c0_337], %599 {strides = array<i32: 2, 1>} : memref<128x128xf32, #tpu.memory_space<vmem>>, vector<4x128xf32>
    %601 = vector.extract_strided_slice %580 {offsets = [8, 256], sizes = [4, 128], strides = [1, 1]} : vector<32x512xf32> to vector<4x128xf32>
    %c40 = arith.constant 40 : index
    %c0_338 = arith.constant 0 : index
    %602 = tpu.strided_load %arg20[%c40, %c0_338] {strides = array<i32: 2, 1>} : memref<128x128xf32, #tpu.memory_space<vmem>>, vector<4x128xf32>
    tpu.strided_store %arg20[%c40, %c0_338], %601 {strides = array<i32: 2, 1>} : memref<128x128xf32, #tpu.memory_space<vmem>>, vector<4x128xf32>
    %603 = vector.extract_strided_slice %580 {offsets = [8, 384], sizes = [4, 128], strides = [1, 1]} : vector<32x512xf32> to vector<4x128xf32>
    %c41_339 = arith.constant 41 : index
    %c0_340 = arith.constant 0 : index
    %604 = tpu.strided_load %arg20[%c41_339, %c0_340] {strides = array<i32: 2, 1>} : memref<128x128xf32, #tpu.memory_space<vmem>>, vector<4x128xf32>
    tpu.strided_store %arg20[%c41_339, %c0_340], %603 {strides = array<i32: 2, 1>} : memref<128x128xf32, #tpu.memory_space<vmem>>, vector<4x128xf32>
    %605 = vector.extract_strided_slice %580 {offsets = [12, 0], sizes = [4, 128], strides = [1, 1]} : vector<32x512xf32> to vector<4x128xf32>
    %c48 = arith.constant 48 : index
    %c0_341 = arith.constant 0 : index
    %606 = tpu.strided_load %arg20[%c48, %c0_341] {strides = array<i32: 2, 1>} : memref<128x128xf32, #tpu.memory_space<vmem>>, vector<4x128xf32>
    tpu.strided_store %arg20[%c48, %c0_341], %605 {strides = array<i32: 2, 1>} : memref<128x128xf32, #tpu.memory_space<vmem>>, vector<4x128xf32>
    %607 = vector.extract_strided_slice %580 {offsets = [12, 128], sizes = [4, 128], strides = [1, 1]} : vector<32x512xf32> to vector<4x128xf32>
    %c49_342 = arith.constant 49 : index
    %c0_343 = arith.constant 0 : index
    %608 = tpu.strided_load %arg20[%c49_342, %c0_343] {strides = array<i32: 2, 1>} : memref<128x128xf32, #tpu.memory_space<vmem>>, vector<4x128xf32>
    tpu.strided_store %arg20[%c49_342, %c0_343], %607 {strides = array<i32: 2, 1>} : memref<128x128xf32, #tpu.memory_space<vmem>>, vector<4x128xf32>
    %609 = vector.extract_strided_slice %580 {offsets = [12, 256], sizes = [4, 128], strides = [1, 1]} : vector<32x512xf32> to vector<4x128xf32>
    %c56 = arith.constant 56 : index
    %c0_344 = arith.constant 0 : index
    %610 = tpu.strided_load %arg20[%c56, %c0_344] {strides = array<i32: 2, 1>} : memref<128x128xf32, #tpu.memory_space<vmem>>, vector<4x128xf32>
    tpu.strided_store %arg20[%c56, %c0_344], %609 {strides = array<i32: 2, 1>} : memref<128x128xf32, #tpu.memory_space<vmem>>, vector<4x128xf32>
    %611 = vector.extract_strided_slice %580 {offsets = [12, 384], sizes = [4, 128], strides = [1, 1]} : vector<32x512xf32> to vector<4x128xf32>
    %c57_345 = arith.constant 57 : index
    %c0_346 = arith.constant 0 : index
    %612 = tpu.strided_load %arg20[%c57_345, %c0_346] {strides = array<i32: 2, 1>} : memref<128x128xf32, #tpu.memory_space<vmem>>, vector<4x128xf32>
    tpu.strided_store %arg20[%c57_345, %c0_346], %611 {strides = array<i32: 2, 1>} : memref<128x128xf32, #tpu.memory_space<vmem>>, vector<4x128xf32>
    %613 = vector.extract_strided_slice %580 {offsets = [16, 0], sizes = [4, 128], strides = [1, 1]} : vector<32x512xf32> to vector<4x128xf32>
    %c64 = arith.constant 64 : index
    %c0_347 = arith.constant 0 : index
    %614 = tpu.strided_load %arg20[%c64, %c0_347] {strides = array<i32: 2, 1>} : memref<128x128xf32, #tpu.memory_space<vmem>>, vector<4x128xf32>
    tpu.strided_store %arg20[%c64, %c0_347], %613 {strides = array<i32: 2, 1>} : memref<128x128xf32, #tpu.memory_space<vmem>>, vector<4x128xf32>
    %615 = vector.extract_strided_slice %580 {offsets = [16, 128], sizes = [4, 128], strides = [1, 1]} : vector<32x512xf32> to vector<4x128xf32>
    %c65_348 = arith.constant 65 : index
    %c0_349 = arith.constant 0 : index
    %616 = tpu.strided_load %arg20[%c65_348, %c0_349] {strides = array<i32: 2, 1>} : memref<128x128xf32, #tpu.memory_space<vmem>>, vector<4x128xf32>
    tpu.strided_store %arg20[%c65_348, %c0_349], %615 {strides = array<i32: 2, 1>} : memref<128x128xf32, #tpu.memory_space<vmem>>, vector<4x128xf32>
    %617 = vector.extract_strided_slice %580 {offsets = [16, 256], sizes = [4, 128], strides = [1, 1]} : vector<32x512xf32> to vector<4x128xf32>
    %c72 = arith.constant 72 : index
    %c0_350 = arith.constant 0 : index
    %618 = tpu.strided_load %arg20[%c72, %c0_350] {strides = array<i32: 2, 1>} : memref<128x128xf32, #tpu.memory_space<vmem>>, vector<4x128xf32>
    tpu.strided_store %arg20[%c72, %c0_350], %617 {strides = array<i32: 2, 1>} : memref<128x128xf32, #tpu.memory_space<vmem>>, vector<4x128xf32>
    %619 = vector.extract_strided_slice %580 {offsets = [16, 384], sizes = [4, 128], strides = [1, 1]} : vector<32x512xf32> to vector<4x128xf32>
    %c73_351 = arith.constant 73 : index
    %c0_352 = arith.constant 0 : index
    %620 = tpu.strided_load %arg20[%c73_351, %c0_352] {strides = array<i32: 2, 1>} : memref<128x128xf32, #tpu.memory_space<vmem>>, vector<4x128xf32>
    tpu.strided_store %arg20[%c73_351, %c0_352], %619 {strides = array<i32: 2, 1>} : memref<128x128xf32, #tpu.memory_space<vmem>>, vector<4x128xf32>
    %621 = vector.extract_strided_slice %580 {offsets = [20, 0], sizes = [4, 128], strides = [1, 1]} : vector<32x512xf32> to vector<4x128xf32>
    %c80 = arith.constant 80 : index
    %c0_353 = arith.constant 0 : index
    %622 = tpu.strided_load %arg20[%c80, %c0_353] {strides = array<i32: 2, 1>} : memref<128x128xf32, #tpu.memory_space<vmem>>, vector<4x128xf32>
    tpu.strided_store %arg20[%c80, %c0_353], %621 {strides = array<i32: 2, 1>} : memref<128x128xf32, #tpu.memory_space<vmem>>, vector<4x128xf32>
    %623 = vector.extract_strided_slice %580 {offsets = [20, 128], sizes = [4, 128], strides = [1, 1]} : vector<32x512xf32> to vector<4x128xf32>
    %c81_354 = arith.constant 81 : index
    %c0_355 = arith.constant 0 : index
    %624 = tpu.strided_load %arg20[%c81_354, %c0_355] {strides = array<i32: 2, 1>} : memref<128x128xf32, #tpu.memory_space<vmem>>, vector<4x128xf32>
    tpu.strided_store %arg20[%c81_354, %c0_355], %623 {strides = array<i32: 2, 1>} : memref<128x128xf32, #tpu.memory_space<vmem>>, vector<4x128xf32>
    %625 = vector.extract_strided_slice %580 {offsets = [20, 256], sizes = [4, 128], strides = [1, 1]} : vector<32x512xf32> to vector<4x128xf32>
    %c88 = arith.constant 88 : index
    %c0_356 = arith.constant 0 : index
    %626 = tpu.strided_load %arg20[%c88, %c0_356] {strides = array<i32: 2, 1>} : memref<128x128xf32, #tpu.memory_space<vmem>>, vector<4x128xf32>
    tpu.strided_store %arg20[%c88, %c0_356], %625 {strides = array<i32: 2, 1>} : memref<128x128xf32, #tpu.memory_space<vmem>>, vector<4x128xf32>
    %627 = vector.extract_strided_slice %580 {offsets = [20, 384], sizes = [4, 128], strides = [1, 1]} : vector<32x512xf32> to vector<4x128xf32>
    %c89_357 = arith.constant 89 : index
    %c0_358 = arith.constant 0 : index
    %628 = tpu.strided_load %arg20[%c89_357, %c0_358] {strides = array<i32: 2, 1>} : memref<128x128xf32, #tpu.memory_space<vmem>>, vector<4x128xf32>
    tpu.strided_store %arg20[%c89_357, %c0_358], %627 {strides = array<i32: 2, 1>} : memref<128x128xf32, #tpu.memory_space<vmem>>, vector<4x128xf32>
    %629 = vector.extract_strided_slice %580 {offsets = [24, 0], sizes = [4, 128], strides = [1, 1]} : vector<32x512xf32> to vector<4x128xf32>
    %c96 = arith.constant 96 : index
    %c0_359 = arith.constant 0 : index
    %630 = tpu.strided_load %arg20[%c96, %c0_359] {strides = array<i32: 2, 1>} : memref<128x128xf32, #tpu.memory_space<vmem>>, vector<4x128xf32>
    tpu.strided_store %arg20[%c96, %c0_359], %629 {strides = array<i32: 2, 1>} : memref<128x128xf32, #tpu.memory_space<vmem>>, vector<4x128xf32>
    %631 = vector.extract_strided_slice %580 {offsets = [24, 128], sizes = [4, 128], strides = [1, 1]} : vector<32x512xf32> to vector<4x128xf32>
    %c97_360 = arith.constant 97 : index
    %c0_361 = arith.constant 0 : index
    %632 = tpu.strided_load %arg20[%c97_360, %c0_361] {strides = array<i32: 2, 1>} : memref<128x128xf32, #tpu.memory_space<vmem>>, vector<4x128xf32>
    tpu.strided_store %arg20[%c97_360, %c0_361], %631 {strides = array<i32: 2, 1>} : memref<128x128xf32, #tpu.memory_space<vmem>>, vector<4x128xf32>
    %633 = vector.extract_strided_slice %580 {offsets = [24, 256], sizes = [4, 128], strides = [1, 1]} : vector<32x512xf32> to vector<4x128xf32>
    %c104 = arith.constant 104 : index
    %c0_362 = arith.constant 0 : index
    %634 = tpu.strided_load %arg20[%c104, %c0_362] {strides = array<i32: 2, 1>} : memref<128x128xf32, #tpu.memory_space<vmem>>, vector<4x128xf32>
    tpu.strided_store %arg20[%c104, %c0_362], %633 {strides = array<i32: 2, 1>} : memref<128x128xf32, #tpu.memory_space<vmem>>, vector<4x128xf32>
    %635 = vector.extract_strided_slice %580 {offsets = [24, 384], sizes = [4, 128], strides = [1, 1]} : vector<32x512xf32> to vector<4x128xf32>
    %c105_363 = arith.constant 105 : index
    %c0_364 = arith.constant 0 : index
    %636 = tpu.strided_load %arg20[%c105_363, %c0_364] {strides = array<i32: 2, 1>} : memref<128x128xf32, #tpu.memory_space<vmem>>, vector<4x128xf32>
    tpu.strided_store %arg20[%c105_363, %c0_364], %635 {strides = array<i32: 2, 1>} : memref<128x128xf32, #tpu.memory_space<vmem>>, vector<4x128xf32>
    %637 = vector.extract_strided_slice %580 {offsets = [28, 0], sizes = [4, 128], strides = [1, 1]} : vector<32x512xf32> to vector<4x128xf32>
    %c112 = arith.constant 112 : index
    %c0_365 = arith.constant 0 : index
    %638 = tpu.strided_load %arg20[%c112, %c0_365] {strides = array<i32: 2, 1>} : memref<128x128xf32, #tpu.memory_space<vmem>>, vector<4x128xf32>
    tpu.strided_store %arg20[%c112, %c0_365], %637 {strides = array<i32: 2, 1>} : memref<128x128xf32, #tpu.memory_space<vmem>>, vector<4x128xf32>
    %639 = vector.extract_strided_slice %580 {offsets = [28, 128], sizes = [4, 128], strides = [1, 1]} : vector<32x512xf32> to vector<4x128xf32>
    %c113_366 = arith.constant 113 : index
    %c0_367 = arith.constant 0 : index
    %640 = tpu.strided_load %arg20[%c113_366, %c0_367] {strides = array<i32: 2, 1>} : memref<128x128xf32, #tpu.memory_space<vmem>>, vector<4x128xf32>
    tpu.strided_store %arg20[%c113_366, %c0_367], %639 {strides = array<i32: 2, 1>} : memref<128x128xf32, #tpu.memory_space<vmem>>, vector<4x128xf32>
    %641 = vector.extract_strided_slice %580 {offsets = [28, 256], sizes = [4, 128], strides = [1, 1]} : vector<32x512xf32> to vector<4x128xf32>
    %c120 = arith.constant 120 : index
    %c0_368 = arith.constant 0 : index
    %642 = tpu.strided_load %arg20[%c120, %c0_368] {strides = array<i32: 2, 1>} : memref<128x128xf32, #tpu.memory_space<vmem>>, vector<4x128xf32>
    tpu.strided_store %arg20[%c120, %c0_368], %641 {strides = array<i32: 2, 1>} : memref<128x128xf32, #tpu.memory_space<vmem>>, vector<4x128xf32>
    %643 = vector.extract_strided_slice %580 {offsets = [28, 384], sizes = [4, 128], strides = [1, 1]} : vector<32x512xf32> to vector<4x128xf32>
    %c121_369 = arith.constant 121 : index
    %c0_370 = arith.constant 0 : index
    %644 = tpu.strided_load %arg20[%c121_369, %c0_370] {strides = array<i32: 2, 1>} : memref<128x128xf32, #tpu.memory_space<vmem>>, vector<4x128xf32>
    tpu.strided_store %arg20[%c121_369, %c0_370], %643 {strides = array<i32: 2, 1>} : memref<128x128xf32, #tpu.memory_space<vmem>>, vector<4x128xf32>
    %c0_371 = arith.constant 0 : index
    %c0_372 = arith.constant 0 : index
    %645 = vector.load %arg20[%c0_371, %c0_372] : memref<128x128xf32, #tpu.memory_space<vmem>>, vector<128x128xf32>
    %646 = vector.extract_strided_slice %645 {offsets = [0, 0], sizes = [128, 32], strides = [1, 1]} : vector<128x128xf32> to vector<128x32xf32>
    %647 = arith.truncf %646 : vector<128x32xf32> to vector<128x32xbf16>
    %c0_373 = arith.constant 0 : index
    %c0_374 = arith.constant 0 : index
    %648 = vector.load %arg12[%c0_373, %c0_374] : memref<32x512xbf16, #tpu.memory_space<vmem>>, vector<32x512xbf16>
    %cst_375 = arith.constant dense<0.000000e+00> : vector<128x512xf32>
    %649 = tpu.matmul %647, %648, %cst_375 {dimension_numbers = #tpu.dot_dimension_numbers<[1], [0], [0], [1], [0, 0, 1, 1], [], []>} : vector<128x32xbf16>, vector<32x512xbf16>, vector<128x512xf32> -> vector<128x512xf32>
    %c0_376 = arith.constant 0 : index
    %c0_377 = arith.constant 0 : index
    %650 = vector.load %arg13[%c0_376, %c0_377] : memref<1x512xf32, #tpu.memory_space<vmem>>, vector<1x512xf32>
    %651 = vector.broadcast %650 : vector<1x512xf32> to vector<128x512xf32>
    %652 = arith.addf %649, %651 : vector<128x512xf32>
    %cst_378 = arith.constant 0.000000e+00 : f32
    %653 = vector.broadcast %cst_378 : f32 to vector<128x512xf32>
    %654 = arith.subf %653, %652 : vector<128x512xf32>
    %655 = math.exp %654 : vector<128x512xf32>
    %cst_379 = arith.constant 1.000000e+00 : f32
    %656 = vector.broadcast %cst_379 : f32 to vector<128x512xf32>
    %657 = arith.addf %656, %655 : vector<128x512xf32>
    %658 = tpu.reciprocal %657 {approx = true} : vector<128x512xf32> -> vector<128x512xf32>
    %659 = vector.extract_strided_slice %658 {offsets = [0, 0], sizes = [8, 128], strides = [1, 1]} : vector<128x512xf32> to vector<8x128xf32>
    %c0_380 = arith.constant 0 : index
    %c0_381 = arith.constant 0 : index
    %660 = tpu.strided_load %arg14[%c0_380, %c0_381] {strides = array<i32: 2, 1>} : memref<512x128xf32, #tpu.memory_space<vmem>>, vector<8x128xf32>
    tpu.strided_store %arg14[%c0_380, %c0_381], %659 {strides = array<i32: 2, 1>} : memref<512x128xf32, #tpu.memory_space<vmem>>, vector<8x128xf32>
    %661 = vector.extract_strided_slice %658 {offsets = [0, 128], sizes = [8, 128], strides = [1, 1]} : vector<128x512xf32> to vector<8x128xf32>
    %c1_382 = arith.constant 1 : index
    %c0_383 = arith.constant 0 : index
    %662 = tpu.strided_load %arg14[%c1_382, %c0_383] {strides = array<i32: 2, 1>} : memref<512x128xf32, #tpu.memory_space<vmem>>, vector<8x128xf32>
    tpu.strided_store %arg14[%c1_382, %c0_383], %661 {strides = array<i32: 2, 1>} : memref<512x128xf32, #tpu.memory_space<vmem>>, vector<8x128xf32>
    %663 = vector.extract_strided_slice %658 {offsets = [0, 256], sizes = [8, 128], strides = [1, 1]} : vector<128x512xf32> to vector<8x128xf32>
    %c16_384 = arith.constant 16 : index
    %c0_385 = arith.constant 0 : index
    %664 = tpu.strided_load %arg14[%c16_384, %c0_385] {strides = array<i32: 2, 1>} : memref<512x128xf32, #tpu.memory_space<vmem>>, vector<8x128xf32>
    tpu.strided_store %arg14[%c16_384, %c0_385], %663 {strides = array<i32: 2, 1>} : memref<512x128xf32, #tpu.memory_space<vmem>>, vector<8x128xf32>
    %665 = vector.extract_strided_slice %658 {offsets = [0, 384], sizes = [8, 128], strides = [1, 1]} : vector<128x512xf32> to vector<8x128xf32>
    %c17_386 = arith.constant 17 : index
    %c0_387 = arith.constant 0 : index
    %666 = tpu.strided_load %arg14[%c17_386, %c0_387] {strides = array<i32: 2, 1>} : memref<512x128xf32, #tpu.memory_space<vmem>>, vector<8x128xf32>
    tpu.strided_store %arg14[%c17_386, %c0_387], %665 {strides = array<i32: 2, 1>} : memref<512x128xf32, #tpu.memory_space<vmem>>, vector<8x128xf32>
    %667 = vector.extract_strided_slice %658 {offsets = [8, 0], sizes = [8, 128], strides = [1, 1]} : vector<128x512xf32> to vector<8x128xf32>
    %c32_388 = arith.constant 32 : index
    %c0_389 = arith.constant 0 : index
    %668 = tpu.strided_load %arg14[%c32_388, %c0_389] {strides = array<i32: 2, 1>} : memref<512x128xf32, #tpu.memory_space<vmem>>, vector<8x128xf32>
    tpu.strided_store %arg14[%c32_388, %c0_389], %667 {strides = array<i32: 2, 1>} : memref<512x128xf32, #tpu.memory_space<vmem>>, vector<8x128xf32>
    %669 = vector.extract_strided_slice %658 {offsets = [8, 128], sizes = [8, 128], strides = [1, 1]} : vector<128x512xf32> to vector<8x128xf32>
    %c33_390 = arith.constant 33 : index
    %c0_391 = arith.constant 0 : index
    %670 = tpu.strided_load %arg14[%c33_390, %c0_391] {strides = array<i32: 2, 1>} : memref<512x128xf32, #tpu.memory_space<vmem>>, vector<8x128xf32>
    tpu.strided_store %arg14[%c33_390, %c0_391], %669 {strides = array<i32: 2, 1>} : memref<512x128xf32, #tpu.memory_space<vmem>>, vector<8x128xf32>
    %671 = vector.extract_strided_slice %658 {offsets = [8, 256], sizes = [8, 128], strides = [1, 1]} : vector<128x512xf32> to vector<8x128xf32>
    %c48_392 = arith.constant 48 : index
    %c0_393 = arith.constant 0 : index
    %672 = tpu.strided_load %arg14[%c48_392, %c0_393] {strides = array<i32: 2, 1>} : memref<512x128xf32, #tpu.memory_space<vmem>>, vector<8x128xf32>
    tpu.strided_store %arg14[%c48_392, %c0_393], %671 {strides = array<i32: 2, 1>} : memref<512x128xf32, #tpu.memory_space<vmem>>, vector<8x128xf32>
    %673 = vector.extract_strided_slice %658 {offsets = [8, 384], sizes = [8, 128], strides = [1, 1]} : vector<128x512xf32> to vector<8x128xf32>
    %c49_394 = arith.constant 49 : index
    %c0_395 = arith.constant 0 : index
    %674 = tpu.strided_load %arg14[%c49_394, %c0_395] {strides = array<i32: 2, 1>} : memref<512x128xf32, #tpu.memory_space<vmem>>, vector<8x128xf32>
    tpu.strided_store %arg14[%c49_394, %c0_395], %673 {strides = array<i32: 2, 1>} : memref<512x128xf32, #tpu.memory_space<vmem>>, vector<8x128xf32>
    %675 = vector.extract_strided_slice %658 {offsets = [16, 0], sizes = [8, 128], strides = [1, 1]} : vector<128x512xf32> to vector<8x128xf32>
    %c64_396 = arith.constant 64 : index
    %c0_397 = arith.constant 0 : index
    %676 = tpu.strided_load %arg14[%c64_396, %c0_397] {strides = array<i32: 2, 1>} : memref<512x128xf32, #tpu.memory_space<vmem>>, vector<8x128xf32>
    tpu.strided_store %arg14[%c64_396, %c0_397], %675 {strides = array<i32: 2, 1>} : memref<512x128xf32, #tpu.memory_space<vmem>>, vector<8x128xf32>
    %677 = vector.extract_strided_slice %658 {offsets = [16, 128], sizes = [8, 128], strides = [1, 1]} : vector<128x512xf32> to vector<8x128xf32>
    %c65_398 = arith.constant 65 : index
    %c0_399 = arith.constant 0 : index
    %678 = tpu.strided_load %arg14[%c65_398, %c0_399] {strides = array<i32: 2, 1>} : memref<512x128xf32, #tpu.memory_space<vmem>>, vector<8x128xf32>
    tpu.strided_store %arg14[%c65_398, %c0_399], %677 {strides = array<i32: 2, 1>} : memref<512x128xf32, #tpu.memory_space<vmem>>, vector<8x128xf32>
    %679 = vector.extract_strided_slice %658 {offsets = [16, 256], sizes = [8, 128], strides = [1, 1]} : vector<128x512xf32> to vector<8x128xf32>
    %c80_400 = arith.constant 80 : index
    %c0_401 = arith.constant 0 : index
    %680 = tpu.strided_load %arg14[%c80_400, %c0_401] {strides = array<i32: 2, 1>} : memref<512x128xf32, #tpu.memory_space<vmem>>, vector<8x128xf32>
    tpu.strided_store %arg14[%c80_400, %c0_401], %679 {strides = array<i32: 2, 1>} : memref<512x128xf32, #tpu.memory_space<vmem>>, vector<8x128xf32>
    %681 = vector.extract_strided_slice %658 {offsets = [16, 384], sizes = [8, 128], strides = [1, 1]} : vector<128x512xf32> to vector<8x128xf32>
    %c81_402 = arith.constant 81 : index
    %c0_403 = arith.constant 0 : index
    %682 = tpu.strided_load %arg14[%c81_402, %c0_403] {strides = array<i32: 2, 1>} : memref<512x128xf32, #tpu.memory_space<vmem>>, vector<8x128xf32>
    tpu.strided_store %arg14[%c81_402, %c0_403], %681 {strides = array<i32: 2, 1>} : memref<512x128xf32, #tpu.memory_space<vmem>>, vector<8x128xf32>
    %683 = vector.extract_strided_slice %658 {offsets = [24, 0], sizes = [8, 128], strides = [1, 1]} : vector<128x512xf32> to vector<8x128xf32>
    %c96_404 = arith.constant 96 : index
    %c0_405 = arith.constant 0 : index
    %684 = tpu.strided_load %arg14[%c96_404, %c0_405] {strides = array<i32: 2, 1>} : memref<512x128xf32, #tpu.memory_space<vmem>>, vector<8x128xf32>
    tpu.strided_store %arg14[%c96_404, %c0_405], %683 {strides = array<i32: 2, 1>} : memref<512x128xf32, #tpu.memory_space<vmem>>, vector<8x128xf32>
    %685 = vector.extract_strided_slice %658 {offsets = [24, 128], sizes = [8, 128], strides = [1, 1]} : vector<128x512xf32> to vector<8x128xf32>
    %c97_406 = arith.constant 97 : index
    %c0_407 = arith.constant 0 : index
    %686 = tpu.strided_load %arg14[%c97_406, %c0_407] {strides = array<i32: 2, 1>} : memref<512x128xf32, #tpu.memory_space<vmem>>, vector<8x128xf32>
    tpu.strided_store %arg14[%c97_406, %c0_407], %685 {strides = array<i32: 2, 1>} : memref<512x128xf32, #tpu.memory_space<vmem>>, vector<8x128xf32>
    %687 = vector.extract_strided_slice %658 {offsets = [24, 256], sizes = [8, 128], strides = [1, 1]} : vector<128x512xf32> to vector<8x128xf32>
    %c112_408 = arith.constant 112 : index
    %c0_409 = arith.constant 0 : index
    %688 = tpu.strided_load %arg14[%c112_408, %c0_409] {strides = array<i32: 2, 1>} : memref<512x128xf32, #tpu.memory_space<vmem>>, vector<8x128xf32>
    tpu.strided_store %arg14[%c112_408, %c0_409], %687 {strides = array<i32: 2, 1>} : memref<512x128xf32, #tpu.memory_space<vmem>>, vector<8x128xf32>
    %689 = vector.extract_strided_slice %658 {offsets = [24, 384], sizes = [8, 128], strides = [1, 1]} : vector<128x512xf32> to vector<8x128xf32>
    %c113_410 = arith.constant 113 : index
    %c0_411 = arith.constant 0 : index
    %690 = tpu.strided_load %arg14[%c113_410, %c0_411] {strides = array<i32: 2, 1>} : memref<512x128xf32, #tpu.memory_space<vmem>>, vector<8x128xf32>
    tpu.strided_store %arg14[%c113_410, %c0_411], %689 {strides = array<i32: 2, 1>} : memref<512x128xf32, #tpu.memory_space<vmem>>, vector<8x128xf32>
    %691 = vector.extract_strided_slice %658 {offsets = [32, 0], sizes = [8, 128], strides = [1, 1]} : vector<128x512xf32> to vector<8x128xf32>
    %c128 = arith.constant 128 : index
    %c0_412 = arith.constant 0 : index
    %692 = tpu.strided_load %arg14[%c128, %c0_412] {strides = array<i32: 2, 1>} : memref<512x128xf32, #tpu.memory_space<vmem>>, vector<8x128xf32>
    tpu.strided_store %arg14[%c128, %c0_412], %691 {strides = array<i32: 2, 1>} : memref<512x128xf32, #tpu.memory_space<vmem>>, vector<8x128xf32>
    %693 = vector.extract_strided_slice %658 {offsets = [32, 128], sizes = [8, 128], strides = [1, 1]} : vector<128x512xf32> to vector<8x128xf32>
    %c129_413 = arith.constant 129 : index
    %c0_414 = arith.constant 0 : index
    %694 = tpu.strided_load %arg14[%c129_413, %c0_414] {strides = array<i32: 2, 1>} : memref<512x128xf32, #tpu.memory_space<vmem>>, vector<8x128xf32>
    tpu.strided_store %arg14[%c129_413, %c0_414], %693 {strides = array<i32: 2, 1>} : memref<512x128xf32, #tpu.memory_space<vmem>>, vector<8x128xf32>
    %695 = vector.extract_strided_slice %658 {offsets = [32, 256], sizes = [8, 128], strides = [1, 1]} : vector<128x512xf32> to vector<8x128xf32>
    %c144 = arith.constant 144 : index
    %c0_415 = arith.constant 0 : index
    %696 = tpu.strided_load %arg14[%c144, %c0_415] {strides = array<i32: 2, 1>} : memref<512x128xf32, #tpu.memory_space<vmem>>, vector<8x128xf32>
    tpu.strided_store %arg14[%c144, %c0_415], %695 {strides = array<i32: 2, 1>} : memref<512x128xf32, #tpu.memory_space<vmem>>, vector<8x128xf32>
    %697 = vector.extract_strided_slice %658 {offsets = [32, 384], sizes = [8, 128], strides = [1, 1]} : vector<128x512xf32> to vector<8x128xf32>
    %c145 = arith.constant 145 : index
    %c0_416 = arith.constant 0 : index
    %698 = tpu.strided_load %arg14[%c145, %c0_416] {strides = array<i32: 2, 1>} : memref<512x128xf32, #tpu.memory_space<vmem>>, vector<8x128xf32>
    tpu.strided_store %arg14[%c145, %c0_416], %697 {strides = array<i32: 2, 1>} : memref<512x128xf32, #tpu.memory_space<vmem>>, vector<8x128xf32>
    %699 = vector.extract_strided_slice %658 {offsets = [40, 0], sizes = [8, 128], strides = [1, 1]} : vector<128x512xf32> to vector<8x128xf32>
    %c160 = arith.constant 160 : index
    %c0_417 = arith.constant 0 : index
    %700 = tpu.strided_load %arg14[%c160, %c0_417] {strides = array<i32: 2, 1>} : memref<512x128xf32, #tpu.memory_space<vmem>>, vector<8x128xf32>
    tpu.strided_store %arg14[%c160, %c0_417], %699 {strides = array<i32: 2, 1>} : memref<512x128xf32, #tpu.memory_space<vmem>>, vector<8x128xf32>
    %701 = vector.extract_strided_slice %658 {offsets = [40, 128], sizes = [8, 128], strides = [1, 1]} : vector<128x512xf32> to vector<8x128xf32>
    %c161 = arith.constant 161 : index
    %c0_418 = arith.constant 0 : index
    %702 = tpu.strided_load %arg14[%c161, %c0_418] {strides = array<i32: 2, 1>} : memref<512x128xf32, #tpu.memory_space<vmem>>, vector<8x128xf32>
    tpu.strided_store %arg14[%c161, %c0_418], %701 {strides = array<i32: 2, 1>} : memref<512x128xf32, #tpu.memory_space<vmem>>, vector<8x128xf32>
    %703 = vector.extract_strided_slice %658 {offsets = [40, 256], sizes = [8, 128], strides = [1, 1]} : vector<128x512xf32> to vector<8x128xf32>
    %c176 = arith.constant 176 : index
    %c0_419 = arith.constant 0 : index
    %704 = tpu.strided_load %arg14[%c176, %c0_419] {strides = array<i32: 2, 1>} : memref<512x128xf32, #tpu.memory_space<vmem>>, vector<8x128xf32>
    tpu.strided_store %arg14[%c176, %c0_419], %703 {strides = array<i32: 2, 1>} : memref<512x128xf32, #tpu.memory_space<vmem>>, vector<8x128xf32>
    %705 = vector.extract_strided_slice %658 {offsets = [40, 384], sizes = [8, 128], strides = [1, 1]} : vector<128x512xf32> to vector<8x128xf32>
    %c177 = arith.constant 177 : index
    %c0_420 = arith.constant 0 : index
    %706 = tpu.strided_load %arg14[%c177, %c0_420] {strides = array<i32: 2, 1>} : memref<512x128xf32, #tpu.memory_space<vmem>>, vector<8x128xf32>
    tpu.strided_store %arg14[%c177, %c0_420], %705 {strides = array<i32: 2, 1>} : memref<512x128xf32, #tpu.memory_space<vmem>>, vector<8x128xf32>
    %707 = vector.extract_strided_slice %658 {offsets = [48, 0], sizes = [8, 128], strides = [1, 1]} : vector<128x512xf32> to vector<8x128xf32>
    %c192 = arith.constant 192 : index
    %c0_421 = arith.constant 0 : index
    %708 = tpu.strided_load %arg14[%c192, %c0_421] {strides = array<i32: 2, 1>} : memref<512x128xf32, #tpu.memory_space<vmem>>, vector<8x128xf32>
    tpu.strided_store %arg14[%c192, %c0_421], %707 {strides = array<i32: 2, 1>} : memref<512x128xf32, #tpu.memory_space<vmem>>, vector<8x128xf32>
    %709 = vector.extract_strided_slice %658 {offsets = [48, 128], sizes = [8, 128], strides = [1, 1]} : vector<128x512xf32> to vector<8x128xf32>
    %c193 = arith.constant 193 : index
    %c0_422 = arith.constant 0 : index
    %710 = tpu.strided_load %arg14[%c193, %c0_422] {strides = array<i32: 2, 1>} : memref<512x128xf32, #tpu.memory_space<vmem>>, vector<8x128xf32>
    tpu.strided_store %arg14[%c193, %c0_422], %709 {strides = array<i32: 2, 1>} : memref<512x128xf32, #tpu.memory_space<vmem>>, vector<8x128xf32>
    %711 = vector.extract_strided_slice %658 {offsets = [48, 256], sizes = [8, 128], strides = [1, 1]} : vector<128x512xf32> to vector<8x128xf32>
    %c208 = arith.constant 208 : index
    %c0_423 = arith.constant 0 : index
    %712 = tpu.strided_load %arg14[%c208, %c0_423] {strides = array<i32: 2, 1>} : memref<512x128xf32, #tpu.memory_space<vmem>>, vector<8x128xf32>
    tpu.strided_store %arg14[%c208, %c0_423], %711 {strides = array<i32: 2, 1>} : memref<512x128xf32, #tpu.memory_space<vmem>>, vector<8x128xf32>
    %713 = vector.extract_strided_slice %658 {offsets = [48, 384], sizes = [8, 128], strides = [1, 1]} : vector<128x512xf32> to vector<8x128xf32>
    %c209 = arith.constant 209 : index
    %c0_424 = arith.constant 0 : index
    %714 = tpu.strided_load %arg14[%c209, %c0_424] {strides = array<i32: 2, 1>} : memref<512x128xf32, #tpu.memory_space<vmem>>, vector<8x128xf32>
    tpu.strided_store %arg14[%c209, %c0_424], %713 {strides = array<i32: 2, 1>} : memref<512x128xf32, #tpu.memory_space<vmem>>, vector<8x128xf32>
    %715 = vector.extract_strided_slice %658 {offsets = [56, 0], sizes = [8, 128], strides = [1, 1]} : vector<128x512xf32> to vector<8x128xf32>
    %c224 = arith.constant 224 : index
    %c0_425 = arith.constant 0 : index
    %716 = tpu.strided_load %arg14[%c224, %c0_425] {strides = array<i32: 2, 1>} : memref<512x128xf32, #tpu.memory_space<vmem>>, vector<8x128xf32>
    tpu.strided_store %arg14[%c224, %c0_425], %715 {strides = array<i32: 2, 1>} : memref<512x128xf32, #tpu.memory_space<vmem>>, vector<8x128xf32>
    %717 = vector.extract_strided_slice %658 {offsets = [56, 128], sizes = [8, 128], strides = [1, 1]} : vector<128x512xf32> to vector<8x128xf32>
    %c225 = arith.constant 225 : index
    %c0_426 = arith.constant 0 : index
    %718 = tpu.strided_load %arg14[%c225, %c0_426] {strides = array<i32: 2, 1>} : memref<512x128xf32, #tpu.memory_space<vmem>>, vector<8x128xf32>
    tpu.strided_store %arg14[%c225, %c0_426], %717 {strides = array<i32: 2, 1>} : memref<512x128xf32, #tpu.memory_space<vmem>>, vector<8x128xf32>
    %719 = vector.extract_strided_slice %658 {offsets = [56, 256], sizes = [8, 128], strides = [1, 1]} : vector<128x512xf32> to vector<8x128xf32>
    %c240 = arith.constant 240 : index
    %c0_427 = arith.constant 0 : index
    %720 = tpu.strided_load %arg14[%c240, %c0_427] {strides = array<i32: 2, 1>} : memref<512x128xf32, #tpu.memory_space<vmem>>, vector<8x128xf32>
    tpu.strided_store %arg14[%c240, %c0_427], %719 {strides = array<i32: 2, 1>} : memref<512x128xf32, #tpu.memory_space<vmem>>, vector<8x128xf32>
    %721 = vector.extract_strided_slice %658 {offsets = [56, 384], sizes = [8, 128], strides = [1, 1]} : vector<128x512xf32> to vector<8x128xf32>
    %c241 = arith.constant 241 : index
    %c0_428 = arith.constant 0 : index
    %722 = tpu.strided_load %arg14[%c241, %c0_428] {strides = array<i32: 2, 1>} : memref<512x128xf32, #tpu.memory_space<vmem>>, vector<8x128xf32>
    tpu.strided_store %arg14[%c241, %c0_428], %721 {strides = array<i32: 2, 1>} : memref<512x128xf32, #tpu.memory_space<vmem>>, vector<8x128xf32>
    %723 = vector.extract_strided_slice %658 {offsets = [64, 0], sizes = [8, 128], strides = [1, 1]} : vector<128x512xf32> to vector<8x128xf32>
    %c256 = arith.constant 256 : index
    %c0_429 = arith.constant 0 : index
    %724 = tpu.strided_load %arg14[%c256, %c0_429] {strides = array<i32: 2, 1>} : memref<512x128xf32, #tpu.memory_space<vmem>>, vector<8x128xf32>
    tpu.strided_store %arg14[%c256, %c0_429], %723 {strides = array<i32: 2, 1>} : memref<512x128xf32, #tpu.memory_space<vmem>>, vector<8x128xf32>
    %725 = vector.extract_strided_slice %658 {offsets = [64, 128], sizes = [8, 128], strides = [1, 1]} : vector<128x512xf32> to vector<8x128xf32>
    %c257 = arith.constant 257 : index
    %c0_430 = arith.constant 0 : index
    %726 = tpu.strided_load %arg14[%c257, %c0_430] {strides = array<i32: 2, 1>} : memref<512x128xf32, #tpu.memory_space<vmem>>, vector<8x128xf32>
    tpu.strided_store %arg14[%c257, %c0_430], %725 {strides = array<i32: 2, 1>} : memref<512x128xf32, #tpu.memory_space<vmem>>, vector<8x128xf32>
    %727 = vector.extract_strided_slice %658 {offsets = [64, 256], sizes = [8, 128], strides = [1, 1]} : vector<128x512xf32> to vector<8x128xf32>
    %c272 = arith.constant 272 : index
    %c0_431 = arith.constant 0 : index
    %728 = tpu.strided_load %arg14[%c272, %c0_431] {strides = array<i32: 2, 1>} : memref<512x128xf32, #tpu.memory_space<vmem>>, vector<8x128xf32>
    tpu.strided_store %arg14[%c272, %c0_431], %727 {strides = array<i32: 2, 1>} : memref<512x128xf32, #tpu.memory_space<vmem>>, vector<8x128xf32>
    %729 = vector.extract_strided_slice %658 {offsets = [64, 384], sizes = [8, 128], strides = [1, 1]} : vector<128x512xf32> to vector<8x128xf32>
    %c273 = arith.constant 273 : index
    %c0_432 = arith.constant 0 : index
    %730 = tpu.strided_load %arg14[%c273, %c0_432] {strides = array<i32: 2, 1>} : memref<512x128xf32, #tpu.memory_space<vmem>>, vector<8x128xf32>
    tpu.strided_store %arg14[%c273, %c0_432], %729 {strides = array<i32: 2, 1>} : memref<512x128xf32, #tpu.memory_space<vmem>>, vector<8x128xf32>
    %731 = vector.extract_strided_slice %658 {offsets = [72, 0], sizes = [8, 128], strides = [1, 1]} : vector<128x512xf32> to vector<8x128xf32>
    %c288 = arith.constant 288 : index
    %c0_433 = arith.constant 0 : index
    %732 = tpu.strided_load %arg14[%c288, %c0_433] {strides = array<i32: 2, 1>} : memref<512x128xf32, #tpu.memory_space<vmem>>, vector<8x128xf32>
    tpu.strided_store %arg14[%c288, %c0_433], %731 {strides = array<i32: 2, 1>} : memref<512x128xf32, #tpu.memory_space<vmem>>, vector<8x128xf32>
    %733 = vector.extract_strided_slice %658 {offsets = [72, 128], sizes = [8, 128], strides = [1, 1]} : vector<128x512xf32> to vector<8x128xf32>
    %c289 = arith.constant 289 : index
    %c0_434 = arith.constant 0 : index
    %734 = tpu.strided_load %arg14[%c289, %c0_434] {strides = array<i32: 2, 1>} : memref<512x128xf32, #tpu.memory_space<vmem>>, vector<8x128xf32>
    tpu.strided_store %arg14[%c289, %c0_434], %733 {strides = array<i32: 2, 1>} : memref<512x128xf32, #tpu.memory_space<vmem>>, vector<8x128xf32>
    %735 = vector.extract_strided_slice %658 {offsets = [72, 256], sizes = [8, 128], strides = [1, 1]} : vector<128x512xf32> to vector<8x128xf32>
    %c304 = arith.constant 304 : index
    %c0_435 = arith.constant 0 : index
    %736 = tpu.strided_load %arg14[%c304, %c0_435] {strides = array<i32: 2, 1>} : memref<512x128xf32, #tpu.memory_space<vmem>>, vector<8x128xf32>
    tpu.strided_store %arg14[%c304, %c0_435], %735 {strides = array<i32: 2, 1>} : memref<512x128xf32, #tpu.memory_space<vmem>>, vector<8x128xf32>
    %737 = vector.extract_strided_slice %658 {offsets = [72, 384], sizes = [8, 128], strides = [1, 1]} : vector<128x512xf32> to vector<8x128xf32>
    %c305 = arith.constant 305 : index
    %c0_436 = arith.constant 0 : index
    %738 = tpu.strided_load %arg14[%c305, %c0_436] {strides = array<i32: 2, 1>} : memref<512x128xf32, #tpu.memory_space<vmem>>, vector<8x128xf32>
    tpu.strided_store %arg14[%c305, %c0_436], %737 {strides = array<i32: 2, 1>} : memref<512x128xf32, #tpu.memory_space<vmem>>, vector<8x128xf32>
    %739 = vector.extract_strided_slice %658 {offsets = [80, 0], sizes = [8, 128], strides = [1, 1]} : vector<128x512xf32> to vector<8x128xf32>
    %c320 = arith.constant 320 : index
    %c0_437 = arith.constant 0 : index
    %740 = tpu.strided_load %arg14[%c320, %c0_437] {strides = array<i32: 2, 1>} : memref<512x128xf32, #tpu.memory_space<vmem>>, vector<8x128xf32>
    tpu.strided_store %arg14[%c320, %c0_437], %739 {strides = array<i32: 2, 1>} : memref<512x128xf32, #tpu.memory_space<vmem>>, vector<8x128xf32>
    %741 = vector.extract_strided_slice %658 {offsets = [80, 128], sizes = [8, 128], strides = [1, 1]} : vector<128x512xf32> to vector<8x128xf32>
    %c321 = arith.constant 321 : index
    %c0_438 = arith.constant 0 : index
    %742 = tpu.strided_load %arg14[%c321, %c0_438] {strides = array<i32: 2, 1>} : memref<512x128xf32, #tpu.memory_space<vmem>>, vector<8x128xf32>
    tpu.strided_store %arg14[%c321, %c0_438], %741 {strides = array<i32: 2, 1>} : memref<512x128xf32, #tpu.memory_space<vmem>>, vector<8x128xf32>
    %743 = vector.extract_strided_slice %658 {offsets = [80, 256], sizes = [8, 128], strides = [1, 1]} : vector<128x512xf32> to vector<8x128xf32>
    %c336 = arith.constant 336 : index
    %c0_439 = arith.constant 0 : index
    %744 = tpu.strided_load %arg14[%c336, %c0_439] {strides = array<i32: 2, 1>} : memref<512x128xf32, #tpu.memory_space<vmem>>, vector<8x128xf32>
    tpu.strided_store %arg14[%c336, %c0_439], %743 {strides = array<i32: 2, 1>} : memref<512x128xf32, #tpu.memory_space<vmem>>, vector<8x128xf32>
    %745 = vector.extract_strided_slice %658 {offsets = [80, 384], sizes = [8, 128], strides = [1, 1]} : vector<128x512xf32> to vector<8x128xf32>
    %c337 = arith.constant 337 : index
    %c0_440 = arith.constant 0 : index
    %746 = tpu.strided_load %arg14[%c337, %c0_440] {strides = array<i32: 2, 1>} : memref<512x128xf32, #tpu.memory_space<vmem>>, vector<8x128xf32>
    tpu.strided_store %arg14[%c337, %c0_440], %745 {strides = array<i32: 2, 1>} : memref<512x128xf32, #tpu.memory_space<vmem>>, vector<8x128xf32>
    %747 = vector.extract_strided_slice %658 {offsets = [88, 0], sizes = [8, 128], strides = [1, 1]} : vector<128x512xf32> to vector<8x128xf32>
    %c352 = arith.constant 352 : index
    %c0_441 = arith.constant 0 : index
    %748 = tpu.strided_load %arg14[%c352, %c0_441] {strides = array<i32: 2, 1>} : memref<512x128xf32, #tpu.memory_space<vmem>>, vector<8x128xf32>
    tpu.strided_store %arg14[%c352, %c0_441], %747 {strides = array<i32: 2, 1>} : memref<512x128xf32, #tpu.memory_space<vmem>>, vector<8x128xf32>
    %749 = vector.extract_strided_slice %658 {offsets = [88, 128], sizes = [8, 128], strides = [1, 1]} : vector<128x512xf32> to vector<8x128xf32>
    %c353 = arith.constant 353 : index
    %c0_442 = arith.constant 0 : index
    %750 = tpu.strided_load %arg14[%c353, %c0_442] {strides = array<i32: 2, 1>} : memref<512x128xf32, #tpu.memory_space<vmem>>, vector<8x128xf32>
    tpu.strided_store %arg14[%c353, %c0_442], %749 {strides = array<i32: 2, 1>} : memref<512x128xf32, #tpu.memory_space<vmem>>, vector<8x128xf32>
    %751 = vector.extract_strided_slice %658 {offsets = [88, 256], sizes = [8, 128], strides = [1, 1]} : vector<128x512xf32> to vector<8x128xf32>
    %c368 = arith.constant 368 : index
    %c0_443 = arith.constant 0 : index
    %752 = tpu.strided_load %arg14[%c368, %c0_443] {strides = array<i32: 2, 1>} : memref<512x128xf32, #tpu.memory_space<vmem>>, vector<8x128xf32>
    tpu.strided_store %arg14[%c368, %c0_443], %751 {strides = array<i32: 2, 1>} : memref<512x128xf32, #tpu.memory_space<vmem>>, vector<8x128xf32>
    %753 = vector.extract_strided_slice %658 {offsets = [88, 384], sizes = [8, 128], strides = [1, 1]} : vector<128x512xf32> to vector<8x128xf32>
    %c369 = arith.constant 369 : index
    %c0_444 = arith.constant 0 : index
    %754 = tpu.strided_load %arg14[%c369, %c0_444] {strides = array<i32: 2, 1>} : memref<512x128xf32, #tpu.memory_space<vmem>>, vector<8x128xf32>
    tpu.strided_store %arg14[%c369, %c0_444], %753 {strides = array<i32: 2, 1>} : memref<512x128xf32, #tpu.memory_space<vmem>>, vector<8x128xf32>
    %755 = vector.extract_strided_slice %658 {offsets = [96, 0], sizes = [8, 128], strides = [1, 1]} : vector<128x512xf32> to vector<8x128xf32>
    %c384 = arith.constant 384 : index
    %c0_445 = arith.constant 0 : index
    %756 = tpu.strided_load %arg14[%c384, %c0_445] {strides = array<i32: 2, 1>} : memref<512x128xf32, #tpu.memory_space<vmem>>, vector<8x128xf32>
    tpu.strided_store %arg14[%c384, %c0_445], %755 {strides = array<i32: 2, 1>} : memref<512x128xf32, #tpu.memory_space<vmem>>, vector<8x128xf32>
    %757 = vector.extract_strided_slice %658 {offsets = [96, 128], sizes = [8, 128], strides = [1, 1]} : vector<128x512xf32> to vector<8x128xf32>
    %c385 = arith.constant 385 : index
    %c0_446 = arith.constant 0 : index
    %758 = tpu.strided_load %arg14[%c385, %c0_446] {strides = array<i32: 2, 1>} : memref<512x128xf32, #tpu.memory_space<vmem>>, vector<8x128xf32>
    tpu.strided_store %arg14[%c385, %c0_446], %757 {strides = array<i32: 2, 1>} : memref<512x128xf32, #tpu.memory_space<vmem>>, vector<8x128xf32>
    %759 = vector.extract_strided_slice %658 {offsets = [96, 256], sizes = [8, 128], strides = [1, 1]} : vector<128x512xf32> to vector<8x128xf32>
    %c400 = arith.constant 400 : index
    %c0_447 = arith.constant 0 : index
    %760 = tpu.strided_load %arg14[%c400, %c0_447] {strides = array<i32: 2, 1>} : memref<512x128xf32, #tpu.memory_space<vmem>>, vector<8x128xf32>
    tpu.strided_store %arg14[%c400, %c0_447], %759 {strides = array<i32: 2, 1>} : memref<512x128xf32, #tpu.memory_space<vmem>>, vector<8x128xf32>
    %761 = vector.extract_strided_slice %658 {offsets = [96, 384], sizes = [8, 128], strides = [1, 1]} : vector<128x512xf32> to vector<8x128xf32>
    %c401 = arith.constant 401 : index
    %c0_448 = arith.constant 0 : index
    %762 = tpu.strided_load %arg14[%c401, %c0_448] {strides = array<i32: 2, 1>} : memref<512x128xf32, #tpu.memory_space<vmem>>, vector<8x128xf32>
    tpu.strided_store %arg14[%c401, %c0_448], %761 {strides = array<i32: 2, 1>} : memref<512x128xf32, #tpu.memory_space<vmem>>, vector<8x128xf32>
    %763 = vector.extract_strided_slice %658 {offsets = [104, 0], sizes = [8, 128], strides = [1, 1]} : vector<128x512xf32> to vector<8x128xf32>
    %c416 = arith.constant 416 : index
    %c0_449 = arith.constant 0 : index
    %764 = tpu.strided_load %arg14[%c416, %c0_449] {strides = array<i32: 2, 1>} : memref<512x128xf32, #tpu.memory_space<vmem>>, vector<8x128xf32>
    tpu.strided_store %arg14[%c416, %c0_449], %763 {strides = array<i32: 2, 1>} : memref<512x128xf32, #tpu.memory_space<vmem>>, vector<8x128xf32>
    %765 = vector.extract_strided_slice %658 {offsets = [104, 128], sizes = [8, 128], strides = [1, 1]} : vector<128x512xf32> to vector<8x128xf32>
    %c417 = arith.constant 417 : index
    %c0_450 = arith.constant 0 : index
    %766 = tpu.strided_load %arg14[%c417, %c0_450] {strides = array<i32: 2, 1>} : memref<512x128xf32, #tpu.memory_space<vmem>>, vector<8x128xf32>
    tpu.strided_store %arg14[%c417, %c0_450], %765 {strides = array<i32: 2, 1>} : memref<512x128xf32, #tpu.memory_space<vmem>>, vector<8x128xf32>
    %767 = vector.extract_strided_slice %658 {offsets = [104, 256], sizes = [8, 128], strides = [1, 1]} : vector<128x512xf32> to vector<8x128xf32>
    %c432 = arith.constant 432 : index
    %c0_451 = arith.constant 0 : index
    %768 = tpu.strided_load %arg14[%c432, %c0_451] {strides = array<i32: 2, 1>} : memref<512x128xf32, #tpu.memory_space<vmem>>, vector<8x128xf32>
    tpu.strided_store %arg14[%c432, %c0_451], %767 {strides = array<i32: 2, 1>} : memref<512x128xf32, #tpu.memory_space<vmem>>, vector<8x128xf32>
    %769 = vector.extract_strided_slice %658 {offsets = [104, 384], sizes = [8, 128], strides = [1, 1]} : vector<128x512xf32> to vector<8x128xf32>
    %c433 = arith.constant 433 : index
    %c0_452 = arith.constant 0 : index
    %770 = tpu.strided_load %arg14[%c433, %c0_452] {strides = array<i32: 2, 1>} : memref<512x128xf32, #tpu.memory_space<vmem>>, vector<8x128xf32>
    tpu.strided_store %arg14[%c433, %c0_452], %769 {strides = array<i32: 2, 1>} : memref<512x128xf32, #tpu.memory_space<vmem>>, vector<8x128xf32>
    %771 = vector.extract_strided_slice %658 {offsets = [112, 0], sizes = [8, 128], strides = [1, 1]} : vector<128x512xf32> to vector<8x128xf32>
    %c448 = arith.constant 448 : index
    %c0_453 = arith.constant 0 : index
    %772 = tpu.strided_load %arg14[%c448, %c0_453] {strides = array<i32: 2, 1>} : memref<512x128xf32, #tpu.memory_space<vmem>>, vector<8x128xf32>
    tpu.strided_store %arg14[%c448, %c0_453], %771 {strides = array<i32: 2, 1>} : memref<512x128xf32, #tpu.memory_space<vmem>>, vector<8x128xf32>
    %773 = vector.extract_strided_slice %658 {offsets = [112, 128], sizes = [8, 128], strides = [1, 1]} : vector<128x512xf32> to vector<8x128xf32>
    %c449 = arith.constant 449 : index
    %c0_454 = arith.constant 0 : index
    %774 = tpu.strided_load %arg14[%c449, %c0_454] {strides = array<i32: 2, 1>} : memref<512x128xf32, #tpu.memory_space<vmem>>, vector<8x128xf32>
    tpu.strided_store %arg14[%c449, %c0_454], %773 {strides = array<i32: 2, 1>} : memref<512x128xf32, #tpu.memory_space<vmem>>, vector<8x128xf32>
    %775 = vector.extract_strided_slice %658 {offsets = [112, 256], sizes = [8, 128], strides = [1, 1]} : vector<128x512xf32> to vector<8x128xf32>
    %c464 = arith.constant 464 : index
    %c0_455 = arith.constant 0 : index
    %776 = tpu.strided_load %arg14[%c464, %c0_455] {strides = array<i32: 2, 1>} : memref<512x128xf32, #tpu.memory_space<vmem>>, vector<8x128xf32>
    tpu.strided_store %arg14[%c464, %c0_455], %775 {strides = array<i32: 2, 1>} : memref<512x128xf32, #tpu.memory_space<vmem>>, vector<8x128xf32>
    %777 = vector.extract_strided_slice %658 {offsets = [112, 384], sizes = [8, 128], strides = [1, 1]} : vector<128x512xf32> to vector<8x128xf32>
    %c465 = arith.constant 465 : index
    %c0_456 = arith.constant 0 : index
    %778 = tpu.strided_load %arg14[%c465, %c0_456] {strides = array<i32: 2, 1>} : memref<512x128xf32, #tpu.memory_space<vmem>>, vector<8x128xf32>
    tpu.strided_store %arg14[%c465, %c0_456], %777 {strides = array<i32: 2, 1>} : memref<512x128xf32, #tpu.memory_space<vmem>>, vector<8x128xf32>
    %779 = vector.extract_strided_slice %658 {offsets = [120, 0], sizes = [8, 128], strides = [1, 1]} : vector<128x512xf32> to vector<8x128xf32>
    %c480 = arith.constant 480 : index
    %c0_457 = arith.constant 0 : index
    %780 = tpu.strided_load %arg14[%c480, %c0_457] {strides = array<i32: 2, 1>} : memref<512x128xf32, #tpu.memory_space<vmem>>, vector<8x128xf32>
    tpu.strided_store %arg14[%c480, %c0_457], %779 {strides = array<i32: 2, 1>} : memref<512x128xf32, #tpu.memory_space<vmem>>, vector<8x128xf32>
    %781 = vector.extract_strided_slice %658 {offsets = [120, 128], sizes = [8, 128], strides = [1, 1]} : vector<128x512xf32> to vector<8x128xf32>
    %c481 = arith.constant 481 : index
    %c0_458 = arith.constant 0 : index
    %782 = tpu.strided_load %arg14[%c481, %c0_458] {strides = array<i32: 2, 1>} : memref<512x128xf32, #tpu.memory_space<vmem>>, vector<8x128xf32>
    tpu.strided_store %arg14[%c481, %c0_458], %781 {strides = array<i32: 2, 1>} : memref<512x128xf32, #tpu.memory_space<vmem>>, vector<8x128xf32>
    %783 = vector.extract_strided_slice %658 {offsets = [120, 256], sizes = [8, 128], strides = [1, 1]} : vector<128x512xf32> to vector<8x128xf32>
    %c496 = arith.constant 496 : index
    %c0_459 = arith.constant 0 : index
    %784 = tpu.strided_load %arg14[%c496, %c0_459] {strides = array<i32: 2, 1>} : memref<512x128xf32, #tpu.memory_space<vmem>>, vector<8x128xf32>
    tpu.strided_store %arg14[%c496, %c0_459], %783 {strides = array<i32: 2, 1>} : memref<512x128xf32, #tpu.memory_space<vmem>>, vector<8x128xf32>
    %785 = vector.extract_strided_slice %658 {offsets = [120, 384], sizes = [8, 128], strides = [1, 1]} : vector<128x512xf32> to vector<8x128xf32>
    %c497 = arith.constant 497 : index
    %c0_460 = arith.constant 0 : index
    %786 = tpu.strided_load %arg14[%c497, %c0_460] {strides = array<i32: 2, 1>} : memref<512x128xf32, #tpu.memory_space<vmem>>, vector<8x128xf32>
    tpu.strided_store %arg14[%c497, %c0_460], %785 {strides = array<i32: 2, 1>} : memref<512x128xf32, #tpu.memory_space<vmem>>, vector<8x128xf32>
    return
  }
  func.func @transform_0(%arg0: i32) -> (i32, i32) {
    %c0_i32 = arith.constant 0 : i32
    %c0_i32_0 = arith.constant 0 : i32
    %c0_i32_1 = arith.constant 0 : i32
    return %c0_i32, %c0_i32_0 : i32, i32
  }
  func.func @transform_1(%arg0: i32) -> (i32, i32, i32) {
    %c0_i32 = arith.constant 0 : i32
    %c0_i32_0 = arith.constant 0 : i32
    %c0_i32_1 = arith.constant 0 : i32
    %c0_i32_2 = arith.constant 0 : i32
    return %c0_i32, %c0_i32_0, %c0_i32_1 : i32, i32, i32
  }
  func.func @transform_2(%arg0: i32) -> (i32, i32) {
    %c0_i32 = arith.constant 0 : i32
    %c0_i32_0 = arith.constant 0 : i32
    %c0_i32_1 = arith.constant 0 : i32
    return %c0_i32, %c0_i32_0 : i32, i32
  }
  func.func @transform_3(%arg0: i32) -> (i32, i32, i32) {
    %c0_i32 = arith.constant 0 : i32
    %c0_i32_0 = arith.constant 0 : i32
    %c0_i32_1 = arith.constant 0 : i32
    %c0_i32_2 = arith.constant 0 : i32
    return %c0_i32, %c0_i32_0, %c0_i32_1 : i32, i32, i32
  }
  func.func @transform_4(%arg0: i32) -> (i32, i32) {
    %c0_i32 = arith.constant 0 : i32
    %c0_i32_0 = arith.constant 0 : i32
    %c0_i32_1 = arith.constant 0 : i32
    return %c0_i32, %c0_i32_0 : i32, i32
  }
  func.func @transform_5(%arg0: i32) -> (i32, i32, i32) {
    %c0_i32 = arith.constant 0 : i32
    %c0_i32_0 = arith.constant 0 : i32
    %c0_i32_1 = arith.constant 0 : i32
    %c0_i32_2 = arith.constant 0 : i32
    return %c0_i32, %c0_i32_0, %c0_i32_1 : i32, i32, i32
  }
  func.func @transform_6(%arg0: i32) -> (i32, i32) {
    %c0_i32 = arith.constant 0 : i32
    %c0_i32_0 = arith.constant 0 : i32
    %c0_i32_1 = arith.constant 0 : i32
    return %c0_i32, %c0_i32_0 : i32, i32
  }
  func.func @transform_7(%arg0: i32) -> (i32, i32) {
    %c0_i32 = arith.constant 0 : i32
    %c0_i32_0 = arith.constant 0 : i32
    %c0_i32_1 = arith.constant 0 : i32
    return %c0_i32, %c0_i32_0 : i32, i32
  }
  func.func @transform_8(%arg0: i32) -> (i32, i32) {
    %c0_i32 = arith.constant 0 : i32
    %c0_i32_0 = arith.constant 0 : i32
    %c0_i32_1 = arith.constant 0 : i32
    return %c0_i32, %c0_i32_0 : i32, i32
  }
  func.func @transform_9(%arg0: i32) -> (i32, i32) {
    %c0_i32 = arith.constant 0 : i32
    %c0_i32_0 = arith.constant 0 : i32
    %c0_i32_1 = arith.constant 0 : i32
    return %c0_i32, %c0_i32_0 : i32, i32
  }
  func.func @transform_10(%arg0: i32) -> (i32, i32) {
    %c0_i32 = arith.constant 0 : i32
    %c0_i32_0 = arith.constant 0 : i32
    %c0_i32_1 = arith.constant 0 : i32
    return %c0_i32, %c0_i32_0 : i32, i32
  }
  func.func @transform_11(%arg0: i32) -> (i32, i32) {
    %c0_i32 = arith.constant 0 : i32
    %c0_i32_0 = arith.constant 0 : i32
    %c0_i32_1 = arith.constant 0 : i32
    return %c0_i32, %c0_i32_0 : i32, i32
  }
  func.func @transform_12(%arg0: i32) -> (i32, i32) {
    %c0_i32 = arith.constant 0 : i32
    %c0_i32_0 = arith.constant 0 : i32
    %c0_i32_1 = arith.constant 0 : i32
    return %c0_i32, %c0_i32_0 : i32, i32
  }
  func.func @transform_13(%arg0: i32) -> (i32, i32) {
    %c0_i32 = arith.constant 0 : i32
    %c0_i32_0 = arith.constant 0 : i32
    %c0_i32_1 = arith.constant 0 : i32
    return %c0_i32, %c0_i32_0 : i32, i32
  }
}

</mosaic_0001>

<bundles_post_ra>
// kernel: autoencoder_forward.1
= control target key start
LH: loop header
LB: loop body
LE: loop exit
PB: predicated region body
PF: predicated region fallthrough
CT: control target
= control target key end

     0   :  { %vm19998_vm0 = vcmask 1043456   ;;  %v70_v0 = vlaneseq  ;;  %v20033_v2 = vmov 0.0|0.0   ;;  %vm19999_vm2 = vcmask 64512   ;;  %s19984_s1 = inlined_call_operand.vmem [shape: bf16[9,8,128], index: 1, kind: input, shape index: {}]   ;;  %s19985_s0 = inlined_call_operand.vmem [shape: f32[546,128], index: 0, kind: input, shape index: {}]   ;;  %s19986_s3 = inlined_call_operand.vmem [shape: bf16[9,32,128], index: 3, kind: input, shape index: {}]   ;;  %s19987_s2 = inlined_call_operand.vmem [shape: f32[1,128], index: 2, kind: input, shape index: {}]   ;;  %s19988_s5 = inlined_call_operand.vmem [shape: bf16[9,64,128], index: 5, kind: input, shape index: {}]   ;;  %s19989_s4 = inlined_call_operand.vmem [shape: f32[1,128], index: 4, kind: input, shape index: {}]   ;;  %s19990_s7 = inlined_call_operand.vmem [shape: bf16[128,512], index: 7, kind: input, shape index: {}]   ;;  %s19991_s6 = inlined_call_operand.vmem [shape: f32[1,128], index: 6, kind: input, shape index: {}]   ;;  %s19992_s9 = inlined_call_operand.vmem [shape: bf16[64,512], index: 9, kind: input, shape index: {}]   ;;  %s19993_s8 = inlined_call_operand.vmem [shape: f32[1,512], index: 8, kind: input, shape index: {}]   ;;  %s19994_s11 = inlined_call_operand.vmem [shape: bf16[32,512], index: 11, kind: input, shape index: {}]   ;;  %s19995_s10 = inlined_call_operand.vmem [shape: f32[1,512], index: 10, kind: input, shape index: {}]   ;;  %s19996_s12 = inlined_call_operand.vmem [shape: f32[1,512], index: 12, kind: input, shape index: {}]   ;;  %s19997_s13 = inlined_call_operand.vmem [shape: f32[512,128], index: 13, kind: output, shape index: {}]  }
   0x1   :  { %v743_v1 = vld [vmem:[%s19984_s1] sm:$0xf]  ;;  %13501 = vmatprep.mubr.bf16.mxu0 %v20033_v2  ;;  %v12387_v3 = vld [vmem:[%s19984_s1 + $0x8] sm:$0xf]  ;;  %13435 = vmatprep.mubr.bf16.mxu1 %v20033_v2  ;;  %v15502_v9 = vld [vmem:[%s19985_s0 + $0x10] sm:$0xff]  ;;  %v20244_v21 = vmov 0 }
   0x2   :  { %14990 = vmatprep.subr.msk.bf16.mxu0 %vm19998_vm0, %v743_v1  ;;  %v15486_v4 = vsel %vm19998_vm0, %v743_v1, 0  ;;  %v15488_v5 = vshrl.u32 %v70_v0, 7  ;;  %v15508_v11 = vld [vmem:[%s19985_s0 + $0x18] sm:$0xff]  ;;  %v15522_v14 = vld [vmem:[%s19985_s0 + $0x30] sm:$0xff]  ;;  %v2327_v20 = vsel %vm19998_vm0, %v12387_v3, 0  ;;  %v1816_v34 = vld [vmem:[%s19985_s0 + $0x22] sm:$0xff] }
   0x3   :  { %13500 = vmatpush3.bf16.msra.mxu0 %v15486_v4  ;;  %v15530_v16 = vld [vmem:[%s19985_s0 + $0x38] sm:$0xff]  ;;  %v15549_v22 = vld [vmem:[%s19985_s0 + $0x2a] sm:$0xff]  ;;  %v20254_v44 = vmov 0  ;;  %v1820_v48 = vld [vmem:[%s19985_s0 + $0x42] sm:$0xff] }
   0x4   :  { %20237 = vst [vmem:[#allocation8_spill] sm:$0xff] %v15488_v5  ;;  %14992 = vmatprep.subr.msk.bf16.mxu0 %vm19998_vm0, %v12387_v3  ;;  %v15493_v6 = vadd.s32 16, %v15488_v5  ;;  %v15496_v7 = vadd.s32 24, %v15488_v5  ;;  %v15511_v12 = vadd.s32 40, %v15488_v5  ;;  %v15554_v23 = vld [vmem:[%s19985_s0 + $0x3a] sm:$0xff]  ;;  %v15573_v29 = vadd.s32 56, %v15488_v5 }
   0x5   :  { %20246 = vst [vmem:[#allocation13_spill] sm:$0xff] %v15554_v23  ;;  %v12418_v24 = vld [vmem:[%s19984_s1 + $0xc] sm:$0xf]  ;;  %v1815_v28 = vld [vmem:[%s19985_s0 + $0x1a] sm:$0xff]  ;;  %v15580_v31 = vadd.s32 72, %v15488_v5  ;;  %v1814_v32 = vld [vmem:[%s19985_s0 + $0x12] sm:$0xff] }
   0x6   :  { %20238 = vst [vmem:[#allocation9_spill] sm:$0xff] %v15493_v6  ;;  %20239 = vst [vmem:[#allocation10_spill] sm:$0xff] %v15496_v7  ;;  %v20023_v8 = vand.u32 15, %v15493_v6  ;;  %v20022_v10 = vand.u32 15, %v15496_v7  ;;  %v204_v27 = vand.u32 15, %v15511_v12  ;;  %v206_v36 = vand.u32 15, %v15573_v29 }
   0x7   :  { %20240 = vst [vmem:[#allocation11_spill] sm:$0xff] %v15511_v12  ;;  %20247 = vst [vmem:[#allocation14_spill] sm:$0xff] %v15573_v29  ;;  %v208_v37 = vand.u32 15, %v15580_v31  ;;  %v3069_v40 = vsel %vm19998_vm0, %v12418_v24, 0  ;;  %v15601_v42 = vadd.s32 88, %v15488_v5  ;;  %v1821_v43 = vld [vmem:[%s19985_s0 + $0x4a] sm:$0xff] }
   0x8   :  { %vm15515_vm1 = vcmp.ge.s32.totalorder %v20023_v8, 1  ;;  %vm15542_vm3 = vcmp.lt.s32.totalorder %v20022_v10, 15  ;;  %vm15575_vm4 = vcmp.lt.s32.totalorder %v204_v27, 15  ;;  %20250 = vst [vmem:[#allocation15_spill] sm:$0xff] %v15580_v31  ;;  %vm15596_vm5 = vcmp.lt.s32.totalorder %v206_v36, 15  ;;  %v1818_v46 = vld [vmem:[%s19985_s0 + $0x32] sm:$0xff] }
   0x9   :  { %v649_v15 = vsel %vm15515_vm1, %v15502_v9, 0.0  ;;  %v5038_v17 = vsel %vm15515_vm1, %v15522_v14, 0.0  ;;  %v20245_v21 = vsel %vm15542_vm3, 4294967295, %v20244_v21  ;;  %v2135_v33 = vsel %vm15542_vm3, %v1815_v28, 0.0  ;;  %20253 = vst [vmem:[#allocation16_spill] sm:$0xff] %v15601_v42  ;;  %v1823_v55 = vld [vmem:[%s19985_s0 + $0x5a] sm:$0xff] }
   0xa   :  { %v712_v18 = vpack.c.bf16 %v15508_v11, %v649_v15  ;;  %v15537_v19 = vpack.c.bf16 %v15530_v16, %v5038_v17  ;;  %v2137_v35 = vsel %vm15575_vm4, %v15549_v22, 0.0  ;;  %v2197_v38 = vpack.c.bf16 %v2135_v33, %v1814_v32  ;;  %v15631_v53 = vld [vmem:[%s19984_s1 + $0x10] sm:$0xf]  ;;  %v1824_v63 = vld [vmem:[%s19985_s0 + $0x62] sm:$0xff]  ;;  %v6339_v41 = vld [vmem:[%s19985_s0 + $0x7a] sm:$0xff] }
   0xb   :  { %v2198_v39 = vpack.c.bf16 %v2137_v35, %v1816_v34  ;;  %vm15606_vm6 = vcmp.lt.s32.totalorder %v208_v37, 15  ;;  %v15611_v45 = vadd.s32 104, %v15488_v5  ;;  %v2139_v47 = vsel %vm15596_vm5, %v15554_v23, 0.0  ;;  %v1825_v58 = vld [vmem:[%s19985_s0 + $0x6a] sm:$0xff]  ;;  %v1822_v61 = vld [vmem:[%s19985_s0 + $0x52] sm:$0xff]  ;;  %v1828_v36 = vld [vmem:[%s19985_s0 + $0x82] sm:$0xff] }
   0xc   :  { %20243 = vst [vmem:[#allocation12_spill] sm:$0xff] %v15537_v19  ;;  %13502 = vmatmul.mubr.msk.bf16.vlgmr.msra.gmra.mrb[0].mxu0 %vm19999_vm2, %v712_v18  ;;  %v20255_v44 = vsel %vm15606_vm6, 4294967295, %v20254_v44  ;;  %v2141_v49 = vsel %vm15606_vm6, %v1821_v43, 0.0  ;;  %v210_v50 = vand.u32 15, %v15601_v42  ;;  %v2199_v52 = vpack.c.bf16 %v2139_v47, %v1818_v46  ;;  %v1827_v18 = vld [vmem:[%s19985_s0 + $0x7a] sm:$0xff]  ;;  %v1829_v27 = vld [vmem:[%s19985_s0 + $0x8a] sm:$0xff] }
   0xd   :  { %13566 = vmatpush3.bf16.msra.mxu0 %v2327_v20  ;;  %13567 = vmatprep.mubr.bf16.mxu0 %v20033_v2  ;;  %20256 = vst [vmem:[#allocation17_spill] sm:$0xff] %v15611_v45  ;;  %v212_v51 = vand.u32 15, %v15611_v45  ;;  %v2200_v54 = vpack.c.bf16 %v2141_v49, %v1820_v48  ;;  %v15643_v57 = vadd.s32 120, %v15488_v5  ;;  %v88_v60 = vadd.s32 136, %v15488_v5  ;;  %v1826_v33 = vld [vmem:[%s19985_s0 + $0x72] sm:$0xff]  ;;  %v1831_v47 = vld [vmem:[%s19985_s0 + $0x9a] sm:$0xff] }
   0xe   :  { %14993 = vmatprep.subr.msk.bf16.mxu0 %vm19998_vm0, %v12418_v24  ;;  %vm15638_vm7 = vcmp.lt.s32.totalorder %v210_v50, 15  ;;  %v90_v24 = vadd.s32 152, %v15488_v5  ;;  %v92_v32 = vadd.s32 168, %v15488_v5  ;;  %v20028_v35 = vand.u32 15, %v15488_v5  ;;  %v1865_v8 = vld [vmem:[%s19985_s0 + $0x1aa] sm:$0xff]  ;;  %v2688_v13 = vld [vmem:[%s19985_s0 + $0x40] sm:$0xff] }
   0xf   :  { %20259 = vst [vmem:[#allocation18_spill] sm:$0xff] %v15643_v57  ;;  %vm15648_vm8 = vcmp.lt.s32.totalorder %v212_v51, 15  ;;  %v2143_v62 = vsel %vm15638_vm7, %v1823_v55, 0.0  ;;  %v214_v1 = vand.u32 15, %v15643_v57  ;;  %v216_v3 = vand.u32 15, %v88_v60  ;;  %v1830_v60 = vld [vmem:[%s19985_s0 + $0x92] sm:$0xff] }
  0x10   :  { %v2145_v0 = vsel %vm15648_vm8, %v1825_v58, 0.0  ;;  %v2201_v15 = vpack.c.bf16 %v2143_v62, %v1822_v61  ;;  %vm15697_vm11 = vcmp.ge.s32.totalorder %v20028_v35, 1  ;;  %v20266_v46 = vmov 0  ;;  %v1832_v62 = vld [vmem:[%s19985_s0 + $0xa2] sm:$0xff]  ;;  %v1869_v26 = vld [vmem:[%s19985_s0 + $0x1ca] sm:$0xff]  ;;  %v6343_v56 = vld [vmem:[%s19985_s0 + $0x9a] sm:$0xff] }
  0x11   :  { %v2202_v17 = vpack.c.bf16 %v2145_v0, %v1824_v63  ;;  %vm15669_vm9 = vcmp.lt.s32.totalorder %v214_v1, 15  ;;  %vm15677_vm10 = vcmp.lt.s32.totalorder %v216_v3, 15  ;;  %v20267_v46 = vsel %vm15697_vm11, 4294967295, %v20266_v46  ;;  %v1873_v25 = vld [vmem:[%s19985_s0 + $0x1ea] sm:$0xff]  ;;  %v2700_v29 = vld [vmem:[%s19985_s0 + $0xa0] sm:$0xff]  ;;  %v6342_v59 = vld [vmem:[%s19985_s0 + $0x92] sm:$0xff] }
  0x12   :  { %v2147_v34 = vsel %vm15669_vm9, %v1827_v18, 0.0  ;;  %v2149_v37 = vsel %vm15677_vm10, %v1829_v27, 0.0  ;;  %20268 = vst [vmem:[#allocation19_spill] sm:$0xff] %v20267_v46  ;;  %v94_v49 = vadd.s32 184, %v15488_v5  ;;  %v2874_v50 = vsel %vm15697_vm11, %v15502_v9, 0.0  ;;  %v2704_v12 = vld [vmem:[%s19985_s0 + $0xc0] sm:$0xff] }
  0x13   :  { %v2204_v43 = vpack.c.bf16 %v2149_v37, %v1828_v36  ;;  %v15713_v51 = vadd.s32 48, %v15488_v5  ;;  %v96_v55 = vadd.s32 200, %v15488_v5  ;;  %v15724_v58 = vpack.c.bf16 %v15508_v11, %v2874_v50  ;;  %v1834_v37 = vld [vmem:[%s19985_s0 + $0xb2] sm:$0xff]  ;;  %v2708_v7 = vld [vmem:[%s19985_s0 + $0xe0] sm:$0xff]  ;;  %v3471_v19 = vld [vmem:[%s19985_s0 + $0x189] sm:$0xff] }
  0x14   :  { %v222_v63 = vand.u32 15, %v94_v49  ;;  %v20274_v0 = vmov 0  ;;  %v20278_v27 = vmov 0  ;;  %v100_v36 = vadd.s32 232, %v15488_v5  ;;  %v2712_v23 = vld [vmem:[%s19985_s0 + $0x100] sm:$0xff]  ;;  %v3475_v46 = vld [vmem:[%s19985_s0 + $0x1a9] sm:$0xff] }
  0x15   :  { %20271 = vst [vmem:[#allocation20_spill] sm:$0xff] %v15713_v51  ;;  %v205_v9 = vand.u32 15, %v15713_v51  ;;  %v224_v1 = vand.u32 15, %v96_v55  ;;  %v20282_v55 = vmov 0  ;;  %v20313_v10 = vmov 0  ;;  %v6337_v30 = vld [vmem:[%s19985_s0 + $0x6a] sm:$0xff] }
  0x16   :  { %vm15752_vm15 = vcmp.lt.s32.totalorder %v222_v63, 15  ;;  %v1840_v63 = vld [vmem:[%s19985_s0 + $0xe2] sm:$0xff]  ;;  %v20319_v35 = vmov 0  ;;  %v20351_v57 = vmov 0  ;;  %v16103_v45 = vadd.s32 112, %v15488_v5  ;;  %v6347_v20 = vld [vmem:[%s19985_s0 + $0xba] sm:$0xff] }
  0x17   :  { %vm15739_vm14 = vcmp.ge.s32.totalorder %v205_v9, 1  ;;  %v20279_v27 = vsel %vm15752_vm15, 4294967295, %v20278_v27  ;;  %v102_v9 = vadd.s32 248, %v15488_v5  ;;  %v89_v31 = vadd.s32 144, %v15488_v5  ;;  %v6346_v28 = vld [vmem:[%s19985_s0 + $0xb2] sm:$0xff]  ;;  %v6351_v48 = vld [vmem:[%s19985_s0 + $0xda] sm:$0xff] }
  0x18   :  { %13568 = vmatmul.mubr.msk.bf16.vlgmr.msra.gmra.mrb[0].mxu0 %vm19999_vm2, %v2197_v38  ;;  %v218_v38 = vand.u32 15, %v90_v24  ;;  %v20275_v0 = vsel %vm15739_vm14, 4294967295, %v20274_v0  ;;  %v653_v3 = vsel %vm15739_vm14, %v15522_v14, 0.0  ;;  %v1835_v24 = vld [vmem:[%s19985_s0 + $0xba] sm:$0xff]  ;;  %20354 = vst [vmem:[#allocation33_spill] sm:$0xff] %v16103_v45  ;;  %v20371_v51 = vmov 0 }
  0x19   :  { %13632 = vmatpush3.bf16.msra.mxu0 %v3069_v40  ;;  %13571 = vmatprep.mubr.msk.bf16.mxu0 %vm19999_vm2, %v2198_v39  ;;  %v220_v39 = vand.u32 15, %v92_v32  ;;  %v2203_v40 = vpack.c.bf16 %v2147_v34, %v1826_v33  ;;  %20276 = vst [vmem:[#allocation21_spill] sm:$0xff] %v20275_v0  ;;  %v98_v32 = vadd.s32 216, %v15488_v5  ;;  %v1837_v33 = vld [vmem:[%s19985_s0 + $0xca] sm:$0xff]  ;;  %v20280_v34 = vmov 0  ;;  %v3470_v0 = vld [vmem:[%s19985_s0 + $0x181] sm:$0xff] }
  0x1a   :  { %14994 = vmatprep.subr.msk.bf16.mxu0 %vm19998_vm0, %v15631_v53  ;;  %vm15704_vm12 = vcmp.lt.s32.totalorder %v218_v38, 15  ;;  %vm15760_vm0 = vcmp.lt.s32.totalorder %v224_v1, 15  ;;  %v2155_v38 = vsel %vm15752_vm15, %v1835_v24, 0.0  ;;  %v1843_v24 = vld [vmem:[%s19985_s0 + $0xfa] sm:$0xff]  ;;  %v20387_v6 = vmov 0 }
  0x1b   :  { %vm15718_vm13 = vcmp.lt.s32.totalorder %v220_v39, 15  ;;  %v2151_v61 = vsel %vm15704_vm12, %v1831_v47, 0.0  ;;  %v20281_v34 = vsel %vm15760_vm0, 4294967295, %v20280_v34  ;;  %v1836_v39 = vld [vmem:[%s19985_s0 + $0xc2] sm:$0xff]  ;;  %v228_v47 = vand.u32 15, %v100_v36 }
  0x1c   :  { %v2207_v49 = vpack.c.bf16 %v2155_v38, %v1834_v37  ;;  %v108_v36 = vadd.s32 296, %v15488_v5  ;;  %v1842_v37 = vld [vmem:[%s19985_s0 + $0xf2] sm:$0xff] }
  0x1d   :  { %vm15788_vm11 = vcmp.lt.s32.totalorder %v228_v47, 15  ;;  %v1847_v47 = vld [vmem:[%s19985_s0 + $0x11a] sm:$0xff] }
  0x20   :  { %13572 = vmatmul.mubr.msk.bf16.gmra.mrb[4].mxu0 %vm19999_vm2, %v2199_v52  ;;  %v1833_v52 = vld [vmem:[%s19985_s0 + $0xaa] sm:$0xff] }
  0x21   :  { %13575 = vmatprep.mubr.msk.bf16.mxu0 %vm19999_vm2, %v2200_v54  ;;  %v20272_v54 = vmov 0  ;;  %v2153_v11 = vsel %vm15718_vm13, %v1833_v52, 0.0  ;;  %v1839_v52 = vld [vmem:[%s19985_s0 + $0xda] sm:$0xff] }
  0x22   :  { %v20273_v54 = vsel %vm15718_vm13, 4294967295, %v20272_v54  ;;  %v2206_v18 = vpack.c.bf16 %v2153_v11, %v1832_v62  ;;  %v1838_v62 = vld [vmem:[%s19985_s0 + $0xd2] sm:$0xff] }
  0x28   :  { %13576 = vmatmul.mubr.msk.bf16.gmra.mrb[8].mxu0 %vm19999_vm2, %v2201_v15  ;;  %v2205_v15 = vpack.c.bf16 %v2151_v61, %v1830_v60  ;;  %v1841_v60 = vld [vmem:[%s19985_s0 + $0xea] sm:$0xff]  ;;  %v20284_v61 = vmov 0 }
  0x29   :  { %13579 = vmatprep.mubr.msk.bf16.mxu0 %vm19999_vm2, %v2202_v17  ;;  %v15747_v17 = vpack.c.bf16 %v15530_v16, %v653_v3  ;;  %v20285_v61 = vsel %vm15788_vm11, 4294967295, %v20284_v61  ;;  %v2161_v1 = vsel %vm15788_vm11, %v1841_v60, 0.0  ;;  %v230_v3 = vand.u32 15, %v102_v9 }
  0x2a   :  { %v20293_v9 = vmov 0  ;;  %v112_v60 = vadd.s32 328, %v15488_v5 }
  0x2b   :  { %20277 = vst [vmem:[#allocation22_spill] sm:$0xff] %v15747_v17  ;;  %v3459_v17 = vld [vmem:[%s19985_s0 + $0x129] sm:$0xff] }
  0x30   :  { %13580 = vmatmul.mubr.msk.bf16.gmra.mrb[12].mxu0 %vm19999_vm2, %v2203_v40  ;;  %v2157_v40 = vsel %vm15760_vm0, %v1837_v33, 0.0  ;;  %vm20286_vm0 = vcmask 64512   ;;  %v106_v33 = vadd.s32 280, %v15488_v5 }
  0x31   :  { %13583 = vmatprep.mubr.msk.bf16.mxu0 %vm19999_vm2, %v2204_v43  ;;  %v226_v43 = vand.u32 15, %v98_v32  ;;  %v2208_v50 = vpack.c.bf16 %v2157_v40, %v1836_v39  ;;  %vm20287_vm15 = vmmov %vm20286_vm0  ;;  %v20288_v32 = vmov 0  ;;  %v236_v40 = vand.u32 15, %v108_v36 }
  0x32   :  { %v234_v39 = vand.u32 15, %v106_v33  ;;  %v1851_v33 = vld [vmem:[%s19985_s0 + $0x13a] sm:$0xff]  ;;  %v20295_v36 = vmov 0 }
  0x34   :  { %vm15823_vm11 = vcmp.lt.s32.totalorder %v234_v39, 15  ;;  %v20297_v39 = vmov 0 }
  0x38   :  { %13584 = vmatmul.mubr.msk.bf16.gmra.mrb[16].mxu0 %vm19999_vm2, %v2205_v15 }
  0x39   :  { %13587 = vmatprep.mubr.msk.bf16.mxu0 %vm19999_vm2, %v2206_v18  ;;  %vm15780_vm2 = vcmp.lt.s32.totalorder %v226_v43, 15  ;;  %v2210_v18 = vpack.c.bf16 %v2161_v1, %v1840_v63  ;;  %v1848_v63 = vld [vmem:[%s19985_s0 + $0x122] sm:$0xff] }
  0x3a   :  { %v20283_v55 = vsel %vm15780_vm2, 4294967295, %v20282_v55  ;;  %v2159_v11 = vsel %vm15780_vm2, %v1839_v52, 0.0  ;;  %vm20290_vm2 = vmmov %vm20287_vm15  ;;  %v1849_v52 = vld [vmem:[%s19985_s0 + $0x12a] sm:$0xff] }
  0x3b   :  { %v2209_v15 = vpack.c.bf16 %v2159_v11, %v1838_v62  ;;  %v1846_v62 = vld [vmem:[%s19985_s0 + $0x112] sm:$0xff]  ;;  %v2167_v11 = vsel %vm15823_vm11, %v1847_v47, 0.0 }
  0x40   :  { %13588 = vmatmul.mubr.msk.bf16.gmra.mrb[20].mxu0 %vm20286_vm0, %v2207_v49  ;;  %vm15807_vm0 = vcmp.lt.s32.totalorder %v230_v3, 15  ;;  %v20291_v49 = vmov 0 }
  0x41   :  { %13591 = vmatprep.mubr.msk.bf16.mxu0 %vm20287_vm15, %v2208_v50  ;;  %v20289_v32 = vsel %vm15807_vm0, 4294967295, %v20288_v32  ;;  %v2163_v38 = vsel %vm15807_vm0, %v1843_v24, 0.0  ;;  %v20292_v49 = vsel %vm15823_vm11, 4294967295, %v20291_v49  ;;  %v110_v50 = vadd.s32 312, %v15488_v5 }
  0x42   :  { %v2211_v43 = vpack.c.bf16 %v2163_v38, %v1842_v37  ;;  %v114_v37 = vadd.s32 344, %v15488_v5  ;;  %v1853_v38 = vld [vmem:[%s19985_s0 + $0x14a] sm:$0xff] }
  0x43   :  { %v238_v3 = vand.u32 15, %v110_v50  ;;  %v1852_v50 = vld [vmem:[%s19985_s0 + $0x142] sm:$0xff] }
  0x48   :  { %13592 = vmatmul.mubr.msk.bf16.gmra.mrb[24].mxu0 %vm20287_vm15, %v2209_v15  ;;  %v240_v15 = vand.u32 15, %v112_v60  ;;  %v242_v60 = vand.u32 15, %v114_v37  ;;  %v1854_v37 = vld [vmem:[%s19985_s0 + $0x152] sm:$0xff] }
  0x49   :  { %13595 = vmatprep.mubr.msk.bf16.mxu0 %vm20290_vm2, %v2210_v18  ;;  %vm15831_vm2 = vcmp.lt.s32.totalorder %v236_v40, 15  ;;  %v2213_v18 = vpack.c.bf16 %v2167_v11, %v1846_v62  ;;  %v116_v40 = vadd.s32 360, %v15488_v5 }
  0x4a   :  { %v20294_v9 = vsel %vm15831_vm2, 4294967295, %v20293_v9  ;;  %v2169_v1 = vsel %vm15831_vm2, %v1849_v52, 0.0  ;;  %vm15859_vm11 = vcmp.lt.s32.totalorder %v240_v15, 15  ;;  %vm20299_vm2 = vcmask 64512  }
  0x4b   :  { %v2214_v24 = vpack.c.bf16 %v2169_v1, %v1848_v63  ;;  %v20298_v39 = vsel %vm15859_vm11, 4294967295, %v20297_v39  ;;  %vm20300_vm0 = vmmov %vm20299_vm2  ;;  %v2173_v52 = vsel %vm15859_vm11, %v1853_v38, 0.0  ;;  %v244_v62 = vand.u32 15, %v116_v40  ;;  %v1855_v1 = vld [vmem:[%s19985_s0 + $0x15a] sm:$0xff]  ;;  %v1856_v40 = vld [vmem:[%s19985_s0 + $0x162] sm:$0xff] }
  0x4c   :  { %v2216_v63 = vpack.c.bf16 %v2173_v52, %v1852_v50  ;;  %v118_v15 = vadd.s32 376, %v15488_v5  ;;  %vm20305_vm11 = vcmask 64512  }
  0x50   :  { %13596 = vmatmul.mubr.msk.bf16.gmra.mrb[28].mxu0 %vm20287_vm15, %v2211_v43  ;;  %vm15851_vm15 = vcmp.lt.s32.totalorder %v238_v3, 15  ;;  %v1850_v43 = vld [vmem:[%s19985_s0 + $0x132] sm:$0xff]  ;;  %v20301_v3 = vmov 0 }
  0x51   :  { %13599 = vmatprep.mubr.bf16.mxu0 %v20033_v2  ;;  %v20296_v36 = vsel %vm15851_vm15, 4294967295, %v20295_v36  ;;  %v2171_v47 = vsel %vm15851_vm15, %v1851_v33, 0.0  ;;  %v120_v33 = vadd.s32 392, %v15488_v5  ;;  %vm20306_vm15 = vmmov %vm20305_vm11  ;;  %v20325_v2 = vmov 0 }
  0x52   :  { %v2215_v11 = vpack.c.bf16 %v2171_v47, %v1850_v43  ;;  %v246_v47 = vand.u32 15, %v118_v15  ;;  %v124_v15 = vadd.s32 424, %v15488_v5 }
  0x53   :  { %v248_v50 = vand.u32 15, %v120_v33  ;;  %v1858_v33 = vld [vmem:[%s19985_s0 + $0x172] sm:$0xff] }
  0x58   :  { %13600 = vmatmul.mubr.msk.bf16.gmra.mrb[32].mxu0 %vm20299_vm2, %v2213_v18  ;;  %v1857_v18 = vld [vmem:[%s19985_s0 + $0x16a] sm:$0xff]  ;;  %vm15887_vm2 = vcmp.lt.s32.totalorder %v244_v62, 15  ;;  %v1859_v62 = vld [vmem:[%s19985_s0 + $0x17a] sm:$0xff] }
  0x59   :  { %13603 = vmatprep.mubr.msk.bf16.mxu0 %vm20300_vm0, %v2214_v24  ;;  %vm15879_vm0 = vcmp.lt.s32.totalorder %v242_v60, 15  ;;  %v20303_v24 = vmov 0  ;;  %v2177_v43 = vsel %vm15887_vm2, %v1857_v18, 0.0  ;;  %v20309_v18 = vmov 0 }
  0x5a   :  { %v20302_v3 = vsel %vm15879_vm0, 4294967295, %v20301_v3  ;;  %v20304_v24 = vsel %vm15887_vm2, 4294967295, %v20303_v24  ;;  %v2175_v38 = vsel %vm15879_vm0, %v1855_v1, 0.0  ;;  %v2218_v60 = vpack.c.bf16 %v2177_v43, %v1856_v40  ;;  %v1861_v1 = vld [vmem:[%s19985_s0 + $0x18a] sm:$0xff] }
  0x5b   :  { %v2217_v52 = vpack.c.bf16 %v2175_v38, %v1854_v37  ;;  %vm20311_vm2 = vcmask 64512   ;;  %v1860_v38 = vld [vmem:[%s19985_s0 + $0x182] sm:$0xff] }
  0x5c   :  { %vm20312_vm0 = vmmov %vm20311_vm2 }
  0x60   :  { %13604 = vmatmul.mubr.msk.bf16.gmra.mrb[36].mxu0 %vm20305_vm11, %v2215_v11  ;;  %vm15907_vm11 = vcmp.lt.s32.totalorder %v246_v47, 15  ;;  %v20307_v11 = vmov 0  ;;  %v252_v47 = vand.u32 15, %v124_v15  ;;  %v1862_v15 = vld [vmem:[%s19985_s0 + $0x192] sm:$0xff] }
  0x61   :  { %13607 = vmatprep.mubr.msk.bf16.mxu0 %vm20306_vm15, %v2216_v63  ;;  %v20308_v11 = vsel %vm15907_vm11, 4294967295, %v20307_v11  ;;  %v122_v63 = vadd.s32 408, %v15488_v5  ;;  %vm15915_vm15 = vcmp.lt.s32.totalorder %v248_v50, 15  ;;  %v2179_v37 = vsel %vm15907_vm11, %v1859_v62, 0.0 }
  0x62   :  { %v20310_v18 = vsel %vm15915_vm15, 4294967295, %v20309_v18  ;;  %v2181_v40 = vsel %vm15915_vm15, %v1861_v1, 0.0  ;;  %v2219_v50 = vpack.c.bf16 %v2179_v37, %v1858_v33  ;;  %v126_v62 = vadd.s32 440, %v15488_v5  ;;  %v1864_v37 = vld [vmem:[%s19985_s0 + $0x1a2] sm:$0xff] }
  0x63   :  { %v250_v43 = vand.u32 15, %v122_v63  ;;  %v20315_v1 = vmov 0  ;;  %v128_v63 = vadd.s32 456, %v15488_v5  ;;  %vm20317_vm15 = vcmask 64512  }
  0x64   :  { %vm20318_vm11 = vmmov %vm20317_vm15 }
  0x68   :  { %13608 = vmatmul.mubr.msk.bf16.gmra.mrb[40].mxu0 %vm20311_vm2, %v2217_v52  ;;  %v2220_v52 = vpack.c.bf16 %v2181_v40, %v1860_v38  ;;  %vm15943_vm2 = vcmp.lt.s32.totalorder %v252_v47, 15  ;;  %v254_v40 = vand.u32 15, %v126_v62  ;;  %v132_v62 = vadd.s32 488, %v15488_v5 }
  0x69   :  { %13611 = vmatprep.mubr.msk.bf16.mxu0 %vm20312_vm0, %v2218_v60  ;;  %v1863_v60 = vld [vmem:[%s19985_s0 + $0x19a] sm:$0xff]  ;;  %vm15935_vm0 = vcmp.lt.s32.totalorder %v250_v43, 15  ;;  %v20316_v1 = vsel %vm15943_vm2, 4294967295, %v20315_v1  ;;  %v2185_v38 = vsel %vm15943_vm2, %v1865_v8, 0.0  ;;  %v256_v43 = vand.u32 15, %v128_v63  ;;  %v1866_v63 = vld [vmem:[%s19985_s0 + $0x1b2] sm:$0xff] }
  0x6a   :  { %v20314_v10 = vsel %vm15935_vm0, 4294967295, %v20313_v10  ;;  %v2183_v33 = vsel %vm15935_vm0, %v1863_v60, 0.0  ;;  %v130_v60 = vadd.s32 472, %v15488_v5  ;;  %v20321_v8 = vmov 0 }
  0x6b   :  { %v2221_v47 = vpack.c.bf16 %v2183_v33, %v1862_v15  ;;  %vm20323_vm2 = vcmask 64512   ;;  %v1868_v33 = vld [vmem:[%s19985_s0 + $0x1c2] sm:$0xff] }
  0x6c   :  { %vm20324_vm0 = vmmov %vm20323_vm2 }
  0x70   :  { %13612 = vmatmul.mubr.msk.bf16.gmra.mrb[44].mxu0 %vm20317_vm15, %v2219_v50  ;;  %v2222_v50 = vpack.c.bf16 %v2185_v38, %v1864_v37  ;;  %vm15971_vm15 = vcmp.lt.s32.totalorder %v256_v43, 15  ;;  %v258_v38 = vand.u32 15, %v130_v60  ;;  %v1870_v60 = vld [vmem:[%s19985_s0 + $0x1d2] sm:$0xff] }
  0x71   :  { %13615 = vmatprep.mubr.msk.bf16.mxu0 %vm20318_vm11, %v2220_v52  ;;  %v1867_v52 = vld [vmem:[%s19985_s0 + $0x1ba] sm:$0xff]  ;;  %vm15963_vm11 = vcmp.lt.s32.totalorder %v254_v40, 15  ;;  %v20322_v8 = vsel %vm15971_vm15, 4294967295, %v20321_v8  ;;  %v2189_v37 = vsel %vm15971_vm15, %v1869_v26, 0.0  ;;  %v260_v40 = vand.u32 15, %v132_v62 }
  0x72   :  { %v20320_v35 = vsel %vm15963_vm11, 4294967295, %v20319_v35  ;;  %v2187_v15 = vsel %vm15963_vm11, %v1867_v52, 0.0  ;;  %v134_v52 = vadd.s32 504, %v15488_v5  ;;  %v20328_v26 = vmov 0 }
  0x73   :  { %v2223_v43 = vpack.c.bf16 %v2187_v15, %v1866_v63  ;;  %vm20331_vm15 = vcmask 64512   ;;  %v1872_v63 = vld [vmem:[%s19985_s0 + $0x1e2] sm:$0xff] }
  0x74   :  { %vm20332_vm11 = vmmov %vm20331_vm15 }
  0x78   :  { %13616 = vmatmul.mubr.msk.bf16.gmra.mrb[48].mxu0 %vm20323_vm2, %v2221_v47  ;;  %v2224_v47 = vpack.c.bf16 %v2189_v37, %v1868_v33  ;;  %vm15999_vm2 = vcmp.lt.s32.totalorder %v260_v40, 15  ;;  %v262_v33 = vand.u32 15, %v134_v52  ;;  %v1875_v40 = vld [vmem:[%s19985_s0 + $0x1fa] sm:$0xff] }
  0x79   :  { %13619 = vmatprep.mubr.msk.bf16.mxu0 %vm20324_vm0, %v2222_v50  ;;  %v1871_v50 = vld [vmem:[%s19985_s0 + $0x1da] sm:$0xff]  ;;  %vm15991_vm0 = vcmp.lt.s32.totalorder %v258_v38, 15  ;;  %v20329_v26 = vsel %vm15999_vm2, 4294967295, %v20328_v26  ;;  %v2193_v15 = vsel %vm15999_vm2, %v1873_v25, 0.0  ;;  %v1874_v25 = vld [vmem:[%s19985_s0 + $0x1f2] sm:$0xff] }
  0x7a   :  { %v20326_v2 = vsel %vm15991_vm0, 4294967295, %v20325_v2  ;;  %20330 = vst [vmem:[#allocation24_spill] sm:$0xff] %v20329_v26  ;;  %v2191_v62 = vsel %vm15991_vm0, %v1871_v50, 0.0  ;;  %v2226_v38 = vpack.c.bf16 %v2193_v15, %v1872_v63  ;;  %vm20337_vm0 = vmmov %vm20331_vm15  ;;  %v20338_v63 = vmov 0  ;;  %v6332_v26 = vld [vmem:[%s19985_s0 + $0x42] sm:$0xff] }
  0x7b   :  { %20327 = vst [vmem:[#allocation23_spill] sm:$0xff] %v20326_v2  ;;  %v2225_v37 = vpack.c.bf16 %v2191_v62, %v1870_v60  ;;  %v2684_v62 = vld [vmem:[%s19985_s0 + $0x20] sm:$0xff]  ;;  %v16041_v15 = vadd.s32 64, %v15488_v5 }
  0x7c   :  { %v3975_v2 = vld [vmem:[%s19985_s0 + $0x1a] sm:$0xff] }
  0x7d   :  { %20341 = vst [vmem:[#allocation28_spill] sm:$0xff] %v16041_v15 }
  0x80   :  { %13620 = vmatmul.mubr.msk.bf16.gmra.mrb[52].mxu0 %vm20331_vm15, %v2223_v43  ;;  %v20333_v43 = vmov 0 }
  0x81   :  { %13623 = vmatprep.mubr.msk.bf16.mxu0 %vm20332_vm11, %v2224_v47  ;;  %vm16018_vm11 = vcmp.lt.s32.totalorder %v262_v33, 15  ;;  %v16023_v47 = vadd.s32 32, %v15488_v5  ;;  %v2685_v33 = vld [vmem:[%s19985_s0 + $0x28] sm:$0xff] }
  0x82   :  { %v20334_v43 = vsel %vm16018_vm11, 4294967295, %v20333_v43  ;;  %v2195_v50 = vsel %vm16018_vm11, %v1875_v40, 0.0  ;;  %v207_v40 = vand.u32 15, %v16041_v15  ;;  %v20363_v15 = vmov 0 }
  0x83   :  { %20335 = vst [vmem:[#allocation25_spill] sm:$0xff] %v20334_v43  ;;  %20336 = vst [vmem:[#allocation26_spill] sm:$0xff] %v16023_v47  ;;  %v203_v52 = vand.u32 15, %v16023_v47  ;;  %v2227_v60 = vpack.c.bf16 %v2195_v50, %v1874_v25  ;;  %v20379_v47 = vmov 0  ;;  %v3478_v43 = vld [vmem:[%s19985_s0 + $0x1c1] sm:$0xff] }
  0x85   :  { %vm16036_vm2 = vcmp.ge.s32.totalorder %v203_v52, 1 }
  0x86   :  { %v20339_v63 = vsel %vm16036_vm2, 4294967295, %v20338_v63 }
  0x87   :  { %20340 = vst [vmem:[#allocation27_spill] sm:$0xff] %v20339_v63  ;;  %v3474_v63 = vld [vmem:[%s19985_s0 + $0x1a1] sm:$0xff] }
  0x88   :  { %13624 = vmatmul.mubr.msk.bf16.gmra.mrb[56].mxu0 %vm20331_vm15, %v2225_v37  ;;  %v2876_v37 = vsel %vm15515_vm1, %v2684_v62, 0.0  ;;  %vm20342_vm15 = vmmov %vm20337_vm0  ;;  %vm16064_vm1 = vcmp.ge.s32.totalorder %v207_v40, 1  ;;  %v2689_v62 = vld [vmem:[%s19985_s0 + $0x48] sm:$0xff] }
  0x89   :  { %13627 = vmatprep.mubr.msk.bf16.mxu0 %vm20337_vm0, %v2226_v38  ;;  %v2878_v38 = vsel %vm16036_vm2, %v15522_v14, 0.0  ;;  %v2939_v25 = vpack.c.bf16 %v2685_v33, %v2876_v37  ;;  %v2690_v14 = vld [vmem:[%s19985_s0 + $0x50] sm:$0xff]  ;;  %v2880_v33 = vsel %vm15739_vm14, %v2688_v13, 0.0  ;;  %v2691_v37 = vld [vmem:[%s19985_s0 + $0x58] sm:$0xff]  ;;  %v2692_v13 = vld [vmem:[%s19985_s0 + $0x60] sm:$0xff] }
  0x8a   :  { %v2940_v50 = vpack.c.bf16 %v15530_v16, %v2878_v38  ;;  %v16072_v16 = vadd.s32 96, %v15488_v5  ;;  %v2882_v38 = vsel %vm16064_vm1, %v2690_v14, 0.0  ;;  %v20355_v14 = vmov 0 }
  0x8c   :  { %20348 = vst [vmem:[#allocation31_spill] sm:$0xff] %v16072_v16 }
  0x90   :  { %13628 = vmatmul.mubr.msk.bf16.gmra.mrb[60].mxu0 %vm20337_vm0, %v2227_v60  ;;  %vm20343_vm0 = vcmask 1043456   ;;  %v16062_v60 = vadd.s32 80, %v15488_v5 }
  0x91   :  { %13633 = vmatprep.mubr.msk.bf16.mxu0 %vm20342_vm15, %v15724_v58  ;;  %v3619_v52 = vsel %vm20343_vm0, %v15631_v53, 0  ;;  %v20345_v58 = vmov 0  ;;  %v16077_v53 = vld [vmem:[%s19984_s1 + $0x14] sm:$0xf]  ;;  %vm20349_vm0 = vmmov %vm20342_vm15 }
  0x92   :  { %20344 = vst [vmem:[#allocation29_spill] sm:$0xff] %v16062_v60  ;;  %v20346_v58 = vsel %vm16064_vm1, 4294967295, %v20345_v58  ;;  %v209_v40 = vand.u32 15, %v16062_v60 }
  0x93   :  { %20347 = vst [vmem:[#allocation30_spill] sm:$0xff] %v20346_v58  ;;  %v3467_v58 = vld [vmem:[%s19985_s0 + $0x169] sm:$0xff] }
  0x98   :  { %13634 = vmatmul.mubr.msk.bf16.vlgmr.msra.gmra.mrb[0].mxu0 %vm20342_vm15, %v2939_v25  ;;  %vm20350_vm15 = vcmask 1043456   ;;  %v211_v25 = vand.u32 15, %v16072_v16  ;;  %v213_v16 = vand.u32 15, %v16103_v45 }
  0x99   :  { %13698 = vmatpush3.bf16.msra.mxu0 %v3619_v52  ;;  %13637 = vmatprep.mubr.msk.bf16.mxu0 %vm20349_vm0, %v2940_v50  ;;  %v2941_v50 = vpack.c.bf16 %v2689_v62, %v2880_v33  ;;  %v2942_v52 = vpack.c.bf16 %v2691_v37, %v2882_v38  ;;  %vm16095_vm0 = vcmp.ge.s32.totalorder %v209_v40, 1  ;;  %v2694_v62 = vld [vmem:[%s19985_s0 + $0x70] sm:$0xff]  ;;  %v87_v33 = vadd.s32 128, %v15488_v5  ;;  %v2693_v37 = vld [vmem:[%s19985_s0 + $0x68] sm:$0xff]  ;;  %v2695_v40 = vld [vmem:[%s19985_s0 + $0x78] sm:$0xff] }
  0x9a   :  { %14995 = vmatprep.subr.msk.bf16.mxu0 %vm20350_vm15, %v16077_v53  ;;  %v20352_v57 = vsel %vm16095_vm0, 4294967295, %v20351_v57  ;;  %vm16105_vm1 = vcmp.ge.s32.totalorder %v211_v25, 1  ;;  %vm20358_vm15 = vcmask 64512   ;;  %v2884_v38 = vsel %vm16095_vm0, %v2692_v13, 0.0  ;;  %v2696_v13 = vld [vmem:[%s19985_s0 + $0x80] sm:$0xff] }
  0x9b   :  { %20353 = vst [vmem:[#allocation32_spill] sm:$0xff] %v20352_v57  ;;  %v20356_v14 = vsel %vm16105_vm1, 4294967295, %v20355_v14  ;;  %vm20359_vm14 = vmmov %vm20358_vm15  ;;  %v2886_v25 = vsel %vm16105_vm1, %v2694_v62, 0.0  ;;  %v215_v42 = vand.u32 15, %v87_v33  ;;  %v2698_v62 = vld [vmem:[%s19985_s0 + $0x90] sm:$0xff]  ;;  %v91_v33 = vadd.s32 160, %v15488_v5 }
  0x9c   :  { %20357 = vst [vmem:[#allocation34_spill] sm:$0xff] %v20356_v14  ;;  %v2944_v60 = vpack.c.bf16 %v2695_v40, %v2886_v25  ;;  %vm20366_vm1 = vcmask 64512   ;;  %v217_v40 = vand.u32 15, %v89_v31  ;;  %v2702_v31 = vld [vmem:[%s19985_s0 + $0xb0] sm:$0xff]  ;;  %v3466_v57 = vld [vmem:[%s19985_s0 + $0x161] sm:$0xff] }
  0x9d   :  { %vm20367_vm0 = vmmov %vm20366_vm1  ;;  %v219_v25 = vand.u32 15, %v91_v33  ;;  %v2701_v33 = vld [vmem:[%s19985_s0 + $0xa8] sm:$0xff]  ;;  %v3460_v14 = vld [vmem:[%s19985_s0 + $0x131] sm:$0xff] }
  0xa0   :  { %13638 = vmatmul.mubr.msk.bf16.gmra.mrb[4].mxu0 %vm20358_vm15, %v2941_v50  ;;  %v2943_v50 = vpack.c.bf16 %v2693_v37, %v2884_v38  ;;  %vm16134_vm15 = vcmp.ge.s32.totalorder %v215_v42, 1  ;;  %v2699_v37 = vld [vmem:[%s19985_s0 + $0x98] sm:$0xff] }
  0xa1   :  { %13641 = vmatprep.mubr.msk.bf16.mxu0 %vm20359_vm14, %v2942_v52  ;;  %vm16126_vm14 = vcmp.ge.s32.totalorder %v213_v16, 1  ;;  %v20360_v52 = vmov 0  ;;  %v20364_v15 = vsel %vm16134_vm15, 4294967295, %v20363_v15  ;;  %v2697_v16 = vld [vmem:[%s19985_s0 + $0x88] sm:$0xff]  ;;  %v2890_v38 = vsel %vm16134_vm15, %v2698_v62, 0.0 }
  0xa2   :  { %v20361_v52 = vsel %vm16126_vm14, 4294967295, %v20360_v52  ;;  %20365 = vst [vmem:[#allocation36_spill] sm:$0xff] %v20364_v15  ;;  %v2888_v42 = vsel %vm16126_vm14, %v2696_v13, 0.0  ;;  %v93_v13 = vadd.s32 176, %v15488_v5  ;;  %v95_v62 = vadd.s32 192, %v15488_v5  ;;  %v3455_v15 = vld [vmem:[%s19985_s0 + $0x109] sm:$0xff] }
  0xa3   :  { %20362 = vst [vmem:[#allocation35_spill] sm:$0xff] %v20361_v52  ;;  %v2945_v45 = vpack.c.bf16 %v2697_v16, %v2888_v42  ;;  %vm20374_vm15 = vcmask 64512   ;;  %v2703_v42 = vld [vmem:[%s19985_s0 + $0xb8] sm:$0xff]  ;;  %v3458_v52 = vld [vmem:[%s19985_s0 + $0x121] sm:$0xff] }
  0xa4   :  { %vm20375_vm14 = vmmov %vm20374_vm15 }
  0xa8   :  { %13642 = vmatmul.mubr.msk.bf16.gmra.mrb[8].mxu0 %vm20366_vm1, %v2943_v50  ;;  %v2946_v50 = vpack.c.bf16 %v2699_v37, %v2890_v38  ;;  %vm16154_vm1 = vcmp.ge.s32.totalorder %v217_v40, 1  ;;  %v221_v38 = vand.u32 15, %v93_v13  ;;  %v223_v40 = vand.u32 15, %v95_v62  ;;  %v2706_v13 = vld [vmem:[%s19985_s0 + $0xd0] sm:$0xff]  ;;  %v2705_v62 = vld [vmem:[%s19985_s0 + $0xc8] sm:$0xff] }
  0xa9   :  { %13645 = vmatprep.mubr.msk.bf16.mxu0 %vm20367_vm0, %v2944_v60  ;;  %v20368_v60 = vmov 0  ;;  %vm16162_vm0 = vcmp.ge.s32.totalorder %v219_v25, 1  ;;  %v2892_v16 = vsel %vm16154_vm1, %v2700_v29, 0.0  ;;  %v97_v29 = vadd.s32 208, %v15488_v5 }
  0xaa   :  { %v20369_v60 = vsel %vm16154_vm1, 4294967295, %v20368_v60  ;;  %v20372_v51 = vsel %vm16162_vm0, 4294967295, %v20371_v51  ;;  %v2894_v37 = vsel %vm16162_vm0, %v2702_v31, 0.0  ;;  %v2947_v25 = vpack.c.bf16 %v2701_v33, %v2892_v16  ;;  %v2707_v16 = vld [vmem:[%s19985_s0 + $0xd8] sm:$0xff] }
  0xab   :  { %20370 = vst [vmem:[#allocation37_spill] sm:$0xff] %v20369_v60  ;;  %20373 = vst [vmem:[#allocation38_spill] sm:$0xff] %v20372_v51  ;;  %v99_v31 = vadd.s32 224, %v15488_v5  ;;  %vm20382_vm0 = vcmask 64512   ;;  %v3451_v51 = vld [vmem:[%s19985_s0 + $0xe9] sm:$0xff]  ;;  %v3454_v60 = vld [vmem:[%s19985_s0 + $0x101] sm:$0xff] }
  0xac   :  { %vm20383_vm1 = vmmov %vm20382_vm0 }
  0xb0   :  { %13646 = vmatmul.mubr.msk.bf16.gmra.mrb[12].mxu0 %vm20374_vm15, %v2945_v45  ;;  %v2948_v45 = vpack.c.bf16 %v2703_v42, %v2894_v37  ;;  %vm16182_vm15 = vcmp.ge.s32.totalorder %v221_v38, 1  ;;  %v225_v37 = vand.u32 15, %v97_v29  ;;  %v227_v38 = vand.u32 15, %v99_v31  ;;  %v2710_v29 = vld [vmem:[%s19985_s0 + $0xf0] sm:$0xff]  ;;  %v2709_v31 = vld [vmem:[%s19985_s0 + $0xe8] sm:$0xff] }
  0xb1   :  { %13649 = vmatprep.mubr.msk.bf16.mxu0 %vm20375_vm14, %v2946_v50  ;;  %v20376_v50 = vmov 0  ;;  %vm16190_vm14 = vcmp.ge.s32.totalorder %v223_v40, 1  ;;  %v2896_v33 = vsel %vm16182_vm15, %v2704_v12, 0.0  ;;  %v101_v12 = vadd.s32 240, %v15488_v5 }
  0xb2   :  { %v20377_v50 = vsel %vm16182_vm15, 4294967295, %v20376_v50  ;;  %v20380_v47 = vsel %vm16190_vm14, 4294967295, %v20379_v47  ;;  %v2898_v42 = vsel %vm16190_vm14, %v2706_v13, 0.0  ;;  %v2949_v40 = vpack.c.bf16 %v2705_v62, %v2896_v33  ;;  %v2711_v33 = vld [vmem:[%s19985_s0 + $0xf8] sm:$0xff] }
  0xb3   :  { %20378 = vst [vmem:[#allocation39_spill] sm:$0xff] %v20377_v50  ;;  %20381 = vst [vmem:[#allocation40_spill] sm:$0xff] %v20380_v47  ;;  %v103_v13 = vadd.s32 256, %v15488_v5  ;;  %vm20390_vm14 = vcmask 64512   ;;  %v3447_v47 = vld [vmem:[%s19985_s0 + $0xc9] sm:$0xff]  ;;  %v3450_v50 = vld [vmem:[%s19985_s0 + $0xe1] sm:$0xff] }
  0xb4   :  { %vm20391_vm15 = vmmov %vm20390_vm14 }
  0xb8   :  { %13650 = vmatmul.mubr.msk.bf16.gmra.mrb[16].mxu0 %vm20382_vm0, %v2947_v25  ;;  %v2950_v25 = vpack.c.bf16 %v2707_v16, %v2898_v42  ;;  %vm16210_vm0 = vcmp.ge.s32.totalorder %v225_v37, 1  ;;  %v229_v42 = vand.u32 15, %v101_v12  ;;  %v231_v37 = vand.u32 15, %v103_v13  ;;  %v2714_v12 = vld [vmem:[%s19985_s0 + $0x110] sm:$0xff]  ;;  %v2713_v13 = vld [vmem:[%s19985_s0 + $0x108] sm:$0xff] }
  0xb9   :  { %13653 = vmatprep.mubr.msk.bf16.mxu0 %vm20383_vm1, %v2948_v45  ;;  %v20384_v45 = vmov 0  ;;  %vm16218_vm1 = vcmp.ge.s32.totalorder %v227_v38, 1  ;;  %v2900_v62 = vsel %vm16210_vm0, %v2708_v7, 0.0  ;;  %v105_v7 = vadd.s32 272, %v15488_v5 }
  0xba   :  { %v20385_v45 = vsel %vm16210_vm0, 4294967295, %v20384_v45  ;;  %v20388_v6 = vsel %vm16218_vm1, 4294967295, %v20387_v6  ;;  %v2902_v16 = vsel %vm16218_vm1, %v2710_v29, 0.0  ;;  %v2951_v38 = vpack.c.bf16 %v2709_v31, %v2900_v62  ;;  %v2715_v62 = vld [vmem:[%s19985_s0 + $0x118] sm:$0xff] }
  0xbb   :  { %20386 = vst [vmem:[#allocation41_spill] sm:$0xff] %v20385_v45  ;;  %20389 = vst [vmem:[#allocation42_spill] sm:$0xff] %v20388_v6  ;;  %v20395_v45 = vmov 0  ;;  %v107_v29 = vadd.s32 288, %v15488_v5  ;;  %vm20398_vm1 = vcmask 64512   ;;  %v20403_v6 = vmov 0 }
  0xbc   :  { %vm20399_vm0 = vmmov %vm20398_vm1 }
  0xc0   :  { %13654 = vmatmul.mubr.msk.bf16.gmra.mrb[20].mxu0 %vm20390_vm14, %v2949_v40  ;;  %v2952_v40 = vpack.c.bf16 %v2711_v33, %v2902_v16  ;;  %vm16238_vm14 = vcmp.ge.s32.totalorder %v229_v42, 1  ;;  %v233_v16 = vand.u32 15, %v105_v7  ;;  %v235_v42 = vand.u32 15, %v107_v29  ;;  %v2718_v7 = vld [vmem:[%s19985_s0 + $0x130] sm:$0xff]  ;;  %v2717_v29 = vld [vmem:[%s19985_s0 + $0x128] sm:$0xff] }
  0xc1   :  { %13657 = vmatprep.mubr.msk.bf16.mxu0 %vm20391_vm15, %v2950_v25  ;;  %v20392_v25 = vmov 0  ;;  %vm16246_vm15 = vcmp.ge.s32.totalorder %v231_v37, 1  ;;  %v2904_v31 = vsel %vm16238_vm14, %v2712_v23, 0.0  ;;  %v109_v23 = vadd.s32 304, %v15488_v5 }
  0xc2   :  { %v20393_v25 = vsel %vm16238_vm14, 4294967295, %v20392_v25  ;;  %v20396_v45 = vsel %vm16246_vm15, 4294967295, %v20395_v45  ;;  %v2906_v33 = vsel %vm16246_vm15, %v2714_v12, 0.0  ;;  %v2953_v37 = vpack.c.bf16 %v2713_v13, %v2904_v31  ;;  %v2719_v31 = vld [vmem:[%s19985_s0 + $0x138] sm:$0xff] }
  0xc3   :  { %20394 = vst [vmem:[#allocation43_spill] sm:$0xff] %v20393_v25  ;;  %20397 = vst [vmem:[#allocation44_spill] sm:$0xff] %v20396_v45  ;;  %v2716_v25 = vld [vmem:[%s19985_s0 + $0x120] sm:$0xff]  ;;  %v111_v12 = vadd.s32 320, %v15488_v5  ;;  %vm20406_vm14 = vcmask 64512   ;;  %v20411_v45 = vmov 0 }
  0xc4   :  { %vm20407_vm15 = vmmov %vm20406_vm14 }
  0xc8   :  { %13658 = vmatmul.mubr.msk.bf16.gmra.mrb[24].mxu0 %vm20398_vm1, %v2951_v38  ;;  %v2954_v38 = vpack.c.bf16 %v2715_v62, %v2906_v33  ;;  %vm16266_vm1 = vcmp.ge.s32.totalorder %v233_v16, 1  ;;  %v237_v33 = vand.u32 15, %v109_v23  ;;  %v239_v16 = vand.u32 15, %v111_v12  ;;  %v2722_v23 = vld [vmem:[%s19985_s0 + $0x150] sm:$0xff]  ;;  %v2721_v12 = vld [vmem:[%s19985_s0 + $0x148] sm:$0xff] }
  0xc9   :  { %13661 = vmatprep.mubr.msk.bf16.mxu0 %vm20399_vm0, %v2952_v40  ;;  %v20400_v40 = vmov 0  ;;  %vm16274_vm0 = vcmp.ge.s32.totalorder %v235_v42, 1  ;;  %v2908_v13 = vsel %vm16266_vm1, %v2716_v25, 0.0  ;;  %v113_v25 = vadd.s32 336, %v15488_v5 }
  0xca   :  { %v20401_v40 = vsel %vm16266_vm1, 4294967295, %v20400_v40  ;;  %v20404_v6 = vsel %vm16274_vm0, 4294967295, %v20403_v6  ;;  %v2910_v62 = vsel %vm16274_vm0, %v2718_v7, 0.0  ;;  %v2955_v42 = vpack.c.bf16 %v2717_v29, %v2908_v13  ;;  %v2723_v13 = vld [vmem:[%s19985_s0 + $0x158] sm:$0xff] }
  0xcb   :  { %20402 = vst [vmem:[#allocation45_spill] sm:$0xff] %v20401_v40  ;;  %20405 = vst [vmem:[#allocation46_spill] sm:$0xff] %v20404_v6  ;;  %v2720_v40 = vld [vmem:[%s19985_s0 + $0x140] sm:$0xff]  ;;  %v115_v7 = vadd.s32 352, %v15488_v5  ;;  %vm20414_vm0 = vcmask 64512   ;;  %v20419_v6 = vmov 0 }
  0xcc   :  { %vm20415_vm1 = vmmov %vm20414_vm0 }
  0xd0   :  { %13662 = vmatmul.mubr.msk.bf16.gmra.mrb[28].mxu0 %vm20406_vm14, %v2953_v37  ;;  %v2956_v37 = vpack.c.bf16 %v2719_v31, %v2910_v62  ;;  %vm16294_vm14 = vcmp.ge.s32.totalorder %v237_v33, 1  ;;  %v241_v62 = vand.u32 15, %v113_v25  ;;  %v243_v33 = vand.u32 15, %v115_v7  ;;  %v2726_v25 = vld [vmem:[%s19985_s0 + $0x170] sm:$0xff]  ;;  %v2725_v7 = vld [vmem:[%s19985_s0 + $0x168] sm:$0xff] }
  0xd1   :  { %13665 = vmatprep.mubr.msk.bf16.mxu0 %vm20407_vm15, %v2954_v38  ;;  %v20408_v38 = vmov 0  ;;  %vm16302_vm15 = vcmp.ge.s32.totalorder %v239_v16, 1  ;;  %v2912_v29 = vsel %vm16294_vm14, %v2720_v40, 0.0  ;;  %v117_v40 = vadd.s32 368, %v15488_v5 }
  0xd2   :  { %v20409_v38 = vsel %vm16294_vm14, 4294967295, %v20408_v38  ;;  %v20412_v45 = vsel %vm16302_vm15, 4294967295, %v20411_v45  ;;  %v2914_v31 = vsel %vm16302_vm15, %v2722_v23, 0.0  ;;  %v2957_v16 = vpack.c.bf16 %v2721_v12, %v2912_v29  ;;  %v2727_v29 = vld [vmem:[%s19985_s0 + $0x178] sm:$0xff] }
  0xd3   :  { %20410 = vst [vmem:[#allocation47_spill] sm:$0xff] %v20409_v38  ;;  %20413 = vst [vmem:[#allocation48_spill] sm:$0xff] %v20412_v45  ;;  %v2724_v38 = vld [vmem:[%s19985_s0 + $0x160] sm:$0xff]  ;;  %v119_v23 = vadd.s32 384, %v15488_v5  ;;  %vm20422_vm15 = vcmask 64512   ;;  %v20427_v45 = vmov 0 }
  0xd4   :  { %vm20423_vm14 = vmmov %vm20422_vm15 }
  0xd8   :  { %13666 = vmatmul.mubr.msk.bf16.gmra.mrb[32].mxu0 %vm20414_vm0, %v2955_v42  ;;  %v2958_v42 = vpack.c.bf16 %v2723_v13, %v2914_v31  ;;  %vm16322_vm0 = vcmp.ge.s32.totalorder %v241_v62, 1  ;;  %v245_v31 = vand.u32 15, %v117_v40  ;;  %v247_v62 = vand.u32 15, %v119_v23  ;;  %v2730_v40 = vld [vmem:[%s19985_s0 + $0x190] sm:$0xff]  ;;  %v2729_v23 = vld [vmem:[%s19985_s0 + $0x188] sm:$0xff] }
  0xd9   :  { %13669 = vmatprep.mubr.msk.bf16.mxu0 %vm20415_vm1, %v2956_v37  ;;  %v20416_v37 = vmov 0  ;;  %vm16330_vm1 = vcmp.ge.s32.totalorder %v243_v33, 1  ;;  %v2916_v12 = vsel %vm16322_vm0, %v2724_v38, 0.0  ;;  %v121_v38 = vadd.s32 400, %v15488_v5 }
  0xda   :  { %v20417_v37 = vsel %vm16322_vm0, 4294967295, %v20416_v37  ;;  %v20420_v6 = vsel %vm16330_vm1, 4294967295, %v20419_v6  ;;  %v2918_v13 = vsel %vm16330_vm1, %v2726_v25, 0.0  ;;  %v2959_v33 = vpack.c.bf16 %v2725_v7, %v2916_v12  ;;  %v2731_v12 = vld [vmem:[%s19985_s0 + $0x198] sm:$0xff] }
  0xdb   :  { %20418 = vst [vmem:[#allocation49_spill] sm:$0xff] %v20417_v37  ;;  %20421 = vst [vmem:[#allocation50_spill] sm:$0xff] %v20420_v6  ;;  %v2728_v37 = vld [vmem:[%s19985_s0 + $0x180] sm:$0xff]  ;;  %v123_v25 = vadd.s32 416, %v15488_v5  ;;  %vm20430_vm1 = vcmask 64512   ;;  %v20435_v6 = vmov 0 }
  0xdc   :  { %vm20431_vm0 = vmmov %vm20430_vm1 }
  0xe0   :  { %13670 = vmatmul.mubr.msk.bf16.gmra.mrb[36].mxu0 %vm20422_vm15, %v2957_v16  ;;  %v2960_v16 = vpack.c.bf16 %v2727_v29, %v2918_v13  ;;  %vm16350_vm15 = vcmp.ge.s32.totalorder %v245_v31, 1  ;;  %v249_v13 = vand.u32 15, %v121_v38  ;;  %v251_v31 = vand.u32 15, %v123_v25  ;;  %v2734_v38 = vld [vmem:[%s19985_s0 + $0x1b0] sm:$0xff]  ;;  %v2733_v25 = vld [vmem:[%s19985_s0 + $0x1a8] sm:$0xff] }
  0xe1   :  { %13673 = vmatprep.mubr.msk.bf16.mxu0 %vm20423_vm14, %v2958_v42  ;;  %v20424_v42 = vmov 0  ;;  %vm16358_vm14 = vcmp.ge.s32.totalorder %v247_v62, 1  ;;  %v2920_v7 = vsel %vm16350_vm15, %v2728_v37, 0.0  ;;  %v125_v37 = vadd.s32 432, %v15488_v5 }
  0xe2   :  { %v20425_v42 = vsel %vm16350_vm15, 4294967295, %v20424_v42  ;;  %v20428_v45 = vsel %vm16358_vm14, 4294967295, %v20427_v45  ;;  %v2922_v29 = vsel %vm16358_vm14, %v2730_v40, 0.0  ;;  %v2961_v62 = vpack.c.bf16 %v2729_v23, %v2920_v7  ;;  %v2735_v7 = vld [vmem:[%s19985_s0 + $0x1b8] sm:$0xff] }
  0xe3   :  { %20426 = vst [vmem:[#allocation51_spill] sm:$0xff] %v20425_v42  ;;  %20429 = vst [vmem:[#allocation52_spill] sm:$0xff] %v20428_v45  ;;  %v2732_v42 = vld [vmem:[%s19985_s0 + $0x1a0] sm:$0xff]  ;;  %v127_v40 = vadd.s32 448, %v15488_v5  ;;  %vm20438_vm14 = vcmask 64512   ;;  %v20443_v45 = vmov 0 }
  0xe4   :  { %vm20439_vm15 = vmmov %vm20438_vm14 }
  0xe8   :  { %13674 = vmatmul.mubr.msk.bf16.gmra.mrb[40].mxu0 %vm20430_vm1, %v2959_v33  ;;  %v2962_v33 = vpack.c.bf16 %v2731_v12, %v2922_v29  ;;  %vm16378_vm1 = vcmp.ge.s32.totalorder %v249_v13, 1  ;;  %v253_v29 = vand.u32 15, %v125_v37  ;;  %v255_v13 = vand.u32 15, %v127_v40  ;;  %v2738_v37 = vld [vmem:[%s19985_s0 + $0x1d0] sm:$0xff]  ;;  %v2737_v40 = vld [vmem:[%s19985_s0 + $0x1c8] sm:$0xff] }
  0xe9   :  { %13677 = vmatprep.mubr.msk.bf16.mxu0 %vm20431_vm0, %v2960_v16  ;;  %v20432_v16 = vmov 0  ;;  %vm16386_vm0 = vcmp.ge.s32.totalorder %v251_v31, 1  ;;  %v2924_v23 = vsel %vm16378_vm1, %v2732_v42, 0.0  ;;  %v129_v42 = vadd.s32 464, %v15488_v5 }
  0xea   :  { %v20433_v16 = vsel %vm16378_vm1, 4294967295, %v20432_v16  ;;  %v20436_v6 = vsel %vm16386_vm0, 4294967295, %v20435_v6  ;;  %v2926_v12 = vsel %vm16386_vm0, %v2734_v38, 0.0  ;;  %v2963_v31 = vpack.c.bf16 %v2733_v25, %v2924_v23  ;;  %v2739_v23 = vld [vmem:[%s19985_s0 + $0x1d8] sm:$0xff] }
  0xeb   :  { %20434 = vst [vmem:[#allocation53_spill] sm:$0xff] %v20433_v16  ;;  %20437 = vst [vmem:[#allocation54_spill] sm:$0xff] %v20436_v6  ;;  %v2736_v16 = vld [vmem:[%s19985_s0 + $0x1c0] sm:$0xff]  ;;  %v131_v38 = vadd.s32 480, %v15488_v5  ;;  %vm20446_vm0 = vcmask 64512   ;;  %v20451_v6 = vmov 0 }
  0xec   :  { %vm20447_vm1 = vmmov %vm20446_vm0 }
  0xf0   :  { %13678 = vmatmul.mubr.msk.bf16.gmra.mrb[44].mxu0 %vm20438_vm14, %v2961_v62  ;;  %v2964_v62 = vpack.c.bf16 %v2735_v7, %v2926_v12  ;;  %vm16406_vm14 = vcmp.ge.s32.totalorder %v253_v29, 1  ;;  %v257_v12 = vand.u32 15, %v129_v42  ;;  %v259_v29 = vand.u32 15, %v131_v38  ;;  %v2742_v42 = vld [vmem:[%s19985_s0 + $0x1f0] sm:$0xff] }
  0xf1   :  { %13681 = vmatprep.mubr.msk.bf16.mxu0 %vm20439_vm15, %v2962_v33  ;;  %v20440_v33 = vmov 0  ;;  %vm16414_vm15 = vcmp.ge.s32.totalorder %v255_v13, 1  ;;  %v2928_v25 = vsel %vm16406_vm14, %v2736_v16, 0.0  ;;  %v133_v16 = vadd.s32 496, %v15488_v5 }
  0xf2   :  { %v20441_v33 = vsel %vm16406_vm14, 4294967295, %v20440_v33  ;;  %v20444_v45 = vsel %vm16414_vm15, 4294967295, %v20443_v45  ;;  %v2930_v7 = vsel %vm16414_vm15, %v2738_v37, 0.0  ;;  %v2965_v13 = vpack.c.bf16 %v2737_v40, %v2928_v25  ;;  %v2741_v37 = vld [vmem:[%s19985_s0 + $0x1e8] sm:$0xff]  ;;  %v2743_v40 = vld [vmem:[%s19985_s0 + $0x1f8] sm:$0xff] }
  0xf3   :  { %20442 = vst [vmem:[#allocation55_spill] sm:$0xff] %v20441_v33  ;;  %20445 = vst [vmem:[#allocation56_spill] sm:$0xff] %v20444_v45  ;;  %v2740_v33 = vld [vmem:[%s19985_s0 + $0x1e0] sm:$0xff]  ;;  %vm20454_vm15 = vcmask 64512  }
  0xf4   :  { %vm20455_vm14 = vmmov %vm20454_vm15  ;;  %v3446_v45 = vld [vmem:[%s19985_s0 + $0xc1] sm:$0xff] }
  0xf8   :  { %13682 = vmatmul.mubr.msk.bf16.gmra.mrb[48].mxu0 %vm20446_vm0, %v2963_v31  ;;  %v2966_v31 = vpack.c.bf16 %v2739_v23, %v2930_v7  ;;  %vm16434_vm0 = vcmp.ge.s32.totalorder %v257_v12, 1  ;;  %v261_v23 = vand.u32 15, %v133_v16  ;;  %v3424_v16 = vld [vmem:[%s19985_s0 + $0x11] sm:$0xff] }
  0xf9   :  { %13685 = vmatprep.mubr.msk.bf16.mxu0 %vm20447_vm1, %v2964_v62  ;;  %v20448_v62 = vmov 0  ;;  %vm16442_vm1 = vcmp.ge.s32.totalorder %v259_v29, 1  ;;  %v2932_v38 = vsel %vm16434_vm0, %v2740_v33, 0.0  ;;  %v20456_v29 = vmov 0  ;;  %v2745_v33 = vld [vmem:[%s19985_s0 + $0x208] sm:$0xff] }
  0xfa   :  { %v20449_v62 = vsel %vm16434_vm0, 4294967295, %v20448_v62  ;;  %v20452_v6 = vsel %vm16442_vm1, 4294967295, %v20451_v6  ;;  %v2934_v25 = vsel %vm16442_vm1, %v2742_v42, 0.0  ;;  %v2967_v7 = vpack.c.bf16 %v2741_v37, %v2932_v38  ;;  %vm20459_vm0 = vmmov %vm20455_vm14  ;;  %v3425_v42 = vld [vmem:[%s19985_s0 + $0x19] sm:$0xff] }
  0xfb   :  { %20450 = vst [vmem:[#allocation57_spill] sm:$0xff] %v20449_v62  ;;  %20453 = vst [vmem:[#allocation58_spill] sm:$0xff] %v20452_v6  ;;  %v2968_v12 = vpack.c.bf16 %v2743_v40, %v2934_v25  ;;  %v16481_v38 = vpack.c.bf16 %v3425_v42, %v3424_v16  ;;  %v3426_v40 = vld [vmem:[%s19985_s0 + $0x21] sm:$0xff]  ;;  %v3427_v25 = vld [vmem:[%s19985_s0 + $0x29] sm:$0xff] }
  0xfc   :  { %v3430_v16 = vld [vmem:[%s19985_s0 + $0x41] sm:$0xff]  ;;  %v3432_v42 = vld [vmem:[%s19985_s0 + $0x51] sm:$0xff]  ;;  %v3443_v62 = vld [vmem:[%s19985_s0 + $0xa9] sm:$0xff] }
  0xfd   :  { %v3442_v6 = vld [vmem:[%s19985_s0 + $0xa1] sm:$0xff] }
 0x100   :  { %13686 = vmatmul.mubr.msk.bf16.gmra.mrb[52].mxu0 %vm20454_vm15, %v2965_v13  ;;  %vm16461_vm15 = vcmp.ge.s32.totalorder %v261_v23, 1  ;;  %v2744_v13 = vld [vmem:[%s19985_s0 + $0x200] sm:$0xff]  ;;  %v3428_v23 = vld [vmem:[%s19985_s0 + $0x31] sm:$0xff] }
 0x101   :  { %13689 = vmatprep.mubr.msk.bf16.mxu0 %vm20455_vm14, %v2966_v31  ;;  %v20457_v29 = vsel %vm16461_vm15, 4294967295, %v20456_v29  ;;  %v2936_v31 = vsel %vm16461_vm15, %v2744_v13, 0.0  ;;  %vm20462_vm15 = vmmov %vm20459_vm0 }
 0x102   :  { %20458 = vst [vmem:[#allocation59_spill] sm:$0xff] %v20457_v29  ;;  %v2969_v37 = vpack.c.bf16 %v2745_v33, %v2936_v31  ;;  %v16507_v31 = vld [vmem:[%s19984_s1 + $0x18] sm:$0xf]  ;;  %v3439_v29 = vld [vmem:[%s19985_s0 + $0x89] sm:$0xff] }
 0x108   :  { %13690 = vmatmul.mubr.msk.bf16.gmra.mrb[56].mxu0 %vm20455_vm14, %v2967_v7  ;;  %vm20460_vm14 = vmmov %vm20459_vm0  ;;  %v3429_v7 = vld [vmem:[%s19985_s0 + $0x39] sm:$0xff] }
 0x109   :  { %13693 = vmatprep.mubr.msk.bf16.mxu0 %vm20459_vm0, %v2968_v12  ;;  %v16498_v12 = vpack.c.bf16 %v3427_v25, %v3426_v40  ;;  %v16500_v13 = vpack.c.bf16 %v3429_v7, %v3428_v23  ;;  %v3434_v23 = vld [vmem:[%s19985_s0 + $0x61] sm:$0xff]  ;;  %v3435_v7 = vld [vmem:[%s19985_s0 + $0x69] sm:$0xff] }
 0x110   :  { %13694 = vmatmul.mubr.msk.bf16.gmra.mrb[60].mxu0 %vm20460_vm14, %v2969_v37  ;;  %vm20461_vm14 = vcmask 1043456   ;;  %v3433_v37 = vld [vmem:[%s19985_s0 + $0x59] sm:$0xff] }
 0x111   :  { %13699 = vmatprep.mubr.msk.bf16.mxu0 %vm20459_vm0, %v16481_v38  ;;  %v4361_v33 = vsel %vm20461_vm14, %v16077_v53, 0  ;;  %v3431_v53 = vld [vmem:[%s19985_s0 + $0x49] sm:$0xff]  ;;  %v16529_v25 = vpack.c.bf16 %v3433_v37, %v3432_v42  ;;  %v3438_v37 = vld [vmem:[%s19985_s0 + $0x81] sm:$0xff] }
 0x112   :  { %v16527_v40 = vpack.c.bf16 %v3431_v53, %v3430_v16  ;;  %v3437_v16 = vld [vmem:[%s19985_s0 + $0x79] sm:$0xff]  ;;  %v16547_v53 = vpack.c.bf16 %v3435_v7, %v3434_v23  ;;  %v3440_v23 = vld [vmem:[%s19985_s0 + $0x91] sm:$0xff] }
 0x113   :  { %v3441_v7 = vld [vmem:[%s19985_s0 + $0x99] sm:$0xff] }
 0x118   :  { %13700 = vmatmul.mubr.msk.bf16.vlgmr.msra.gmra.mrb[0].mxu0 %vm20459_vm0, %v16498_v12 }
 0x119   :  { %13764 = vmatpush3.bf16.msra.mxu0 %v4361_v33  ;;  %13703 = vmatprep.mubr.msk.bf16.mxu0 %vm20462_vm15, %v16500_v13  ;;  %vm20463_vm15 = vmmov %vm20459_vm0  ;;  %v3436_v33 = vld [vmem:[%s19985_s0 + $0x71] sm:$0xff] }
 0x11a   :  { %14996 = vmatprep.subr.msk.bf16.mxu0 %vm20461_vm14, %v16507_v31  ;;  %v16549_v42 = vpack.c.bf16 %v3437_v16, %v3436_v33  ;;  %vm20464_vm14 = vmmov %vm20459_vm0  ;;  %v16567_v33 = vpack.c.bf16 %v3439_v29, %v3438_v37  ;;  %v16569_v16 = vpack.c.bf16 %v3441_v7, %v3440_v23  ;;  %v3444_v29 = vld [vmem:[%s19985_s0 + $0xb1] sm:$0xff]  ;;  %v3445_v37 = vld [vmem:[%s19985_s0 + $0xb9] sm:$0xff]  ;;  %v16587_v23 = vpack.c.bf16 %v3443_v62, %v3442_v6 }
 0x11b   :  { %v16589_v7 = vpack.c.bf16 %v3445_v37, %v3444_v29  ;;  %v3448_v6 = vld [vmem:[%s19985_s0 + $0xd1] sm:$0xff]  ;;  %v3449_v62 = vld [vmem:[%s19985_s0 + $0xd9] sm:$0xff]  ;;  %v16607_v29 = vpack.c.bf16 %v3447_v47, %v3446_v45 }
 0x11c   :  { %v16609_v37 = vpack.c.bf16 %v3449_v62, %v3448_v6  ;;  %v3452_v47 = vld [vmem:[%s19985_s0 + $0xf1] sm:$0xff]  ;;  %v3453_v45 = vld [vmem:[%s19985_s0 + $0xf9] sm:$0xff]  ;;  %v16627_v6 = vpack.c.bf16 %v3451_v51, %v3450_v50 }
 0x11d   :  { %v16629_v62 = vpack.c.bf16 %v3453_v45, %v3452_v47  ;;  %v3456_v51 = vld [vmem:[%s19985_s0 + $0x111] sm:$0xff]  ;;  %v3457_v50 = vld [vmem:[%s19985_s0 + $0x119] sm:$0xff]  ;;  %v3503_v47 = vpack.c.bf16 %v3455_v15, %v3454_v60  ;;  %v16664_v60 = vpack.c.bf16 %v3459_v17, %v3458_v52 }
 0x11e   :  { %v16647_v45 = vpack.c.bf16 %v3457_v50, %v3456_v51  ;;  %v3461_v15 = vld [vmem:[%s19985_s0 + $0x139] sm:$0xff]  ;;  %v3462_v50 = vld [vmem:[%s19985_s0 + $0x141] sm:$0xff]  ;;  %v3464_v17 = vld [vmem:[%s19985_s0 + $0x151] sm:$0xff] }
 0x11f   :  { %v16666_v51 = vpack.c.bf16 %v3461_v15, %v3460_v14  ;;  %v3465_v14 = vld [vmem:[%s19985_s0 + $0x159] sm:$0xff] }
 0x120   :  { %13704 = vmatmul.mubr.msk.bf16.gmra.mrb[4].mxu0 %vm20463_vm15, %v16527_v40  ;;  %vm20465_vm15 = vmmov %vm20459_vm0  ;;  %v16686_v15 = vpack.c.bf16 %v3465_v14, %v3464_v17  ;;  %v16704_v17 = vpack.c.bf16 %v3467_v58, %v3466_v57  ;;  %v3472_v57 = vld [vmem:[%s19985_s0 + $0x191] sm:$0xff]  ;;  %v3473_v58 = vld [vmem:[%s19985_s0 + $0x199] sm:$0xff] }
 0x121   :  { %13707 = vmatprep.mubr.msk.bf16.mxu0 %vm20459_vm0, %v16529_v25 }
 0x128   :  { %13708 = vmatmul.mubr.msk.bf16.gmra.mrb[8].mxu0 %vm20464_vm14, %v16547_v53  ;;  %vm20466_vm14 = vmmov %vm20459_vm0 }
 0x129   :  { %13711 = vmatprep.mubr.msk.bf16.mxu0 %vm20465_vm15, %v16549_v42  ;;  %vm20467_vm15 = vmmov %vm20459_vm0 }
 0x130   :  { %13712 = vmatmul.mubr.msk.bf16.gmra.mrb[12].mxu0 %vm20459_vm0, %v16567_v33 }
 0x131   :  { %13715 = vmatprep.mubr.msk.bf16.mxu0 %vm20466_vm14, %v16569_v16  ;;  %vm20468_vm14 = vmmov %vm20459_vm0 }
 0x138   :  { %13716 = vmatmul.mubr.msk.bf16.gmra.mrb[16].mxu0 %vm20467_vm15, %v16587_v23  ;;  %vm20469_vm15 = vmmov %vm20459_vm0 }
 0x139   :  { %13719 = vmatprep.mubr.msk.bf16.mxu0 %vm20459_vm0, %v16589_v7 }
 0x140   :  { %13720 = vmatmul.mubr.msk.bf16.gmra.mrb[20].mxu0 %vm20468_vm14, %v16607_v29  ;;  %vm20470_vm14 = vmmov %vm20459_vm0 }
 0x141   :  { %13723 = vmatprep.mubr.msk.bf16.mxu0 %vm20469_vm15, %v16609_v37  ;;  %vm20471_vm15 = vmmov %vm20459_vm0 }
 0x148   :  { %13724 = vmatmul.mubr.msk.bf16.gmra.mrb[24].mxu0 %vm20459_vm0, %v16627_v6 }
 0x149   :  { %13727 = vmatprep.mubr.msk.bf16.mxu0 %vm20470_vm14, %v16629_v62  ;;  %vm20472_vm14 = vmmov %vm20459_vm0 }
 0x150   :  { %13728 = vmatmul.mubr.msk.bf16.gmra.mrb[28].mxu0 %vm20471_vm15, %v3503_v47  ;;  %vm20473_vm15 = vmmov %vm20459_vm0  ;;  %v3463_v47 = vld [vmem:[%s19985_s0 + $0x149] sm:$0xff] }
 0x151   :  { %13731 = vmatprep.mubr.msk.bf16.mxu0 %vm20459_vm0, %v16647_v45  ;;  %v16684_v52 = vpack.c.bf16 %v3463_v47, %v3462_v50  ;;  %v3468_v50 = vld [vmem:[%s19985_s0 + $0x171] sm:$0xff]  ;;  %v3469_v47 = vld [vmem:[%s19985_s0 + $0x179] sm:$0xff] }
 0x152   :  { %v16706_v14 = vpack.c.bf16 %v3469_v47, %v3468_v50  ;;  %v16724_v50 = vpack.c.bf16 %v3471_v19, %v3470_v0  ;;  %v16726_v47 = vpack.c.bf16 %v3473_v58, %v3472_v57  ;;  %v3476_v19 = vld [vmem:[%s19985_s0 + $0x1b1] sm:$0xff]  ;;  %v3477_v0 = vld [vmem:[%s19985_s0 + $0x1b9] sm:$0xff]  ;;  %v16744_v57 = vpack.c.bf16 %v3475_v46, %v3474_v63 }
 0x153   :  { %v16746_v58 = vpack.c.bf16 %v3477_v0, %v3476_v19  ;;  %v3480_v46 = vld [vmem:[%s19985_s0 + $0x1d1] sm:$0xff]  ;;  %v3481_v63 = vld [vmem:[%s19985_s0 + $0x1d9] sm:$0xff] }
 0x154   :  { %20476 = vst [vmem:[#allocation60_spill] sm:$0xff] %v16724_v50  ;;  %20477 = vst [vmem:[#allocation61_spill] sm:$0xff] %v16726_v47  ;;  %v16766_v0 = vpack.c.bf16 %v3481_v63, %v3480_v46  ;;  %v3485_v46 = vld [vmem:[%s19985_s0 + $0x1f9] sm:$0xff] }
 0x155   :  { %20480 = vst [vmem:[#allocation62_spill] sm:$0xff] %v16744_v57  ;;  %20481 = vst [vmem:[#allocation63_spill] sm:$0xff] %v16746_v58 }
 0x156   :  { %20484 = vst [vmem:[#allocation65_spill] sm:$0xff] %v16766_v0 }
 0x158   :  { %13732 = vmatmul.mubr.msk.bf16.gmra.mrb[32].mxu0 %vm20472_vm14, %v16664_v60  ;;  %vm20474_vm14 = vmmov %vm20459_vm0 }
 0x159   :  { %13735 = vmatprep.mubr.msk.bf16.mxu0 %vm20473_vm15, %v16666_v51  ;;  %vm20475_vm15 = vmmov %vm20459_vm0 }
 0x160   :  { %13736 = vmatmul.mubr.msk.bf16.gmra.mrb[36].mxu0 %vm20459_vm0, %v16684_v52 }
 0x161   :  { %13739 = vmatprep.mubr.msk.bf16.mxu0 %vm20474_vm14, %v16686_v15  ;;  %vm20478_vm14 = vmmov %vm20459_vm0 }
 0x168   :  { %13740 = vmatmul.mubr.msk.bf16.gmra.mrb[40].mxu0 %vm20475_vm15, %v16704_v17  ;;  %vm20479_vm15 = vmmov %vm20459_vm0 }
 0x169   :  { %13743 = vmatprep.mubr.msk.bf16.mxu0 %vm20459_vm0, %v16706_v14 }
 0x170   :  { %13744 = vmatmul.mubr.msk.bf16.gmra.mrb[44].mxu0 %vm20478_vm14, %v16724_v50  ;;  %vm20482_vm14 = vmmov %vm20459_vm0  ;;  %v3978_v50 = vld [vmem:[%s19985_s0 + $0x32] sm:$0xff] }
 0x171   :  { %13747 = vmatprep.mubr.msk.bf16.mxu0 %vm20479_vm15, %v16726_v47  ;;  %v3479_v47 = vld [vmem:[%s19985_s0 + $0x1c9] sm:$0xff]  ;;  %vm20486_vm15 = vmmov %vm20459_vm0 }
 0x172   :  { %v16764_v19 = vpack.c.bf16 %v3479_v47, %v3478_v43  ;;  %v3483_v43 = vld [vmem:[%s19985_s0 + $0x1e9] sm:$0xff]  ;;  %v3484_v47 = vld [vmem:[%s19985_s0 + $0x1f1] sm:$0xff] }
 0x174   :  { %20483 = vst [vmem:[#allocation64_spill] sm:$0xff] %v16764_v19 }
 0x178   :  { %13748 = vmatmul.mubr.msk.bf16.gmra.mrb[48].mxu0 %vm20459_vm0, %v16744_v57  ;;  %v3482_v57 = vld [vmem:[%s19985_s0 + $0x1e1] sm:$0xff] }
 0x179   :  { %13751 = vmatprep.mubr.msk.bf16.mxu0 %vm20482_vm14, %v16746_v58  ;;  %v16769_v58 = vadd.s32 8, %v15488_v5 }
 0x17b   :  { %20485 = vst [vmem:[#allocation66_spill] sm:$0xff] %v16769_v58  ;;  %v20184_v63 = vand.u32 15, %v16769_v58 }
 0x17d   :  { %vm16794_vm14 = vcmp.lt.s32.totalorder %v20184_v63, 15 }
 0x180   :  { %13752 = vmatmul.mubr.msk.bf16.gmra.mrb[52].mxu0 %vm20486_vm15, %v16764_v19  ;;  %v16788_v19 = vpack.c.bf16 %v3483_v43, %v3482_v57  ;;  %vm20491_vm15 = vmmov %vm20459_vm0  ;;  %v3486_v57 = vld [vmem:[%s19985_s0 + $0x201] sm:$0xff]  ;;  %v3487_v43 = vld [vmem:[%s19985_s0 + $0x209] sm:$0xff] }
 0x181   :  { %13755 = vmatprep.mubr.msk.bf16.mxu0 %vm20459_vm0, %v16766_v0  ;;  %v16790_v0 = vpack.c.bf16 %v3485_v46, %v3484_v47  ;;  %v3974_v47 = vld [vmem:[%s19985_s0 + $0x12] sm:$0xff]  ;;  %v4167_v46 = vsel %vm16794_vm14, %v3975_v2, 0.0  ;;  %v3519_v63 = vpack.c.bf16 %v3487_v43, %v3486_v57  ;;  %v20493_v57 = vsel %vm15542_vm3, %v15549_v22, 0.0  ;;  %vm20495_vm3 = vmmov %vm20459_vm0  ;;  %v3980_v22 = vld [vmem:[%s19985_s0 + $0x42] sm:$0xff] }
 0x182   :  { %20487 = vst [vmem:[#allocation67_spill] sm:$0xff] %v16788_v19  ;;  %v4230_v58 = vpack.c.bf16 %v4167_v46, %v3974_v47  ;;  %v3983_v46 = vld [vmem:[%s19985_s0 + $0x5a] sm:$0xff] }
 0x183   :  { %20488 = vst [vmem:[#allocation68_spill] sm:$0xff] %v16790_v0 }
 0x188   :  { %13756 = vmatmul.mubr.msk.bf16.gmra.mrb[56].mxu0 %vm20491_vm15, %v16788_v19  ;;  %vm20492_vm15 = vmmov %vm20459_vm0  ;;  %v3976_v19 = vld [vmem:[%s19985_s0 + $0x22] sm:$0xff] }
 0x189   :  { %13759 = vmatprep.mubr.msk.bf16.mxu0 %vm20459_vm0, %v16790_v0  ;;  %v3979_v0 = vld [vmem:[%s19985_s0 + $0x3a] sm:$0xff]  ;;  %v4231_v43 = vpack.c.bf16 %v20493_v57, %v3976_v19  ;;  %v4175_v19 = vsel %vm15606_vm6, %v3983_v46, 0.0 }
 0x18a   :  { %v4171_v2 = vsel %vm15575_vm4, %v3979_v0, 0.0  ;;  %v16844_v0 = vld [vmem:[%s19984_s1 + $0x1c] sm:$0xf] }
 0x18b   :  { %v4232_v47 = vpack.c.bf16 %v4171_v2, %v3978_v50  ;;  %v3982_v50 = vld [vmem:[%s19985_s0 + $0x52] sm:$0xff] }
 0x18c   :  { %v4234_v57 = vpack.c.bf16 %v4175_v19, %v3982_v50  ;;  %v15396_v19 = vld [vmem:[%s19984_s1] sm:$0xf] }
 0x190   :  { %13760 = vmatmul.mubr.msk.bf16.gmra.mrb[60].mxu0 %vm20492_vm15, %v3519_v63  ;;  %vm20494_vm15 = vcmask 1043456   ;;  %v3981_v63 = vld [vmem:[%s19985_s0 + $0x4a] sm:$0xff] }
 0x191   :  { %13765 = vmatprep.mubr.msk.bf16.mxu0 %vm20459_vm0, %v4230_v58  ;;  %v5231_v58 = vsel %vm20494_vm15, %v16507_v31, 0  ;;  %v4173_v31 = vsel %vm15596_vm5, %v3981_v63, 0.0  ;;  %v3984_v63 = vld [vmem:[%s19985_s0 + $0x62] sm:$0xff]  ;;  %vm20497_vm6 = vmmov %vm20494_vm15 }
 0x192   :  { %v4233_v2 = vpack.c.bf16 %v4173_v31, %v3980_v22  ;;  %v3986_v31 = vld [vmem:[%s19985_s0 + $0x72] sm:$0xff] }
 0x198   :  { %13766 = vmatmul.mubr.msk.bf16.vlgmr.msra.gmra.mrb[0].mxu0 %vm20459_vm0, %v4231_v43  ;;  %v3985_v43 = vld [vmem:[%s19985_s0 + $0x6a] sm:$0xff] }
 0x199   :  { %13830 = vmatpush3.bf16.msra.mxu0 %v5231_v58  ;;  %13769 = vmatprep.mubr.msk.bf16.mxu0 %vm20495_vm3, %v4232_v47  ;;  %v3987_v47 = vld [vmem:[%s19985_s0 + $0x7a] sm:$0xff]  ;;  %vm20496_vm3 = vmmov %vm20459_vm0  ;;  %v12326_v58 = vld [vmem:[%s19984_s1 + $0x4] sm:$0xf]  ;;  %v4177_v46 = vsel %vm15638_vm7, %v3985_v43, 0.0 }
 0x19a   :  { %14997 = vmatprep.subr.msk.bf16.mxu0 %vm20494_vm15, %v16844_v0  ;;  %14989 = vmatprep.subr.msk.bf16.mxu1 %vm20494_vm15, %v12326_v58  ;;  %v1133_v22 = vsel %vm20497_vm6, %v12326_v58, 0  ;;  %v4179_v50 = vsel %vm15648_vm8, %v3987_v47, 0.0  ;;  %v3989_v43 = vld [vmem:[%s19985_s0 + $0x8a] sm:$0xff]  ;;  %v3991_v47 = vld [vmem:[%s19985_s0 + $0x9a] sm:$0xff]  ;;  %vm20500_vm15 = vmmov %vm20459_vm0 }
 0x19b   :  { %13434 = vmatpush3.bf16.msra.mxu1 %v1133_v22  ;;  %v4181_v58 = vsel %vm15669_vm9, %v3989_v43, 0.0  ;;  %v3993_v22 = vld [vmem:[%s19985_s0 + $0xaa] sm:$0xff] }
 0x19c   :  { %v3997_v43 = vld [vmem:[%s19985_s0 + $0xca] sm:$0xff] }
 0x19e   :  { %13436 = vmatmul.mubr.msk.bf16.vlgmr.msra.gmra.mrb[0].mxu1 %vm20459_vm0, %v16481_v38  ;;  %v3988_v38 = vld [vmem:[%s19985_s0 + $0x82] sm:$0xff] }
 0x1a0   :  { %13770 = vmatmul.mubr.msk.bf16.gmra.mrb[4].mxu0 %vm20496_vm3, %v4233_v2  ;;  %vm20498_vm3 = vmmov %vm20497_vm6  ;;  %v4235_v2 = vpack.c.bf16 %v4177_v46, %v3984_v63  ;;  %v4237_v63 = vpack.c.bf16 %v4181_v58, %v3988_v38  ;;  %v3996_v38 = vld [vmem:[%s19985_s0 + $0xc2] sm:$0xff]  ;;  %v3998_v58 = vld [vmem:[%s19985_s0 + $0xd2] sm:$0xff] }
 0x1a1   :  { %13773 = vmatprep.mubr.msk.bf16.mxu0 %vm20459_vm0, %v4234_v57  ;;  %14991 = vmatprep.subr.msk.bf16.mxu1 %vm20498_vm3, %v15396_v19  ;;  %v4236_v57 = vpack.c.bf16 %v4179_v50, %v3986_v31  ;;  %vm20499_vm6 = vmmov %vm20459_vm0  ;;  %v3995_v31 = vld [vmem:[%s19985_s0 + $0xba] sm:$0xff]  ;;  %v3992_v50 = vld [vmem:[%s19985_s0 + $0xa2] sm:$0xff] }
 0x1a2   :  { %13439 = vmatprep.mubr.msk.bf16.mxu1 %vm20499_vm6, %v16498_v12  ;;  %14316 = vmatpush3.bf16.msra.mxu1 %v15486_v4  ;;  %vm20501_vm3 = vmmov %vm20459_vm0  ;;  %v3990_v12 = vld [vmem:[%s19985_s0 + $0x92] sm:$0xff]  ;;  %v4183_v4 = vsel %vm15677_vm10, %v3991_v47, 0.0  ;;  %v3999_v47 = vld [vmem:[%s19985_s0 + $0xda] sm:$0xff] }
 0x1a3   :  { %v4238_v46 = vpack.c.bf16 %v4183_v4, %v3990_v12  ;;  %vm20502_vm6 = vmmov %vm20459_vm0  ;;  %v3994_v19 = vld [vmem:[%s19985_s0 + $0xb2] sm:$0xff] }
 0x1a6   :  { %13440 = vmatmul.mubr.msk.bf16.gmra.mrb[4].mxu1 %vm20459_vm0, %v16500_v13  ;;  %v4185_v13 = vsel %vm15704_vm12, %v3993_v22, 0.0  ;;  %v104_v22 = vadd.s32 264, %v15488_v5 }
 0x1a7   :  { %13443 = vmatprep.mubr.msk.bf16.mxu1 %vm20502_vm6, %v16527_v40  ;;  %v4187_v40 = vsel %vm15718_vm13, %v3995_v31, 0.0  ;;  %vm20505_vm6 = vmmov %vm20459_vm0 }
 0x1a8   :  { %13774 = vmatmul.mubr.msk.bf16.gmra.mrb[8].mxu0 %vm20500_vm15, %v4235_v2  ;;  %vm20503_vm15 = vmmov %vm20459_vm0  ;;  %v4239_v2 = vpack.c.bf16 %v4185_v13, %v3992_v50  ;;  %v232_v13 = vand.u32 15, %v104_v22  ;;  %v4013_v22 = vld [vmem:[%s19985_s0 + $0x14a] sm:$0xff] }
 0x1a9   :  { %13777 = vmatprep.mubr.msk.bf16.mxu0 %vm20501_vm3, %v4236_v57  ;;  %vm20504_vm3 = vmmov %vm20459_vm0  ;;  %v4240_v57 = vpack.c.bf16 %v4187_v40, %v3994_v19 }
 0x1ae   :  { %13444 = vmatmul.mubr.msk.bf16.gmra.mrb[8].mxu1 %vm20459_vm0, %v16529_v25 }
 0x1af   :  { %13447 = vmatprep.mubr.msk.bf16.mxu1 %vm20505_vm6, %v16547_v53  ;;  %vm20509_vm6 = vnez %v20281_v34 }
 0x1b0   :  { %13778 = vmatmul.mubr.msk.bf16.gmra.mrb[12].mxu0 %vm20503_vm15, %v4237_v63  ;;  %vm20506_vm15 = vmmov %vm20459_vm0  ;;  %v4191_v53 = vsel %vm20509_vm6, %v3999_v47, 0.0  ;;  %v4001_v63 = vld [vmem:[%s19985_s0 + $0xea] sm:$0xff] }
 0x1b1   :  { %13781 = vmatprep.mubr.msk.bf16.mxu0 %vm20504_vm3, %v4238_v46  ;;  %vm20507_vm3 = vmmov %vm20459_vm0  ;;  %vm20508_vm0 = vnez %v20279_v27  ;;  %v4242_v4 = vpack.c.bf16 %v4191_v53, %v3998_v58  ;;  %v4003_v46 = vld [vmem:[%s19985_s0 + $0xfa] sm:$0xff]  ;;  %v4009_v53 = vld [vmem:[%s19985_s0 + $0x12a] sm:$0xff] }
 0x1b2   :  { %v4189_v25 = vsel %vm20508_vm0, %v3997_v43, 0.0  ;;  %vm20511_vm0 = vmmov %vm20507_vm3  ;;  %v4007_v43 = vld [vmem:[%s19985_s0 + $0x11a] sm:$0xff] }
 0x1b3   :  { %v4241_v12 = vpack.c.bf16 %v4189_v25, %v3996_v38  ;;  %vm20512_vm6 = vmmov %vm20511_vm0 }
 0x1b4   :  { %vm20519_vm13 = vmmov %vm20511_vm0 }
 0x1b8   :  { %13782 = vmatmul.mubr.msk.bf16.gmra.mrb[16].mxu0 %vm20506_vm15, %v4239_v2  ;;  %vm20510_vm15 = vmmov %vm20507_vm3  ;;  %v4005_v2 = vld [vmem:[%s19985_s0 + $0x10a] sm:$0xff] }
 0x1b9   :  { %13785 = vmatprep.mubr.msk.bf16.mxu0 %vm20507_vm3, %v4240_v57  ;;  %13448 = vmatmul.mubr.msk.bf16.gmra.mrb[12].mxu1 %vm20510_vm15, %v16549_v42  ;;  %v4000_v42 = vld [vmem:[%s19985_s0 + $0xe2] sm:$0xff]  ;;  %vm20513_vm15 = vnez %v20283_v55  ;;  %v20516_v57 = vmov 0 }
 0x1ba   :  { %13451 = vmatprep.mubr.msk.bf16.mxu1 %vm20507_vm3, %v16567_v33  ;;  %v4193_v31 = vsel %vm20513_vm15, %v4001_v63, 0.0  ;;  %v4002_v33 = vld [vmem:[%s19985_s0 + $0xf2] sm:$0xff]  ;;  %vm20514_vm3 = vnez %v20285_v61  ;;  %vm16984_vm15 = vcmp.lt.s32.totalorder %v232_v13, 15 }
 0x1bb   :  { %v4195_v50 = vsel %vm20514_vm3, %v4003_v46, 0.0  ;;  %v4243_v19 = vpack.c.bf16 %v4193_v31, %v4000_v42  ;;  %v20517_v57 = vsel %vm16984_vm15, 4294967295, %v20516_v57  ;;  %vm20518_vm3 = vmmov %vm20511_vm0  ;;  %v4199_v38 = vsel %vm16984_vm15, %v4007_v43, 0.0  ;;  %v4015_v42 = vld [vmem:[%s19985_s0 + $0x15a] sm:$0xff]  ;;  %v4012_v31 = vld [vmem:[%s19985_s0 + $0x142] sm:$0xff] }
 0x1bc   :  { %v4244_v40 = vpack.c.bf16 %v4195_v50, %v4002_v33  ;;  %v4014_v33 = vld [vmem:[%s19985_s0 + $0x152] sm:$0xff]  ;;  %v4016_v43 = vld [vmem:[%s19985_s0 + $0x162] sm:$0xff] }
 0x1c0   :  { %13786 = vmatmul.mubr.msk.bf16.gmra.mrb[20].mxu0 %vm20511_vm0, %v4241_v12  ;;  %v4008_v12 = vld [vmem:[%s19985_s0 + $0x122] sm:$0xff] }
 0x1c1   :  { %13789 = vmatprep.mubr.msk.bf16.mxu0 %vm20512_vm6, %v4242_v4  ;;  %13452 = vmatmul.mubr.msk.bf16.gmra.mrb[16].mxu1 %vm20511_vm0, %v16569_v16  ;;  %vm20515_vm6 = vmmov %vm20511_vm0  ;;  %v4004_v16 = vld [vmem:[%s19985_s0 + $0x102] sm:$0xff]  ;;  %vm20520_vm0 = vnez %v20289_v32  ;;  %v4011_v32 = vld [vmem:[%s19985_s0 + $0x13a] sm:$0xff] }
 0x1c2   :  { %13455 = vmatprep.mubr.msk.bf16.mxu1 %vm20515_vm6, %v16587_v23  ;;  %v4197_v47 = vsel %vm20520_vm0, %v4005_v2, 0.0  ;;  %v4006_v23 = vld [vmem:[%s19985_s0 + $0x112] sm:$0xff]  ;;  %vm20522_vm6 = vmmov %vm20518_vm3  ;;  %v4019_v2 = vld [vmem:[%s19985_s0 + $0x17a] sm:$0xff] }
 0x1c3   :  { %v4245_v25 = vpack.c.bf16 %v4197_v47, %v4004_v16  ;;  %v4246_v58 = vpack.c.bf16 %v4199_v38, %v4006_v23  ;;  %vm20523_vm0 = vmmov %vm20518_vm3  ;;  %v4010_v4 = vld [vmem:[%s19985_s0 + $0x132] sm:$0xff] }
 0x1c4   :  { %vm20528_vm15 = vmmov %vm20523_vm0  ;;  %v4018_v16 = vld [vmem:[%s19985_s0 + $0x172] sm:$0xff] }
 0x1c8   :  { %13790 = vmatmul.mubr.msk.bf16.gmra.mrb[24].mxu0 %vm20518_vm3, %v4243_v19  ;;  %v4017_v19 = vld [vmem:[%s19985_s0 + $0x16a] sm:$0xff] }
 0x1c9   :  { %13793 = vmatprep.mubr.msk.bf16.mxu0 %vm20519_vm13, %v4244_v40  ;;  %13456 = vmatmul.mubr.msk.bf16.gmra.mrb[20].mxu1 %vm20518_vm3, %v16589_v7  ;;  %vm20521_vm13 = vmmov %vm20518_vm3  ;;  %vm20524_vm3 = vnez %v20292_v49  ;;  %v20531_v40 = vmov 0.0|0.0  }
 0x1ca   :  { %13459 = vmatprep.mubr.msk.bf16.mxu1 %vm20521_vm13, %v16607_v29  ;;  %v4201_v7 = vsel %vm20524_vm3, %v4009_v53, 0.0  ;;  %vm20525_vm13 = vnez %v20294_v9  ;;  %vm20527_vm3 = vmmov %vm20523_vm0  ;;  %v4020_v53 = vld [vmem:[%s19985_s0 + $0x182] sm:$0xff] }
 0x1cb   :  { %v4203_v29 = vsel %vm20525_vm13, %v4011_v32, 0.0  ;;  %v4247_v63 = vpack.c.bf16 %v4201_v7, %v4008_v12  ;;  %v4022_v32 = vld [vmem:[%s19985_s0 + $0x192] sm:$0xff] }
 0x1cc   :  { %v4248_v46 = vpack.c.bf16 %v4203_v29, %v4010_v4  ;;  %v4025_v4 = vld [vmem:[%s19985_s0 + $0x1aa] sm:$0xff]  ;;  %v4027_v29 = vld [vmem:[%s19985_s0 + $0x1ba] sm:$0xff] }
 0x1d0   :  { %13794 = vmatmul.mubr.msk.bf16.gmra.mrb[28].mxu0 %vm20522_vm6, %v4245_v25  ;;  %vm20526_vm6 = vmmov %vm20523_vm0  ;;  %v4021_v25 = vld [vmem:[%s19985_s0 + $0x18a] sm:$0xff] }
 0x1d1   :  { %13797 = vmatprep.mubr.msk.bf16.mxu0 %vm20523_vm0, %v4246_v58  ;;  %13460 = vmatmul.mubr.msk.bf16.gmra.mrb[24].mxu1 %vm20526_vm6, %v16609_v37  ;;  %vm20529_vm6 = vnez %v20296_v36  ;;  %v4023_v58 = vld [vmem:[%s19985_s0 + $0x19a] sm:$0xff] }
 0x1d2   :  { %13463 = vmatprep.mubr.msk.bf16.mxu1 %vm20523_vm0, %v16627_v6  ;;  %v4205_v37 = vsel %vm20529_vm6, %v4013_v22, 0.0  ;;  %vm20530_vm0 = vnez %v20298_v39  ;;  %vm20533_vm6 = vmmov %vm20527_vm3 }
 0x1d3   :  { %v4207_v6 = vsel %vm20530_vm0, %v4015_v42, 0.0  ;;  %v4249_v50 = vpack.c.bf16 %v4205_v37, %v4012_v31  ;;  %vm20535_vm0 = vnez %v20304_v24  ;;  %v4029_v31 = vld [vmem:[%s19985_s0 + $0x1ca] sm:$0xff]  ;;  %v4031_v37 = vld [vmem:[%s19985_s0 + $0x1da] sm:$0xff] }
 0x1d4   :  { %v4250_v13 = vpack.c.bf16 %v4207_v6, %v4014_v33  ;;  %v4211_v47 = vsel %vm20535_vm0, %v4019_v2, 0.0  ;;  %v4028_v33 = vld [vmem:[%s19985_s0 + $0x1c2] sm:$0xff]  ;;  %v4030_v6 = vld [vmem:[%s19985_s0 + $0x1d2] sm:$0xff] }
 0x1d5   :  { %v4252_v38 = vpack.c.bf16 %v4211_v47, %v4018_v16  ;;  %v20551_v2 = vld [vmem:[#allocation60_spill] sm:$0xff] }
 0x1d6   :  { %v4034_v47 = vld [vmem:[%s19985_s0 + $0x1f2] sm:$0xff] }
 0x1d8   :  { %13798 = vmatmul.mubr.msk.bf16.gmra.mrb[32].mxu0 %vm20527_vm3, %v4247_v63  ;;  %v4024_v63 = vld [vmem:[%s19985_s0 + $0x1a2] sm:$0xff] }
 0x1d9   :  { %13801 = vmatprep.mubr.msk.bf16.mxu0 %vm20528_vm15, %v4248_v46  ;;  %13464 = vmatmul.mubr.msk.bf16.gmra.mrb[28].mxu1 %vm20527_vm3, %v16629_v62  ;;  %vm20532_vm15 = vmmov %vm20527_vm3  ;;  %vm20534_vm3 = vnez %v20302_v3  ;;  %v4026_v46 = vld [vmem:[%s19985_s0 + $0x1b2] sm:$0xff] }
 0x1da   :  { %13467 = vmatprep.mubr.bf16.mxu1 %v20531_v40  ;;  %v4209_v62 = vsel %vm20534_vm3, %v4017_v19, 0.0  ;;  %vm20537_vm3 = vmmov %vm20533_vm6  ;;  %v4033_v19 = vld [vmem:[%s19985_s0 + $0x1ea] sm:$0xff] }
 0x1db   :  { %v4251_v23 = vpack.c.bf16 %v4209_v62, %v4016_v43  ;;  %vm20538_vm13 = vmmov %vm20537_vm3  ;;  %v4035_v43 = vld [vmem:[%s19985_s0 + $0x1fa] sm:$0xff]  ;;  %v4032_v62 = vld [vmem:[%s19985_s0 + $0x1e2] sm:$0xff] }
 0x1dc   :  { %vm20543_vm0 = vmmov %vm20537_vm3 }
 0x1e0   :  { %13802 = vmatmul.mubr.msk.bf16.gmra.mrb[36].mxu0 %vm20532_vm15, %v4249_v50  ;;  %vm20536_vm15 = vmmov %vm20533_vm6 }
 0x1e1   :  { %13805 = vmatprep.mubr.msk.bf16.mxu0 %vm20533_vm6, %v4250_v13  ;;  %13468 = vmatmul.mubr.msk.bf16.gmra.mrb[32].mxu1 %vm20536_vm15, %v16647_v45  ;;  %vm20539_vm15 = vnez %v20308_v11 }
 0x1e2   :  { %13471 = vmatprep.mubr.msk.bf16.mxu1 %vm20533_vm6, %v16664_v60  ;;  %v4213_v45 = vsel %vm20539_vm15, %v4021_v25, 0.0  ;;  %vm20540_vm6 = vnez %v20310_v18  ;;  %vm20542_vm15 = vmmov %vm20537_vm3 }
 0x1e3   :  { %v4215_v60 = vsel %vm20540_vm6, %v4023_v58, 0.0  ;;  %v4253_v12 = vpack.c.bf16 %v4213_v45, %v4020_v53  ;;  %vm20548_vm6 = vmmov %vm20543_vm0  ;;  %v20559_v53 = vld [vmem:[#allocation61_spill] sm:$0xff]  ;;  %v4037_v45 = vld [vmem:[%s19985_s0 + $0x20a] sm:$0xff] }
 0x1e4   :  { %v4254_v7 = vpack.c.bf16 %v4215_v60, %v4022_v32  ;;  %v20561_v32 = vld [vmem:[#allocation62_spill] sm:$0xff] }
 0x1e5   :  { %v4716_v60 = vld [vmem:[%s19985_s0 + $0x20] sm:$0xff] }
 0x1e8   :  { %13806 = vmatmul.mubr.msk.bf16.gmra.mrb[40].mxu0 %vm20537_vm3, %v4251_v23  ;;  %v20557_v23 = vld [vmem:[#allocation24_spill] sm:$0xff] }
 0x1e9   :  { %13809 = vmatprep.mubr.msk.bf16.mxu0 %vm20538_vm13, %v4252_v38  ;;  %13472 = vmatmul.mubr.msk.bf16.gmra.mrb[36].mxu1 %vm20537_vm3, %v16666_v51  ;;  %vm20541_vm13 = vmmov %vm20537_vm3  ;;  %vm20544_vm3 = vnez %v20314_v10 }
 0x1ea   :  { %13475 = vmatprep.mubr.msk.bf16.mxu1 %vm20541_vm13, %v16684_v52  ;;  %v4217_v51 = vsel %vm20544_vm3, %v4025_v4, 0.0  ;;  %vm20545_vm13 = vnez %v20316_v1  ;;  %vm20547_vm3 = vmmov %vm20543_vm0  ;;  %v4229_v4 = vsel %vm16018_vm11, %v4037_v45, 0.0 }
 0x1eb   :  { %v4219_v52 = vsel %vm20545_vm13, %v4027_v29, 0.0  ;;  %v4255_v22 = vpack.c.bf16 %v4217_v51, %v4024_v63  ;;  %vm20554_vm13 = vmmov %vm20547_vm3  ;;  %v4717_v29 = vld [vmem:[%s19985_s0 + $0x28] sm:$0xff] }
 0x1ec   :  { %v4256_v42 = vpack.c.bf16 %v4219_v52, %v4026_v46  ;;  %v20565_v63 = vld [vmem:[#allocation19_spill] sm:$0xff] }
 0x1f0   :  { %13810 = vmatmul.mubr.msk.bf16.gmra.mrb[44].mxu0 %vm20542_vm15, %v4253_v12  ;;  %vm20546_vm15 = vmmov %vm20543_vm0  ;;  %v4036_v12 = vld [vmem:[%s19985_s0 + $0x202] sm:$0xff] }
 0x1f1   :  { %13813 = vmatprep.mubr.msk.bf16.mxu0 %vm20543_vm0, %v4254_v7  ;;  %13476 = vmatmul.mubr.msk.bf16.gmra.mrb[40].mxu1 %vm20546_vm15, %v16686_v15  ;;  %vm20549_vm15 = vnez %v20320_v35  ;;  %v4261_v46 = vpack.c.bf16 %v4229_v4, %v4036_v12  ;;  %v4726_v12 = vld [vmem:[%s19985_s0 + $0x70] sm:$0xff]  ;;  %v4728_v7 = vld [vmem:[%s19985_s0 + $0x80] sm:$0xff]  ;;  %v651_v4 = vsel %vm16036_vm2, %v4716_v60, 0.0 }
 0x1f2   :  { %13479 = vmatprep.mubr.msk.bf16.mxu1 %vm20543_vm0, %v16704_v17  ;;  %v4221_v15 = vsel %vm20549_vm15, %v4029_v31, 0.0  ;;  %vm20550_vm0 = vnez %v20322_v8  ;;  %vm20553_vm15 = vmmov %vm20547_vm3  ;;  %v4720_v31 = vld [vmem:[%s19985_s0 + $0x40] sm:$0xff] }
 0x1f3   :  { %v4223_v17 = vsel %vm20550_vm0, %v4031_v37, 0.0  ;;  %v4257_v50 = vpack.c.bf16 %v4221_v15, %v4028_v33  ;;  %v4721_v37 = vld [vmem:[%s19985_s0 + $0x48] sm:$0xff]  ;;  %v5040_v15 = vsel %vm16036_vm2, %v4720_v31, 0.0 }
 0x1f4   :  { %v4258_v13 = vpack.c.bf16 %v4223_v17, %v4030_v6  ;;  %v5102_v6 = vpack.c.bf16 %v4721_v37, %v5040_v15  ;;  %v20573_v17 = vld [vmem:[#allocation65_spill] sm:$0xff] }
 0x1f8   :  { %13814 = vmatmul.mubr.msk.bf16.gmra.mrb[48].mxu0 %vm20547_vm3, %v4255_v22  ;;  %v20567_v22 = vld [vmem:[#allocation63_spill] sm:$0xff] }
 0x1f9   :  { %13817 = vmatprep.mubr.msk.bf16.mxu0 %vm20548_vm6, %v4256_v42  ;;  %13480 = vmatmul.mubr.msk.bf16.gmra.mrb[44].mxu1 %vm20547_vm3, %v16706_v14  ;;  %vm20552_vm6 = vmmov %vm20547_vm3  ;;  %v20555_v14 = vld [vmem:[#allocation23_spill] sm:$0xff]  ;;  %v20569_v42 = vld [vmem:[#allocation64_spill] sm:$0xff] }
 0x1fa   :  { %13483 = vmatprep.mubr.msk.bf16.mxu1 %vm20552_vm6, %v20551_v2  ;;  %vm20556_vm3 = vnez %v20555_v14  ;;  %vm20558_vm6 = vnez %v20557_v23  ;;  %v4724_v2 = vld [vmem:[%s19985_s0 + $0x60] sm:$0xff] }
 0x1fb   :  { %v4225_v16 = vsel %vm20556_vm3, %v4033_v19, 0.0  ;;  %v4227_v38 = vsel %vm20558_vm6, %v4035_v43, 0.0  ;;  %vm20562_vm3 = vmmov %vm20554_vm13  ;;  %v20576_v19 = vld [vmem:[#allocation67_spill] sm:$0xff]  ;;  %v17207_v43 = vld [vmem:[%s19984_s1 + $0x20] sm:$0xf] }
 0x1fc   :  { %v4259_v25 = vpack.c.bf16 %v4225_v16, %v4032_v62  ;;  %v4260_v58 = vpack.c.bf16 %v4227_v38, %v4034_v47  ;;  %vm20563_vm0 = vmmov %vm20562_vm3  ;;  %v20577_v62 = vld [vmem:[#allocation12_spill] sm:$0xff]  ;;  %v20580_v16 = vld [vmem:[#allocation21_spill] sm:$0xff] }
 0x1fd   :  { %vm20570_vm11 = vmmov %vm20563_vm0  ;;  %v4725_v38 = vld [vmem:[%s19985_s0 + $0x68] sm:$0xff] }
 0x200   :  { %13818 = vmatmul.mubr.msk.bf16.gmra.mrb[52].mxu0 %vm20553_vm15, %v4257_v50  ;;  %vm20560_vm15 = vmmov %vm20554_vm13 }
 0x201   :  { %13821 = vmatprep.mubr.msk.bf16.mxu0 %vm20554_vm13, %v4258_v13  ;;  %13484 = vmatmul.mubr.msk.bf16.gmra.mrb[48].mxu1 %vm20560_vm15, %v20559_v53  ;;  %vm20566_vm15 = vnez %v20565_v63  ;;  %v4722_v13 = vld [vmem:[%s19985_s0 + $0x50] sm:$0xff]  ;;  %v4727_v63 = vld [vmem:[%s19985_s0 + $0x78] sm:$0xff] }
 0x202   :  { %13487 = vmatprep.mubr.msk.bf16.mxu1 %vm20554_vm13, %v20561_v32  ;;  %v5036_v51 = vsel %vm20566_vm15, %v4716_v60, 0.0  ;;  %vm20571_vm13 = vmmov %vm20563_vm0  ;;  %v20585_v32 = vld [vmem:[#allocation68_spill] sm:$0xff] }
 0x203   :  { %v5100_v52 = vpack.c.bf16 %v4717_v29, %v5036_v51  ;;  %vm20574_vm15 = vmmov %vm20563_vm0  ;;  %v20588_v51 = vld [vmem:[#allocation32_spill] sm:$0xff] }
 0x208   :  { %13822 = vmatmul.mubr.msk.bf16.gmra.mrb[56].mxu0 %vm20562_vm3, %v4259_v25  ;;  %vm20568_vm3 = vmmov %vm20563_vm0  ;;  %v20582_v25 = vld [vmem:[#allocation30_spill] sm:$0xff] }
 0x209   :  { %13825 = vmatprep.mubr.msk.bf16.mxu0 %vm20563_vm0, %v4260_v58  ;;  %13488 = vmatmul.mubr.msk.bf16.gmra.mrb[52].mxu1 %vm20568_vm3, %v20567_v22  ;;  %vm20575_vm3 = vcmask 1043456   ;;  %v4729_v22 = vld [vmem:[%s19985_s0 + $0x88] sm:$0xff] }
 0x20a   :  { %13491 = vmatprep.mubr.msk.bf16.mxu1 %vm20563_vm0, %v20569_v42  ;;  %v5973_v50 = vsel %vm20575_vm3, %v16844_v0, 0  ;;  %v4723_v0 = vld [vmem:[%s19985_s0 + $0x58] sm:$0xff]  ;;  %vm20583_vm3 = vnez %v20582_v25  ;;  %v20590_v42 = vld [vmem:[#allocation34_spill] sm:$0xff]  ;;  %v20598_v25 = vld [vmem:[#allocation36_spill] sm:$0xff] }
 0x20b   :  { %v5044_v58 = vsel %vm20583_vm3, %v4724_v2, 0.0 }
 0x20c   :  { %v5104_v45 = vpack.c.bf16 %v4725_v38, %v5044_v58 }
 0x210   :  { %13826 = vmatmul.mubr.msk.bf16.gmra.mrb[60].mxu0 %vm20570_vm11, %v4261_v46  ;;  %vm20578_vm11 = vmmov %vm20563_vm0 }
 0x211   :  { %13831 = vmatprep.mubr.msk.bf16.mxu0 %vm20571_vm13, %v5100_v52  ;;  %13492 = vmatmul.mubr.msk.bf16.gmra.mrb[56].mxu1 %vm20574_vm15, %v20573_v17  ;;  %vm20579_vm13 = vmmov %vm20563_vm0  ;;  %vm20581_vm15 = vnez %v20580_v16  ;;  %v713_v52 = vpack.c.bf16 %v4717_v29, %v651_v4  ;;  %v4730_v17 = vld [vmem:[%s19985_s0 + $0x90] sm:$0xff]  ;;  %v4732_v29 = vld [vmem:[%s19985_s0 + $0xa0] sm:$0xff] }
 0x212   :  { %13495 = vmatprep.mubr.msk.bf16.mxu1 %vm20563_vm0, %v20576_v19  ;;  %v5042_v47 = vsel %vm20581_vm15, %v4722_v13, 0.0  ;;  %vm20584_vm0 = vcmask 1043456   ;;  %vm20587_vm15 = vmmov %vm20578_vm11  ;;  %v20596_v16 = vld [vmem:[#allocation35_spill] sm:$0xff]  ;;  %v4734_v4 = vld [vmem:[%s19985_s0 + $0xb0] sm:$0xff] }
 0x213   :  { %v5103_v53 = vpack.c.bf16 %v4723_v0, %v5042_v47 }
 0x218   :  { %13832 = vmatmul.mubr.msk.bf16.vlgmr.msra.gmra.mrb[0].mxu0 %vm20578_vm11, %v20577_v62  ;;  %v4731_v62 = vld [vmem:[%s19985_s0 + $0x98] sm:$0xff] }
 0x219   :  { %13896 = vmatpush3.bf16.msra.mxu0 %v5973_v50  ;;  %13835 = vmatprep.mubr.msk.bf16.mxu0 %vm20579_vm13, %v5102_v6  ;;  %vm20586_vm13 = vmmov %vm20578_vm11  ;;  %v20592_v6 = vld [vmem:[#allocation22_spill] sm:$0xff]  ;;  %v655_v50 = vsel %vm20583_vm3, %v4720_v31, 0.0  ;;  %vm20599_vm3 = vnez %v20598_v25  ;;  %v20613_v25 = vld [vmem:[#allocation40_spill] sm:$0xff] }
 0x21a   :  { %14998 = vmatprep.subr.msk.bf16.mxu0 %vm20584_vm0, %v17207_v43  ;;  %13496 = vmatmul.mubr.msk.bf16.gmra.mrb[60].mxu1 %vm20578_vm11, %v20585_v32  ;;  %vm20589_vm0 = vnez %v20588_v51  ;;  %vm20591_vm11 = vnez %v20590_v42  ;;  %vm20593_vm2 = vmmov %vm20586_vm13  ;;  %v715_v58 = vpack.c.bf16 %v4721_v37, %v655_v50  ;;  %v5052_v31 = vsel %vm20599_vm3, %v4732_v29, 0.0  ;;  %v4736_v37 = vld [vmem:[%s19985_s0 + $0xc0] sm:$0xff] }
 0x21b   :  { %v5046_v46 = vsel %vm20589_vm0, %v4726_v12, 0.0  ;;  %v5048_v15 = vsel %vm20591_vm11, %v4728_v7, 0.0  ;;  %13505 = vmatprep.mubr.msk.bf16.mxu1 %vm20586_vm13, %v713_v52  ;;  %v657_v19 = vsel %vm20589_vm0, %v4722_v13, 0.0  ;;  %v20604_v52 = vld [vmem:[#allocation37_spill] sm:$0xff]  ;;  %v20606_v42 = vld [vmem:[#allocation38_spill] sm:$0xff] }
 0x21c   :  { %v5105_v60 = vpack.c.bf16 %v4727_v63, %v5046_v46  ;;  %v5106_v33 = vpack.c.bf16 %v4729_v22, %v5048_v15  ;;  %v4735_v46 = vld [vmem:[%s19985_s0 + $0xb8] sm:$0xff] }
 0x220   :  { %13836 = vmatmul.mubr.msk.bf16.gmra.mrb[4].mxu0 %vm20586_vm13, %v5103_v53  ;;  %vm20595_vm13 = vmmov %vm20593_vm2  ;;  %v716_v53 = vpack.c.bf16 %v4723_v0, %v657_v19  ;;  %v659_v0 = vsel %vm20591_vm11, %v4724_v2, 0.0  ;;  %vm20607_vm11 = vnez %v20606_v42  ;;  %v4738_v19 = vld [vmem:[%s19985_s0 + $0xd0] sm:$0xff]  ;;  %v20621_v42 = vld [vmem:[#allocation42_spill] sm:$0xff] }
 0x221   :  { %13839 = vmatprep.mubr.msk.bf16.mxu0 %vm20587_vm15, %v5104_v45  ;;  %vm20594_vm15 = vmmov %vm20593_vm2  ;;  %v4733_v45 = vld [vmem:[%s19985_s0 + $0xa8] sm:$0xff]  ;;  %v5056_v2 = vsel %vm20607_vm11, %v4736_v37, 0.0 }
 0x222   :  { %13506 = vmatmul.mubr.msk.bf16.vlgmr.msra.gmra.mrb[4].mxu1 %vm20593_vm2, %v20592_v6  ;;  %vm20597_vm2 = vnez %v20596_v16  ;;  %v5108_v32 = vpack.c.bf16 %v4733_v45, %v5052_v31  ;;  %vm20601_vm0 = vmmov %vm20595_vm13  ;;  %v4737_v6 = vld [vmem:[%s19985_s0 + $0xc8] sm:$0xff] }
 0x223   :  { %v5050_v47 = vsel %vm20597_vm2, %v4730_v17, 0.0  ;;  %v661_v51 = vsel %vm20597_vm2, %v4726_v12, 0.0  ;;  %v5110_v50 = vpack.c.bf16 %v4737_v6, %v5056_v2 }
 0x224   :  { %v5107_v13 = vpack.c.bf16 %v4731_v62, %v5050_v47  ;;  %v4739_v47 = vld [vmem:[%s19985_s0 + $0xd8] sm:$0xff] }
 0x228   :  { %13840 = vmatmul.mubr.msk.bf16.gmra.mrb[8].mxu0 %vm20594_vm15, %v5105_v60  ;;  %vm20600_vm15 = vmmov %vm20595_vm13  ;;  %v717_v60 = vpack.c.bf16 %v4725_v38, %v659_v0  ;;  %v4740_v38 = vld [vmem:[%s19985_s0 + $0xe0] sm:$0xff] }
 0x229   :  { %13843 = vmatprep.mubr.msk.bf16.mxu0 %vm20595_vm13, %v5106_v33  ;;  %13509 = vmatprep.mubr.msk.bf16.mxu1 %vm20600_vm15, %v715_v58  ;;  %vm20602_vm13 = vmmov %vm20601_vm0  ;;  %v718_v33 = vpack.c.bf16 %v4727_v63, %v661_v51  ;;  %v663_v63 = vsel %vm20599_vm3, %v4728_v7, 0.0  ;;  %v20611_v58 = vld [vmem:[#allocation39_spill] sm:$0xff]  ;;  %vm20614_vm3 = vnez %v20613_v25  ;;  %v4742_v51 = vld [vmem:[%s19985_s0 + $0xf0] sm:$0xff] }
 0x22a   :  { %13510 = vmatmul.mubr.msk.bf16.gmra.mrb[8].mxu1 %vm20601_vm0, %v716_v53  ;;  %vm20603_vm15 = vmmov %vm20601_vm0  ;;  %vm20605_vm0 = vnez %v20604_v52  ;;  %v719_v31 = vpack.c.bf16 %v4729_v22, %v663_v63  ;;  %v5060_v7 = vsel %vm20614_vm3, %v4740_v38, 0.0  ;;  %v4744_v22 = vld [vmem:[%s19985_s0 + $0x100] sm:$0xff] }
 0x22b   :  { %v5054_v15 = vsel %vm20605_vm0, %v4734_v4, 0.0  ;;  %13513 = vmatprep.mubr.msk.bf16.mxu1 %vm20602_vm13, %v717_v60  ;;  %vm20608_vm2 = vmmov %vm20602_vm13  ;;  %v665_v16 = vsel %vm20605_vm0, %v4730_v17, 0.0  ;;  %v20619_v60 = vld [vmem:[#allocation41_spill] sm:$0xff] }
 0x22c   :  { %v5109_v12 = vpack.c.bf16 %v4735_v46, %v5054_v15  ;;  %v4743_v15 = vld [vmem:[%s19985_s0 + $0xf8] sm:$0xff] }
 0x230   :  { %13844 = vmatmul.mubr.msk.bf16.gmra.mrb[12].mxu0 %vm20602_vm13, %v5107_v13  ;;  %vm20610_vm13 = vmmov %vm20608_vm2  ;;  %v720_v13 = vpack.c.bf16 %v4731_v62, %v665_v16  ;;  %v667_v62 = vsel %vm20607_vm11, %v4732_v29, 0.0  ;;  %vm20622_vm11 = vnez %v20621_v42  ;;  %v4748_v16 = vld [vmem:[%s19985_s0 + $0x120] sm:$0xff]  ;;  %v298_v42 = vld [vmem:[%s19985_s0 + $0x118] sm:$0xff] }
 0x231   :  { %13847 = vmatprep.mubr.msk.bf16.mxu0 %vm20603_vm15, %v5108_v32  ;;  %vm20609_vm15 = vmmov %vm20608_vm2  ;;  %v4741_v32 = vld [vmem:[%s19985_s0 + $0xe8] sm:$0xff]  ;;  %v721_v2 = vpack.c.bf16 %v4733_v45, %v667_v62  ;;  %v5064_v29 = vsel %vm20622_vm11, %v4744_v22, 0.0  ;;  %v671_v45 = vsel %vm20614_vm3, %v4736_v37, 0.0  ;;  %v4750_v37 = vld [vmem:[%s19985_s0 + $0x130] sm:$0xff] }
 0x232   :  { %13514 = vmatmul.mubr.msk.bf16.gmra.mrb[12].mxu1 %vm20608_vm2, %v718_v33  ;;  %vm20612_vm2 = vnez %v20611_v58  ;;  %v5112_v0 = vpack.c.bf16 %v4741_v32, %v5060_v7  ;;  %vm20616_vm0 = vmmov %vm20610_vm13  ;;  %v723_v58 = vpack.c.bf16 %v4737_v6, %v671_v45  ;;  %v4752_v6 = vld [vmem:[%s19985_s0 + $0x140] sm:$0xff]  ;;  %v20632_v22 = vld [vmem:[#allocation45_spill] sm:$0xff] }
 0x233   :  { %v5058_v53 = vsel %vm20612_vm2, %v4738_v19, 0.0  ;;  %v669_v52 = vsel %vm20612_vm2, %v4734_v4, 0.0 }
 0x234   :  { %v5111_v17 = vpack.c.bf16 %v4739_v47, %v5058_v53 }
 0x238   :  { %13848 = vmatmul.mubr.msk.bf16.gmra.mrb[16].mxu0 %vm20609_vm15, %v5109_v12  ;;  %vm20615_vm15 = vmmov %vm20610_vm13  ;;  %v722_v12 = vpack.c.bf16 %v4735_v46, %v669_v52 }
 0x239   :  { %13851 = vmatprep.mubr.msk.bf16.mxu0 %vm20610_vm13, %v5110_v50  ;;  %13517 = vmatprep.mubr.msk.bf16.mxu1 %vm20615_vm15, %v719_v31  ;;  %vm20617_vm13 = vmmov %vm20616_vm0  ;;  %v4745_v50 = vld [vmem:[%s19985_s0 + $0x108] sm:$0xff] }
 0x23a   :  { %13518 = vmatmul.mubr.msk.bf16.gmra.mrb[16].mxu1 %vm20616_vm0, %v720_v13  ;;  %vm20618_vm15 = vmmov %vm20616_vm0  ;;  %vm20620_vm0 = vnez %v20619_v60  ;;  %v5114_v63 = vpack.c.bf16 %v4745_v50, %v5064_v29  ;;  %v4749_v31 = vld [vmem:[%s19985_s0 + $0x128] sm:$0xff]  ;;  %v20626_v13 = vld [vmem:[#allocation44_spill] sm:$0xff] }
 0x23b   :  { %v5062_v33 = vsel %vm20620_vm0, %v4742_v51, 0.0  ;;  %13521 = vmatprep.mubr.msk.bf16.mxu1 %vm20617_vm13, %v721_v2  ;;  %vm20623_vm2 = vmmov %vm20617_vm13  ;;  %v673_v46 = vsel %vm20620_vm0, %v4738_v19, 0.0  ;;  %v675_v19 = vsel %vm20622_vm11, %v4740_v38, 0.0  ;;  %vm20633_vm0 = vnez %v20632_v22  ;;  %v20634_v2 = vld [vmem:[#allocation46_spill] sm:$0xff]  ;;  %v4754_v50 = vld [vmem:[%s19985_s0 + $0x150] sm:$0xff] }
 0x23c   :  { %v5113_v4 = vpack.c.bf16 %v4743_v15, %v5062_v33  ;;  %vm20625_vm6 = vmmov %vm20623_vm2  ;;  %v724_v53 = vpack.c.bf16 %v4739_v47, %v673_v46  ;;  %v20629_v47 = vld [vmem:[#allocation43_spill] sm:$0xff]  ;;  %v5070_v62 = vsel %vm20633_vm0, %v4750_v37, 0.0  ;;  %v725_v52 = vpack.c.bf16 %v4741_v32, %v675_v19  ;;  %v4756_v32 = vld [vmem:[%s19985_s0 + $0x160] sm:$0xff] }
 0x23d   :  { %vm20631_vm3 = vmmov %vm20623_vm2  ;;  %v4753_v33 = vld [vmem:[%s19985_s0 + $0x148] sm:$0xff]  ;;  %vm20635_vm11 = vnez %v20634_v2  ;;  %v4755_v29 = vld [vmem:[%s19985_s0 + $0x158] sm:$0xff] }
 0x23e   :  { %v5072_v38 = vsel %vm20635_vm11, %v4752_v6, 0.0  ;;  %v4757_v46 = vld [vmem:[%s19985_s0 + $0x168] sm:$0xff]  ;;  %v4758_v19 = vld [vmem:[%s19985_s0 + $0x170] sm:$0xff]  ;;  %v20647_v2 = vld [vmem:[#allocation50_spill] sm:$0xff] }
 0x240   :  { %13852 = vmatmul.mubr.msk.bf16.gmra.mrb[20].mxu0 %vm20617_vm13, %v5111_v17  ;;  %vm20627_vm13 = vnez %v20626_v13 }
 0x241   :  { %13855 = vmatprep.mubr.msk.bf16.mxu0 %vm20618_vm15, %v5112_v0  ;;  %vm20624_vm15 = vmmov %vm20623_vm2  ;;  %v5068_v7 = vsel %vm20627_vm13, %v4748_v16, 0.0  ;;  %v4751_v0 = vld [vmem:[%s19985_s0 + $0x138] sm:$0xff] }
 0x242   :  { %13522 = vmatmul.mubr.msk.bf16.gmra.mrb[20].mxu1 %vm20623_vm2, %v722_v12  ;;  %v5116_v17 = vpack.c.bf16 %v4749_v31, %v5068_v7  ;;  %vm20636_vm13 = vmmov %vm20623_vm2  ;;  %v5118_v12 = vpack.c.bf16 %v4753_v33, %v5072_v38 }
 0x243   :  { %13525 = vmatprep.mubr.msk.bf16.mxu1 %vm20623_vm2, %v723_v58  ;;  %v20641_v58 = vld [vmem:[#allocation48_spill] sm:$0xff] }
 0x248   :  { %13856 = vmatmul.mubr.msk.bf16.gmra.mrb[24].mxu0 %vm20624_vm15, %v5113_v4  ;;  %vm20628_vm15 = vmmov %vm20623_vm2  ;;  %v20639_v4 = vld [vmem:[#allocation47_spill] sm:$0xff] }
 0x249   :  { %13859 = vmatprep.mubr.msk.bf16.mxu0 %vm20625_vm6, %v5114_v63  ;;  %vm20630_vm6 = vnez %v20629_v47  ;;  %v4760_v47 = vld [vmem:[%s19985_s0 + $0x180] sm:$0xff] }
 0x24a   :  { %13526 = vmatmul.mubr.msk.bf16.gmra.mrb[24].mxu1 %vm20628_vm15, %v724_v53  ;;  %v677_v25 = vsel %vm20630_vm6, %v4742_v51, 0.0  ;;  %v5117_v51 = vpack.c.bf16 %v4751_v0, %v5070_v62  ;;  %vm20637_vm15 = vmmov %vm20623_vm2  ;;  %v4759_v62 = vld [vmem:[%s19985_s0 + $0x178] sm:$0xff] }
 0x24b   :  { %v726_v60 = vpack.c.bf16 %v4743_v15, %v677_v25  ;;  %13529 = vmatprep.mubr.msk.bf16.mxu1 %vm20636_vm13, %v725_v52  ;;  %v297_v15 = vld [vmem:[%s19985_s0 + $0x110] sm:$0xff]  ;;  %vm20638_vm6 = vmmov %vm20623_vm2  ;;  %vm20642_vm13 = vnez %v20641_v58  ;;  %v683_v25 = vsel %vm20635_vm11, %v4748_v16, 0.0  ;;  %v20645_v52 = vld [vmem:[#allocation49_spill] sm:$0xff]  ;;  %vm20648_vm11 = vnez %v20647_v2 }
 0x24c   :  { %v681_v45 = vsel %vm20633_vm0, %v297_v15, 0.0  ;;  %v5076_v53 = vsel %vm20642_vm13, %v4756_v32, 0.0  ;;  %vm20643_vm0 = vmmov %vm20623_vm2  ;;  %v729_v38 = vpack.c.bf16 %v4749_v31, %v683_v25  ;;  %v5080_v16 = vsel %vm20648_vm11, %v4760_v47, 0.0  ;;  %v4764_v31 = vld [vmem:[%s19985_s0 + $0x1a0] sm:$0xff]  ;;  %v20654_v58 = vld [vmem:[#allocation52_spill] sm:$0xff] }
 0x24d   :  { %v728_v13 = vpack.c.bf16 %v298_v42, %v681_v45  ;;  %v4762_v42 = vld [vmem:[%s19985_s0 + $0x190] sm:$0xff]  ;;  %v20652_v45 = vld [vmem:[#allocation51_spill] sm:$0xff]  ;;  %v20661_v2 = vld [vmem:[#allocation54_spill] sm:$0xff] }
 0x250   :  { %13860 = vmatmul.mubr.bf16.gmra.mrb[28].mxu0 %v20531_v40 }
 0x251   :  { %13863 = vmatprep.mubr.msk.bf16.mxu0 %vm20631_vm3, %v5116_v17  ;;  %vm20640_vm3 = vnez %v20639_v4  ;;  %v5120_v17 = vpack.c.bf16 %v4757_v46, %v5076_v53 }
 0x252   :  { %13530 = vmatmul.mubr.msk.bf16.gmra.mrb[28].mxu1 %vm20623_vm2, %v726_v60  ;;  %v5074_v63 = vsel %vm20640_vm3, %v4754_v50, 0.0  ;;  %v685_v22 = vsel %vm20640_vm3, %v4750_v37, 0.0  ;;  %vm20650_vm3 = vmmov %vm20643_vm0 }
 0x253   :  { %13533 = vmatprep.mubr.bf16.mxu1 %v20531_v40  ;;  %v5119_v7 = vpack.c.bf16 %v4755_v29, %v5074_v63  ;;  %v4763_v63 = vld [vmem:[%s19985_s0 + $0x198] sm:$0xff] }
 0x258   :  { %13864 = vmatmul.mubr.msk.bf16.gmra.mrb[32].mxu0 %vm20637_vm15, %v5117_v51  ;;  %vm20644_vm15 = vmmov %vm20643_vm0  ;;  %v730_v51 = vpack.c.bf16 %v4751_v0, %v685_v22  ;;  %v687_v0 = vsel %vm20642_vm13, %v4752_v6, 0.0  ;;  %vm20655_vm13 = vnez %v20654_v58  ;;  %v4766_v22 = vld [vmem:[%s19985_s0 + $0x1b0] sm:$0xff] }
 0x259   :  { %13867 = vmatprep.mubr.msk.bf16.mxu0 %vm20638_vm6, %v5118_v12  ;;  %vm20646_vm6 = vnez %v20645_v52  ;;  %v4761_v12 = vld [vmem:[%s19985_s0 + $0x188] sm:$0xff]  ;;  %v5084_v6 = vsel %vm20655_vm13, %v4764_v31, 0.0  ;;  %v20668_v58 = vld [vmem:[#allocation56_spill] sm:$0xff] }
 0x25a   :  { %13534 = vmatmul.mubr.msk.bf16.gmra.mrb[32].mxu1 %vm20623_vm2, %v728_v13  ;;  %v5078_v60 = vsel %vm20646_vm6, %v4758_v19, 0.0  ;;  %vm20649_vm2 = vmmov %vm20643_vm0  ;;  %v5122_v15 = vpack.c.bf16 %v4761_v12, %v5080_v16  ;;  %v689_v4 = vsel %vm20646_vm6, %v4754_v50, 0.0  ;;  %v731_v13 = vpack.c.bf16 %v4753_v33, %v687_v0  ;;  %v4768_v33 = vld [vmem:[%s19985_s0 + $0x1c0] sm:$0xff] }
 0x25b   :  { %13537 = vmatprep.mubr.msk.bf16.mxu1 %vm20649_vm2, %v729_v38  ;;  %v5121_v37 = vpack.c.bf16 %v4759_v62, %v5078_v60  ;;  %vm20653_vm2 = vnez %v20652_v45  ;;  %vm20657_vm6 = vmmov %vm20643_vm0  ;;  %v4767_v60 = vld [vmem:[%s19985_s0 + $0x1b8] sm:$0xff] }
 0x25c   :  { %v5082_v53 = vsel %vm20653_vm2, %v4762_v42, 0.0  ;;  %v693_v52 = vsel %vm20653_vm2, %v4758_v19, 0.0  ;;  %v20659_v38 = vld [vmem:[#allocation53_spill] sm:$0xff]  ;;  %vm20664_vm2 = vmmov %vm20643_vm0 }
 0x25d   :  { %v5123_v50 = vpack.c.bf16 %v4763_v63, %v5082_v53  ;;  %v4771_v53 = vld [vmem:[%s19985_s0 + $0x1d8] sm:$0xff] }
 0x260   :  { %13868 = vmatmul.mubr.msk.bf16.gmra.mrb[36].mxu0 %vm20643_vm0, %v5119_v7  ;;  %v732_v7 = vpack.c.bf16 %v4755_v29, %v689_v4  ;;  %v691_v29 = vsel %vm20648_vm11, %v4756_v32, 0.0  ;;  %vm20662_vm11 = vnez %v20661_v2  ;;  %v4770_v4 = vld [vmem:[%s19985_s0 + $0x1d0] sm:$0xff] }
 0x261   :  { %13871 = vmatprep.mubr.msk.bf16.mxu0 %vm20644_vm15, %v5120_v17  ;;  %vm20651_vm15 = vmmov %vm20643_vm0  ;;  %v4765_v17 = vld [vmem:[%s19985_s0 + $0x1a8] sm:$0xff]  ;;  %v733_v16 = vpack.c.bf16 %v4757_v46, %v691_v29  ;;  %v5088_v32 = vsel %vm20662_vm11, %v4768_v33, 0.0  ;;  %v4772_v46 = vld [vmem:[%s19985_s0 + $0x1e0] sm:$0xff] }
 0x262   :  { %13538 = vmatmul.mubr.msk.bf16.gmra.mrb[36].mxu1 %vm20650_vm3, %v730_v51  ;;  %vm20656_vm3 = vmmov %vm20643_vm0  ;;  %v5124_v25 = vpack.c.bf16 %v4765_v17, %v5084_v6  ;;  %v5599_v2 = vld [vmem:[%s19985_s0 + $0x89] sm:$0xff] }
 0x263   :  { %13541 = vmatprep.mubr.msk.bf16.mxu1 %vm20656_vm3, %v731_v13  ;;  %vm20660_vm3 = vnez %v20659_v38  ;;  %v20666_v13 = vld [vmem:[#allocation55_spill] sm:$0xff] }
 0x264   :  { %v5086_v51 = vsel %vm20660_vm3, %v4766_v22, 0.0  ;;  %v697_v45 = vsel %vm20660_vm3, %v4762_v42, 0.0  ;;  %vm20671_vm3 = vmmov %vm20643_vm0 }
 0x265   :  { %v5125_v19 = vpack.c.bf16 %v4767_v60, %v5086_v51  ;;  %v4775_v51 = vld [vmem:[%s19985_s0 + $0x1f8] sm:$0xff] }
 0x268   :  { %13872 = vmatmul.mubr.msk.bf16.gmra.mrb[40].mxu0 %vm20643_vm0, %v5121_v37  ;;  %v734_v37 = vpack.c.bf16 %v4759_v62, %v693_v52  ;;  %v695_v62 = vsel %vm20655_vm13, %v4760_v47, 0.0  ;;  %vm20669_vm13 = vnez %v20668_v58  ;;  %v4774_v52 = vld [vmem:[%s19985_s0 + $0x1f0] sm:$0xff]  ;;  %v5589_v58 = vld [vmem:[%s19985_s0 + $0x39] sm:$0xff] }
 0x269   :  { %13875 = vmatprep.mubr.msk.bf16.mxu0 %vm20651_vm15, %v5122_v15  ;;  %vm20658_vm15 = vmmov %vm20643_vm0  ;;  %v4769_v15 = vld [vmem:[%s19985_s0 + $0x1c8] sm:$0xff]  ;;  %v735_v6 = vpack.c.bf16 %v4761_v12, %v695_v62  ;;  %v5092_v47 = vsel %vm20669_vm13, %v4772_v46, 0.0  ;;  %v4776_v12 = vld [vmem:[%s19985_s0 + $0x200] sm:$0xff] }
 0x26a   :  { %13542 = vmatmul.mubr.msk.bf16.gmra.mrb[40].mxu1 %vm20657_vm6, %v732_v7  ;;  %vm20663_vm6 = vmmov %vm20643_vm0  ;;  %v5126_v0 = vpack.c.bf16 %v4769_v15, %v5088_v32 }
 0x26b   :  { %13545 = vmatprep.mubr.msk.bf16.mxu1 %vm20663_vm6, %v733_v16  ;;  %vm20667_vm6 = vnez %v20666_v13  ;;  %v20673_v16 = vld [vmem:[#allocation57_spill] sm:$0xff] }
 0x26c   :  { %v5090_v7 = vsel %vm20667_vm6, %v4770_v4, 0.0  ;;  %v701_v38 = vsel %vm20667_vm6, %v4766_v22, 0.0  ;;  %vm20677_vm6 = vmmov %vm20643_vm0 }
 0x26d   :  { %v5127_v42 = vpack.c.bf16 %v4771_v53, %v5090_v7  ;;  %v5586_v7 = vld [vmem:[%s19985_s0 + $0x21] sm:$0xff] }
 0x270   :  { %13876 = vmatmul.mubr.msk.bf16.gmra.mrb[44].mxu0 %vm20643_vm0, %v5123_v50  ;;  %v736_v50 = vpack.c.bf16 %v4763_v63, %v697_v45  ;;  %v699_v63 = vsel %vm20662_vm11, %v4764_v31, 0.0  ;;  %v5096_v31 = vsel %vm16442_vm1, %v4776_v12, 0.0  ;;  %vm20676_vm11 = vmmov %vm20643_vm0  ;;  %v703_v45 = vsel %vm20669_vm13, %v4768_v33, 0.0 }
 0x271   :  { %13879 = vmatprep.mubr.msk.bf16.mxu0 %vm20658_vm15, %v5124_v25  ;;  %vm20665_vm15 = vmmov %vm20643_vm0  ;;  %v4773_v25 = vld [vmem:[%s19985_s0 + $0x1e8] sm:$0xff]  ;;  %v737_v32 = vpack.c.bf16 %v4765_v17, %v699_v63  ;;  %v707_v33 = vsel %vm16442_vm1, %v4772_v46, 0.0 }
 0x272   :  { %13546 = vmatmul.mubr.msk.bf16.gmra.mrb[44].mxu1 %vm20664_vm2, %v734_v37  ;;  %vm20670_vm2 = vmmov %vm20643_vm0  ;;  %v5128_v29 = vpack.c.bf16 %v4773_v25, %v5092_v47  ;;  %v741_v47 = vpack.c.bf16 %v4773_v25, %v707_v33  ;;  %v5591_v46 = vld [vmem:[%s19985_s0 + $0x49] sm:$0xff]  ;;  %v5592_v25 = vld [vmem:[%s19985_s0 + $0x51] sm:$0xff] }
 0x273   :  { %13549 = vmatprep.mubr.msk.bf16.mxu1 %vm20670_vm2, %v735_v6  ;;  %vm20674_vm2 = vnez %v20673_v16  ;;  %v5587_v6 = vld [vmem:[%s19985_s0 + $0x29] sm:$0xff]  ;;  %vm20684_vm1 = vmmov %vm20643_vm0  ;;  %v5606_v33 = vld [vmem:[%s19985_s0 + $0xc1] sm:$0xff] }
 0x274   :  { %v5094_v37 = vsel %vm20674_vm2, %v4774_v52, 0.0  ;;  %v705_v17 = vsel %vm20674_vm2, %v4770_v4, 0.0  ;;  %vm20683_vm2 = vmmov %vm20643_vm0 }
 0x275   :  { %v5129_v22 = vpack.c.bf16 %v4775_v51, %v5094_v37  ;;  %v740_v13 = vpack.c.bf16 %v4771_v53, %v705_v17  ;;  %v5588_v53 = vld [vmem:[%s19985_s0 + $0x31] sm:$0xff]  ;;  %v5602_v17 = vld [vmem:[%s19985_s0 + $0xa1] sm:$0xff] }
 0x278   :  { %13880 = vmatmul.mubr.msk.bf16.gmra.mrb[48].mxu0 %vm20643_vm0, %v5125_v19  ;;  %v738_v19 = vpack.c.bf16 %v4767_v60, %v701_v38  ;;  %v739_v60 = vpack.c.bf16 %v4769_v15, %v703_v45  ;;  %v20681_v15 = vld [vmem:[#allocation59_spill] sm:$0xff]  ;;  %v5593_v38 = vld [vmem:[%s19985_s0 + $0x59] sm:$0xff] }
 0x279   :  { %13883 = vmatprep.mubr.msk.bf16.mxu0 %vm20665_vm15, %v5126_v0  ;;  %vm20672_vm15 = vmmov %vm20643_vm0  ;;  %v4777_v0 = vld [vmem:[%s19985_s0 + $0x208] sm:$0xff]  ;;  %vm20682_vm13 = vnez %v20681_v15  ;;  %v5845_v16 = vpack.c.bf16 %v5593_v38, %v5592_v25  ;;  %v5601_v45 = vld [vmem:[%s19985_s0 + $0x99] sm:$0xff] }
 0x27a   :  { %13550 = vmatmul.mubr.msk.bf16.gmra.mrb[48].mxu1 %vm20671_vm3, %v736_v50  ;;  %v5130_v62 = vpack.c.bf16 %v4777_v0, %v5096_v31  ;;  %vm20678_vm3 = vmmov %vm20643_vm0  ;;  %v5842_v50 = vpack.c.bf16 %v5587_v6, %v5586_v7  ;;  %v709_v4 = vsel %vm20682_vm13, %v4774_v52, 0.0  ;;  %v5843_v52 = vpack.c.bf16 %v5589_v58, %v5588_v53  ;;  %v5598_v0 = vld [vmem:[%s19985_s0 + $0x81] sm:$0xff]  ;;  %v5604_v6 = vld [vmem:[%s19985_s0 + $0xb1] sm:$0xff] }
 0x27b   :  { %13553 = vmatprep.mubr.msk.bf16.mxu1 %vm20676_vm11, %v737_v32  ;;  %vm20680_vm11 = vmmov %vm20643_vm0  ;;  %v5596_v32 = vld [vmem:[%s19985_s0 + $0x71] sm:$0xff]  ;;  %v5607_v15 = vld [vmem:[%s19985_s0 + $0xc9] sm:$0xff] }
 0x27c   :  { %vm20689_vm13 = vmmov %vm20643_vm0  ;;  %v5852_v53 = vpack.c.bf16 %v5607_v15, %v5606_v33  ;;  %v5608_v58 = vld [vmem:[%s19985_s0 + $0xd1] sm:$0xff]  ;;  %v5614_v25 = vld [vmem:[%s19985_s0 + $0x101] sm:$0xff] }
 0x27d   :  { %v5615_v38 = vld [vmem:[%s19985_s0 + $0x109] sm:$0xff]  ;;  %v5629_v33 = vld [vmem:[%s19985_s0 + $0x179] sm:$0xff]  ;;  %v5630_v15 = vld [vmem:[%s19985_s0 + $0x181] sm:$0xff] }
 0x280   :  { %13884 = vmatmul.mubr.msk.bf16.gmra.mrb[52].mxu0 %vm20643_vm0, %v5127_v42  ;;  %v742_v42 = vpack.c.bf16 %v4775_v51, %v709_v4  ;;  %v5594_v51 = vld [vmem:[%s19985_s0 + $0x61] sm:$0xff] }
 0x281   :  { %13887 = vmatprep.mubr.msk.bf16.mxu0 %vm20672_vm15, %v5128_v29  ;;  %vm20679_vm15 = vmmov %vm20643_vm0  ;;  %v5590_v29 = vld [vmem:[%s19985_s0 + $0x41] sm:$0xff] }
 0x282   :  { %13554 = vmatmul.mubr.msk.bf16.gmra.mrb[52].mxu1 %vm20677_vm6, %v738_v19  ;;  %v5844_v12 = vpack.c.bf16 %v5591_v46, %v5590_v29  ;;  %vm20685_vm6 = vmmov %vm20643_vm0  ;;  %v5597_v19 = vld [vmem:[%s19985_s0 + $0x79] sm:$0xff]  ;;  %v5611_v29 = vld [vmem:[%s19985_s0 + $0xe9] sm:$0xff] }
 0x283   :  { %13557 = vmatprep.mubr.msk.bf16.mxu1 %vm20679_vm15, %v739_v60  ;;  %vm20687_vm15 = vmmov %vm20643_vm0  ;;  %v5847_v31 = vpack.c.bf16 %v5597_v19, %v5596_v32  ;;  %v5603_v60 = vld [vmem:[%s19985_s0 + $0xa9] sm:$0xff]  ;;  %v5620_v19 = vld [vmem:[%s19985_s0 + $0x131] sm:$0xff] }
 0x284   :  { %v5850_v7 = vpack.c.bf16 %v5603_v60, %v5602_v17  ;;  %v5625_v17 = vld [vmem:[%s19985_s0 + $0x159] sm:$0xff]  ;;  %v5626_v60 = vld [vmem:[%s19985_s0 + $0x161] sm:$0xff] }
 0x288   :  { %13888 = vmatmul.mubr.msk.bf16.gmra.mrb[56].mxu0 %vm20678_vm3, %v5129_v22  ;;  %vm20686_vm3 = vcmask 1043456   ;;  %v5848_v22 = vpack.c.bf16 %v5599_v2, %v5598_v0  ;;  %v5621_v0 = vld [vmem:[%s19985_s0 + $0x139] sm:$0xff]  ;;  %v5622_v2 = vld [vmem:[%s19985_s0 + $0x141] sm:$0xff] }
 0x289   :  { %13891 = vmatprep.mubr.msk.bf16.mxu0 %vm20643_vm0, %v5130_v62  ;;  %v6779_v63 = vsel %vm20686_vm3, %v17207_v43, 0  ;;  %v5595_v43 = vld [vmem:[%s19985_s0 + $0x69] sm:$0xff]  ;;  %v5600_v62 = vld [vmem:[%s19985_s0 + $0x91] sm:$0xff]  ;;  %vm20693_vm3 = vmmov %vm20643_vm0 }
 0x28a   :  { %13558 = vmatmul.mubr.msk.bf16.gmra.mrb[56].mxu1 %vm20680_vm11, %v740_v13  ;;  %v5846_v37 = vpack.c.bf16 %v5595_v43, %v5594_v51  ;;  %vm20688_vm11 = vmmov %vm20643_vm0  ;;  %v5849_v13 = vpack.c.bf16 %v5601_v45, %v5600_v62  ;;  %v5856_v43 = vpack.c.bf16 %v5615_v38, %v5614_v25  ;;  %v5624_v45 = vld [vmem:[%s19985_s0 + $0x151] sm:$0xff] }
 0x28b   :  { %13561 = vmatprep.mubr.msk.bf16.mxu1 %vm20684_vm1, %v741_v47  ;;  %vm20691_vm1 = vmmov %vm20643_vm0  ;;  %v5609_v47 = vld [vmem:[%s19985_s0 + $0xd9] sm:$0xff]  ;;  %v5636_v38 = vld [vmem:[%s19985_s0 + $0x1b1] sm:$0xff] }
 0x28c   :  { %v5853_v46 = vpack.c.bf16 %v5609_v47, %v5608_v58  ;;  %v5632_v47 = vld [vmem:[%s19985_s0 + $0x191] sm:$0xff] }
 0x290   :  { %13892 = vmatmul.mubr.bf16.gmra.mrb[60].mxu0 %v20531_v40 }
 0x291   :  { %13897 = vmatprep.mubr.msk.bf16.mxu0 %vm20683_vm2, %v5842_v50  ;;  %vm20690_vm2 = vmmov %vm20643_vm0  ;;  %v5605_v50 = vld [vmem:[%s19985_s0 + $0xb9] sm:$0xff] }
 0x292   :  { %13562 = vmatmul.mubr.msk.bf16.gmra.mrb[60].mxu1 %vm20685_vm6, %v742_v42  ;;  %vm20692_vm6 = vmmov %vm20643_vm0  ;;  %v5851_v4 = vpack.c.bf16 %v5605_v50, %v5604_v6  ;;  %v5610_v42 = vld [vmem:[%s19985_s0 + $0xe1] sm:$0xff]  ;;  %v5628_v50 = vld [vmem:[%s19985_s0 + $0x171] sm:$0xff] }
 0x298   :  { %13898 = vmatmul.mubr.msk.bf16.vlgmr.msra.gmra.mrb[0].mxu0 %vm20643_vm0, %v5843_v52  ;;  %v5854_v52 = vpack.c.bf16 %v5611_v29, %v5610_v42  ;;  %v5633_v42 = vld [vmem:[%s19985_s0 + $0x199] sm:$0xff]  ;;  %v17711_v29 = vpop.f32.mrb[0].mxu1 }
 0x299   :  { %13962 = vmatpush3.bf16.msra.mxu0 %v6779_v63  ;;  %13901 = vmatprep.mubr.msk.bf16.mxu0 %vm20687_vm15, %v5844_v12  ;;  %vm20694_vm15 = vmmov %vm20643_vm0  ;;  %v5612_v12 = vld [vmem:[%s19985_s0 + $0xf1] sm:$0xff]  ;;  %v5613_v63 = vld [vmem:[%s19985_s0 + $0xf9] sm:$0xff]  ;;  %v17720_v25 = vpop.f32.mrb[1].mxu1 }
 0x29a   :  { %v5855_v51 = vpack.c.bf16 %v5613_v63, %v5612_v12  ;;  %v5865_v12 = vpack.c.bf16 %v5633_v42, %v5632_v47 }
 0x2a0   :  { %13902 = vmatmul.mubr.msk.bf16.gmra.mrb[4].mxu0 %vm20688_vm11, %v5845_v16  ;;  %vm20695_vm11 = vmmov %vm20643_vm0  ;;  %v5618_v16 = vld [vmem:[%s19985_s0 + $0x121] sm:$0xff] }
 0x2a1   :  { %13905 = vmatprep.mubr.msk.bf16.mxu0 %vm20689_vm13, %v5846_v37  ;;  %vm20696_vm13 = vmmov %vm20643_vm0  ;;  %v5619_v37 = vld [vmem:[%s19985_s0 + $0x129] sm:$0xff] }
 0x2a2   :  { %v5858_v32 = vpack.c.bf16 %v5619_v37, %v5618_v16  ;;  %v5638_v16 = vld [vmem:[%s19985_s0 + $0x1c1] sm:$0xff]  ;;  %v5639_v37 = vld [vmem:[%s19985_s0 + $0x1c9] sm:$0xff] }
 0x2a8   :  { %13906 = vmatmul.mubr.msk.bf16.gmra.mrb[8].mxu0 %vm20690_vm2, %v5847_v31  ;;  %vm20697_vm2 = vmmov %vm20643_vm0  ;;  %v5623_v31 = vld [vmem:[%s19985_s0 + $0x149] sm:$0xff] }
 0x2a9   :  { %13909 = vmatprep.mubr.msk.bf16.mxu0 %vm20691_vm1, %v5848_v22  ;;  %vm20698_vm1 = vmmov %vm20643_vm0  ;;  %v5859_v22 = vpack.c.bf16 %v5621_v0, %v5620_v19  ;;  %v5860_v62 = vpack.c.bf16 %v5623_v31, %v5622_v2  ;;  %v5868_v0 = vpack.c.bf16 %v5639_v37, %v5638_v16  ;;  %v5640_v31 = vld [vmem:[%s19985_s0 + $0x1d1] sm:$0xff] }
 0x2b0   :  { %13910 = vmatmul.mubr.msk.bf16.gmra.mrb[12].mxu0 %vm20692_vm6, %v5849_v13  ;;  %vm20699_vm6 = vmmov %vm20643_vm0  ;;  %v5627_v13 = vld [vmem:[%s19985_s0 + $0x169] sm:$0xff] }
 0x2b1   :  { %13913 = vmatprep.mubr.msk.bf16.mxu0 %vm20693_vm3, %v5850_v7  ;;  %vm20700_vm3 = vmmov %vm20643_vm0  ;;  %v5861_v7 = vpack.c.bf16 %v5625_v17, %v5624_v45  ;;  %v5862_v6 = vpack.c.bf16 %v5627_v13, %v5626_v60  ;;  %v5642_v45 = vld [vmem:[%s19985_s0 + $0x1e1] sm:$0xff]  ;;  %v5643_v17 = vld [vmem:[%s19985_s0 + $0x1e9] sm:$0xff] }
 0x2b8   :  { %13914 = vmatmul.mubr.msk.bf16.gmra.mrb[16].mxu0 %vm20643_vm0, %v5851_v4  ;;  %v5631_v4 = vld [vmem:[%s19985_s0 + $0x189] sm:$0xff] }
 0x2b9   :  { %13917 = vmatprep.mubr.msk.bf16.mxu0 %vm20694_vm15, %v5852_v53  ;;  %vm20701_vm15 = vmmov %vm20643_vm0  ;;  %v5863_v53 = vpack.c.bf16 %v5629_v33, %v5628_v50  ;;  %v5864_v58 = vpack.c.bf16 %v5631_v4, %v5630_v15  ;;  %v5644_v33 = vld [vmem:[%s19985_s0 + $0x1f1] sm:$0xff]  ;;  %v5645_v15 = vld [vmem:[%s19985_s0 + $0x1f9] sm:$0xff] }
 0x2c0   :  { %13918 = vmatmul.mubr.msk.bf16.gmra.mrb[20].mxu0 %vm20695_vm11, %v5853_v46  ;;  %vm20702_vm11 = vmmov %vm20643_vm0  ;;  %v5634_v46 = vld [vmem:[%s19985_s0 + $0x1a1] sm:$0xff] }
 0x2c1   :  { %13921 = vmatprep.mubr.msk.bf16.mxu0 %vm20696_vm13, %v5854_v52  ;;  %vm20703_vm13 = vmmov %vm20643_vm0  ;;  %v5635_v52 = vld [vmem:[%s19985_s0 + $0x1a9] sm:$0xff] }
 0x2c2   :  { %v5866_v63 = vpack.c.bf16 %v5635_v52, %v5634_v46  ;;  %v5871_v46 = vpack.c.bf16 %v5645_v15, %v5644_v33  ;;  %v6335_v15 = vld [vmem:[%s19985_s0 + $0x5a] sm:$0xff] }
 0x2c8   :  { %13922 = vmatmul.mubr.msk.bf16.gmra.mrb[24].mxu0 %vm20697_vm2, %v5855_v51  ;;  %vm20704_vm2 = vmmov %vm20643_vm0  ;;  %v5637_v51 = vld [vmem:[%s19985_s0 + $0x1b9] sm:$0xff] }
 0x2c9   :  { %13925 = vmatprep.mubr.msk.bf16.mxu0 %vm20698_vm1, %v5856_v43  ;;  %vm20705_vm1 = vmmov %vm20643_vm0  ;;  %v17729_v43 = vpop.f32.mrb[2].mxu1  ;;  %v5867_v19 = vpack.c.bf16 %v5637_v51, %v5636_v38  ;;  %v6328_v51 = vld [vmem:[%s19985_s0 + $0x22] sm:$0xff] }
 0x2d0   :  { %13926 = vmatmul.mubr.bf16.gmra.mrb[28].mxu0 %v20531_v40 }
 0x2d1   :  { %13929 = vmatprep.mubr.msk.bf16.mxu0 %vm20699_vm6, %v5858_v32  ;;  %vm20706_vm6 = vmmov %vm20643_vm0  ;;  %v17737_v32 = vpop.f32.mrb[3].mxu1 }
 0x2d8   :  { %13930 = vmatmul.mubr.msk.bf16.gmra.mrb[32].mxu0 %vm20700_vm3, %v5859_v22  ;;  %vm20707_vm3 = vmmov %vm20643_vm0  ;;  %v5641_v22 = vld [vmem:[%s19985_s0 + $0x1d9] sm:$0xff] }
 0x2d9   :  { %13933 = vmatprep.mubr.msk.bf16.mxu0 %vm20643_vm0, %v5860_v62 }
 0x2e0   :  { %13934 = vmatmul.mubr.msk.bf16.gmra.mrb[36].mxu0 %vm20701_vm15, %v5861_v7  ;;  %v5869_v7 = vpack.c.bf16 %v5641_v22, %v5640_v31  ;;  %vm20708_vm15 = vmmov %vm20643_vm0  ;;  %v6333_v31 = vld [vmem:[%s19985_s0 + $0x4a] sm:$0xff]  ;;  %v6330_v22 = vld [vmem:[%s19985_s0 + $0x32] sm:$0xff] }
 0x2e1   :  { %13937 = vmatprep.mubr.msk.bf16.mxu0 %vm20702_vm11, %v5862_v6  ;;  %v5870_v6 = vpack.c.bf16 %v5643_v17, %v5642_v45  ;;  %vm20709_vm11 = vmmov %vm20643_vm0 }
 0x2e8   :  { %13938 = vmatmul.mubr.msk.bf16.gmra.mrb[40].mxu0 %vm20703_vm13, %v5863_v53  ;;  %v5646_v53 = vld [vmem:[%s19985_s0 + $0x201] sm:$0xff]  ;;  %vm20710_vm13 = vmmov %vm20643_vm0 }
 0x2e9   :  { %13941 = vmatprep.mubr.msk.bf16.mxu0 %vm20704_vm2, %v5864_v58  ;;  %v5647_v58 = vld [vmem:[%s19985_s0 + $0x209] sm:$0xff]  ;;  %vm20711_vm2 = vmmov %vm20643_vm0 }
 0x2ea   :  { %v5872_v52 = vpack.c.bf16 %v5647_v58, %v5646_v53  ;;  %v20714_v58 = vld [vmem:[#allocation13_spill] sm:$0xff] }
 0x2f0   :  { %13942 = vmatmul.mubr.msk.bf16.gmra.mrb[44].mxu0 %vm20705_vm1, %v5865_v12  ;;  %v6329_v12 = vld [vmem:[%s19985_s0 + $0x2a] sm:$0xff]  ;;  %vm20713_vm1 = vnez %v20245_v21  ;;  %v6336_v21 = vld [vmem:[%s19985_s0 + $0x62] sm:$0xff] }
 0x2f1   :  { %13945 = vmatprep.mubr.msk.bf16.mxu0 %vm20706_vm6, %v5866_v63  ;;  %v6585_v16 = vsel %vm16794_vm14, %v6329_v12, 0.0  ;;  %vm20712_vm14 = vmmov %vm20643_vm0 }
 0x2f2   :  { %vm20717_vm6 = vmmov %vm20643_vm0 }
 0x2f5   :  { %v17740_v2 = vpop.f32.mrb[4].mxu1 }
 0x2f6   :  { %v17749_v62 = vpop.f32.mrb[5].mxu1 }
 0x2f7   :  { %v17757_v60 = vpop.f32.mrb[6].mxu1 }
 0x2f8   :  { %13946 = vmatmul.mubr.msk.bf16.gmra.mrb[48].mxu0 %vm20707_vm3, %v5867_v19  ;;  %v17759_v13 = vpop.f32.mrb[7].mxu1  ;;  %vm20718_vm3 = vnez %v20255_v44  ;;  %v6338_v44 = vld [vmem:[%s19985_s0 + $0x72] sm:$0xff] }
 0x2f9   :  { %13949 = vmatprep.mubr.msk.bf16.mxu0 %vm20643_vm0, %v5868_v0  ;;  %v6648_v0 = vpack.c.bf16 %v6585_v16, %v6328_v51  ;;  %v6334_v51 = vld [vmem:[%s19985_s0 + $0x52] sm:$0xff]  ;;  %v6591_v16 = vsel %vm15596_vm5, %v6335_v15, 0.0  ;;  %vm20719_vm5 = vmmov %vm20643_vm0 }
 0x2fd   :  { %v17762_v50 = vpop.f32.mrb[8].mxu1 }
 0x2fe   :  { %v17771_v4 = vpop.f32.mrb[9].mxu1 }
 0x2ff   :  { %v17779_v47 = vpop.f32.mrb[10].mxu1 }
 0x300   :  { %13950 = vmatmul.mubr.msk.bf16.gmra.mrb[52].mxu0 %vm20708_vm15, %v5869_v7  ;;  %v17781_v42 = vpop.f32.mrb[11].mxu1  ;;  %v15002_v7 = vld [vmem:[%s19986_s3 + $0x10] sm:$0xff]   ;;  %vm20722_vm15 = vmmov %vm20643_vm0 }
 0x301   :  { %13953 = vmatprep.mubr.msk.bf16.mxu0 %vm20709_vm11, %v5870_v6  ;;  %v6589_v6 = vsel %vm15575_vm4, %v6333_v31, 0.0  ;;  %14027 = vmatprep.subr.bf16.mxu1 %v15002_v7  ;;  %vm20716_vm4 = vmmov %vm20643_vm0 }
 0x302   :  { %14028 = vmatpush3.bf16.msra.mxu1 %v15002_v7  ;;  %v6650_v12 = vpack.c.bf16 %v6589_v6, %v6332_v26  ;;  %v6651_v6 = vpack.c.bf16 %v6591_v16, %v6334_v51  ;;  %vm20731_vm11 = vmmov %vm20643_vm0 }
 0x305   :  { %v17787_v63 = vpop.f32.mrb[12].mxu1 }
 0x306   :  { %v17790_v38 = vpop.f32.mrb[13].mxu1 }
 0x307   :  { %v17797_v37 = vpop.f32.mrb[14].mxu1 }
 0x308   :  { %13954 = vmatmul.mubr.msk.bf16.gmra.mrb[56].mxu0 %vm20710_vm13, %v5871_v46  ;;  %v17799_v19 = vpop.f32.mrb[15].mxu1  ;;  %v20715_v46 = vsel %vm20713_vm1, %v20714_v58, 0.0  ;;  %v6341_v58 = vld [vmem:[%s19985_s0 + $0x8a] sm:$0xff]  ;;  %vm20732_vm13 = vnez %v20279_v27  ;;  %v6355_v27 = vld [vmem:[%s19985_s0 + $0xfa] sm:$0xff]  ;;  %vm20737_vm1 = vmmov %vm20643_vm0 }
 0x309   :  { %13957 = vmatprep.mubr.msk.bf16.mxu0 %vm20711_vm2, %v5872_v52  ;;  %v6649_v52 = vpack.c.bf16 %v20715_v46, %v6330_v22  ;;  %v6593_v22 = vsel %vm20718_vm3, %v6337_v30, 0.0  ;;  %v6340_v30 = vld [vmem:[%s19985_s0 + $0x82] sm:$0xff]  ;;  %v6597_v51 = vsel %vm15648_vm8, %v6341_v58, 0.0  ;;  %v6599_v58 = vsel %vm15669_vm9, %v6343_v56, 0.0  ;;  %v6349_v56 = vld [vmem:[%s19985_s0 + $0xca] sm:$0xff]  ;;  %vm20724_vm8 = vmmov %vm20643_vm0 }
 0x30a   :  { %v6652_v15 = vpack.c.bf16 %v6593_v22, %v6336_v21  ;;  %vm20726_vm9 = vmmov %vm20643_vm0  ;;  %vm20734_vm2 = vnez %v20281_v34  ;;  %v6354_v34 = vld [vmem:[%s19985_s0 + $0xf2] sm:$0xff] }
 0x30b   :  { %vm20741_vm3 = vmmov %vm20643_vm0 }
 0x30d   :  { %v17811_v45 = vpop.f32.mrb[16].mxu1 }
 0x30e   :  { %v17814_v17 = vpop.f32.mrb[17].mxu1 }
 0x30f   :  { %v17821_v33 = vpop.f32.mrb[18].mxu1 }
 0x310   :  { %13958 = vmatmul.mubr.bf16.gmra.mrb[60].mxu0 %v20531_v40  ;;  %v17826_v53 = vpop.f32.mrb[19].mxu1 }
 0x311   :  { %13963 = vmatprep.mubr.msk.bf16.mxu0 %vm20712_vm14, %v6648_v0  ;;  %vm20735_vm14 = vmmov %vm20643_vm0 }
 0x315   :  { %v17841_v0 = vpop.f32.mrb[20].mxu1 }
 0x316   :  { %v17847_v31 = vpop.f32.mrb[21].mxu1 }
 0x317   :  { %v17851_v26 = vpop.f32.mrb[22].mxu1 }
 0x318   :  { %13964 = vmatmul.mubr.msk.bf16.vlgmr.msra.gmra.mrb[0].mxu0 %vm20716_vm4, %v6649_v52  ;;  %v17853_v7 = vpop.f32.mrb[23].mxu1  ;;  %v6595_v52 = vsel %vm15638_vm7, %v6339_v41, 0.0  ;;  %v6345_v41 = vld [vmem:[%s19985_s0 + $0xaa] sm:$0xff]  ;;  %vm20720_vm7 = vmmov %vm20643_vm0  ;;  %vm20738_vm4 = vnez %v20283_v55 }
 0x319   :  { %13967 = vmatprep.mubr.msk.bf16.mxu0 %vm20717_vm6, %v6650_v12  ;;  %v6653_v22 = vpack.c.bf16 %v6595_v52, %v6338_v44  ;;  %v6344_v52 = vld [vmem:[%s19985_s0 + $0xa2] sm:$0xff]  ;;  %vm20740_vm6 = vnez %v20285_v61  ;;  %v6361_v55 = vld [vmem:[%s19985_s0 + $0x12a] sm:$0xff] }
 0x31a   :  { %v6360_v61 = vld [vmem:[%s19985_s0 + $0x122] sm:$0xff] }
 0x31d   :  { %v17862_v46 = vpop.f32.mrb[24].mxu1 }
 0x31e   :  { %v17870_v12 = vpop.f32.mrb[25].mxu1 }
 0x31f   :  { %v17877_v16 = vpop.f32.mrb[26].mxu1 }
 0x320   :  { %13968 = vmatmul.mubr.msk.bf16.gmra.mrb[4].mxu0 %vm20719_vm5, %v6651_v6  ;;  %v17879_v21 = vpop.f32.mrb[27].mxu1  ;;  %v6654_v6 = vpack.c.bf16 %v6597_v51, %v6340_v30  ;;  %v6601_v30 = vsel %vm15677_vm10, %v6345_v41, 0.0  ;;  %v6603_v41 = vsel %vm15704_vm12, %v6347_v20, 0.0  ;;  %vm20728_vm10 = vnez %v20273_v54  ;;  %v6353_v20 = vld [vmem:[%s19985_s0 + $0xea] sm:$0xff]  ;;  %vm20729_vm12 = vmmov %vm20643_vm0  ;;  %v6350_v54 = vld [vmem:[%s19985_s0 + $0xd2] sm:$0xff] }
 0x321   :  { %13971 = vmatprep.mubr.msk.bf16.mxu0 %vm20643_vm0, %v6652_v15  ;;  %vm20742_vm5 = vmmov %vm20643_vm0  ;;  %vm20744_vm0 = vnez %v20517_v57  ;;  %v6362_v57 = vld [vmem:[%s19985_s0 + $0x132] sm:$0xff] }
 0x325   :  { %v17888_v15 = vpop.f32.mrb[28].mxu1 }
 0x326   :  { %20721 = vst [vmem:[#allocation60_spill] sm:$0xff] %v17888_v15  ;;  %v17896_v44 = vpop.f32.mrb[29].mxu1  ;;  %v6656_v15 = vpack.c.bf16 %v6601_v30, %v6344_v52  ;;  %v6605_v52 = vsel %vm20728_vm10, %v6349_v56, 0.0  ;;  %v6607_v56 = vsel %vm20732_vm13, %v6351_v48, 0.0  ;;  %v6357_v48 = vld [vmem:[%s19985_s0 + $0x10a] sm:$0xff]  ;;  %vm20754_vm10 = vmmov %vm20737_vm1 }
 0x327   :  { %20723 = vst [vmem:[#allocation23_spill] sm:$0xff] %v17896_v44  ;;  %v17903_v51 = vpop.f32.mrb[30].mxu1  ;;  %vm20758_vm13 = vmmov %vm20737_vm1 }
 0x328   :  { %13972 = vmatmul.mubr.msk.bf16.gmra.mrb[8].mxu0 %vm20720_vm7, %v6653_v22  ;;  %v17905_v22 = vpop.f32.mrb[31].mxu1  ;;  %vm20748_vm7 = vmmov %vm20737_vm1 }
 0x329   :  { %13975 = vmatprep.mubr.msk.bf16.mxu0 %vm20722_vm15, %v6654_v6  ;;  %v6655_v6 = vpack.c.bf16 %v6599_v58, %v6342_v59  ;;  %v6348_v58 = vld [vmem:[%s19985_s0 + $0xc2] sm:$0xff]  ;;  %vm20749_vm15 = vnez %v20292_v49  ;;  %v6367_v49 = vld [vmem:[%s19985_s0 + $0x15a] sm:$0xff] }
 0x32d   :  { %v17914_v44 = vpop.f32.mrb[32].mxu1 }
 0x32e   :  { %20725 = vst [vmem:[#allocation24_spill] sm:$0xff] %v17914_v44  ;;  %v17922_v59 = vpop.f32.mrb[33].mxu1  ;;  %v6658_v44 = vpack.c.bf16 %v6605_v52, %v6348_v58  ;;  %v6609_v58 = vsel %vm20734_vm2, %v6353_v20, 0.0  ;;  %v6611_v20 = vsel %vm20738_vm4, %v6355_v27, 0.0  ;;  %vm20760_vm2 = vmmov %vm20737_vm1 }
 0x32f   :  { %20727 = vst [vmem:[#allocation61_spill] sm:$0xff] %v17922_v59  ;;  %v17929_v30 = vpop.f32.mrb[34].mxu1  ;;  %vm20764_vm4 = vmmov %vm20760_vm2 }
 0x330   :  { %13976 = vmatmul.mubr.msk.bf16.gmra.mrb[12].mxu0 %vm20724_vm8, %v6655_v6  ;;  %v17931_v6 = vpop.f32.mrb[35].mxu1  ;;  %vm20751_vm8 = vnez %v20294_v9  ;;  %v6366_v9 = vld [vmem:[%s19985_s0 + $0x152] sm:$0xff] }
 0x331   :  { %13979 = vmatprep.mubr.msk.bf16.mxu0 %vm20726_vm9, %v6656_v15  ;;  %v6657_v15 = vpack.c.bf16 %v6603_v41, %v6346_v28  ;;  %v6352_v41 = vld [vmem:[%s19985_s0 + $0xe2] sm:$0xff]  ;;  %vm20752_vm9 = vmmov %vm20737_vm1 }
 0x335   :  { %v17940_v59 = vpop.f32.mrb[36].mxu1 }
 0x336   :  { %20730 = vst [vmem:[#allocation62_spill] sm:$0xff] %v17940_v59  ;;  %v17948_v28 = vpop.f32.mrb[37].mxu1  ;;  %v6660_v59 = vpack.c.bf16 %v6609_v58, %v6352_v41  ;;  %v6613_v41 = vsel %vm20740_vm6, %v6357_v48, 0.0  ;;  %v6617_v48 = vsel %vm20744_vm0, %v6361_v55, 0.0  ;;  %vm20766_vm6 = vmmov %vm20760_vm2 }
 0x337   :  { %20733 = vst [vmem:[#allocation25_spill] sm:$0xff] %v17948_v28  ;;  %v17955_v52 = vpop.f32.mrb[38].mxu1  ;;  %vm20769_vm0 = vmmov %vm20760_vm2 }
 0x338   :  { %13980 = vmatmul.mubr.msk.bf16.gmra.mrb[16].mxu0 %vm20729_vm12, %v6657_v15  ;;  %v17957_v15 = vpop.f32.mrb[39].mxu1  ;;  %vm20755_vm12 = vnez %v20296_v36  ;;  %v6371_v36 = vld [vmem:[%s19985_s0 + $0x17a] sm:$0xff] }
 0x339   :  { %13983 = vmatprep.mubr.msk.bf16.mxu0 %vm20731_vm11, %v6658_v44  ;;  %v6659_v44 = vpack.c.bf16 %v6607_v56, %v6350_v54  ;;  %v6356_v56 = vld [vmem:[%s19985_s0 + $0x102] sm:$0xff]  ;;  %vm20757_vm11 = vnez %v20298_v39  ;;  %v6370_v39 = vld [vmem:[%s19985_s0 + $0x172] sm:$0xff] }
 0x33d   :  { %v17966_v28 = vpop.f32.mrb[40].mxu1 }
 0x33e   :  { %20736 = vst [vmem:[#allocation19_spill] sm:$0xff] %v17966_v28  ;;  %v17974_v54 = vpop.f32.mrb[41].mxu1  ;;  %v6662_v28 = vpack.c.bf16 %v6613_v41, %v6356_v56  ;;  %v6664_v56 = vpack.c.bf16 %v6617_v48, %v6360_v61  ;;  %v6363_v41 = vld [vmem:[%s19985_s0 + $0x13a] sm:$0xff]  ;;  %v6364_v48 = vld [vmem:[%s19985_s0 + $0x142] sm:$0xff] }
 0x33f   :  { %20739 = vst [vmem:[#allocation63_spill] sm:$0xff] %v17974_v54  ;;  %v17981_v58 = vpop.f32.mrb[42].mxu1  ;;  %v6619_v55 = vsel %vm20749_vm15, %v6363_v41, 0.0  ;;  %v6369_v41 = vld [vmem:[%s19985_s0 + $0x16a] sm:$0xff]  ;;  %vm20771_vm15 = vnez %v20314_v10  ;;  %v6382_v10 = vld [vmem:[%s19985_s0 + $0x1d2] sm:$0xff] }
 0x340   :  { %13984 = vmatmul.mubr.msk.bf16.gmra.mrb[20].mxu0 %vm20735_vm14, %v6659_v44  ;;  %v17983_v44 = vpop.f32.mrb[43].mxu1  ;;  %vm20761_vm14 = vnez %v20302_v3  ;;  %v6375_v3 = vld [vmem:[%s19985_s0 + $0x19a] sm:$0xff] }
 0x341   :  { %13987 = vmatprep.mubr.msk.bf16.mxu0 %vm20737_vm1, %v6660_v59  ;;  %v6661_v59 = vpack.c.bf16 %v6611_v20, %v6354_v34  ;;  %vm20763_vm1 = vnez %v20304_v24  ;;  %v6374_v24 = vld [vmem:[%s19985_s0 + $0x192] sm:$0xff] }
 0x345   :  { %v17989_v27 = vpop.f32.mrb[44].mxu1 }
 0x346   :  { %v17992_v54 = vpop.f32.mrb[45].mxu1 }
 0x347   :  { %20743 = vst [vmem:[#allocation64_spill] sm:$0xff] %v17992_v54  ;;  %v17999_v34 = vpop.f32.mrb[46].mxu1 }
 0x348   :  { %13988 = vmatmul.mubr.msk.bf16.gmra.mrb[24].mxu0 %vm20741_vm3, %v6661_v59  ;;  %20745 = vst [vmem:[#allocation27_spill] sm:$0xff] %v17999_v34  ;;  %v18001_v20 = vpop.f32.mrb[47].mxu1  ;;  %vm20767_vm3 = vnez %v20308_v11  ;;  %v6379_v11 = vld [vmem:[%s19985_s0 + $0x1ba] sm:$0xff] }
 0x349   :  { %13991 = vmatprep.mubr.msk.bf16.mxu0 %vm20742_vm5, %v6662_v28  ;;  %20746 = vst [vmem:[#allocation65_spill] sm:$0xff] %v18001_v20  ;;  %v6365_v28 = vld [vmem:[%s19985_s0 + $0x14a] sm:$0xff]  ;;  %vm20768_vm5 = vnez %v20310_v18  ;;  %v6378_v18 = vld [vmem:[%s19985_s0 + $0x1b2] sm:$0xff] }
 0x34a   :  { %v6621_v20 = vsel %vm20751_vm8, %v6365_v28, 0.0  ;;  %vm20772_vm8 = vnez %v20316_v1 }
 0x34b   :  { %v6666_v54 = vpack.c.bf16 %v6621_v20, %v6364_v48  ;;  %v6623_v20 = vsel %vm20755_vm12, %v6367_v49, 0.0  ;;  %v6373_v49 = vld [vmem:[%s19985_s0 + $0x18a] sm:$0xff]  ;;  %vm20775_vm12 = vnez %v20320_v35  ;;  %v20194_v35 = vmov 0.0  }
 0x34c   :  { %45 = vst [vmem:[#allocation2] sm:$0xff] %v20194_v35  ;;  %48 = vst [vmem:[#allocation2 + $0x18] sm:$0xff] %v20194_v35 }
 0x34d   :  { %v18010_v59 = vpop.f32.mrb[48].mxu1  ;;  %49 = vst [vmem:[#allocation2 + $0x20] sm:$0xff] %v20194_v35  ;;  %46 = vst [vmem:[#allocation2 + $0x8] sm:$0xff] %v20194_v35 }
 0x34e   :  { %20747 = vst [vmem:[#allocation67_spill] sm:$0xff] %v18010_v59  ;;  %v18018_v61 = vpop.f32.mrb[49].mxu1  ;;  %47 = vst [vmem:[#allocation2 + $0x10] sm:$0xff] %v20194_v35 }
 0x34f   :  { %20750 = vst [vmem:[#allocation12_spill] sm:$0xff] %v18018_v61  ;;  %v18025_v34 = vpop.f32.mrb[50].mxu1  ;;  %50 = vst [vmem:[#allocation2 + $0x28] sm:$0xff] %v20194_v35 }
 0x350   :  { %13992 = vmatmul.mubr.bf16.gmra.mrb[28].mxu0 %v20531_v40  ;;  %v18027_v59 = vpop.f32.mrb[51].mxu1  ;;  %51 = vst [vmem:[#allocation2 + $0x30] sm:$0xff] %v20194_v35  ;;  %52 = vst [vmem:[#allocation2 + $0x38] sm:$0xff] %v20194_v35 }
 0x351   :  { %13995 = vmatprep.mubr.msk.bf16.mxu0 %vm20748_vm7, %v6664_v56  ;;  %v6665_v56 = vpack.c.bf16 %v6619_v55, %v6362_v57  ;;  %v6368_v57 = vld [vmem:[%s19985_s0 + $0x162] sm:$0xff]  ;;  %v6625_v55 = vsel %vm20757_vm11, %v6369_v41, 0.0  ;;  %v6627_v41 = vsel %vm20761_vm14, %v6371_v36, 0.0  ;;  %v6377_v36 = vld [vmem:[%s19985_s0 + $0x1aa] sm:$0xff]  ;;  %vm20770_vm7 = vmmov %vm20769_vm0  ;;  %vm20776_vm11 = vnez %v20322_v8  ;;  %53 = vst [vmem:[#allocation2 + $0x40] sm:$0xff] %v20194_v35 }
 0x352   :  { %54 = vst [vmem:[#allocation2 + $0x48] sm:$0xff] %v20194_v35  ;;  %55 = vst [vmem:[#allocation2 + $0x50] sm:$0xff] %v20194_v35  ;;  %v6386_v8 = vld [vmem:[%s19985_s0 + $0x1f2] sm:$0xff]  ;;  %vm20779_vm14 = vnez %v20555_v14 }
 0x353   :  { %56 = vst [vmem:[#allocation2 + $0x58] sm:$0xff] %v20194_v35  ;;  %57 = vst [vmem:[#allocation2 + $0x60] sm:$0xff] %v20194_v35 }
 0x354   :  { %58 = vst [vmem:[#allocation2 + $0x68] sm:$0xff] %v20194_v35  ;;  %59 = vst [vmem:[#allocation2 + $0x70] sm:$0xff] %v20194_v35 }
 0x355   :  { %v18036_v61 = vpop.f32.mrb[52].mxu1  ;;  %60 = vst [vmem:[#allocation2 + $0x78] sm:$0xff] %v20194_v35  ;;  %61 = vst [vmem:[#allocation2 + $0x80] sm:$0xff] %v20194_v35 }
 0x356   :  { %20753 = vst [vmem:[#allocation21_spill] sm:$0xff] %v18036_v61  ;;  %v18044_v28 = vpop.f32.mrb[53].mxu1  ;;  %v6668_v61 = vpack.c.bf16 %v6625_v55, %v6368_v57  ;;  %v6629_v57 = vsel %vm20763_vm1, %v6373_v49, 0.0  ;;  %v6631_v49 = vsel %vm20767_vm3, %v6375_v3, 0.0  ;;  %v6381_v3 = vld [vmem:[%s19985_s0 + $0x1ca] sm:$0xff]  ;;  %62 = vst [vmem:[#allocation2 + $0x88] sm:$0xff] %v20194_v35  ;;  %vm20780_vm1 = vnez %v20557_v23 }
 0x357   :  { %20756 = vst [vmem:[#allocation30_spill] sm:$0xff] %v18044_v28  ;;  %v18051_v48 = vpop.f32.mrb[54].mxu1  ;;  %64 = vst [vmem:[#allocation3] sm:$0xff] %v20194_v35  ;;  %v18194_v23 = vld [vmem:[%s19987_s2] ss:$0 sm:$0xff]  ;;  %vm20215_vm3 = vcmask 261120  }
 0x358   :  { %13996 = vmatmul.mubr.msk.bf16.gmra.mrb[32].mxu0 %vm20752_vm9, %v6665_v56  ;;  %v18053_v56 = vpop.f32.mrb[55].mxu1  ;;  %vm20773_vm9 = vmmov %vm20769_vm0  ;;  %65 = vst [vmem:[#allocation3 + $0x8] sm:$0xff] %v20194_v35 }
 0x359   :  { %13999 = vmatprep.mubr.msk.bf16.mxu0 %vm20754_vm10, %v6666_v54  ;;  %v6667_v54 = vpack.c.bf16 %v6623_v20, %v6366_v9  ;;  %v6372_v20 = vld [vmem:[%s19985_s0 + $0x182] sm:$0xff]  ;;  %vm20774_vm10 = vmmov %vm20769_vm0  ;;  %66 = vst [vmem:[#allocation3 + $0x10] sm:$0xff] %v20194_v35 }
 0x35a   :  { %67 = vst [vmem:[#allocation3 + $0x18] sm:$0xff] %v20194_v35  ;;  %68 = vst [vmem:[#allocation3 + $0x20] sm:$0xff] %v20194_v35 }
 0x35b   :  { %69 = vst [vmem:[#allocation3 + $0x28] sm:$0x3] %v20194_v35 }
 0x35d   :  { %v18062_v28 = vpop.f32.mrb[56].mxu1 }
 0x35e   :  { %20759 = vst [vmem:[#allocation68_spill] sm:$0xff] %v18062_v28  ;;  %v18070_v9 = vpop.f32.mrb[57].mxu1  ;;  %v6670_v28 = vpack.c.bf16 %v6629_v57, %v6372_v20  ;;  %v6633_v20 = vsel %vm20768_vm5, %v6377_v36, 0.0  ;;  %v6635_v36 = vsel %vm20771_vm15, %v6379_v11, 0.0  ;;  %v6384_v11 = vld [vmem:[%s19985_s0 + $0x1e2] sm:$0xff] }
 0x35f   :  { %20762 = vst [vmem:[#allocation32_spill] sm:$0xff] %v18070_v9  ;;  %v18077_v55 = vpop.f32.mrb[58].mxu1 }
 0x360   :  { %14000 = vmatmul.mubr.msk.bf16.gmra.mrb[36].mxu0 %vm20758_vm13, %v6667_v54  ;;  %v18079_v54 = vpop.f32.mrb[59].mxu1  ;;  %vm20777_vm13 = vmmov %vm20769_vm0 }
 0x361   :  { %14003 = vmatprep.mubr.msk.bf16.mxu0 %vm20760_vm2, %v6668_v61  ;;  %v6669_v61 = vpack.c.bf16 %v6627_v41, %v6370_v39  ;;  %v6376_v41 = vld [vmem:[%s19985_s0 + $0x1a2] sm:$0xff]  ;;  %vm20778_vm2 = vmmov %vm20769_vm0 }
 0x365   :  { %v18088_v9 = vpop.f32.mrb[60].mxu1 }
 0x366   :  { %20765 = vst [vmem:[#allocation34_spill] sm:$0xff] %v18088_v9  ;;  %v18096_v39 = vpop.f32.mrb[61].mxu1  ;;  %v6672_v9 = vpack.c.bf16 %v6633_v20, %v6376_v41  ;;  %v6673_v41 = vpack.c.bf16 %v6635_v36, %v6378_v18 }
 0x367   :  { %v18103_v57 = vpop.f32.mrb[62].mxu1 }
 0x368   :  { %14004 = vmatmul.mubr.msk.bf16.gmra.mrb[40].mxu0 %vm20764_vm4, %v6669_v61  ;;  %v18105_v61 = vpop.f32.mrb[63].mxu1  ;;  %vm20781_vm4 = vmmov %vm20769_vm0 }
 0x369   :  { %14007 = vmatprep.mubr.msk.bf16.mxu0 %vm20766_vm6, %v6670_v28  ;;  %v6671_v28 = vpack.c.bf16 %v6631_v49, %v6374_v24  ;;  %v6380_v24 = vld [vmem:[%s19985_s0 + $0x1c2] sm:$0xff]  ;;  %v6637_v49 = vsel %vm20772_vm8, %v6381_v3, 0.0  ;;  %vm20782_vm6 = vmmov %vm20769_vm0 }
 0x36a   :  { %v6674_v20 = vpack.c.bf16 %v6637_v49, %v6380_v24  ;;  %v6387_v24 = vld [vmem:[%s19985_s0 + $0x1fa] sm:$0xff]  ;;  %v6389_v49 = vld [vmem:[%s19985_s0 + $0x20a] sm:$0xff] }
 0x370   :  { %14008 = vmatmul.mubr.msk.bf16.gmra.mrb[44].mxu0 %vm20769_vm0, %v6671_v28  ;;  %v6385_v28 = vld [vmem:[%s19985_s0 + $0x1ea] sm:$0xff] }
 0x371   :  { %14011 = vmatprep.mubr.msk.bf16.mxu0 %vm20770_vm7, %v6672_v9  ;;  %v6383_v9 = vld [vmem:[%s19985_s0 + $0x1da] sm:$0xff]  ;;  %v6641_v3 = vsel %vm20776_vm11, %v6385_v28, 0.0 }
 0x372   :  { %v6639_v1 = vsel %vm20775_vm12, %v6383_v9, 0.0  ;;  %v6676_v36 = vpack.c.bf16 %v6641_v3, %v6384_v11  ;;  %v6645_v9 = vsel %vm20780_vm1, %v6389_v49, 0.0 }
 0x373   :  { %v6675_v18 = vpack.c.bf16 %v6639_v1, %v6382_v10  ;;  %v15003_v1 = vld [vmem:[%s19986_s3 + $0x18] sm:$0xff]  }
 0x374   :  { %14029 = vmatprep.subr.bf16.mxu1 %v15003_v1 }
 0x375   :  { %14030 = vmatpush3.bf16.msra.mxu1 %v15003_v1 }
 0x378   :  { %14012 = vmatmul.mubr.msk.bf16.gmra.mrb[48].mxu0 %vm20773_vm9, %v6673_v41  ;;  %v6643_v41 = vsel %vm20779_vm14, %v6387_v24, 0.0 }
 0x379   :  { %14015 = vmatprep.mubr.msk.bf16.mxu0 %vm20774_vm10, %v6674_v20  ;;  %v6388_v20 = vld [vmem:[%s19985_s0 + $0x202] sm:$0xff]  ;;  %v6677_v28 = vpack.c.bf16 %v6643_v41, %v6386_v8 }
 0x37a   :  { %v6678_v10 = vpack.c.bf16 %v6645_v9, %v6388_v20 }
 0x380   :  { %14016 = vmatmul.mubr.msk.bf16.gmra.mrb[52].mxu0 %vm20777_vm13, %v6675_v18 }
 0x381   :  { %14019 = vmatprep.mubr.msk.bf16.mxu0 %vm20778_vm2, %v6676_v36 }
 0x388   :  { %14020 = vmatmul.mubr.msk.bf16.gmra.mrb[56].mxu0 %vm20781_vm4, %v6677_v28 }
 0x389   :  { %14023 = vmatprep.mubr.msk.bf16.mxu0 %vm20782_vm6, %v6678_v10 }
 0x390   :  { %14024 = vmatmul.mubr.bf16.gmra.mrb[60].mxu0 %v20531_v40 }
 0x3eb   :  { %v13965_v14 = vpop.f32.mrb[0].mxu0 }
 0x3ec   :  { %v14317_v11 = vadd.f32 %v13965_v14, %v17711_v29  ;;  %v6815_v3 = vpop.f32.mrb[1].mxu0  ;;  %v18207_v29 = vld [vmem:[%s19986_s3] sm:$0xff]  }
 0x3ed   :  { %v14318_v18 = vadd.f32 %v6815_v3, %v17720_v25  ;;  %v13966_v36 = vpop.f32.mrb[2].mxu0  ;;  %14047 = vmatprep.subr.bf16.mxu1 %v18207_v29 }
 0x3ee   :  { %v7143_v24 = vadd.f32 %v14317_v11, %v18194_v23  ;;  %v14319_v49 = vadd.f32 %v13966_v36, %v17729_v43  ;;  %v6818_v8 = vpop.f32.mrb[3].mxu0 }
 0x3ef   :  { %v7141_v40 = vadd.f32 %v14318_v18, %v18194_v23  ;;  %v14320_v41 = vadd.f32 %v6818_v8, %v17737_v32 }
 0x3f0   :  { %v7207_v20 = vmax.f32 %v7143_v24, 0.0  ;;  %v7144_v9 = vadd.f32 %v14319_v49, %v18194_v23 }
 0x3f1   :  { %v7205_v28 = vmax.f32 %v7141_v40, 0.0  ;;  %v7142_v10 = vadd.f32 %v14320_v41, %v18194_v23 }
 0x3f2   :  { %7271 = vst [vmem:[#allocation4 + $0x10] sm:$0xff] %v7207_v20  ;;  %v7208_v25 = vmax.f32 %v7144_v9, 0.0 }
 0x3f3   :  { %7269 = vst [vmem:[#allocation4] sm:$0xff] %v7205_v28  ;;  %v7206_v43 = vmax.f32 %v7142_v10, 0.0  ;;  %v13969_v1 = vpop.f32.mrb[4].mxu0 }
 0x3f4   :  { %7272 = vst [vmem:[#allocation4 + $0x18] sm:$0xff] %v7208_v25  ;;  %v14321_v32 = vadd.f32 %v13969_v1, %v17740_v2  ;;  %v6831_v14 = vpop.f32.mrb[5].mxu0 }
 0x3f5   :  { %7270 = vst [vmem:[#allocation4 + $0x8] sm:$0xff] %v7206_v43  ;;  %v14322_v11 = vadd.f32 %v6831_v14, %v17749_v62  ;;  %v13970_v3 = vpop.f32.mrb[6].mxu0 }
 0x3f6   :  { %v7147_v18 = vadd.f32 %v14321_v32, %v18194_v23  ;;  %v14323_v36 = vadd.f32 %v13970_v3, %v17757_v60  ;;  %v6834_v24 = vpop.f32.mrb[7].mxu0 }
 0x3f7   :  { %v7145_v49 = vadd.f32 %v14322_v11, %v18194_v23  ;;  %v14324_v8 = vadd.f32 %v6834_v24, %v17759_v13 }
 0x3f8   :  { %v7211_v40 = vmax.f32 %v7147_v18, 0.0  ;;  %v7148_v41 = vadd.f32 %v14323_v36, %v18194_v23 }
 0x3f9   :  { %v7209_v20 = vmax.f32 %v7145_v49, 0.0  ;;  %v7146_v2 = vadd.f32 %v14324_v8, %v18194_v23 }
 0x3fa   :  { %7275 = vst [vmem:[#allocation4 + $0x30] sm:$0xff] %v7211_v40  ;;  %v7212_v9 = vmax.f32 %v7148_v41, 0.0 }
 0x3fb   :  { %v7335_v28 = vld [vmem:[#allocation4 + $0x10] ss:$2 sm:$0xff]  ;;  %v7399_v62 = vld [vmem:[#allocation4 + $0x11] ss:$2 sm:$0xff]  ;;  %7273 = vst [vmem:[#allocation4 + $0x20] sm:$0xff] %v7209_v20  ;;  %v7210_v10 = vmax.f32 %v7146_v2, 0.0 }
 0x3fc   :  { %v13973_v25 = vpop.f32.mrb[8].mxu0  ;;  %v7461_v43 = vmax.f32 %v7335_v28, %v7399_v62  ;;  %v7333_v60 = vld [vmem:[#allocation4] ss:$2 sm:$0xff]  ;;  %v7397_v1 = vld [vmem:[#allocation4 + $0x1] ss:$2 sm:$0xff]  ;;  %7276 = vst [vmem:[#allocation4 + $0x38] sm:$0xff] %v7212_v9 }
 0x3fd   :  { %v14325_v32 = vadd.f32 %v13973_v25, %v17762_v50  ;;  %v6847_v13 = vpop.f32.mrb[9].mxu0  ;;  %v7460_v14 = vmax.f32 %v7333_v60, %v7397_v1  ;;  %7274 = vst [vmem:[#allocation4 + $0x28] sm:$0xff] %v7210_v10 }
 0x3fe   :  { %v14326_v11 = vadd.f32 %v6847_v13, %v17771_v4  ;;  %v13974_v3 = vpop.f32.mrb[10].mxu0 }
 0x3ff   :  { %v7151_v18 = vadd.f32 %v14325_v32, %v18194_v23  ;;  %v14327_v36 = vadd.f32 %v13974_v3, %v17779_v47  ;;  %v6850_v24 = vpop.f32.mrb[11].mxu0  ;;  %v7492_v49 = vmax.f32 %v7460_v14, %v7461_v43 }
 0x400   :  { %v7149_v8 = vadd.f32 %v14326_v11, %v18194_v23  ;;  %v14328_v40 = vadd.f32 %v6850_v24, %v17781_v42 }
 0x401   :  { %v7215_v41 = vmax.f32 %v7151_v18, 0.0  ;;  %v7152_v20 = vadd.f32 %v14327_v36, %v18194_v23  ;;  %7493 = vst [vmem:[#allocation2 + $0x9] sm:$0xff] %v7492_v49  ;;  %v7744_v4 = vpack.c.bf16 %v7492_v49, %v20194_v35 }
 0x402   :  { %v7213_v50 = vmax.f32 %v7149_v8, 0.0  ;;  %v7150_v2 = vadd.f32 %v14328_v40, %v18194_v23 }
 0x403   :  { %7279 = vst [vmem:[#allocation4 + $0x50] sm:$0xff] %v7215_v41  ;;  %v7216_v9 = vmax.f32 %v7152_v20, 0.0  ;;  %v7339_v28 = vld [vmem:[#allocation4 + $0x30] ss:$2 sm:$0xff]  ;;  %v7403_v47 = vld [vmem:[#allocation4 + $0x31] ss:$2 sm:$0xff]  ;;  %14031 = vmatprep.mubr.msk.bf16.mxu1 %vm20215_vm3, %v7744_v4 }
 0x404   :  { %7277 = vst [vmem:[#allocation4 + $0x40] sm:$0xff] %v7213_v50  ;;  %v7214_v62 = vmax.f32 %v7150_v2, 0.0  ;;  %v13977_v10 = vpop.f32.mrb[12].mxu0  ;;  %v7463_v42 = vmax.f32 %v7339_v28, %v7403_v47  ;;  %v7337_v25 = vld [vmem:[#allocation4 + $0x20] ss:$2 sm:$0xff]  ;;  %v7540_v20 = vand.u32 7, %v15488_v5 }
 0x405   :  { %v7401_v43 = vld [vmem:[#allocation4 + $0x21] ss:$2 sm:$0xff]  ;;  %7280 = vst [vmem:[#allocation4 + $0x58] sm:$0xff] %v7216_v9  ;;  %v14329_v60 = vadd.f32 %v13977_v10, %v17787_v63  ;;  %v6863_v1 = vpop.f32.mrb[13].mxu0 }
 0x406   :  { %v7462_v32 = vmax.f32 %v7337_v25, %v7401_v43  ;;  %7278 = vst [vmem:[#allocation4 + $0x48] sm:$0xff] %v7214_v62  ;;  %v14330_v13 = vadd.f32 %v6863_v1, %v17790_v38  ;;  %v13978_v14 = vpop.f32.mrb[14].mxu0  ;;  %v20783_v43 = vld [vmem:[#allocation66_spill] sm:$0xff]  ;;  %vm18246_vm5 = vcmp.ge.s32.totalorder %v7540_v20, 1  ;;  %vm18269_vm7 = vcmp.lt.s32.totalorder %v7540_v20, 7 }
 0x407   :  { %v7155_v11 = vadd.f32 %v14329_v60, %v18194_v23  ;;  %v14331_v3 = vadd.f32 %v13978_v14, %v17797_v37  ;;  %v6866_v18 = vpop.f32.mrb[15].mxu0  ;;  %v7541_v60 = vand.u32 7, %v20783_v43 }
 0x408   :  { %v7494_v36 = vmax.f32 %v7462_v32, %v7463_v42  ;;  %v7153_v24 = vadd.f32 %v14330_v13, %v18194_v23  ;;  %v14332_v49 = vadd.f32 %v6866_v18, %v17799_v19  ;;  %v18244_v18 = vld [vmem:[#allocation2 + $0x8] sm:$0xff] }
 0x409   :  { %v7219_v8 = vmax.f32 %v7155_v11, 0.0  ;;  %v7156_v40 = vadd.f32 %v14331_v3, %v18194_v23  ;;  %vm18259_vm0 = vcmp.ge.s32.totalorder %v7541_v60, 1  ;;  %vm18314_vm8 = vcmp.lt.s32.totalorder %v7541_v60, 7 }
 0x40a   :  { %7495 = vst [vmem:[#allocation2 + $0x11] sm:$0xff] %v7494_v36  ;;  %v7217_v63 = vmax.f32 %v7153_v24, 0.0  ;;  %v7154_v41 = vadd.f32 %v14332_v49, %v18194_v23 }
 0x40b   :  { %7283 = vst [vmem:[#allocation4 + $0x70] sm:$0xff] %v7219_v8  ;;  %v7220_v38 = vmax.f32 %v7156_v40, 0.0  ;;  %v13981_v4 = vpop.f32.mrb[16].mxu0 }
 0x40c   :  { %v7343_v50 = vld [vmem:[#allocation4 + $0x50] ss:$2 sm:$0xff]  ;;  %v7407_v2 = vld [vmem:[#allocation4 + $0x51] ss:$2 sm:$0xff]  ;;  %7281 = vst [vmem:[#allocation4 + $0x60] sm:$0xff] %v7217_v63  ;;  %v7218_v37 = vmax.f32 %v7154_v41, 0.0  ;;  %v14333_v19 = vadd.f32 %v13981_v4, %v17811_v45 }
 0x40d   :  { %v7465_v9 = vmax.f32 %v7343_v50, %v7407_v2  ;;  %v7341_v28 = vld [vmem:[#allocation4 + $0x40] ss:$2 sm:$0xff]  ;;  %v7405_v47 = vld [vmem:[#allocation4 + $0x41] ss:$2 sm:$0xff]  ;;  %7284 = vst [vmem:[#allocation4 + $0x78] sm:$0xff] %v7220_v38  ;;  %v6879_v62 = vpop.f32.mrb[17].mxu0 }
 0x40e   :  { %v7464_v10 = vmax.f32 %v7341_v28, %v7405_v47  ;;  %7282 = vst [vmem:[#allocation4 + $0x68] sm:$0xff] %v7218_v37  ;;  %v14334_v42 = vadd.f32 %v6879_v62, %v17814_v17  ;;  %v13982_v25 = vpop.f32.mrb[18].mxu0  ;;  %v7159_v1 = vadd.f32 %v14333_v19, %v18194_v23  ;;  %v8330_v50 = vsel %vm18246_vm5, %v18244_v18, 0.0  ;;  %v20791_v19 = vld [vmem:[#allocation9_spill] sm:$0xff]  ;;  %v18800_v63 = vld [vmem:[#allocation2] sm:$0xff] }
 0x40f   :  { %v14335_v32 = vadd.f32 %v13982_v25, %v17821_v33  ;;  %v6882_v13 = vpop.f32.mrb[19].mxu0  ;;  %v7542_v62 = vand.u32 7, %v20791_v19 }
 0x410   :  { %v7496_v14 = vmax.f32 %v7464_v10, %v7465_v9  ;;  %v7157_v11 = vadd.f32 %v14334_v42, %v18194_v23  ;;  %v14336_v3 = vadd.f32 %v6882_v13, %v17826_v53  ;;  %v7223_v17 = vmax.f32 %v7159_v1, 0.0  ;;  %v15005_v53 = vld [vmem:[%s19986_s3 + $0x8] sm:$0xff]  }
 0x411   :  { %v7160_v24 = vadd.f32 %v14335_v32, %v18194_v23  ;;  %v18251_v49 = vld [vmem:[#allocation2 + $0x10] sm:$0xff]  ;;  %vm18308_vm15 = vcmp.ge.s32.totalorder %v7542_v62, 1  ;;  %vm18360_vm10 = vcmp.lt.s32.totalorder %v7542_v62, 7 }
 0x412   :  { %7497 = vst [vmem:[#allocation2 + $0x19] sm:$0xff] %v7496_v14  ;;  %v7221_v8 = vmax.f32 %v7157_v11, 0.0  ;;  %v7158_v33 = vadd.f32 %v14336_v3, %v18194_v23  ;;  %v7745_v40 = vpack.c.bf16 %v7496_v14, %v7494_v36  ;;  %7287 = vst [vmem:[#allocation4 + $0x90] sm:$0xff] %v7223_v17  ;;  %v8025_v38 = vld [vmem:[#allocation2 + $0xa] sm:$0xff]  ;;  %v8331_v36 = vsel %vm18259_vm0, %v18251_v49, 0.0  ;;  %v18283_v11 = vld [vmem:[%s19986_s3 + $0x20] sm:$0xff]  }
 0x413   :  { %v7224_v41 = vmax.f32 %v7160_v24, 0.0  ;;  %v13985_v28 = vpop.f32.mrb[20].mxu0  ;;  %v18274_v47 = vpack.c.bf16 %v8331_v36, %v8330_v50  ;;  %v8734_v3 = vsel %vm18269_vm7, %v8025_v38, 0.0  ;;  %v20806_v62 = vld [vmem:[#allocation60_spill] sm:$0xff] }
 0x414   :  { %v7347_v37 = vld [vmem:[#allocation4 + $0x70] ss:$2 sm:$0xff]  ;;  %v7411_v4 = vld [vmem:[#allocation4 + $0x71] ss:$2 sm:$0xff]  ;;  %7285 = vst [vmem:[#allocation4 + $0x80] sm:$0xff] %v7221_v8  ;;  %v7222_v9 = vmax.f32 %v7158_v33, 0.0  ;;  %14032 = vmatmul.mubr.msk.bf16.vlgmr.msra.gmra.mrb[64].mxu1 %vm20215_vm3, %v7745_v40  ;;  %v14337_v20 = vadd.f32 %v13985_v28, %v17841_v0 }
 0x415   :  { %20790 = vst [vmem:[#allocation22_spill] sm:$0xff] %v18274_v47  ;;  %v7467_v10 = vmax.f32 %v7347_v37, %v7411_v4  ;;  %v7345_v42 = vld [vmem:[#allocation4 + $0x60] ss:$2 sm:$0xff]  ;;  %v7409_v25 = vld [vmem:[#allocation4 + $0x61] ss:$2 sm:$0xff]  ;;  %7288 = vst [vmem:[#allocation4 + $0x98] sm:$0xff] %v7224_v41  ;;  %14048 = vmatpush3.bf16.msra.mxu1 %v18207_v29 }
 0x416   :  { %v6895_v1 = vpop.f32.mrb[21].mxu0  ;;  %v7466_v32 = vmax.f32 %v7345_v42, %v7409_v25  ;;  %7286 = vst [vmem:[#allocation4 + $0x88] sm:$0xff] %v7222_v9  ;;  %14049 = vmatprep.subr.bf16.mxu1 %v15005_v53  ;;  %v8992_v0 = vsel %vm18246_vm5, %v18251_v49, 0.0  ;;  %v7163_v29 = vadd.f32 %v14337_v20, %v18194_v23  ;;  %v20797_v4 = vld [vmem:[#allocation10_spill] sm:$0xff] }
 0x417   :  { %v14338_v13 = vadd.f32 %v6895_v1, %v17847_v31  ;;  %v13986_v14 = vpop.f32.mrb[22].mxu0  ;;  %v7543_v9 = vand.u32 7, %v20797_v4  ;;  %v20818_v4 = vld [vmem:[#allocation24_spill] sm:$0xff] }
 0x418   :  { %v14339_v17 = vadd.f32 %v13986_v14, %v17851_v26  ;;  %v6898_v24 = vpop.f32.mrb[23].mxu0  ;;  %v18292_v31 = vmax.f32 %v7466_v32, %v7467_v10  ;;  %v7227_v40 = vmax.f32 %v7163_v29, 0.0  ;;  %v18322_v10 = vld [vmem:[#allocation2 + $0x11] sm:$0xff] }
 0x419   :  { %v7161_v8 = vadd.f32 %v14338_v13, %v18194_v23  ;;  %v14340_v33 = vadd.f32 %v6898_v24, %v17853_v7  ;;  %14050 = vmatpush3.bf16.msra.mxu1 %v15005_v53  ;;  %v18297_v38 = vld [vmem:[#allocation2 + $0x18] sm:$0xff]  ;;  %20798 = vst [vmem:[#allocation36_spill] sm:$0xff] %v18322_v10  ;;  %vm18352_vm9 = vcmp.ge.s32.totalorder %v7543_v9, 1  ;;  %vm18407_vm11 = vcmp.lt.s32.totalorder %v7543_v9, 7 }
 0x41a   :  { %v7164_v41 = vadd.f32 %v14339_v17, %v18194_v23  ;;  %v18299_v50 = vld [vmem:[#allocation2 + $0x12] sm:$0xff]  ;;  %7499 = vst [vmem:[#allocation2 + $0x21] sm:$0xff] %v18292_v31  ;;  %14067 = vmatprep.subr.bf16.mxu1 %v18283_v11  ;;  %7291 = vst [vmem:[#allocation4 + $0xb0] sm:$0xff] %v7227_v40  ;;  %v8332_v28 = vsel %vm18308_vm15, %v18297_v38, 0.0 }
 0x41b   :  { %v18301_v45 = vld [vmem:[#allocation2 + $0x19] sm:$0xff]  ;;  %v7225_v26 = vmax.f32 %v7161_v8, 0.0  ;;  %v7162_v36 = vadd.f32 %v14340_v33, %v18194_v23  ;;  %v8735_v42 = vsel %vm18314_vm8, %v18299_v50, 0.0  ;;  %v13989_v1 = vpop.f32.mrb[24].mxu0  ;;  %v8993_v33 = vsel %vm18259_vm0, %v18297_v38, 0.0 }
 0x41c   :  { %20792 = vst [vmem:[#allocation35_spill] sm:$0xff] %v18301_v45  ;;  %v7228_v37 = vmax.f32 %v7164_v41, 0.0  ;;  %v7351_v25 = vld [vmem:[#allocation4 + $0x90] ss:$2 sm:$0xff]  ;;  %v7415_v20 = vld [vmem:[#allocation4 + $0x91] ss:$2 sm:$0xff]  ;;  %v18327_v32 = vpack.c.bf16 %v8735_v42, %v8734_v3  ;;  %v14341_v24 = vadd.f32 %v13989_v1, %v17862_v46 }
 0x41d   :  { %7289 = vst [vmem:[#allocation4 + $0xa0] sm:$0xff] %v7225_v26  ;;  %v7226_v60 = vmax.f32 %v7162_v36, 0.0  ;;  %v7469_v14 = vmax.f32 %v7351_v25, %v7415_v20  ;;  %v7349_v29 = vld [vmem:[#allocation4 + $0x80] ss:$2 sm:$0xff]  ;;  %v7413_v17 = vld [vmem:[#allocation4 + $0x81] ss:$2 sm:$0xff]  ;;  %v18336_v26 = vpack.c.bf16 %v8993_v33, %v8992_v0 }
 0x41e   :  { %20799 = vst [vmem:[#allocation37_spill] sm:$0xff] %v18327_v32  ;;  %7292 = vst [vmem:[#allocation4 + $0xb8] sm:$0xff] %v7228_v37  ;;  %v6911_v8 = vpop.f32.mrb[25].mxu0  ;;  %v7468_v40 = vmax.f32 %v7349_v29, %v7413_v17  ;;  %v9460_v36 = vsel %vm18269_vm7, %v18299_v50, 0.0  ;;  %v7167_v37 = vadd.f32 %v14341_v24, %v18194_v23  ;;  %v20803_v17 = vmov 0 }
 0x41f   :  { %7290 = vst [vmem:[#allocation4 + $0xa8] sm:$0xff] %v7226_v60  ;;  %v14342_v41 = vadd.f32 %v6911_v8, %v17870_v12  ;;  %v13990_v3 = vpop.f32.mrb[26].mxu0  ;;  %20800 = vst [vmem:[#allocation38_spill] sm:$0xff] %v18336_v26  ;;  %v20804_v17 = vsel %vm18360_vm10, 4294967295, %v20803_v17 }
 0x420   :  { %v14343_v46 = vadd.f32 %v13990_v3, %v17877_v16  ;;  %v6914_v42 = vpop.f32.mrb[27].mxu0  ;;  %v7500_v25 = vmax.f32 %v7468_v40, %v7469_v14  ;;  %v7231_v60 = vmax.f32 %v7167_v37, 0.0 }
 0x421   :  { %v7165_v20 = vadd.f32 %v14342_v41, %v18194_v23  ;;  %v14344_v1 = vadd.f32 %v6914_v42, %v17879_v21  ;;  %v18346_v29 = vld [vmem:[#allocation2 + $0x20] sm:$0xff] }
 0x422   :  { %v7168_v12 = vadd.f32 %v14343_v46, %v18194_v23  ;;  %7501 = vst [vmem:[#allocation2 + $0x29] sm:$0xff] %v7500_v25  ;;  %v7746_v50 = vpack.c.bf16 %v7500_v25, %v18292_v31  ;;  %7295 = vst [vmem:[#allocation4 + $0xd0] sm:$0xff] %v7231_v60  ;;  %v18356_v21 = vld [vmem:[#allocation2 + $0x1a] sm:$0xff]  ;;  %v8333_v31 = vsel %vm18352_vm9, %v18346_v29, 0.0 }
 0x423   :  { %v7229_v0 = vmax.f32 %v7165_v20, 0.0  ;;  %v7166_v2 = vadd.f32 %v14344_v1, %v18194_v23  ;;  %v13993_v40 = vpop.f32.mrb[28].mxu0  ;;  %v18368_v41 = vpack.c.bf16 %v8333_v31, %v8332_v28  ;;  %v20807_v20 = vld [vmem:[#allocation26_spill] sm:$0xff]  ;;  %v8994_v28 = vsel %vm18308_vm15, %v18346_v29, 0.0 }
 0x424   :  { %v7232_v14 = vmax.f32 %v7168_v12, 0.0  ;;  %14035 = vmatprep.mubr.msk.bf16.mxu1 %vm20215_vm3, %v7746_v50  ;;  %v14345_v42 = vadd.f32 %v13993_v40, %v20806_v62  ;;  %v6927_v25 = vpop.f32.mrb[29].mxu0  ;;  %v20195_v1 = vand.u32 7, %v20807_v20  ;;  %v20808_v12 = vld [vmem:[#allocation23_spill] sm:$0xff] }
 0x425   :  { %v7355_v24 = vld [vmem:[#allocation4 + $0xb0] ss:$2 sm:$0xff]  ;;  %v7419_v8 = vld [vmem:[#allocation4 + $0xb1] ss:$2 sm:$0xff]  ;;  %7293 = vst [vmem:[#allocation4 + $0xc0] sm:$0xff] %v7229_v0  ;;  %v7230_v33 = vmax.f32 %v7166_v2, 0.0  ;;  %v14346_v13 = vadd.f32 %v6927_v25, %v20808_v12 }
 0x426   :  { %20805 = vst [vmem:[#allocation39_spill] sm:$0xff] %v18368_v41  ;;  %v7471_v3 = vmax.f32 %v7355_v24, %v7419_v8  ;;  %v7353_v37 = vld [vmem:[#allocation4 + $0xa0] ss:$2 sm:$0xff]  ;;  %v7417_v46 = vld [vmem:[#allocation4 + $0xa1] ss:$2 sm:$0xff]  ;;  %7296 = vst [vmem:[#allocation4 + $0xd8] sm:$0xff] %v7232_v14  ;;  %v7171_v50 = vadd.f32 %v14345_v42, %v18194_v23 }
 0x427   :  { %v7470_v60 = vmax.f32 %v7353_v37, %v7417_v46  ;;  %7294 = vst [vmem:[#allocation4 + $0xc8] sm:$0xff] %v7230_v33  ;;  %v13994_v0 = vpop.f32.mrb[30].mxu0  ;;  %v8736_v2 = vsel %vm18360_vm10, %v18356_v21, 0.0  ;;  %v9461_v24 = vsel %vm18314_vm8, %v18356_v21, 0.0  ;;  %v7169_v33 = vadd.f32 %v14346_v13, %v18194_v23  ;;  %v20882_v41 = vld [vmem:[#allocation30_spill] sm:$0xff] }
 0x428   :  { %v14347_v14 = vadd.f32 %v13994_v0, %v17903_v51  ;;  %v6930_v31 = vpop.f32.mrb[31].mxu0  ;;  %v18388_v37 = vpack.c.bf16 %v9461_v24, %v9460_v36  ;;  %v7235_v46 = vmax.f32 %v7171_v50, 0.0  ;;  %vm18401_vm12 = vcmp.ge.s32.totalorder %v20195_v1, 1 }
 0x429   :  { %v18384_v8 = vmax.f32 %v7470_v60, %v7471_v3  ;;  %v14348_v40 = vadd.f32 %v6930_v31, %v17905_v22  ;;  %v18391_v25 = vld [vmem:[#allocation2 + $0x28] sm:$0xff]  ;;  %v7233_v12 = vmax.f32 %v7169_v33, 0.0  ;;  %v20813_v13 = vmov 0 }
 0x42a   :  { %20809 = vst [vmem:[#allocation40_spill] sm:$0xff] %v18388_v37  ;;  %v7172_v62 = vadd.f32 %v14347_v14, %v18194_v23  ;;  %v18393_v42 = vld [vmem:[#allocation2 + $0x22] sm:$0xff]  ;;  %v20814_v13 = vsel %vm18407_vm11, 4294967295, %v20813_v13  ;;  %7299 = vst [vmem:[#allocation4 + $0xf0] sm:$0xff] %v7235_v46  ;;  %v8334_v50 = vsel %vm18401_vm12, %v18391_v25, 0.0  ;;  %v8995_v5 = vsel %vm18352_vm9, %v18391_v25, 0.0 }
 0x42b   :  { %v18395_v51 = vld [vmem:[#allocation2 + $0x29] sm:$0xff]  ;;  %7503 = vst [vmem:[#allocation2 + $0x31] sm:$0xff] %v18384_v8  ;;  %v7170_v3 = vadd.f32 %v14348_v40, %v18194_v23  ;;  %v18415_v14 = vld [vmem:[#allocation2 + $0x21] sm:$0xff]  ;;  %v8737_v31 = vsel %vm18407_vm11, %v18393_v42, 0.0  ;;  %7297 = vst [vmem:[#allocation4 + $0xe0] sm:$0xff] %v7233_v12  ;;  %v13997_v40 = vpop.f32.mrb[32].mxu0 }
 0x42c   :  { %20810 = vst [vmem:[#allocation41_spill] sm:$0xff] %v18395_v51  ;;  %v7236_v36 = vmax.f32 %v7172_v62, 0.0  ;;  %v20815_v60 = vld [vmem:[#allocation11_spill] sm:$0xff]  ;;  %20816 = vst [vmem:[#allocation42_spill] sm:$0xff] %v18415_v14  ;;  %v18420_v35 = vpack.c.bf16 %v8737_v31, %v8736_v2  ;;  %v14349_v19 = vadd.f32 %v13997_v40, %v20818_v4  ;;  %v6943_v43 = vpop.f32.mrb[33].mxu0  ;;  %v20819_v12 = vld [vmem:[#allocation61_spill] sm:$0xff]  ;;  %v18429_v31 = vpack.c.bf16 %v8995_v5, %v8994_v28 }
 0x42d   :  { %v7359_v24 = vld [vmem:[#allocation4 + $0xd0] ss:$2 sm:$0xff]  ;;  %v7423_v33 = vld [vmem:[#allocation4 + $0xd1] ss:$2 sm:$0xff]  ;;  %v7234_v9 = vmax.f32 %v7170_v3, 0.0  ;;  %v14350_v3 = vadd.f32 %v6943_v43, %v20819_v12  ;;  %v13998_v2 = vpop.f32.mrb[34].mxu0 }
 0x42e   :  { %20817 = vst [vmem:[#allocation44_spill] sm:$0xff] %v18420_v35  ;;  %v7473_v62 = vmax.f32 %v7359_v24, %v7423_v33  ;;  %v7357_v1 = vld [vmem:[#allocation4 + $0xc0] ss:$2 sm:$0xff]  ;;  %v7421_v0 = vld [vmem:[#allocation4 + $0xc1] ss:$2 sm:$0xff]  ;;  %7300 = vst [vmem:[#allocation4 + $0xf8] sm:$0xff] %v7236_v36  ;;  %v7175_v36 = vadd.f32 %v14349_v19, %v18194_v23  ;;  %v14351_v4 = vadd.f32 %v13998_v2, %v17929_v30 }
 0x42f   :  { %v7472_v37 = vmax.f32 %v7357_v1, %v7421_v0  ;;  %7298 = vst [vmem:[#allocation4 + $0xe8] sm:$0xff] %v7234_v9  ;;  %20820 = vst [vmem:[#allocation43_spill] sm:$0xff] %v18429_v31  ;;  %v9462_v24 = vsel %vm18360_vm10, %v18393_v42, 0.0  ;;  %v6946_v33 = vpop.f32.mrb[35].mxu0  ;;  %v7173_v46 = vadd.f32 %v14350_v3, %v18194_v23  ;;  %v20821_v19 = vand.u32 7, %v20815_v60  ;;  %v20830_v31 = vld [vmem:[#allocation25_spill] sm:$0xff] }
 0x430   :  { %v14352_v1 = vadd.f32 %v6946_v33, %v17931_v6  ;;  %v7239_v0 = vmax.f32 %v7175_v36, 0.0  ;;  %v7176_v43 = vadd.f32 %v14351_v4, %v18194_v23  ;;  %v20825_v3 = vmov 0  ;;  %v20843_v51 = vld [vmem:[#allocation63_spill] sm:$0xff] }
 0x431   :  { %v7504_v40 = vmax.f32 %v7472_v37, %v7473_v62  ;;  %v7237_v5 = vmax.f32 %v7173_v46, 0.0  ;;  %vm18445_vm13 = vcmp.ge.s32.totalorder %v20821_v19, 1  ;;  %v20824_v62 = vand.u32 7, %v20807_v20 }
 0x432   :  { %v18439_v9 = vld [vmem:[#allocation2 + $0x30] sm:$0xff]  ;;  %v7174_v28 = vadd.f32 %v14352_v1, %v18194_v23  ;;  %7303 = vst [vmem:[#allocation4 + $0x110] sm:$0xff] %v7239_v0  ;;  %v7240_v37 = vmax.f32 %v7176_v43, 0.0  ;;  %v20828_v0 = vld [vmem:[#allocation62_spill] sm:$0xff]  ;;  %vm20901_vm10 = vcmask 261120  }
 0x433   :  { %7505 = vst [vmem:[#allocation2 + $0x39] sm:$0xff] %v7504_v40  ;;  %v7747_v12 = vpack.c.bf16 %v7504_v40, %v18384_v8  ;;  %v18449_v6 = vld [vmem:[#allocation2 + $0x2a] sm:$0xff]  ;;  %vm18453_vm2 = vcmp.lt.s32.totalorder %v20824_v62, 7  ;;  %v8335_v8 = vsel %vm18445_vm13, %v18439_v9, 0.0  ;;  %7301 = vst [vmem:[#allocation4 + $0x100] sm:$0xff] %v7237_v5  ;;  %v14001_v4 = vpop.f32.mrb[36].mxu0 }
 0x434   :  { %v20826_v3 = vsel %vm18453_vm2, 4294967295, %v20825_v3  ;;  %v7238_v36 = vmax.f32 %v7174_v28, 0.0  ;;  %v18461_v33 = vpack.c.bf16 %v8335_v8, %v8334_v50  ;;  %7304 = vst [vmem:[#allocation4 + $0x118] sm:$0xff] %v7240_v37  ;;  %v14353_v43 = vadd.f32 %v14001_v4, %v20828_v0  ;;  %v6959_v19 = vpop.f32.mrb[37].mxu0  ;;  %v20829_v62 = vld [vmem:[#allocation20_spill] sm:$0xff] }
 0x435   :  { %v7363_v46 = vld [vmem:[#allocation4 + $0xf0] ss:$2 sm:$0xff]  ;;  %v7427_v2 = vld [vmem:[#allocation4 + $0xf1] ss:$2 sm:$0xff]  ;;  %14036 = vmatmul.mubr.msk.bf16.gmra.mrb[68].mxu1 %vm20215_vm3, %v7747_v12  ;;  %v20203_v10 = vand.u32 7, %v20829_v62  ;;  %v14354_v26 = vadd.f32 %v6959_v19, %v20830_v31  ;;  %v14002_v5 = vpop.f32.mrb[38].mxu0 }
 0x436   :  { %20827 = vst [vmem:[#allocation45_spill] sm:$0xff] %v18461_v33  ;;  %v7475_v40 = vmax.f32 %v7363_v46, %v7427_v2  ;;  %v7361_v1 = vld [vmem:[#allocation4 + $0xe0] ss:$2 sm:$0xff]  ;;  %v7425_v20 = vld [vmem:[#allocation4 + $0xe1] ss:$2 sm:$0xff]  ;;  %7302 = vst [vmem:[#allocation4 + $0x108] sm:$0xff] %v7238_v36  ;;  %v7179_v12 = vadd.f32 %v14353_v43, %v18194_v23  ;;  %v14355_v37 = vadd.f32 %v14002_v5, %v17955_v52 }
 0x437   :  { %v7474_v45 = vmax.f32 %v7361_v1, %v7425_v20  ;;  %v8738_v28 = vsel %vm18453_vm2, %v18449_v6, 0.0  ;;  %v8996_v50 = vsel %vm18401_vm12, %v18439_v9, 0.0  ;;  %v6962_v8 = vpop.f32.mrb[39].mxu0  ;;  %v9463_v46 = vsel %vm18407_vm11, %v18449_v6, 0.0 }
 0x438   :  { %v7177_v31 = vadd.f32 %v14354_v26, %v18194_v23  ;;  %v14356_v36 = vadd.f32 %v6962_v8, %v17957_v15  ;;  %v18481_v4 = vpack.c.bf16 %v9463_v46, %v9462_v24  ;;  %v7243_v1 = vmax.f32 %v7179_v12, 0.0  ;;  %v20837_v24 = vld [vmem:[#allocation14_spill] sm:$0xff]  ;;  %v18508_v8 = vld [vmem:[#allocation2 + $0x31] sm:$0xff] }
 0x439   :  { %v18477_v2 = vmax.f32 %v7474_v45, %v7475_v40  ;;  %v7180_v20 = vadd.f32 %v14355_v37, %v18194_v23  ;;  %vm18492_vm14 = vcmp.ge.s32.totalorder %v20203_v10, 1  ;;  %v20838_v5 = vand.u32 7, %v20815_v60  ;;  %20841 = vst [vmem:[#allocation50_spill] sm:$0xff] %v18508_v8  ;;  %v20842_v40 = vld [vmem:[#allocation19_spill] sm:$0xff] }
 0x43a   :  { %20832 = vst [vmem:[#allocation47_spill] sm:$0xff] %v18481_v4  ;;  %v18484_v0 = vld [vmem:[#allocation2 + $0x38] sm:$0xff]  ;;  %v7241_v52 = vmax.f32 %v7177_v31, 0.0  ;;  %v7178_v19 = vadd.f32 %v14356_v36, %v18194_v23  ;;  %7307 = vst [vmem:[#allocation4 + $0x130] sm:$0xff] %v7243_v1  ;;  %v20839_v12 = vmov 0 }
 0x43b   :  { %20831 = vst [vmem:[#allocation46_spill] sm:$0xff] %v18477_v2  ;;  %v18486_v43 = vld [vmem:[#allocation2 + $0x39] sm:$0xff]  ;;  %7507 = vst [vmem:[#allocation2 + $0x41] sm:$0xff] %v18477_v2  ;;  %v7244_v26 = vmax.f32 %v7180_v20, 0.0  ;;  %vm18501_vm1 = vcmp.lt.s32.totalorder %v20838_v5, 7  ;;  %v8336_v37 = vsel %vm18492_vm14, %v18484_v0, 0.0 }
 0x43c   :  { %20833 = vst [vmem:[#allocation48_spill] sm:$0xff] %v18486_v43  ;;  %v18496_v15 = vld [vmem:[#allocation2 + $0x32] sm:$0xff]  ;;  %v20840_v12 = vsel %vm18501_vm1, 4294967295, %v20839_v12  ;;  %7305 = vst [vmem:[#allocation4 + $0x120] sm:$0xff] %v7241_v52  ;;  %v7242_v36 = vmax.f32 %v7178_v19, 0.0  ;;  %v14005_v1 = vpop.f32.mrb[40].mxu0 }
 0x43d   :  { %20836 = vst [vmem:[#allocation49_spill] sm:$0xff] %v18496_v15  ;;  %v7367_v46 = vld [vmem:[#allocation4 + $0x110] ss:$2 sm:$0xff]  ;;  %v7431_v31 = vld [vmem:[#allocation4 + $0x111] ss:$2 sm:$0xff]  ;;  %7308 = vst [vmem:[#allocation4 + $0x138] sm:$0xff] %v7244_v26  ;;  %v14357_v4 = vadd.f32 %v14005_v1, %v20842_v40 }
 0x43e   :  { %v7477_v10 = vmax.f32 %v7367_v46, %v7431_v31  ;;  %v7365_v60 = vld [vmem:[#allocation4 + $0x100] ss:$2 sm:$0xff]  ;;  %v7429_v5 = vld [vmem:[#allocation4 + $0x101] ss:$2 sm:$0xff]  ;;  %v6975_v35 = vpop.f32.mrb[41].mxu0  ;;  %v8739_v32 = vsel %vm18501_vm1, %v18496_v15, 0.0 }
 0x43f   :  { %v7476_v2 = vmax.f32 %v7365_v60, %v7429_v5  ;;  %7306 = vst [vmem:[#allocation4 + $0x128] sm:$0xff] %v7242_v36  ;;  %v14358_v52 = vadd.f32 %v6975_v35, %v20843_v51  ;;  %v14006_v19 = vpop.f32.mrb[42].mxu0  ;;  %v18517_v14 = vpack.c.bf16 %v8739_v32, %v8738_v28  ;;  %v8997_v46 = vsel %vm18445_vm13, %v18484_v0, 0.0  ;;  %v20857_v43 = vld [vmem:[#allocation64_spill] sm:$0xff] }
 0x440   :  { %v7183_v26 = vadd.f32 %v14357_v4, %v18194_v23  ;;  %v14359_v40 = vadd.f32 %v14006_v19, %v17981_v58  ;;  %v6978_v31 = vpop.f32.mrb[43].mxu0  ;;  %v18524_v1 = vpack.c.bf16 %v8997_v46, %v8996_v50  ;;  %v9464_v36 = vsel %vm18453_vm2, %v18496_v15, 0.0  ;;  %v20883_v15 = vld [vmem:[#allocation29_spill] sm:$0xff] }
 0x441   :  { %20844 = vst [vmem:[#allocation51_spill] sm:$0xff] %v18517_v14  ;;  %v18529_v60 = vmax.f32 %v7476_v2, %v7477_v10  ;;  %v7181_v35 = vadd.f32 %v14358_v52, %v18194_v23  ;;  %v14360_v32 = vadd.f32 %v6978_v31, %v17983_v44  ;;  %v20847_v4 = vand.u32 7, %v20837_v24 }
 0x442   :  { %20845 = vst [vmem:[#allocation52_spill] sm:$0xff] %v18524_v1  ;;  %v7247_v51 = vmax.f32 %v7183_v26, 0.0  ;;  %v7184_v28 = vadd.f32 %v14359_v40, %v18194_v23  ;;  %v18540_v50 = vld [vmem:[#allocation2 + $0x3a] sm:$0xff]  ;;  %v20851_v52 = vmov 0.0   ;;  %v20852_v19 = vand.u32 7, %v20829_v62 }
 0x443   :  { %20846 = vst [vmem:[#allocation53_spill] sm:$0xff] %v18529_v60  ;;  %vm18536_vm4 = vcmp.ge.s32.totalorder %v20847_v4, 1  ;;  %v18542_v5 = vld [vmem:[#allocation2 + $0x40] sm:$0xff]  ;;  %7509 = vst [vmem:[#allocation2 + $0x49] sm:$0xff] %v18529_v60  ;;  %v7245_v10 = vmax.f32 %v7181_v35, 0.0  ;;  %v7182_v2 = vadd.f32 %v14360_v32, %v18194_v23  ;;  %v7748_v44 = vpack.c.bf16 %v18529_v60, %v20851_v52  ;;  %v14009_v52 = vpop.f32.mrb[44].mxu0 }
 0x444   :  { %20850 = vst [vmem:[#allocation54_spill] sm:$0xff] %v18542_v5  ;;  %vm18550_vm6 = vcmp.lt.s32.totalorder %v20852_v19, 7  ;;  %v20853_v46 = vmov 0  ;;  %7311 = vst [vmem:[#allocation4 + $0x150] sm:$0xff] %v7247_v51  ;;  %v7248_v26 = vmax.f32 %v7184_v28, 0.0  ;;  %v8337_v40 = vsel %vm18536_vm4, %v18542_v5, 0.0 }
 0x445   :  { %v20854_v46 = vsel %vm18550_vm6, 4294967295, %v20853_v46  ;;  %v8740_v31 = vsel %vm18550_vm6, %v18540_v50, 0.0  ;;  %v7371_v35 = vld [vmem:[#allocation4 + $0x130] ss:$2 sm:$0xff]  ;;  %v7435_v32 = vld [vmem:[#allocation4 + $0x131] ss:$2 sm:$0xff]  ;;  %14039 = vmatprep.mubr.msk.bf16.mxu1 %vm20215_vm3, %v7748_v44  ;;  %v18561_v62 = vpack.c.bf16 %v8337_v40, %v8336_v37  ;;  %v14361_v20 = vadd.f32 %v14009_v52, %v17989_v27 }
 0x446   :  { %20855 = vst [vmem:[#allocation55_spill] sm:$0xff] %v20854_v46  ;;  %7309 = vst [vmem:[#allocation4 + $0x140] sm:$0xff] %v7245_v10  ;;  %v7246_v4 = vmax.f32 %v7182_v2, 0.0  ;;  %v7479_v19 = vmax.f32 %v7371_v35, %v7435_v32  ;;  %v7369_v51 = vld [vmem:[#allocation4 + $0x120] ss:$2 sm:$0xff]  ;;  %v6991_v1 = vpop.f32.mrb[45].mxu0 }
 0x447   :  { %20856 = vst [vmem:[#allocation56_spill] sm:$0xff] %v18561_v62  ;;  %v7433_v28 = vld [vmem:[#allocation4 + $0x121] ss:$2 sm:$0xff]  ;;  %7312 = vst [vmem:[#allocation4 + $0x158] sm:$0xff] %v7248_v26  ;;  %v14362_v8 = vadd.f32 %v6991_v1, %v20857_v43  ;;  %v14010_v33 = vpop.f32.mrb[46].mxu0  ;;  %v9465_v37 = vsel %vm18501_vm1, %v18540_v50, 0.0  ;;  %v7187_v2 = vadd.f32 %v14361_v20, %v18194_v23 }
 0x448   :  { %v7478_v14 = vmax.f32 %v7369_v51, %v7433_v28  ;;  %7310 = vst [vmem:[#allocation4 + $0x148] sm:$0xff] %v7246_v4  ;;  %v20858_v44 = vld [vmem:[#allocation27_spill] sm:$0xff]  ;;  %v6994_v40 = vpop.f32.mrb[47].mxu0  ;;  %v18573_v27 = vpack.c.bf16 %v9465_v37, %v9464_v36  ;;  %v20861_v1 = vld [vmem:[#allocation65_spill] sm:$0xff]  ;;  %v20864_v36 = vmov 0 }
 0x449   :  { %v14363_v26 = vadd.f32 %v14010_v33, %v20858_v44  ;;  %v7185_v43 = vadd.f32 %v14362_v8, %v18194_v23  ;;  %v14364_v32 = vadd.f32 %v6994_v40, %v20861_v1  ;;  %v7251_v4 = vmax.f32 %v7187_v2, 0.0  ;;  %v20866_v8 = vld [vmem:[#allocation28_spill] sm:$0xff] }
 0x44a   :  { %20859 = vst [vmem:[#allocation57_spill] sm:$0xff] %v18573_v27  ;;  %v18575_v35 = vmax.f32 %v7478_v14, %v7479_v19  ;;  %v18580_v51 = vld [vmem:[#allocation2 + $0x42] sm:$0xff]  ;;  %v20863_v33 = vand.u32 7, %v20837_v24  ;;  %v7548_v19 = vand.u32 7, %v20866_v8  ;;  %v20869_v27 = vld [vmem:[#allocation12_spill] sm:$0xff] }
 0x44b   :  { %v7188_v52 = vadd.f32 %v14363_v26, %v18194_v23  ;;  %20862 = vst [vmem:[#allocation59_spill] sm:$0xff] %v18580_v51  ;;  %v7249_v28 = vmax.f32 %v7185_v43, 0.0  ;;  %v7186_v20 = vadd.f32 %v14364_v32, %v18194_v23  ;;  %7315 = vst [vmem:[#allocation4 + $0x170] sm:$0xff] %v7251_v4  ;;  %v14013_v24 = vpop.f32.mrb[48].mxu0 }
 0x44c   :  { %20860 = vst [vmem:[#allocation58_spill] sm:$0xff] %v18575_v35  ;;  %7511 = vst [vmem:[#allocation2 + $0x51] sm:$0xff] %v18575_v35  ;;  %vm18586_vm5 = vcmp.lt.s32.totalorder %v20863_v33, 7  ;;  %v7007_v8 = vpop.f32.mrb[49].mxu0  ;;  %vm18606_vm7 = vcmp.ge.s32.totalorder %v7548_v19, 1  ;;  %vm18616_vm3 = vcmp.lt.s32.totalorder %v7548_v19, 7 }
 0x44d   :  { %v20865_v36 = vsel %vm18586_vm5, 4294967295, %v20864_v36  ;;  %v7252_v14 = vmax.f32 %v7188_v52, 0.0  ;;  %v8741_v2 = vsel %vm18586_vm5, %v18580_v51, 0.0  ;;  %7313 = vst [vmem:[#allocation4 + $0x160] sm:$0xff] %v7249_v28  ;;  %v7250_v40 = vmax.f32 %v7186_v20, 0.0  ;;  %v20868_v52 = vld [vmem:[#allocation67_spill] sm:$0xff] }
 0x44e   :  { %v7375_v44 = vld [vmem:[#allocation4 + $0x150] ss:$2 sm:$0xff]  ;;  %v7439_v26 = vld [vmem:[#allocation4 + $0x151] ss:$2 sm:$0xff]  ;;  %v18596_v43 = vpack.c.bf16 %v8741_v2, %v8740_v31  ;;  %v14365_v33 = vadd.f32 %v14013_v24, %v20868_v52  ;;  %v14366_v5 = vadd.f32 %v7007_v8, %v20869_v27  ;;  %v14014_v28 = vpop.f32.mrb[50].mxu0  ;;  %v20870_v20 = vld [vmem:[#allocation15_spill] sm:$0xff] }
 0x44f   :  { %v7481_v1 = vmax.f32 %v7375_v44, %v7439_v26  ;;  %v7373_v32 = vld [vmem:[#allocation4 + $0x140] ss:$2 sm:$0xff]  ;;  %v7437_v4 = vld [vmem:[#allocation4 + $0x141] ss:$2 sm:$0xff]  ;;  %7316 = vst [vmem:[#allocation4 + $0x178] sm:$0xff] %v7252_v14  ;;  %7314 = vst [vmem:[#allocation4 + $0x168] sm:$0xff] %v7250_v40  ;;  %v14367_v2 = vadd.f32 %v14014_v28, %v18025_v34 }
 0x450   :  { %20867 = vst [vmem:[#allocation13_spill] sm:$0xff] %v18596_v43  ;;  %v7480_v37 = vmax.f32 %v7373_v32, %v7437_v4  ;;  %v7549_v60 = vand.u32 7, %v20870_v20  ;;  %v7191_v31 = vadd.f32 %v14365_v33, %v18194_v23  ;;  %v7010_v44 = vpop.f32.mrb[51].mxu0  ;;  %v7189_v24 = vadd.f32 %v14366_v5, %v18194_v23  ;;  %v18614_v32 = vld [vmem:[#allocation2 + $0x48] sm:$0xff]  ;;  %v20881_v51 = vld [vmem:[#allocation21_spill] sm:$0xff] }
 0x451   :  { %v14368_v40 = vadd.f32 %v7010_v44, %v18027_v59  ;;  %v7192_v34 = vadd.f32 %v14367_v2, %v18194_v23  ;;  %v8338_v8 = vsel %vm18606_vm7, %v18614_v32, 0.0  ;;  %vm20879_vm5 = vcmask 261120  }
 0x452   :  { %v18610_v26 = vmax.f32 %v7480_v37, %v7481_v1  ;;  %v7255_v4 = vmax.f32 %v7191_v31, 0.0  ;;  %v7253_v37 = vmax.f32 %v7189_v24, 0.0  ;;  %vm18629_vm6 = vcmp.ge.s32.totalorder %v7549_v60, 1 }
 0x453   :  { %v18621_v52 = vld [vmem:[#allocation2 + $0x50] sm:$0xff]  ;;  %v7190_v5 = vadd.f32 %v14368_v40, %v18194_v23  ;;  %v7256_v1 = vmax.f32 %v7192_v34, 0.0  ;;  %v14017_v24 = vpop.f32.mrb[52].mxu0 }
 0x454   :  { %20873 = vst [vmem:[#allocation60_spill] sm:$0xff] %v18610_v26  ;;  %v18623_v33 = vld [vmem:[#allocation2 + $0x4a] sm:$0xff]  ;;  %7513 = vst [vmem:[#allocation2 + $0x59] sm:$0xff] %v18610_v26  ;;  %v7749_v59 = vpack.c.bf16 %v18610_v26, %v18575_v35  ;;  %v8339_v28 = vsel %vm18629_vm6, %v18621_v52, 0.0  ;;  %v14369_v43 = vadd.f32 %v14017_v24, %v20881_v51  ;;  %v7023_v35 = vpop.f32.mrb[53].mxu0 }
 0x455   :  { %20876 = vst [vmem:[#allocation26_spill] sm:$0xff] %v18623_v33  ;;  %7319 = vst [vmem:[#allocation4 + $0x190] sm:$0xff] %v7255_v4  ;;  %v8742_v20 = vsel %vm18616_vm3, %v18623_v33, 0.0  ;;  %v7254_v44 = vmax.f32 %v7190_v5, 0.0  ;;  %v18643_v40 = vpack.c.bf16 %v8339_v28, %v8338_v8  ;;  %v14370_v47 = vadd.f32 %v7023_v35, %v20882_v41  ;;  %v14018_v46 = vpop.f32.mrb[54].mxu0 }
 0x456   :  { %v7379_v31 = vld [vmem:[#allocation4 + $0x170] ss:$2 sm:$0xff]  ;;  %v7443_v2 = vld [vmem:[#allocation4 + $0x171] ss:$2 sm:$0xff]  ;;  %7317 = vst [vmem:[#allocation4 + $0x180] sm:$0xff] %v7253_v37  ;;  %14040 = vmatmul.mubr.msk.bf16.gmra.mrb[72].mxu1 %vm20879_vm5, %v7749_v59  ;;  %7320 = vst [vmem:[#allocation4 + $0x198] sm:$0xff] %v7256_v1  ;;  %v7195_v59 = vadd.f32 %v14369_v43, %v18194_v23  ;;  %v14371_v8 = vadd.f32 %v14018_v46, %v18051_v48 }
 0x457   :  { %20880 = vst [vmem:[#allocation23_spill] sm:$0xff] %v18643_v40  ;;  %v7483_v4 = vmax.f32 %v7379_v31, %v7443_v2  ;;  %v7377_v34 = vld [vmem:[#allocation4 + $0x160] ss:$2 sm:$0xff]  ;;  %v7441_v10 = vld [vmem:[#allocation4 + $0x161] ss:$2 sm:$0xff]  ;;  %7318 = vst [vmem:[#allocation4 + $0x188] sm:$0xff] %v7254_v44  ;;  %v7193_v51 = vadd.f32 %v14370_v47, %v18194_v23 }
 0x458   :  { %v7482_v62 = vmax.f32 %v7377_v34, %v7441_v10  ;;  %v7550_v37 = vand.u32 7, %v20883_v15  ;;  %v9000_v5 = vsel %vm18606_vm7, %v18621_v52, 0.0  ;;  %v7026_v28 = vpop.f32.mrb[55].mxu0  ;;  %v7259_v31 = vmax.f32 %v7195_v59, 0.0  ;;  %v20890_v46 = vld [vmem:[#allocation16_spill] sm:$0xff] }
 0x459   :  { %v14372_v10 = vadd.f32 %v7026_v28, %v18053_v56  ;;  %v7196_v41 = vadd.f32 %v14371_v8, %v18194_v23  ;;  %v7257_v15 = vmax.f32 %v7193_v51, 0.0  ;;  %vm18666_vm7 = vcmp.lt.s32.totalorder %v7549_v60, 7  ;;  %v20891_v28 = vld [vmem:[#allocation68_spill] sm:$0xff] }
 0x45a   :  { %v18653_v1 = vmax.f32 %v7482_v62, %v7483_v4  ;;  %vm18662_vm5 = vcmp.ge.s32.totalorder %v7550_v37, 1  ;;  %v20887_v48 = vmov 0  ;;  %7323 = vst [vmem:[#allocation4 + $0x1b0] sm:$0xff] %v7259_v31  ;;  %v20892_v62 = vld [vmem:[#allocation32_spill] sm:$0xff] }
 0x45b   :  { %v18658_v35 = vld [vmem:[#allocation2 + $0x58] sm:$0xff]  ;;  %v7194_v14 = vadd.f32 %v14372_v10, %v18194_v23  ;;  %v20888_v48 = vsel %vm18666_vm7, 4294967295, %v20887_v48  ;;  %v7260_v56 = vmax.f32 %v7196_v41, 0.0  ;;  %7321 = vst [vmem:[#allocation4 + $0x1a0] sm:$0xff] %v7257_v15  ;;  %v14021_v4 = vpop.f32.mrb[56].mxu0 }
 0x45c   :  { %20884 = vst [vmem:[#allocation11_spill] sm:$0xff] %v18653_v1  ;;  %7515 = vst [vmem:[#allocation2 + $0x61] sm:$0xff] %v18653_v1  ;;  %v18670_v47 = vld [vmem:[#allocation2 + $0x52] sm:$0xff]  ;;  %v8340_v2 = vsel %vm18662_vm5, %v18658_v35, 0.0  ;;  %v14373_v51 = vadd.f32 %v14021_v4, %v20891_v28  ;;  %v7039_v10 = vpop.f32.mrb[57].mxu0  ;;  %v9001_v15 = vsel %vm18629_vm6, %v18658_v35, 0.0 }
 0x45d   :  { %20889 = vst [vmem:[#allocation24_spill] sm:$0xff] %v18670_v47  ;;  %v7383_v44 = vld [vmem:[#allocation4 + $0x190] ss:$2 sm:$0xff]  ;;  %v7447_v24 = vld [vmem:[#allocation4 + $0x191] ss:$2 sm:$0xff]  ;;  %v7258_v60 = vmax.f32 %v7194_v14, 0.0  ;;  %v14374_v23 = vadd.f32 %v7039_v10, %v20892_v62  ;;  %v18692_v4 = vpack.c.bf16 %v9001_v15, %v9000_v5 }
 0x45e   :  { %v7485_v34 = vmax.f32 %v7383_v44, %v7447_v24  ;;  %v7381_v59 = vld [vmem:[#allocation4 + $0x180] ss:$2 sm:$0xff]  ;;  %v7445_v8 = vld [vmem:[#allocation4 + $0x181] ss:$2 sm:$0xff]  ;;  %7324 = vst [vmem:[#allocation4 + $0x1b8] sm:$0xff] %v7260_v56  ;;  %v8743_v31 = vsel %vm18666_vm7, %v18670_v47, 0.0 }
 0x45f   :  { %v7484_v41 = vmax.f32 %v7381_v59, %v7445_v8  ;;  %7322 = vst [vmem:[#allocation4 + $0x1a8] sm:$0xff] %v7258_v60  ;;  %v14022_v26 = vpop.f32.mrb[58].mxu0  ;;  %v18683_v40 = vpack.c.bf16 %v8743_v31, %v8742_v20  ;;  %v15397_v14 = vld [vmem:[%s19987_s2] ss:$0 sm:$0xff]  ;;  %20894 = vst [vmem:[#allocation62_spill] sm:$0xff] %v18692_v4  ;;  %v9468_v62 = vsel %vm18616_vm3, %v18670_v47, 0.0 }
 0x460   :  { %v7199_v56 = vadd.f32 %v15397_v14, %v14373_v51  ;;  %v14375_v44 = vadd.f32 %v14022_v26, %v18077_v55  ;;  %v7042_v24 = vpop.f32.mrb[59].mxu0  ;;  %v7197_v60 = vadd.f32 %v15397_v14, %v14374_v23  ;;  %v20896_v10 = vand.u32 7, %v20890_v46  ;;  %v15399_v51 = vld [vmem:[#allocation2 + $0xa] sm:$0xff] }
 0x461   :  { %20893 = vst [vmem:[#allocation61_spill] sm:$0xff] %v18683_v40  ;;  %v18697_v20 = vmax.f32 %v7484_v41, %v7485_v34  ;;  %v14376_v59 = vadd.f32 %v7042_v24, %v18079_v54  ;;  %vm18713_vm3 = vcmp.lt.s32.totalorder %v7550_v37, 7  ;;  %v20899_v54 = vmov 0  ;;  %v20903_v40 = vld [vmem:[#allocation31_spill] sm:$0xff] }
 0x462   :  { %v7263_v8 = vmax.f32 %v7199_v56, 0.0  ;;  %v7200_v28 = vadd.f32 %v15397_v14, %v14375_v44  ;;  %vm18702_vm2 = vcmp.ge.s32.totalorder %v20896_v10, 1  ;;  %v7261_v27 = vmax.f32 %v7197_v60, 0.0 }
 0x463   :  { %20895 = vst [vmem:[#allocation20_spill] sm:$0xff] %v18697_v20  ;;  %v18706_v55 = vld [vmem:[#allocation2 + $0x60] sm:$0xff]  ;;  %7517 = vst [vmem:[#allocation2 + $0x69] sm:$0xff] %v18697_v20  ;;  %v7198_v5 = vadd.f32 %v15397_v14, %v14376_v59  ;;  %v7750_v23 = vpack.c.bf16 %v18697_v20, %v18653_v1  ;;  %v20900_v54 = vsel %vm18713_vm3, 4294967295, %v20899_v54  ;;  %v14025_v24 = vpop.f32.mrb[60].mxu0  ;;  %v7552_v1 = vand.u32 7, %v20903_v40 }
 0x464   :  { %v18708_v26 = vld [vmem:[#allocation2 + $0x5a] sm:$0xff]  ;;  %7327 = vst [vmem:[#allocation4 + $0x1d0] sm:$0xff] %v7263_v8  ;;  %v7264_v34 = vmax.f32 %v7200_v28, 0.0  ;;  %v8341_v31 = vsel %vm18702_vm2, %v18706_v55, 0.0  ;;  %7325 = vst [vmem:[#allocation4 + $0x1c0] sm:$0xff] %v7261_v27  ;;  %v7055_v4 = vpop.f32.mrb[61].mxu0 }
 0x465   :  { %v8744_v41 = vsel %vm18713_vm3, %v18708_v26, 0.0  ;;  %v7387_v15 = vld [vmem:[#allocation4 + $0x1b0] ss:$2 sm:$0xff]  ;;  %v7451_v56 = vld [vmem:[#allocation4 + $0x1b1] ss:$2 sm:$0xff]  ;;  %v7262_v44 = vmax.f32 %v7198_v5, 0.0  ;;  %14043 = vmatprep.mubr.msk.bf16.mxu1 %vm20901_vm10, %v7750_v23  ;;  %v18724_v37 = vpack.c.bf16 %v8341_v31, %v8340_v2  ;;  %v14378_v33 = vadd.f32 %v7055_v4, %v18096_v39 }
 0x466   :  { %v7487_v60 = vmax.f32 %v7387_v15, %v7451_v56  ;;  %v7385_v59 = vld [vmem:[#allocation4 + $0x1a0] ss:$2 sm:$0xff]  ;;  %v7449_v8 = vld [vmem:[#allocation4 + $0x1a1] ss:$2 sm:$0xff]  ;;  %7328 = vst [vmem:[#allocation4 + $0x1d8] sm:$0xff] %v7264_v34  ;;  %v20902_v28 = vld [vmem:[#allocation34_spill] sm:$0xff] }
 0x467   :  { %v14377_v10 = vadd.f32 %v14025_v24, %v20902_v28  ;;  %v7486_v47 = vmax.f32 %v7385_v59, %v7449_v8  ;;  %7326 = vst [vmem:[#allocation4 + $0x1c8] sm:$0xff] %v7262_v44  ;;  %v14026_v27 = vpop.f32.mrb[62].mxu0  ;;  %v9002_v5 = vsel %vm18662_vm5, %v18706_v55, 0.0  ;;  %v9469_v2 = vsel %vm18666_vm7, %v18708_v26, 0.0 }
 0x468   :  { %v14379_v34 = vadd.f32 %v14026_v27, %v18103_v57  ;;  %v7058_v31 = vpop.f32.mrb[63].mxu0  ;;  %v18736_v15 = vpack.c.bf16 %v9469_v2, %v9468_v62  ;;  %v7201_v56 = vadd.f32 %v15397_v14, %v14378_v33  ;;  %vm18746_vm10 = vcmp.ge.s32.totalorder %v7552_v1, 1  ;;  %v20910_v62 = vld [vmem:[#allocation17_spill] sm:$0xff] }
 0x469   :  { %v7203_v23 = vadd.f32 %v15397_v14, %v14377_v10  ;;  %v18738_v40 = vmax.f32 %v7486_v47, %v7487_v60  ;;  %v14380_v39 = vadd.f32 %v7058_v31, %v18105_v61  ;;  %v20907_v47 = vand.u32 7, %v20890_v46 }
 0x46a   :  { %20904 = vst [vmem:[#allocation25_spill] sm:$0xff] %v18736_v15  ;;  %v7204_v44 = vadd.f32 %v15397_v14, %v14379_v34  ;;  %v18741_v24 = vld [vmem:[#allocation2 + $0x68] sm:$0xff]  ;;  %v7265_v8 = vmax.f32 %v7201_v56, 0.0  ;;  %v7553_v60 = vand.u32 7, %v20910_v62 }
 0x46b   :  { %v7267_v4 = vmax.f32 %v7203_v23, 0.0  ;;  %v18743_v59 = vld [vmem:[#allocation2 + $0x62] sm:$0xff]  ;;  %7519 = vst [vmem:[#allocation2 + $0x71] sm:$0xff] %v18738_v40  ;;  %v7202_v28 = vadd.f32 %v15397_v14, %v14380_v39  ;;  %vm18752_vm7 = vcmp.lt.s32.totalorder %v20907_v47, 7  ;;  %v8342_v10 = vsel %vm18746_vm10, %v18741_v24, 0.0 }
 0x46c   :  { %v7268_v61 = vmax.f32 %v7204_v44, 0.0  ;;  %7329 = vst [vmem:[#allocation4 + $0x1e0] sm:$0xff] %v7265_v8  ;;  %v8745_v46 = vsel %vm18752_vm7, %v18743_v59, 0.0  ;;  %v9470_v44 = vsel %vm18713_vm3, %v18743_v59, 0.0  ;;  %vm18780_vm1 = vcmp.ge.s32.totalorder %v7553_v60, 1 }
 0x46d   :  { %7331 = vst [vmem:[#allocation4 + $0x1f0] sm:$0xff] %v7267_v4  ;;  %v7391_v27 = vld [vmem:[#allocation4 + $0x1d0] ss:$2 sm:$0xff]  ;;  %v7455_v2 = vld [vmem:[#allocation4 + $0x1d1] ss:$2 sm:$0xff]  ;;  %v7266_v23 = vmax.f32 %v7202_v28, 0.0  ;;  %v18765_v39 = vpack.c.bf16 %v8745_v46, %v8744_v41 }
 0x46e   :  { %v7489_v34 = vmax.f32 %v7391_v27, %v7455_v2  ;;  %v7389_v31 = vld [vmem:[#allocation4 + $0x1c0] ss:$2 sm:$0xff]  ;;  %v7453_v56 = vld [vmem:[#allocation4 + $0x1c1] ss:$2 sm:$0xff]  ;;  %7332 = vst [vmem:[#allocation4 + $0x1f8] sm:$0xff] %v7268_v61  ;;  %v9003_v4 = vsel %vm18702_vm2, %v18741_v24, 0.0 }
 0x46f   :  { %20911 = vst [vmem:[#allocation14_spill] sm:$0xff] %v18765_v39  ;;  %v7488_v8 = vmax.f32 %v7389_v31, %v7453_v56  ;;  %7330 = vst [vmem:[#allocation4 + $0x1e8] sm:$0xff] %v7266_v23  ;;  %v18773_v28 = vpack.c.bf16 %v9003_v4, %v9002_v5  ;;  %v7653_v61 = vsel %vm18259_vm0, %v18244_v18, 0.0  ;;  %vm18793_vm3 = vcmp.lt.s32.totalorder %v7552_v1, 7  ;;  %v15400_v41 = vld [vmem:[#allocation2 + $0x12] sm:$0xff]  ;;  %v20960_v2 = vld [vmem:[#allocation39_spill] sm:$0xff] }
 0x470   :  { %v7668_v23 = vpack.c.bf16 %v7653_v61, %v18800_v63  ;;  %vm20918_vm0 = vcmask 261120   ;;  %v7655_v39 = vsel %vm18352_vm9, %v18297_v38, 0.0 }
 0x471   :  { %20912 = vst [vmem:[#allocation19_spill] sm:$0xff] %v18773_v28  ;;  %v18775_v47 = vmax.f32 %v7488_v8, %v7489_v34  ;;  %vm20919_vm11 = vmmov %vm20918_vm0 }
 0x472   :  { %v18784_v62 = vld [vmem:[#allocation2 + $0x70] sm:$0xff] }
 0x473   :  { %v18786_v27 = vld [vmem:[#allocation2 + $0x6a] sm:$0xff]  ;;  %7521 = vst [vmem:[#allocation2 + $0x79] sm:$0xff] %v18775_v47  ;;  %v18791_v5 = vpack.c.bf16 %v18775_v47, %v18738_v40  ;;  %v8343_v18 = vsel %vm18780_vm1, %v18784_v62, 0.0  ;;  %v9004_v1 = vsel %vm18746_vm10, %v18784_v62, 0.0 }
 0x474   :  { %v18803_v46 = vpack.c.bf16 %v8343_v18, %v8342_v10  ;;  %v8746_v34 = vsel %vm18793_vm3, %v18786_v27, 0.0  ;;  %v9471_v4 = vsel %vm18752_vm7, %v18786_v27, 0.0  ;;  %v20920_v18 = vld [vmem:[#allocation33_spill] sm:$0xff] }
 0x475   :  { %20915 = vst [vmem:[#allocation63_spill] sm:$0xff] %v18791_v5  ;;  %v7395_v31 = vld [vmem:[#allocation4 + $0x1f0] ss:$2 sm:$0xff]  ;;  %v7459_v56 = vld [vmem:[#allocation4 + $0x1f1] ss:$2 sm:$0xff]  ;;  %14044 = vmatmul.mubr.msk.bf16.gmra.mrb[76].mxu1 %vm20918_vm0, %v18791_v5  ;;  %v7554_v14 = vand.u32 7, %v20920_v18  ;;  %v18818_v15 = vpack.c.bf16 %v9471_v4, %v9470_v44 }
 0x476   :  { %v7491_v8 = vmax.f32 %v7395_v31, %v7459_v56  ;;  %v7393_v10 = vld [vmem:[#allocation4 + $0x1e0] ss:$2 sm:$0xff]  ;;  %v7457_v61 = vld [vmem:[#allocation4 + $0x1e1] ss:$2 sm:$0xff]  ;;  %14051 = vmatprep.mubr.msk.bf16.mxu1 %vm20919_vm11, %v7668_v23  ;;  %v7657_v5 = vsel %vm18445_vm13, %v18391_v25, 0.0  ;;  %v7654_v31 = vsel %vm18308_vm15, %v18251_v49, 0.0 }
 0x477   :  { %v7490_v28 = vmax.f32 %v7393_v10, %v7457_v61  ;;  %vm18831_vm11 = vcmp.ge.s32.totalorder %v7554_v14, 1  ;;  %vm18835_vm0 = vcmp.lt.s32.totalorder %v7553_v60, 7  ;;  %v7669_v16 = vpack.c.bf16 %v7655_v39, %v7654_v31  ;;  %v15007_v49 = vld [vmem:[%s19986_s3 + $0x28] sm:$0xff]   ;;  %v15008_v10 = vld [vmem:[%s19986_s3 + $0x30] sm:$0xff]   ;;  %v15009_v18 = vld [vmem:[%s19986_s3 + $0x38] sm:$0xff]  }
 0x478   :  { %v7656_v25 = vsel %vm18401_vm12, %v18346_v29, 0.0  ;;  %vm20925_vm15 = vcmask 261120   ;;  %v7658_v61 = vsel %vm18492_vm14, %v18439_v9, 0.0  ;;  %v20962_v44 = vld [vmem:[#allocation45_spill] sm:$0xff] }
 0x479   :  { %v18823_v20 = vmax.f32 %v7490_v28, %v7491_v8  ;;  %v7670_v60 = vpack.c.bf16 %v7657_v5, %v7656_v25  ;;  %vm20926_vm9 = vmmov %vm20925_vm15  ;;  %v20927_v5 = vld [vmem:[#allocation18_spill] sm:$0xff] }
 0x47a   :  { %v7571_v23 = vld [vmem:[#allocation2 + $0x78] sm:$0xff]  ;;  %v7555_v8 = vand.u32 7, %v20927_v5 }
 0x47b   :  { %v18839_v38 = vld [vmem:[#allocation2 + $0x72] sm:$0xff]  ;;  %7523 = vst [vmem:[#allocation2 + $0x81] sm:$0xff] %v18823_v20  ;;  %v8344_v7 = vsel %vm18831_vm11, %v7571_v23, 0.0  ;;  %v8531_v30 = vpack.c.bf16 %v18823_v20, %v18775_v47  ;;  %v9005_v39 = vsel %vm18780_vm1, %v7571_v23, 0.0 }
 0x47c   :  { %v8747_v28 = vsel %vm18835_vm0, %v18839_v38, 0.0  ;;  %v18860_v22 = vpack.c.bf16 %v9005_v39, %v9004_v1  ;;  %v9472_v4 = vsel %vm18793_vm3, %v18839_v38, 0.0  ;;  %vm18874_vm12 = vcmp.lt.s32.totalorder %v7555_v8, 7  ;;  %v20964_v1 = vld [vmem:[#allocation56_spill] sm:$0xff]  ;;  %v20997_v47 = vld [vmem:[#allocation13_spill] sm:$0xff] }
 0x47d   :  { %14052 = vmatmul.mubr.msk.bf16.vlgmr.msra.gmra.mrb[64].mxu1 %vm20925_vm15, %v7669_v16  ;;  %v18858_v29 = vpack.c.bf16 %v8747_v28, %v8746_v34  ;;  %v7659_v34 = vsel %vm18536_vm4, %v18484_v0, 0.0  ;;  %vm18884_vm13 = vcmp.ge.s32.totalorder %v7555_v8, 1  ;;  %vm18890_vm4 = vcmp.lt.s32.totalorder %v7554_v14, 7  ;;  %v15022_v0 = vld [vmem:[%s19988_s5 + $0x30] sm:$0xff]  }
 0x47e   :  { %14068 = vmatpush3.bf16.msra.mxu1 %v18283_v11  ;;  %14055 = vmatprep.mubr.msk.bf16.mxu1 %vm20926_vm9, %v7670_v60  ;;  %v7661_v11 = vsel %vm18629_vm6, %v18614_v32, 0.0  ;;  %v7671_v32 = vpack.c.bf16 %v7659_v34, %v7658_v61  ;;  %vm20934_vm6 = vmmov %vm20926_vm9  ;;  %v7663_v8 = vsel %vm18702_vm2, %v18658_v35, 0.0  ;;  %v7665_v34 = vsel %vm18780_vm1, %v18741_v24, 0.0 }
 0x47f   :  { %14069 = vmatprep.subr.bf16.mxu1 %v15007_v49  ;;  %v7672_v25 = vpack.c.bf16 %v7661_v11, %v18800_v63  ;;  %vm20935_vm15 = vmmov %vm20934_vm6  ;;  %v7662_v11 = vsel %vm18662_vm5, %v18621_v52, 0.0  ;;  %v7667_v35 = vsel %vm18884_vm13, %v7571_v23, 0.0  ;;  %v8105_v24 = vsel %vm18314_vm8, %v15399_v51, 0.0 }
 0x480   :  { %v7673_v61 = vpack.c.bf16 %v7663_v8, %v7662_v11  ;;  %vm20936_vm9 = vmmov %vm20934_vm6  ;;  %v7666_v52 = vsel %vm18831_vm11, %v18784_v62, 0.0  ;;  %v8120_v57 = vpack.c.bf16 %v8105_v24, %v18800_v63  ;;  %vm20939_vm5 = vnez %v20814_v13  ;;  %v8508_v11 = vld [vmem:[#allocation2 + $0x9] sm:$0xff]  ;;  %v15013_v24 = vld [vmem:[%s19986_s3 + $0x58] sm:$0xff]  }
 0x481   :  { %v7675_v43 = vpack.c.bf16 %v7667_v35, %v7666_v52  ;;  %vm20937_vm2 = vmmov %vm20934_vm6  ;;  %vm20941_vm8 = vnez %v20804_v17  ;;  %v8116_v8 = vsel %vm18793_vm3, %v18743_v59, 0.0  ;;  %v8118_v33 = vsel %vm18890_vm4, %v18839_v38, 0.0  ;;  %v15011_v59 = vld [vmem:[%s19986_s3 + $0x48] sm:$0xff]   ;;  %v15012_v38 = vld [vmem:[%s19986_s3 + $0x50] sm:$0xff]  }
 0x482   :  { %14070 = vmatpush3.bf16.msra.mxu1 %v15007_v49  ;;  %v18888_v31 = vld [vmem:[#allocation2 + $0x7a] sm:$0xff]  ;;  %v18896_v16 = vld [vmem:[#allocation2 + $0x82] sm:$0xff]  ;;  %vm20938_vm1 = vmmov %vm20937_vm2  ;;  %v8106_v23 = vsel %vm20941_vm8, %v15400_v41, 0.0  ;;  %vm20954_vm8 = vnez %v20900_v54 }
 0x483   :  { %v18894_v58 = vld [vmem:[#allocation2 + $0x80] sm:$0xff]  ;;  %14087 = vmatprep.subr.bf16.mxu1 %v15008_v10  ;;  %v8748_v19 = vsel %vm18890_vm4, %v18888_v31, 0.0  ;;  %v8749_v14 = vsel %vm18874_vm12, %v18896_v16, 0.0  ;;  %v9473_v39 = vsel %vm18835_vm0, %v18888_v31, 0.0  ;;  %v9474_v5 = vsel %vm18890_vm4, %v18896_v16, 0.0  ;;  %v20973_v52 = vld [vmem:[#allocation41_spill] sm:$0xff] }
 0x484   :  { %v8345_v9 = vsel %vm18884_vm13, %v18894_v58, 0.0  ;;  %v18910_v60 = vpack.c.bf16 %v8749_v14, %v8748_v19  ;;  %v9006_v28 = vsel %vm18831_vm11, %v18894_v58, 0.0  ;;  %vm20942_vm13 = vnez %v20826_v3  ;;  %v20949_v3 = vld [vmem:[#allocation55_spill] sm:$0xff]  ;;  %v20972_v35 = vld [vmem:[#allocation42_spill] sm:$0xff]  ;;  %v20981_v41 = vld [vmem:[#allocation53_spill] sm:$0xff] }
 0x485   :  { %v18908_v49 = vpack.c.bf16 %v8345_v9, %v8344_v7  ;;  %14056 = vmatmul.mubr.msk.bf16.gmra.mrb[68].mxu1 %vm20934_vm6, %v7671_v32  ;;  %v18923_v7 = vpack.c.bf16 %v9473_v39, %v9472_v4  ;;  %v7664_v32 = vsel %vm18746_vm10, %v18706_v55, 0.0  ;;  %v8107_v55 = vsel %vm20939_vm5, %v18356_v21, 0.0  ;;  %v15010_v21 = vld [vmem:[%s19986_s3 + $0x40] sm:$0xff]  }
 0x486   :  { %14059 = vmatprep.mubr.msk.bf16.mxu1 %vm20935_vm15, %v7672_v25  ;;  %v7674_v9 = vpack.c.bf16 %v7665_v34, %v7664_v32  ;;  %vm20940_vm10 = vnez %v20840_v12  ;;  %v8121_v62 = vpack.c.bf16 %v8107_v55, %v8106_v23  ;;  %v8108_v4 = vsel %vm20942_vm13, %v18393_v42, 0.0  ;;  %vm20943_vm15 = vmmov %vm20938_vm1  ;;  %v20946_v42 = vld [vmem:[#allocation26_spill] sm:$0xff] }
 0x487   :  { %v8109_v53 = vsel %vm20940_vm10, %v18449_v6, 0.0  ;;  %v20948_v6 = vld [vmem:[#allocation49_spill] sm:$0xff]  ;;  %v9015_v45 = vpack.c.bf16 %v18800_v63, %v9006_v28  ;;  %v9176_v58 = vld [vmem:[#allocation2 + $0x41] sm:$0xff] }
 0x488   :  { %v8122_v19 = vpack.c.bf16 %v8109_v53, %v8108_v4  ;;  %v20980_v53 = vld [vmem:[#allocation58_spill] sm:$0xff]  ;;  %v20984_v4 = vld [vmem:[#allocation60_spill] sm:$0xff] }
 0x489   :  { %v20982_v23 = vpack.c.bf16 %v20980_v53, %v20981_v41  ;;  %v9179_v28 = vld [vmem:[#allocation2 + $0x59] sm:$0xff] }
 0x48a   :  { %v19170_v16 = vld [vmem:[%s19988_s5] sm:$0xff]  }
 0x48d   :  { %14060 = vmatmul.mubr.msk.bf16.gmra.mrb[72].mxu1 %vm20936_vm9, %v7673_v61  ;;  %vm20944_vm9 = vmmov %vm20938_vm1  ;;  %v15401_v61 = vld [vmem:[#allocation2 + $0x11] sm:$0xff] }
 0x48e   :  { %14063 = vmatprep.mubr.msk.bf16.mxu1 %vm20934_vm6, %v7674_v9  ;;  %vm20945_vm6 = vnez %v20865_v36  ;;  %vm20951_vm5 = vmmov %vm20944_vm9  ;;  %v8117_v36 = vsel %vm18835_vm0, %v18786_v27, 0.0  ;;  %v20958_v27 = vld [vmem:[#allocation22_spill] sm:$0xff]  ;;  %v8524_v32 = vpack.c.bf16 %v15401_v61, %v8508_v11  ;;  %v21032_v11 = vld [vmem:[#allocation40_spill] sm:$0xff] }
 0x48f   :  { %v8111_v17 = vsel %vm20945_vm6, %v18540_v50, 0.0  ;;  %vm20952_vm10 = vmmov %vm20951_vm5  ;;  %v8115_v50 = vsel %vm18752_vm7, %v18708_v26, 0.0  ;;  %v8126_v34 = vpack.c.bf16 %v8117_v36, %v8116_v8  ;;  %v8119_v26 = vsel %vm18874_vm12, %v18888_v31, 0.0  ;;  %v20966_v31 = vld [vmem:[#allocation23_spill] sm:$0xff]  ;;  %v15402_v9 = vld [vmem:[#allocation2 + $0x19] sm:$0xff] }
 0x490   :  { %vm20955_vm13 = vmmov %vm20951_vm5  ;;  %v8127_v54 = vpack.c.bf16 %v8119_v26, %v8118_v33  ;;  %v8525_v51 = vpack.c.bf16 %v20972_v35, %v15402_v9  ;;  %v21008_v36 = vld [vmem:[#allocation52_spill] sm:$0xff]  ;;  %v21015_v8 = vld [vmem:[#allocation19_spill] sm:$0xff] }
 0x491   :  { %vm20957_vm7 = vmmov %vm20951_vm5  ;;  %v21020_v26 = vld [vmem:[#allocation36_spill] sm:$0xff]  ;;  %v21034_v61 = vld [vmem:[#allocation47_spill] sm:$0xff] }
 0x492   :  { %vm20959_vm0 = vmmov %vm20951_vm5  ;;  %v21038_v9 = vld [vmem:[#allocation59_spill] sm:$0xff] }
 0x493   :  { %vm20961_vm3 = vmmov %vm20959_vm0 }
 0x494   :  { %vm20963_vm12 = vmmov %vm20959_vm0 }
 0x495   :  { %14064 = vmatmul.mubr.msk.bf16.gmra.mrb[76].mxu1 %vm20937_vm2, %v7675_v43  ;;  %vm20947_vm2 = vnez %v20888_v48  ;;  %v20953_v48 = vld [vmem:[#allocation24_spill] sm:$0xff]  ;;  %vm20967_vm6 = vmmov %vm20959_vm0 }
 0x496   :  { %14071 = vmatprep.mubr.msk.bf16.mxu1 %vm20938_vm1, %v8120_v57  ;;  %v8113_v13 = vsel %vm20947_vm2, %v20946_v42, 0.0  ;;  %vm20950_vm1 = vnez %v20949_v3  ;;  %v8114_v25 = vsel %vm20954_vm8, %v20953_v48, 0.0  ;;  %vm20968_vm2 = vmmov %vm20959_vm0  ;;  %v20978_v57 = vld [vmem:[#allocation46_spill] sm:$0xff]  ;;  %v15015_v42 = vld [vmem:[%s19986_s3 + $0x68] sm:$0xff]   ;;  %v9483_v3 = vpack.c.bf16 %v18800_v63, %v9474_v5 }
 0x497   :  { %v8110_v12 = vsel %vm20950_vm1, %v20948_v6, 0.0  ;;  %v8124_v14 = vpack.c.bf16 %v8113_v13, %v18800_v63  ;;  %v8125_v39 = vpack.c.bf16 %v8115_v50, %v8114_v25  ;;  %vm20971_vm8 = vmmov %vm20959_vm0  ;;  %v20993_v13 = vld [vmem:[#allocation44_spill] sm:$0xff]  ;;  %v20995_v6 = vld [vmem:[#allocation51_spill] sm:$0xff] }
 0x498   :  { %v21006_v50 = vld [vmem:[#allocation43_spill] sm:$0xff]  ;;  %vm21026_vm11 = vmmov %vm20959_vm0  ;;  %v19176_v5 = vld [vmem:[%s19989_s4] ss:$0 sm:$0xff] }
 0x49d   :  { %14072 = vmatmul.mubr.msk.bf16.vlgmr.msra.gmra.mrb[64].mxu1 %vm20943_vm15, %v8121_v62  ;;  %vm20956_vm15 = vmmov %vm20951_vm5  ;;  %v20983_v62 = vld [vmem:[#allocation11_spill] sm:$0xff] }
 0x49e   :  { %14088 = vmatpush3.bf16.msra.mxu1 %v15008_v10  ;;  %14075 = vmatprep.mubr.msk.bf16.mxu1 %vm20944_vm9, %v8122_v19  ;;  %v8123_v10 = vpack.c.bf16 %v8111_v17, %v8110_v12  ;;  %vm20965_vm9 = vmmov %vm20959_vm0  ;;  %v20987_v19 = vld [vmem:[#allocation20_spill] sm:$0xff]  ;;  %v20991_v17 = vld [vmem:[#allocation37_spill] sm:$0xff] }
 0x49f   :  { %14089 = vmatprep.subr.bf16.mxu1 %v15009_v18  ;;  %v21001_v12 = vld [vmem:[#allocation14_spill] sm:$0xff] }
 0x4a2   :  { %14090 = vmatpush3.bf16.msra.mxu1 %v15009_v18  ;;  %v20985_v18 = vpack.c.bf16 %v20983_v62, %v20984_v4 }
 0x4a3   :  { %14107 = vmatprep.subr.bf16.mxu1 %v15010_v21 }
 0x4a5   :  { %14076 = vmatmul.mubr.msk.bf16.gmra.mrb[68].mxu1 %vm20951_vm5, %v8123_v10  ;;  %vm20969_vm5 = vmmov %vm20959_vm0  ;;  %v21005_v10 = vld [vmem:[#allocation38_spill] sm:$0xff] }
 0x4a6   :  { %14079 = vmatprep.mubr.msk.bf16.mxu1 %vm20952_vm10, %v8124_v14  ;;  %vm20970_vm10 = vmmov %vm20959_vm0  ;;  %v15017_v14 = vld [vmem:[%s19986_s3 + $0x78] sm:$0xff]  }
 0x4ad   :  { %14080 = vmatmul.mubr.msk.bf16.gmra.mrb[72].mxu1 %vm20955_vm13, %v8125_v39  ;;  %vm20975_vm13 = vmmov %vm20959_vm0  ;;  %v21013_v39 = vld [vmem:[#allocation62_spill] sm:$0xff] }
 0x4ae   :  { %14083 = vmatprep.mubr.msk.bf16.mxu1 %vm20956_vm15, %v8126_v34  ;;  %vm20976_vm15 = vmmov %vm20959_vm0  ;;  %v21019_v34 = vld [vmem:[#allocation35_spill] sm:$0xff] }
 0x4af   :  { %v21021_v33 = vpack.c.bf16 %v21019_v34, %v21020_v26 }
 0x4b5   :  { %14084 = vmatmul.mubr.msk.bf16.gmra.mrb[76].mxu1 %vm20957_vm7, %v8127_v54  ;;  %vm20979_vm7 = vmmov %vm20959_vm0  ;;  %v15019_v54 = vld [vmem:[%s19986_s3 + $0x88] sm:$0xff]  }
 0x4b6   :  { %14091 = vmatprep.mubr.msk.bf16.mxu1 %vm20959_vm0, %v20958_v27  ;;  %v9237_v27 = vpack.c.bf16 %v18800_v63, %v9176_v58 }
 0x4bd   :  { %14092 = vmatmul.mubr.msk.bf16.vlgmr.msra.gmra.mrb[64].mxu1 %vm20961_vm3, %v20960_v2  ;;  %vm20986_vm3 = vmmov %vm20959_vm0 }
 0x4be   :  { %14108 = vmatpush3.bf16.msra.mxu1 %v15010_v21  ;;  %14095 = vmatprep.mubr.msk.bf16.mxu1 %vm20963_vm12, %v20962_v44  ;;  %v20988_v21 = vpack.c.bf16 %v18738_v40, %v20987_v19  ;;  %vm20989_vm12 = vmmov %vm20959_vm0  ;;  %v15016_v40 = vld [vmem:[%s19986_s3 + $0x70] sm:$0xff]   ;;  %v9180_v44 = vld [vmem:[#allocation2 + $0x61] sm:$0xff] }
 0x4bf   :  { %14109 = vmatprep.subr.bf16.mxu1 %v15011_v59 }
 0x4c2   :  { %14110 = vmatpush3.bf16.msra.mxu1 %v15011_v59  ;;  %v9178_v59 = vld [vmem:[#allocation2 + $0x51] sm:$0xff] }
 0x4c3   :  { %14127 = vmatprep.subr.bf16.mxu1 %v15012_v38  ;;  %v9238_v2 = vpack.c.bf16 %v9179_v28, %v9178_v59 }
 0x4c5   :  { %14096 = vmatmul.mubr.msk.bf16.gmra.mrb[68].mxu1 %vm20965_vm9, %v20964_v1  ;;  %vm20990_vm9 = vmmov %vm20959_vm0  ;;  %v21030_v1 = vld [vmem:[#allocation63_spill] sm:$0xff] }
 0x4c6   :  { %14099 = vmatprep.mubr.msk.bf16.mxu1 %vm20967_vm6, %v20966_v31  ;;  %vm20992_vm6 = vmmov %vm20959_vm0  ;;  %v9241_v31 = vpack.c.bf16 %v18800_v63, %v18823_v20  ;;  %v21041_v20 = vld [vmem:[#allocation25_spill] sm:$0xff] }
 0x4cd   :  { %14100 = vmatmul.mubr.msk.bf16.gmra.mrb[72].mxu1 %vm20968_vm2, %v18724_v37  ;;  %v20974_v37 = vld [vmem:[#allocation50_spill] sm:$0xff]  ;;  %vm20994_vm2 = vmmov %vm20959_vm0 }
 0x4ce   :  { %14103 = vmatprep.mubr.msk.bf16.mxu1 %vm20969_vm5, %v18803_v46  ;;  %v8526_v43 = vpack.c.bf16 %v20974_v37, %v20973_v52  ;;  %v15014_v46 = vld [vmem:[%s19986_s3 + $0x60] sm:$0xff]   ;;  %vm20996_vm5 = vmmov %vm20959_vm0 }
 0x4d5   :  { %14104 = vmatmul.mubr.msk.bf16.gmra.mrb[76].mxu1 %vm20970_vm10, %v18908_v49  ;;  %v20977_v49 = vld [vmem:[#allocation48_spill] sm:$0xff]  ;;  %vm20998_vm10 = vmmov %vm20959_vm0 }
 0x4d6   :  { %14111 = vmatprep.mubr.msk.bf16.mxu1 %vm20971_vm8, %v8524_v32  ;;  %v8527_v55 = vpack.c.bf16 %v20978_v57, %v20977_v49  ;;  %vm21000_vm8 = vmmov %vm20959_vm0  ;;  %v21025_v56 = vpack.c.bf16 %v20977_v49, %v20974_v37  ;;  %v21036_v32 = vld [vmem:[#allocation57_spill] sm:$0xff] }
 0x4dd   :  { %14112 = vmatmul.mubr.msk.bf16.vlgmr.msra.gmra.mrb[64].mxu1 %vm20975_vm13, %v8525_v51  ;;  %vm21002_vm13 = vmmov %vm20959_vm0 }
 0x4de   :  { %14128 = vmatpush3.bf16.msra.mxu1 %v15012_v38  ;;  %14115 = vmatprep.mubr.msk.bf16.mxu1 %vm20976_vm15, %v8526_v43  ;;  %vm21003_vm15 = vmmov %vm20959_vm0  ;;  %v9239_v38 = vpack.c.bf16 %v20987_v19, %v9180_v44 }
 0x4df   :  { %14129 = vmatprep.subr.bf16.mxu1 %v15013_v24 }
 0x4e2   :  { %14130 = vmatpush3.bf16.msra.mxu1 %v15013_v24  ;;  %v15020_v24 = vld [vmem:[%s19988_s5 + $0x20] sm:$0xff]  }
 0x4e3   :  { %14147 = vmatprep.subr.bf16.mxu1 %v15014_v46 }
 0x4e5   :  { %14116 = vmatmul.mubr.msk.bf16.gmra.mrb[68].mxu1 %vm20979_vm7, %v8527_v55  ;;  %vm21004_vm7 = vmmov %vm20959_vm0 }
 0x4e6   :  { %14119 = vmatprep.mubr.msk.bf16.mxu1 %vm20959_vm0, %v20982_v23 }
 0x4ed   :  { %14120 = vmatmul.mubr.msk.bf16.gmra.mrb[72].mxu1 %vm20986_vm3, %v20985_v18  ;;  %vm21007_vm3 = vmmov %vm20959_vm0 }
 0x4ee   :  { %14123 = vmatprep.mubr.msk.bf16.mxu1 %vm20989_vm12, %v20988_v21  ;;  %vm21009_vm12 = vmmov %vm20959_vm0 }
 0x4f5   :  { %14124 = vmatmul.mubr.msk.bf16.gmra.mrb[76].mxu1 %vm20990_vm9, %v8531_v30  ;;  %v20999_v30 = vld [vmem:[#allocation61_spill] sm:$0xff]  ;;  %vm21012_vm9 = vmmov %vm20959_vm0 }
 0x4f6   :  { %14131 = vmatprep.mubr.msk.bf16.mxu1 %vm20992_vm6, %v20991_v17  ;;  %vm21014_vm6 = vmmov %vm20959_vm0 }
 0x4fd   :  { %14132 = vmatmul.mubr.msk.bf16.vlgmr.msra.gmra.mrb[64].mxu1 %vm20994_vm2, %v20993_v13  ;;  %vm21016_vm2 = vmmov %vm20959_vm0 }
 0x4fe   :  { %14148 = vmatpush3.bf16.msra.mxu1 %v15014_v46  ;;  %14135 = vmatprep.mubr.msk.bf16.mxu1 %vm20996_vm5, %v20995_v6  ;;  %vm21017_vm5 = vmmov %vm20959_vm0 }
 0x4ff   :  { %14149 = vmatprep.subr.bf16.mxu1 %v15015_v42 }
 0x502   :  { %14150 = vmatpush3.bf16.msra.mxu1 %v15015_v42 }
 0x503   :  { %14167 = vmatprep.subr.bf16.mxu1 %v15016_v40 }
 0x505   :  { %14136 = vmatmul.mubr.msk.bf16.gmra.mrb[68].mxu1 %vm20998_vm10, %v20997_v47  ;;  %vm21022_vm10 = vmmov %vm20959_vm0 }
 0x506   :  { %14139 = vmatprep.mubr.msk.bf16.mxu1 %vm21000_vm8, %v20999_v30  ;;  %vm21024_vm8 = vmmov %vm20959_vm0 }
 0x50d   :  { %14140 = vmatmul.mubr.msk.bf16.gmra.mrb[72].mxu1 %vm21002_vm13, %v21001_v12  ;;  %vm21027_vm13 = vmmov %vm20959_vm0 }
 0x50e   :  { %14143 = vmatprep.mubr.msk.bf16.mxu1 %vm21003_vm15, %v18858_v29  ;;  %v15018_v29 = vld [vmem:[%s19986_s3 + $0x80] sm:$0xff]   ;;  %vm21028_vm15 = vmmov %vm20959_vm0 }
 0x515   :  { %14144 = vmatmul.mubr.msk.bf16.gmra.mrb[76].mxu1 %vm21004_vm7, %v18910_v60  ;;  %v21010_v60 = vld [vmem:[#allocation54_spill] sm:$0xff]  ;;  %vm21029_vm7 = vmmov %vm20959_vm0 }
 0x516   :  { %14151 = vmatprep.mubr.msk.bf16.mxu1 %vm20959_vm0, %v21005_v10  ;;  %v21011_v48 = vsel %vm18492_vm14, %v21010_v60, 0.0  ;;  %vm21018_vm14 = vmmov %vm20959_vm0 }
 0x517   :  { %v9011_v25 = vpack.c.bf16 %v18800_v63, %v21011_v48 }
 0x51d   :  { %14152 = vmatmul.mubr.msk.bf16.vlgmr.msra.gmra.mrb[64].mxu1 %vm21007_vm3, %v21006_v50  ;;  %vm21031_vm3 = vmmov %vm20959_vm0 }
 0x51e   :  { %14168 = vmatpush3.bf16.msra.mxu1 %v15016_v40  ;;  %14155 = vmatprep.mubr.msk.bf16.mxu1 %vm21009_vm12, %v21008_v36  ;;  %vm21033_vm12 = vmmov %vm20959_vm0 }
 0x51f   :  { %14169 = vmatprep.subr.bf16.mxu1 %v15017_v14 }
 0x522   :  { %14170 = vmatpush3.bf16.msra.mxu1 %v15017_v14 }
 0x523   :  { %14187 = vmatprep.subr.bf16.mxu1 %v15018_v29 }
 0x525   :  { %14156 = vmatmul.mubr.msk.bf16.gmra.mrb[68].mxu1 %vm21012_vm9, %v9011_v25  ;;  %vm21035_vm9 = vmmov %vm20959_vm0 }
 0x526   :  { %14159 = vmatprep.mubr.msk.bf16.mxu1 %vm21014_vm6, %v21013_v39  ;;  %vm21037_vm6 = vmmov %vm20959_vm0 }
 0x52d   :  { %14160 = vmatmul.mubr.msk.bf16.gmra.mrb[72].mxu1 %vm21016_vm2, %v21015_v8  ;;  %vm21040_vm2 = vmmov %vm20959_vm0 }
 0x52e   :  { %14163 = vmatprep.mubr.msk.bf16.mxu1 %vm21017_vm5, %v18860_v22  ;;  %v21023_v22 = vpack.c.bf16 %v20973_v52, %v20972_v35  ;;  %v21039_v35 = vsel %vm20950_vm1, %v21038_v9, 0.0  ;;  %vm21042_vm5 = vmmov %vm20959_vm0 }
 0x52f   :  { %v9479_v51 = vpack.c.bf16 %v18800_v63, %v21039_v35  ;;  %vm21045_vm1 = vmmov %vm20959_vm0  ;;  %v15023_v63 = vld [vmem:[%s19988_s5 + $0x38] sm:$0xff]  }
 0x535   :  { %14164 = vmatmul.mubr.msk.bf16.gmra.mrb[76].mxu1 %vm21018_vm14, %v9015_v45  ;;  %vm21043_vm14 = vmmov %vm20959_vm0 }
 0x536   :  { %14171 = vmatprep.mubr.msk.bf16.mxu1 %vm21022_vm10, %v21021_v33  ;;  %vm21044_vm10 = vmmov %vm20959_vm0 }
 0x53d   :  { %14172 = vmatmul.mubr.msk.bf16.vlgmr.msra.gmra.mrb[64].mxu1 %vm21024_vm8, %v21023_v22  ;;  %vm9857_vm8 = vcmask 523264  }
 0x53e   :  { %14188 = vmatpush3.bf16.msra.mxu1 %v15018_v29  ;;  %14175 = vmatprep.mubr.msk.bf16.mxu1 %vm21026_vm11, %v21025_v56 }
 0x53f   :  { %14189 = vmatprep.subr.bf16.mxu1 %v15019_v54 }
 0x542   :  { %14190 = vmatpush3.bf16.msra.mxu1 %v15019_v54 }
 0x543   :  { %14207 = vmatprep.subr.bf16.mxu1 %v15020_v24 }
 0x545   :  { %14176 = vmatmul.mubr.msk.bf16.gmra.mrb[68].mxu1 %vm21027_vm13, %v9237_v27 }
 0x546   :  { %14179 = vmatprep.mubr.msk.bf16.mxu1 %vm21028_vm15, %v9238_v2 }
 0x54d   :  { %14180 = vmatmul.mubr.msk.bf16.gmra.mrb[72].mxu1 %vm21029_vm7, %v9239_v38 }
 0x54e   :  { %14183 = vmatprep.mubr.msk.bf16.mxu1 %vm20959_vm0, %v21030_v1 }
 0x555   :  { %14184 = vmatmul.mubr.msk.bf16.gmra.mrb[76].mxu1 %vm21031_vm3, %v9241_v31 }
 0x556   :  { %14191 = vmatprep.mubr.msk.bf16.mxu1 %vm21033_vm12, %v21032_v11 }
 0x55d   :  { %14192 = vmatmul.mubr.msk.bf16.vlgmr.msra.gmra.mrb[64].mxu1 %vm21035_vm9, %v21034_v61 }
 0x55e   :  { %14195 = vmatprep.mubr.msk.bf16.mxu1 %vm21037_vm6, %v21036_v32  ;;  %14208 = vmatpush3.bf16.msra.mxu1 %v15020_v24 }
 0x565   :  { %14196 = vmatmul.mubr.msk.bf16.gmra.mrb[68].mxu1 %vm21040_vm2, %v9479_v51 }
 0x566   :  { %14199 = vmatprep.mubr.msk.bf16.mxu1 %vm21042_vm5, %v21041_v20 }
 0x56d   :  { %14200 = vmatmul.mubr.msk.bf16.gmra.mrb[72].mxu1 %vm21043_vm14, %v18818_v15  ;;  %v15021_v15 = vld [vmem:[%s19988_s5 + $0x28] sm:$0xff]  }
 0x56e   :  { %14203 = vmatprep.mubr.msk.bf16.mxu1 %vm21044_vm10, %v18923_v7  ;;  %14209 = vmatprep.subr.bf16.mxu1 %v15021_v15 }
 0x56f   :  { %14210 = vmatpush3.bf16.msra.mxu1 %v15021_v15 }
 0x570   :  { %14211 = vmatprep.subr.bf16.mxu1 %v15022_v0 }
 0x573   :  { %14212 = vmatpush3.bf16.msra.mxu1 %v15022_v0 }
 0x574   :  { %14213 = vmatprep.subr.bf16.mxu1 %v15023_v63 }
 0x575   :  { %14204 = vmatmul.mubr.msk.bf16.gmra.mrb[76].mxu1 %vm21045_vm1, %v9483_v3 }
 0x577   :  { %14214 = vmatpush3.bf16.msra.mxu1 %v15023_v63 }
 0x578   :  { %14219 = vmatprep.subr.bf16.mxu1 %v19170_v16 }
 0x630   :  { %v14193_v7 = vpop.f32.mrb[64].mxu1 }
 0x631   :  { %v9647_v52 = vadd.f32 %v14193_v7, %v19176_v5  ;;  %v9559_v37 = vpop.f32.mrb[65].mxu1 }
 0x632   :  { %v9645_v43 = vadd.f32 %v19176_v5, %v9559_v37  ;;  %v14194_v46 = vpop.f32.mrb[66].mxu1 }
 0x633   :  { %v9663_v49 = vmax.f32 %v9647_v52, 0.0  ;;  %v9648_v57 = vadd.f32 %v14194_v46, %v19176_v5  ;;  %v9562_v55 = vpop.f32.mrb[67].mxu1 }
 0x634   :  { %v9661_v53 = vmax.f32 %v9645_v43, 0.0  ;;  %v9646_v41 = vadd.f32 %v19176_v5, %v9562_v55 }
 0x635   :  { %9679 = vst [vmem:[#allocation4 + $0x10] sm:$0xff] %v9663_v49  ;;  %v9664_v23 = vmax.f32 %v9648_v57, 0.0 }
 0x636   :  { %9677 = vst [vmem:[#allocation4] sm:$0xff] %v9661_v53  ;;  %v9662_v62 = vmax.f32 %v9646_v41, 0.0 }
 0x637   :  { %9680 = vst [vmem:[#allocation4 + $0x18] sm:$0xff] %v9664_v23 }
 0x638   :  { %9678 = vst [vmem:[#allocation4 + $0x8] sm:$0xff] %v9662_v62  ;;  %v14197_v4 = vpop.f32.mrb[68].mxu1 }
 0x639   :  { %v9651_v18 = vadd.f32 %v14197_v4, %v19176_v5  ;;  %v9575_v19 = vpop.f32.mrb[69].mxu1 }
 0x63a   :  { %v9649_v21 = vadd.f32 %v19176_v5, %v9575_v19  ;;  %v14198_v17 = vpop.f32.mrb[70].mxu1  ;;  %v21046_v19 = vld [vmem:[#allocation8_spill] sm:$0xff] }
 0x63b   :  { %v9667_v42 = vmax.f32 %v9651_v18, 0.0  ;;  %v9652_v13 = vadd.f32 %v14198_v17, %v19176_v5  ;;  %v9578_v6 = vpop.f32.mrb[71].mxu1 }
 0x63c   :  { %v9665_v40 = vmax.f32 %v9649_v21, 0.0  ;;  %v9650_v47 = vadd.f32 %v19176_v5, %v9578_v6  ;;  %v21047_v21 = vand.u32 15, %v21046_v19 }
 0x63d   :  { %9683 = vst [vmem:[#allocation4 + $0x30] sm:$0xff] %v9667_v42  ;;  %v9668_v30 = vmax.f32 %v9652_v13, 0.0 }
 0x63e   :  { %v9695_v12 = vld [vmem:[#allocation4 + $0x10] ss:$2 sm:$0xff]  ;;  %v9709_v10 = vld [vmem:[#allocation4 + $0x11] ss:$2 sm:$0xff]  ;;  %9681 = vst [vmem:[#allocation4 + $0x20] sm:$0xff] %v9665_v40  ;;  %v9666_v14 = vmax.f32 %v9650_v47, 0.0 }
 0x63f   :  { %v9717_v50 = vmax.f32 %v9695_v12, %v9709_v10  ;;  %v9693_v36 = vld [vmem:[#allocation4] ss:$2 sm:$0xff]  ;;  %v9708_v29 = vld [vmem:[#allocation4 + $0x1] ss:$2 sm:$0xff]  ;;  %9684 = vst [vmem:[#allocation4 + $0x38] sm:$0xff] %v9668_v30  ;;  %vm19196_vm4 = vcmp.ge.s32.totalorder %v21047_v21, 4 }
 0x640   :  { %v9716_v60 = vmax.f32 %v9693_v36, %v9708_v29  ;;  %9682 = vst [vmem:[#allocation4 + $0x28] sm:$0xff] %v9666_v14  ;;  %v14201_v48 = vpop.f32.mrb[72].mxu1  ;;  %v21050_v10 = vld [vmem:[#allocation66_spill] sm:$0xff] }
 0x641   :  { %v9655_v25 = vadd.f32 %v14201_v48, %v19176_v5  ;;  %v9591_v39 = vpop.f32.mrb[73].mxu1  ;;  %v9730_v8 = vrot.slane %v9717_v50, 4  ;;  %v9765_v14 = vand.u32 3, %v21050_v10  ;;  %v21051_v48 = vand.u32 15, %v21050_v10 }
 0x642   :  { %v9725_v45 = vrot.slane %v9716_v60, 4  ;;  %v9653_v34 = vadd.f32 %v19176_v5, %v9591_v39  ;;  %v14202_v26 = vpop.f32.mrb[74].mxu1 }
 0x643   :  { %v9671_v33 = vmax.f32 %v9655_v25, 0.0  ;;  %v9656_v54 = vadd.f32 %v14202_v26, %v19176_v5  ;;  %v9594_v22 = vpop.f32.mrb[75].mxu1  ;;  %v9732_v56 = vmax.f32 %v9717_v50, %v9730_v8  ;;  %vm19206_vm11 = vcmp.lt.s32.totalorder %v21051_v48, 12 }
 0x644   :  { %v9727_v58 = vmax.f32 %v9716_v60, %v9725_v45  ;;  %v9669_v28 = vmax.f32 %v9653_v34, 0.0  ;;  %v9654_v27 = vadd.f32 %v19176_v5, %v9594_v22  ;;  %v9764_v45 = vand.u32 3, %v21046_v19  ;;  %v15035_v34 = vld [vmem:[%s19988_s5 + $0x78] sm:$0xff]  }
 0x645   :  { %9687 = vst [vmem:[#allocation4 + $0x50] sm:$0xff] %v9671_v33  ;;  %v9672_v59 = vmax.f32 %v9656_v54, 0.0  ;;  %9733 = vst [vmem:[#allocation3 + $0x9] sm:$0xf] %v9732_v56  ;;  %vm19211_vm13 = vcmp.ge.s32.totalorder %v9765_v14, 1  ;;  %vm19215_vm15 = vcmp.lt.s32.totalorder %v9765_v14, 3 }
 0x646   :  { %9728 = vst [vmem:[#allocation3 + $0x5] sm:$0xf] %v9727_v58  ;;  %v9699_v2 = vld [vmem:[#allocation4 + $0x30] ss:$2 sm:$0xff]  ;;  %v9711_v44 = vld [vmem:[#allocation4 + $0x31] ss:$2 sm:$0xff]  ;;  %vm10437_vm7 = vmand %vm19206_vm11, %vm19211_vm13 }
 0x647   :  { %9685 = vst [vmem:[#allocation4 + $0x40] sm:$0xff] %v9669_v28  ;;  %v9670_v38 = vmax.f32 %v9654_v27, 0.0  ;;  %v9719_v1 = vmax.f32 %v9699_v2, %v9711_v44  ;;  %v9697_v31 = vld [vmem:[#allocation4 + $0x20] ss:$2 sm:$0xff]  ;;  %v9710_v11 = vld [vmem:[#allocation4 + $0x21] ss:$2 sm:$0xff]  ;;  %vm10661_vm0 = vmand %vm19206_vm11, %vm19215_vm15 }
 0x648   :  { %9688 = vst [vmem:[#allocation4 + $0x58] sm:$0xff] %v9672_v59  ;;  %v9718_v61 = vmax.f32 %v9697_v31, %v9710_v11  ;;  %v14205_v32 = vpop.f32.mrb[76].mxu1  ;;  %vm19229_vm3 = vcmp.ge.s32.totalorder %v9764_v45, 1  ;;  %vm19233_vm12 = vcmp.lt.s32.totalorder %v9764_v45, 3  ;;  %v15032_v14 = vld [vmem:[%s19988_s5 + $0x60] sm:$0xff]   ;;  %v15034_v45 = vld [vmem:[%s19988_s5 + $0x70] sm:$0xff]  }
 0x649   :  { %9686 = vst [vmem:[#allocation4 + $0x48] sm:$0xff] %v9670_v38  ;;  %v9740_v9 = vrot.slane %v9719_v1, 4  ;;  %v9659_v35 = vadd.f32 %v14205_v32, %v19176_v5  ;;  %v9607_v51 = vpop.f32.mrb[77].mxu1  ;;  %vm9780_vm6 = vmand %vm19196_vm4, %vm19229_vm3  ;;  %v15042_v33 = vld [vmem:[%s19988_s5 + $0xb0] sm:$0xff]   ;;  %v15043_v2 = vld [vmem:[%s19988_s5 + $0xb8] sm:$0xff]  }
 0x64a   :  { %v9735_v20 = vrot.slane %v9718_v61, 4  ;;  %v9657_v3 = vadd.f32 %v19176_v5, %v9607_v51  ;;  %v14206_v24 = vpop.f32.mrb[78].mxu1  ;;  %vm10000_vm14 = vmand %vm19196_vm4, %vm19233_vm12 }
 0x64b   :  { %v9742_v15 = vmax.f32 %v9719_v1, %v9740_v9  ;;  %v9675_v0 = vmax.f32 %v9659_v35, 0.0  ;;  %v9660_v63 = vadd.f32 %v14206_v24, %v19176_v5  ;;  %v9610_v7 = vpop.f32.mrb[79].mxu1  ;;  %v21062_v35 = vld [vmem:[#allocation9_spill] sm:$0xff] }
 0x64c   :  { %v9737_v52 = vmax.f32 %v9718_v61, %v9735_v20  ;;  %v9673_v37 = vmax.f32 %v9657_v3, 0.0  ;;  %v9658_v43 = vadd.f32 %v19176_v5, %v9610_v7  ;;  %v21063_v51 = vand.u32 15, %v21062_v35  ;;  %v15031_v5 = vld [vmem:[%s19988_s5 + $0x58] sm:$0xff]  }
 0x64d   :  { %9743 = vst [vmem:[#allocation3 + $0x11] sm:$0xf] %v9742_v15  ;;  %9691 = vst [vmem:[#allocation4 + $0x70] sm:$0xff] %v9675_v0  ;;  %v9676_v46 = vmax.f32 %v9660_v63, 0.0  ;;  %v9806_v17 = vld [vmem:[#allocation3 + $0x1] sm:$0xff]  ;;  %v9766_v24 = vand.u32 3, %v21062_v35 }
 0x64e   :  { %9738 = vst [vmem:[#allocation3 + $0xd] sm:$0xf] %v9737_v52  ;;  %9689 = vst [vmem:[#allocation4 + $0x60] sm:$0xff] %v9673_v37  ;;  %v9674_v55 = vmax.f32 %v9658_v43, 0.0  ;;  %v9818_v40 = vsel %vm19196_vm4, %v9806_v17, 0.0  ;;  %vm19252_vm9 = vcmp.ge.s32.totalorder %v21063_v51, 4 }
 0x64f   :  { %v9703_v49 = vld [vmem:[#allocation4 + $0x50] ss:$2 sm:$0xff]  ;;  %v9713_v57 = vld [vmem:[#allocation4 + $0x51] ss:$2 sm:$0xff]  ;;  %9692 = vst [vmem:[#allocation4 + $0x78] sm:$0xff] %v9676_v46  ;;  %v15025_v37 = vld [vmem:[%s19988_s5 + $0x8] sm:$0xff]  }
 0x650   :  { %v9721_v53 = vmax.f32 %v9703_v49, %v9713_v57  ;;  %v9701_v41 = vld [vmem:[#allocation4 + $0x40] ss:$2 sm:$0xff]  ;;  %v9712_v23 = vld [vmem:[#allocation4 + $0x41] ss:$2 sm:$0xff]  ;;  %9690 = vst [vmem:[#allocation4 + $0x68] sm:$0xff] %v9674_v55  ;;  %v9768_v3 = vld [vmem:[#allocation3] sm:$0xff] }
 0x651   :  { %v9720_v62 = vmax.f32 %v9701_v41, %v9712_v23  ;;  %v9792_v52 = vsel %vm9780_vm6, %v9768_v3, 0.0  ;;  %vm19271_vm2 = vcmp.ge.s32.totalorder %v9766_v24, 1  ;;  %v15026_v49 = vld [vmem:[%s19988_s5 + $0x10] sm:$0xff]   ;;  %v21068_v57 = vld [vmem:[#allocation10_spill] sm:$0xff]  ;;  %vm19323_vm1 = vcmp.lt.s32.totalorder %v9766_v24, 3  ;;  %v15049_v41 = vld [vmem:[%s19988_s5 + $0xe8] sm:$0xff]  }
 0x652   :  { %v9750_v4 = vrot.slane %v9721_v53, 4  ;;  %vm9782_vm5 = vmand %vm19252_vm9, %vm19271_vm2  ;;  %v9767_v55 = vand.u32 3, %v21068_v57  ;;  %v15028_v23 = vld [vmem:[%s19988_s5 + $0x40] sm:$0xff]   ;;  %v15050_v46 = vld [vmem:[%s19988_s5 + $0xf0] sm:$0xff]  }
 0x653   :  { %v9745_v18 = vrot.slane %v9720_v62, 4  ;;  %v10220_v59 = vld [vmem:[#allocation3 + $0x5] sm:$0xff] }
 0x654   :  { %v9752_v42 = vmax.f32 %v9721_v53, %v9750_v4  ;;  %vm19295_vm10 = vcmp.ge.s32.totalorder %v9767_v55, 1  ;;  %vm19329_vm4 = vcmp.lt.s32.totalorder %v9767_v55, 3  ;;  %v15040_v35 = vld [vmem:[%s19988_s5 + $0xa0] sm:$0xff]  }
 0x655   :  { %v9747_v13 = vmax.f32 %v9720_v62, %v9745_v18  ;;  %v9807_v6 = vld [vmem:[#allocation3 + $0x9] sm:$0xff] }
 0x656   :  { %9753 = vst [vmem:[#allocation3 + $0x19] sm:$0xf] %v9752_v42  ;;  %v9707_v47 = vld [vmem:[#allocation4 + $0x70] ss:$2 sm:$0xff]  ;;  %v9715_v30 = vld [vmem:[#allocation4 + $0x71] ss:$2 sm:$0xff]  ;;  %v9822_v12 = vpack.c.bf16 %v9807_v6, %v9818_v40 }
 0x657   :  { %9748 = vst [vmem:[#allocation3 + $0x15] sm:$0xf] %v9747_v13  ;;  %v9723_v50 = vmax.f32 %v9707_v47, %v9715_v30  ;;  %v9705_v36 = vld [vmem:[#allocation4 + $0x60] ss:$2 sm:$0xff]  ;;  %v9714_v29 = vld [vmem:[#allocation4 + $0x61] ss:$2 sm:$0xff] }
 0x658   :  { %v9722_v60 = vmax.f32 %v9705_v36, %v9714_v29  ;;  %14215 = vmatprep.mubr.msk.bf16.mxu1 %vm9857_vm8, %v9822_v12  ;;  %v9769_v22 = vld [vmem:[#allocation3 + $0x8] sm:$0xff]  ;;  %v15029_v13 = vld [vmem:[%s19988_s5 + $0x48] sm:$0xff]   ;;  %v15030_v40 = vld [vmem:[%s19988_s5 + $0x50] sm:$0xff]  }
 0x659   :  { %v9760_v39 = vrot.slane %v9723_v50, 4  ;;  %v9993_v56 = vld [vmem:[#allocation3 + $0xa] sm:$0xff]  ;;  %v10448_v44 = vsel %vm19229_vm3, %v9769_v22, 0.0  ;;  %v9793_v15 = vsel %vm19211_vm13, %v9769_v22, 0.0  ;;  %v9992_v62 = vld [vmem:[#allocation3 + $0x2] sm:$0xff] }
 0x65a   :  { %v9755_v8 = vrot.slane %v9722_v60, 4  ;;  %v10672_v61 = vsel %vm19233_vm12, %v9993_v56, 0.0  ;;  %v9796_v43 = vpack.c.bf16 %v9793_v15, %v9792_v52  ;;  %v10013_v18 = vsel %vm19215_vm15, %v9993_v56, 0.0  ;;  %v10111_v12 = vld [vmem:[#allocation3 + $0xc] sm:$0xff]  ;;  %v10110_v36 = vld [vmem:[#allocation3 + $0x4] sm:$0xff] }
 0x65b   :  { %v9762_v26 = vmax.f32 %v9723_v50, %v9760_v39  ;;  %v10012_v42 = vsel %vm10000_vm14, %v9992_v62, 0.0  ;;  %v10123_v29 = vsel %vm19211_vm13, %v10111_v12, 0.0  ;;  %v10122_v25 = vsel %vm19229_vm3, %v10110_v36, 0.0  ;;  %v15033_v39 = vld [vmem:[%s19988_s5 + $0x68] sm:$0xff]   ;;  %v15036_v22 = vld [vmem:[%s19988_s5 + $0x80] sm:$0xff]  }
 0x65c   :  { %v9757_v54 = vmax.f32 %v9722_v60, %v9755_v8  ;;  %v10126_v8 = vpack.c.bf16 %v10123_v29, %v10122_v25  ;;  %v10318_v20 = vld [vmem:[#allocation3 + $0x6] sm:$0xff]  ;;  %v15045_v62 = vld [vmem:[%s19988_s5 + $0xc8] sm:$0xff]  }
 0x65d   :  { %9763 = vst [vmem:[#allocation3 + $0x21] sm:$0xf] %v9762_v26  ;;  %v15061_v25 = vld [vmem:[%s19990_s7 + $0x24] ss:$16 sps:$4 sm:$0xff]   ;;  %v15059_v47 = vld [vmem:[%s19990_s7 + $0x20] ss:$16 sps:$4 sm:$0xff]  }
 0x65e   :  { %v9808_v58 = vld [vmem:[#allocation3 + $0x11] sm:$0xff]  ;;  %9758 = vst [vmem:[#allocation3 + $0x1d] sm:$0xf] %v9757_v54 }
 0x65f   :  { %v9770_v28 = vld [vmem:[#allocation3 + $0x10] sm:$0xff]  ;;  %v10559_v1 = vsel %vm19206_vm11, %v9808_v58, 0.0  ;;  %v9820_v63 = vsel %vm19252_vm9, %v9808_v58, 0.0  ;;  %vm10002_vm11 = vmand %vm19252_vm9, %vm19323_vm1 }
 0x660   :  { %v19227_v27 = vld [vmem:[#allocation3 + $0x12] sm:$0xff]  ;;  %v10449_v38 = vsel %vm10437_vm7, %v9770_v28, 0.0  ;;  %v19243_v11 = vpack.c.bf16 %v10559_v1, %v9807_v6  ;;  %v9794_v21 = vsel %vm9782_vm5, %v9770_v28, 0.0  ;;  %v10016_v6 = vpack.c.bf16 %v10013_v18, %v10012_v42 }
 0x661   :  { %v19241_v31 = vpack.c.bf16 %v10449_v38, %v10448_v44  ;;  %v10673_v32 = vsel %vm10661_vm0, %v19227_v27, 0.0  ;;  %v10014_v60 = vsel %vm10002_vm11, %v19227_v27, 0.0  ;;  %v10112_v54 = vld [vmem:[#allocation3 + $0x14] sm:$0xff]  ;;  %v21075_v18 = vand.u32 15, %v21068_v57 }
 0x662   :  { %v19248_v9 = vpack.c.bf16 %v10673_v32, %v10672_v61  ;;  %v10221_v58 = vld [vmem:[#allocation3 + $0xd] sm:$0xff]  ;;  %v10124_v28 = vsel %vm19271_vm2, %v10112_v54, 0.0  ;;  %v15038_v1 = vld [vmem:[%s19988_s5 + $0x90] sm:$0xff]   ;;  %v15039_v61 = vld [vmem:[%s19988_s5 + $0x98] sm:$0xff]  }
 0x663   :  { %v15037_v44 = vld [vmem:[%s19988_s5 + $0x88] sm:$0xff]   ;;  %v10224_v38 = vpack.c.bf16 %v10221_v58, %v10220_v59  ;;  %vm19413_vm13 = vcmp.lt.s32.totalorder %v21075_v18, 12  ;;  %v15068_v54 = vld [vmem:[%s19990_s7 + $0x80] ss:$16 sps:$4 sm:$0xff]   ;;  %v15076_v58 = vld [vmem:[%s19990_s7 + $0xc4] ss:$16 sps:$4 sm:$0xff]  }
 0x664   :  { %v10319_v32 = vld [vmem:[#allocation3 + $0xe] sm:$0xff]  ;;  %v10659_v36 = vld [vmem:[#allocation3 + $0x22] sm:$0xff]  ;;  %vm10663_vm7 = vmand %vm19413_vm13, %vm19329_vm4 }
 0x665   :  { %v19263_v0 = vld [vmem:[#allocation3 + $0x19] sm:$0xff]  ;;  %v10331_v3 = vsel %vm19215_vm15, %v10319_v32, 0.0  ;;  %vm10439_vm15 = vmand %vm19413_vm13, %vm19295_vm10 }
 0x666   :  { %v9823_v7 = vpack.c.bf16 %v19263_v0, %v9820_v63  ;;  %v19293_v53 = vld [vmem:[#allocation3 + $0x18] sm:$0xff]  ;;  %v10330_v63 = vsel %vm19233_vm12, %v10318_v20, 0.0  ;;  %v10431_v42 = vld [vmem:[#allocation3 + $0x20] sm:$0xff] }
 0x667   :  { %v9795_v4 = vsel %vm19295_vm10, %v19293_v53, 0.0  ;;  %v19327_v30 = vld [vmem:[#allocation3 + $0x1a] sm:$0xff]  ;;  %v10334_v52 = vpack.c.bf16 %v10331_v3, %v10330_v63  ;;  %v10450_v57 = vsel %vm19271_vm2, %v19293_v53, 0.0 }
 0x668   :  { %14216 = vmatmul.mubr.msk.bf16.vlgmr.msra.gmra.mrb[80].mxu1 %vm9857_vm8, %v9823_v7  ;;  %v9797_v17 = vpack.c.bf16 %v9795_v4, %v9794_v21  ;;  %v10015_v50 = vsel %vm19329_vm4, %v19327_v30, 0.0  ;;  %v10113_v26 = vld [vmem:[#allocation3 + $0x1c] sm:$0xff]  ;;  %v15041_v7 = vld [vmem:[%s19988_s5 + $0xa8] sm:$0xff]   ;;  %v10674_v29 = vsel %vm19323_vm1, %v19327_v30, 0.0  ;;  %v15062_v30 = vld [vmem:[%s19990_s7 + $0x40] ss:$16 sps:$4 sm:$0xff]  }
 0x669   :  { %14220 = vmatpush3.bf16.msra.mxu1 %v19170_v16  ;;  %14227 = vmatprep.mubr.msk.bf16.mxu1 %vm9857_vm8, %v9796_v43  ;;  %v15027_v16 = vld [vmem:[%s19988_s5 + $0x18] sm:$0xff]   ;;  %v10017_v48 = vpack.c.bf16 %v10015_v50, %v10014_v60  ;;  %v10125_v56 = vsel %vm19295_vm10, %v10113_v26, 0.0  ;;  %v10222_v24 = vld [vmem:[#allocation3 + $0x15] sm:$0xff]  ;;  %v10675_v60 = vsel %vm10663_vm7, %v10659_v36, 0.0  ;;  %v15405_v26 = vmov 0  }
 0x66a   :  { %14221 = vmatprep.subr.bf16.mxu1 %v15025_v37  ;;  %v10127_v27 = vpack.c.bf16 %v10125_v56, %v10124_v28  ;;  %v10223_v51 = vld [vmem:[#allocation3 + $0x1d] sm:$0xff]  ;;  %v10677_v10 = vpack.c.bf16 %v10675_v60, %v10674_v29  ;;  %v15071_v56 = vld [vmem:[%s19990_s7 + $0xa0] ss:$16 sps:$4 sm:$0xff]  }
 0x66b   :  { %v10225_v15 = vpack.c.bf16 %v10223_v51, %v10222_v24  ;;  %v10321_v43 = vld [vmem:[#allocation3 + $0x1e] sm:$0xff]  ;;  %v15074_v28 = vld [vmem:[%s19990_s7 + $0xc0] ss:$16 sps:$4 sm:$0xff]  }
 0x66c   :  { %v10333_v55 = vsel %vm19329_vm4, %v10321_v43, 0.0  ;;  %v15046_v4 = vld [vmem:[%s19988_s5 + $0xd0] sm:$0xff]   ;;  %v15051_v53 = vld [vmem:[%s19988_s5 + $0xf8] sm:$0xff]  }
 0x66d   :  { %14222 = vmatpush3.bf16.msra.mxu1 %v15025_v37  ;;  %v10320_v37 = vld [vmem:[#allocation3 + $0x16] sm:$0xff]  ;;  %v15080_v18 = vld [vmem:[%s19990_s7 + $0x8] ss:$16 sps:$4 sm:$0xff]  }
 0x66e   :  { %14223 = vmatprep.subr.bf16.mxu1 %v15026_v49  ;;  %v15054_v50 = vld [vmem:[%s19988_s5 + $0x110] sm:$0xff]  }
 0x66f   :  { %v15077_v59 = vld [vmem:[%s19990_s7 + $0xe0] ss:$16 sps:$4 sm:$0xff]   ;;  %v15112_v60 = vld [vmem:[%s19992_s9 + $0x44] ss:$16 sps:$4 sm:$0xff]  }
 0x670   :  { %v15104_v36 = vld [vmem:[%s19992_s9] ss:$16 sps:$4 sm:$0xff]  }
 0x671   :  { %14224 = vmatpush3.bf16.msra.mxu1 %v15026_v49  ;;  %v15044_v49 = vld [vmem:[%s19988_s5 + $0xc0] sm:$0xff]  }
 0x672   :  { %14225 = vmatprep.subr.bf16.mxu1 %v15027_v16  ;;  %v15107_v29 = vld [vmem:[%s19992_s9 + $0x20] ss:$16 sps:$4 sm:$0xff]  }
 0x675   :  { %14226 = vmatpush3.bf16.msra.mxu1 %v15027_v16  ;;  %v10332_v16 = vsel %vm19323_vm1, %v10320_v37, 0.0 }
 0x676   :  { %14231 = vmatprep.subr.bf16.mxu1 %v15028_v23 }
 0x678   :  { %14228 = vmatmul.mubr.msk.bf16.vlgmr.msra.gmra.mrb[80].mxu1 %vm9857_vm8, %v9797_v17  ;;  %v15047_v17 = vld [vmem:[%s19988_s5 + $0xd8] sm:$0xff]  }
 0x679   :  { %14232 = vmatpush3.bf16.msra.mxu1 %v15028_v23  ;;  %14239 = vmatprep.mubr.msk.bf16.mxu1 %vm9857_vm8, %v10016_v6  ;;  %v10335_v23 = vpack.c.bf16 %v10333_v55, %v10332_v16 }
 0x67a   :  { %14233 = vmatprep.subr.bf16.mxu1 %v15029_v13 }
 0x67d   :  { %14234 = vmatpush3.bf16.msra.mxu1 %v15029_v13  ;;  %v10451_v13 = vsel %vm10439_vm15, %v10431_v42, 0.0  ;;  %v15085_v42 = vld [vmem:[%s19990_s7 + $0x2c] ss:$16 sps:$4 sm:$0xff]  }
 0x67e   :  { %14235 = vmatprep.subr.bf16.mxu1 %v15030_v40  ;;  %v10453_v6 = vpack.c.bf16 %v10451_v13, %v10450_v57  ;;  %v15088_v57 = vld [vmem:[%s19990_s7 + $0x4c] ss:$16 sps:$4 sm:$0xff]   ;;  %v15086_v13 = vld [vmem:[%s19990_s7 + $0x48] ss:$16 sps:$4 sm:$0xff]  }
 0x681   :  { %14236 = vmatpush3.bf16.msra.mxu1 %v15030_v40  ;;  %v10549_v40 = vld [vmem:[#allocation3 + $0x21] sm:$0xff] }
 0x682   :  { %14237 = vmatprep.subr.bf16.mxu1 %v15031_v5 }
 0x685   :  { %14238 = vmatpush3.bf16.msra.mxu1 %v15031_v5  ;;  %v15052_v5 = vld [vmem:[%s19988_s5 + $0x100] sm:$0xff]  }
 0x686   :  { %14243 = vmatprep.subr.bf16.mxu1 %v15032_v14 }
 0x688   :  { %14240 = vmatmul.mubr.msk.bf16.vlgmr.msra.gmra.mrb[80].mxu1 %vm9857_vm8, %v10017_v48  ;;  %v15056_v48 = vld [vmem:[%s19990_s7] ss:$16 sps:$4 sm:$0xff]  }
 0x689   :  { %14244 = vmatpush3.bf16.msra.mxu1 %v15032_v14  ;;  %14251 = vmatprep.mubr.msk.bf16.mxu1 %vm9857_vm8, %v10126_v8  ;;  %v15053_v14 = vld [vmem:[%s19988_s5 + $0x108] sm:$0xff]   ;;  %v15067_v8 = vld [vmem:[%s19990_s7 + $0x64] ss:$16 sps:$4 sm:$0xff]  }
 0x68a   :  { %14245 = vmatprep.subr.bf16.mxu1 %v15033_v39 }
 0x68d   :  { %14246 = vmatpush3.bf16.msra.mxu1 %v15033_v39  ;;  %v15064_v39 = vld [vmem:[%s19990_s7 + $0x44] ss:$16 sps:$4 sm:$0xff]  }
 0x68e   :  { %14247 = vmatprep.subr.bf16.mxu1 %v15034_v45 }
 0x691   :  { %14248 = vmatpush3.bf16.msra.mxu1 %v15034_v45  ;;  %v15065_v45 = vld [vmem:[%s19990_s7 + $0x60] ss:$16 sps:$4 sm:$0xff]  }
 0x692   :  { %14249 = vmatprep.subr.bf16.mxu1 %v15035_v34 }
 0x695   :  { %14250 = vmatpush3.bf16.msra.mxu1 %v15035_v34  ;;  %v15070_v34 = vld [vmem:[%s19990_s7 + $0x84] ss:$16 sps:$4 sm:$0xff]  }
 0x696   :  { %14255 = vmatprep.subr.bf16.mxu1 %v15036_v22 }
 0x698   :  { %14252 = vmatmul.mubr.msk.bf16.vlgmr.msra.gmra.mrb[80].mxu1 %vm9857_vm8, %v10127_v27  ;;  %v15079_v27 = vld [vmem:[%s19990_s7 + $0xe4] ss:$16 sps:$4 sm:$0xff]  }
 0x699   :  { %14256 = vmatpush3.bf16.msra.mxu1 %v15036_v22  ;;  %14263 = vmatprep.mubr.msk.bf16.mxu1 %vm9857_vm8, %v10224_v38  ;;  %v15073_v22 = vld [vmem:[%s19990_s7 + $0xa4] ss:$16 sps:$4 sm:$0xff]   ;;  %v12852_v38 = vld [vmem:[%s19991_s6] ss:$0 sm:$0xff] }
 0x69a   :  { %14257 = vmatprep.subr.bf16.mxu1 %v15037_v44 }
 0x69d   :  { %14258 = vmatpush3.bf16.msra.mxu1 %v15037_v44  ;;  %v15082_v44 = vld [vmem:[%s19990_s7 + $0xc] ss:$16 sps:$4 sm:$0xff]  }
 0x69e   :  { %14259 = vmatprep.subr.bf16.mxu1 %v15038_v1 }
 0x6a1   :  { %14260 = vmatpush3.bf16.msra.mxu1 %v15038_v1 }
 0x6a2   :  { %14261 = vmatprep.subr.bf16.mxu1 %v15039_v61 }
 0x6a5   :  { %14262 = vmatpush3.bf16.msra.mxu1 %v15039_v61 }
 0x6a6   :  { %14267 = vmatprep.subr.bf16.mxu1 %v15040_v35 }
 0x6a8   :  { %14264 = vmatmul.mubr.msk.bf16.vlgmr.msra.gmra.mrb[80].mxu1 %vm9857_vm8, %v10225_v15 }
 0x6a9   :  { %14268 = vmatpush3.bf16.msra.mxu1 %v15040_v35  ;;  %14275 = vmatprep.mubr.msk.bf16.mxu1 %vm9857_vm8, %v10334_v52 }
 0x6aa   :  { %14269 = vmatprep.subr.bf16.mxu1 %v15041_v7 }
 0x6ad   :  { %14270 = vmatpush3.bf16.msra.mxu1 %v15041_v7 }
 0x6ae   :  { %14271 = vmatprep.subr.bf16.mxu1 %v15042_v33 }
 0x6b1   :  { %14272 = vmatpush3.bf16.msra.mxu1 %v15042_v33 }
 0x6b2   :  { %14273 = vmatprep.subr.bf16.mxu1 %v15043_v2 }
 0x6b5   :  { %14274 = vmatpush3.bf16.msra.mxu1 %v15043_v2 }
 0x6b6   :  { %14279 = vmatprep.subr.bf16.mxu1 %v15044_v49 }
 0x6b8   :  { %14276 = vmatmul.mubr.msk.bf16.vlgmr.msra.gmra.mrb[80].mxu1 %vm9857_vm8, %v10335_v23 }
 0x6b9   :  { %14280 = vmatpush3.bf16.msra.mxu1 %v15044_v49  ;;  %14287 = vmatprep.mubr.msk.bf16.mxu1 %vm9857_vm8, %v19241_v31  ;;  %v15048_v31 = vld [vmem:[%s19988_s5 + $0xe0] sm:$0xff]  }
 0x6ba   :  { %14281 = vmatprep.subr.bf16.mxu1 %v15045_v62 }
 0x6bd   :  { %14282 = vmatpush3.bf16.msra.mxu1 %v15045_v62 }
 0x6be   :  { %14283 = vmatprep.subr.bf16.mxu1 %v15046_v4 }
 0x6c1   :  { %14284 = vmatpush3.bf16.msra.mxu1 %v15046_v4 }
 0x6c2   :  { %14285 = vmatprep.subr.bf16.mxu1 %v15047_v17 }
 0x6c5   :  { %14286 = vmatpush3.bf16.msra.mxu1 %v15047_v17 }
 0x6c6   :  { %14291 = vmatprep.subr.bf16.mxu1 %v15048_v31 }
 0x6c8   :  { %14288 = vmatmul.mubr.msk.bf16.vlgmr.msra.gmra.mrb[80].mxu1 %vm9857_vm8, %v10453_v6  ;;  %v15091_v6 = vld [vmem:[%s19990_s7 + $0x6c] ss:$16 sps:$4 sm:$0xff]  }
 0x6c9   :  { %14292 = vmatpush3.bf16.msra.mxu1 %v15048_v31  ;;  %14299 = vmatprep.mubr.msk.bf16.mxu1 %vm9857_vm8, %v19243_v11  ;;  %v10561_v11 = vsel %vm19413_vm13, %v10549_v40, 0.0  ;;  %v15083_v31 = vld [vmem:[%s19990_s7 + $0x28] ss:$16 sps:$4 sm:$0xff]   ;;  %v15097_v40 = vld [vmem:[%s19990_s7 + $0xac] ss:$16 sps:$4 sm:$0xff]  }
 0x6ca   :  { %14293 = vmatprep.subr.bf16.mxu1 %v15049_v41  ;;  %v10563_v12 = vpack.c.bf16 %v10561_v11, %v19263_v0  ;;  %v15055_v0 = vld [vmem:[%s19988_s5 + $0x118] sm:$0xff]  }
 0x6cb   :  { %v15100_v11 = vld [vmem:[%s19990_s7 + $0xcc] ss:$16 sps:$4 sm:$0xff]  }
 0x6cd   :  { %14294 = vmatpush3.bf16.msra.mxu1 %v15049_v41  ;;  %v15089_v41 = vld [vmem:[%s19990_s7 + $0x68] ss:$16 sps:$4 sm:$0xff]  }
 0x6ce   :  { %14295 = vmatprep.subr.bf16.mxu1 %v15050_v46 }
 0x6d1   :  { %14296 = vmatpush3.bf16.msra.mxu1 %v15050_v46  ;;  %v15094_v46 = vld [vmem:[%s19990_s7 + $0x8c] ss:$16 sps:$4 sm:$0xff]  }
 0x6d2   :  { %14297 = vmatprep.subr.bf16.mxu1 %v15051_v53 }
 0x6d5   :  { %14298 = vmatpush3.bf16.msra.mxu1 %v15051_v53  ;;  %v15092_v53 = vld [vmem:[%s19990_s7 + $0x88] ss:$16 sps:$4 sm:$0xff]  }
 0x6d6   :  { %14303 = vmatprep.subr.bf16.mxu1 %v15052_v5 }
 0x6d8   :  { %14300 = vmatmul.mubr.msk.bf16.vlgmr.msra.gmra.mrb[80].mxu1 %vm9857_vm8, %v10563_v12  ;;  %v15098_v12 = vld [vmem:[%s19990_s7 + $0xc8] ss:$16 sps:$4 sm:$0xff]  }
 0x6d9   :  { %14304 = vmatpush3.bf16.msra.mxu1 %v15052_v5  ;;  %14311 = vmatprep.mubr.msk.bf16.mxu1 %vm9857_vm8, %v19248_v9  ;;  %v15058_v9 = vld [vmem:[%s19990_s7 + $0x4] ss:$16 sps:$4 sm:$0xff]   ;;  %v15095_v5 = vld [vmem:[%s19990_s7 + $0xa8] ss:$16 sps:$4 sm:$0xff]  }
 0x6da   :  { %14305 = vmatprep.subr.bf16.mxu1 %v15053_v14 }
 0x6dd   :  { %14306 = vmatpush3.bf16.msra.mxu1 %v15053_v14  ;;  %v15103_v14 = vld [vmem:[%s19990_s7 + $0xec] ss:$16 sps:$4 sm:$0xff]  }
 0x6de   :  { %14307 = vmatprep.subr.bf16.mxu1 %v15054_v50 }
 0x6e1   :  { %14308 = vmatpush3.bf16.msra.mxu1 %v15054_v50  ;;  %v15101_v50 = vld [vmem:[%s19990_s7 + $0xe8] ss:$16 sps:$4 sm:$0xff]  }
 0x6e2   :  { %14309 = vmatprep.subr.bf16.mxu1 %v15055_v0 }
 0x6e5   :  { %14310 = vmatpush3.bf16.msra.mxu1 %v15055_v0  ;;  %v15106_v0 = vld [vmem:[%s19992_s9 + $0x4] ss:$16 sps:$4 sm:$0xff]  }
 0x6e6   :  { %11023 = vmatprep.subr.bf16.mxu1 %v15058_v9  ;;  %v15109_v9 = vld [vmem:[%s19992_s9 + $0x24] ss:$16 sps:$4 sm:$0xff]  }
 0x6e8   :  { %14312 = vmatmul.mubr.msk.bf16.vlgmr.msra.gmra.mrb[80].mxu1 %vm9857_vm8, %v10677_v10  ;;  %v15115_v10 = vld [vmem:[%s19992_s9 + $0x64] ss:$16 sps:$4 sm:$0xff]  }
 0x6e9   :  { %11024 = vmatpush1.bf16.msra.mxu1 %v15056_v48  ;;  %11055 = vmatprep.mubr.bf16.mxu1 %v15405_v26  ;;  %v15110_v48 = vld [vmem:[%s19992_s9 + $0x40] ss:$16 sps:$4 sm:$0xff]  }
 0x6ea   :  { %11025 = vmatprep.subr.bf16.mxu1 %v15061_v25  ;;  %v15113_v25 = vld [vmem:[%s19992_s9 + $0x60] ss:$16 sps:$4 sm:$0xff]  }
 0x6ed   :  { %11026 = vmatpush1.bf16.msra.mxu1 %v15059_v47  ;;  %v15118_v47 = vld [vmem:[%s19992_s9 + $0xc] ss:$16 sps:$4 sm:$0xff]  }
 0x6ee   :  { %11027 = vmatprep.subr.bf16.mxu1 %v15064_v39  ;;  %v10841_v39 = vld [vmem:[%s19993_s8] sm:$0xf] }
 0x6f1   :  { %11028 = vmatpush1.bf16.msra.mxu1 %v15062_v30  ;;  %v19598_v30 = vsub.s32 0, %v21046_v19 }
 0x6f2   :  { %11029 = vmatprep.subr.bf16.mxu1 %v15067_v8  ;;  %v19604_v8 = vsub.s32 1, %v21046_v19 }
 0x6f5   :  { %11030 = vmatpush1.bf16.msra.mxu1 %v15065_v45  ;;  %v10846_v45 = vrot.slane %v10841_v39, %v19598_v30 }
 0x6f6   :  { %11031 = vmatprep.subr.bf16.mxu1 %v15070_v34  ;;  %v10850_v34 = vrot.slane %v10841_v39, %v19604_v8 }
 0x6f9   :  { %11032 = vmatpush1.bf16.msra.mxu1 %v15068_v54 }
 0x6fa   :  { %11033 = vmatprep.subr.bf16.mxu1 %v15073_v22 }
 0x6fd   :  { %11034 = vmatpush1.bf16.msra.mxu1 %v15071_v56 }
 0x6fe   :  { %11035 = vmatprep.subr.bf16.mxu1 %v15076_v58 }
 0x701   :  { %11036 = vmatpush1.bf16.msra.mxu1 %v15074_v28 }
 0x702   :  { %11037 = vmatprep.subr.bf16.mxu1 %v15079_v27 }
 0x705   :  { %11038 = vmatpush1.bf16.msra.mxu1 %v15077_v59 }
 0x706   :  { %11064 = vmatprep.subr.bf16.mxu1 %v15082_v44 }
 0x7bb   :  { %v14313_v1 = vpop.f32.mrb[80].mxu1 }
 0x7bc   :  { %v10779_v61 = vadd.f32 %v14313_v1, %v12852_v38  ;;  %v10751_v32 = vpop.f32.mrb[81].mxu1 }
 0x7bd   :  { %v10777_v35 = vadd.f32 %v12852_v38, %v10751_v32  ;;  %v14314_v51 = vpop.f32.mrb[82].mxu1 }
 0x7be   :  { %v10783_v20 = vmax.f32 %v10779_v61, 0.0  ;;  %v10780_v3 = vadd.f32 %v14314_v51, %v12852_v38  ;;  %v10754_v24 = vpop.f32.mrb[83].mxu1 }
 0x7bf   :  { %v10781_v15 = vmax.f32 %v10777_v35, 0.0  ;;  %v10778_v63 = vadd.f32 %v12852_v38, %v10754_v24 }
 0x7c0   :  { %10787 = vst [vmem:[#allocation4 + $0x10] sm:$0xff] %v10783_v20  ;;  %v10784_v7 = vmax.f32 %v10780_v3, 0.0  ;;  %v19609_v20 = vsub.s32 2, %v21046_v19  ;;  %v19612_v3 = vsub.s32 3, %v21046_v19 }
 0x7c1   :  { %10785 = vst [vmem:[#allocation4] sm:$0xff] %v10781_v15  ;;  %v10782_v52 = vmax.f32 %v10778_v63, 0.0 }
 0x7c2   :  { %10788 = vst [vmem:[#allocation4 + $0x18] sm:$0xff] %v10784_v7  ;;  %v10854_v24 = vrot.slane %v10841_v39, %v19609_v20  ;;  %v10858_v15 = vrot.slane %v10841_v39, %v19612_v3 }
 0x7c3   :  { %10786 = vst [vmem:[#allocation4 + $0x8] sm:$0xff] %v10782_v52 }
 0x7c9   :  { %v10790_v33 = vld [vmem:[#allocation4 + $0x10] ss:$2 sm:$0xff]  ;;  %v10792_v2 = vld [vmem:[#allocation4 + $0x11] ss:$2 sm:$0xff] }
 0x7ca   :  { %v10789_v37 = vld [vmem:[#allocation4] ss:$2 sm:$0xff]  ;;  %v10791_v43 = vld [vmem:[#allocation4 + $0x1] ss:$2 sm:$0xff]  ;;  %v10794_v49 = vmax.f32 %v10790_v33, %v10792_v2 }
 0x7cb   :  { %v10793_v16 = vmax.f32 %v10789_v37, %v10791_v43 }
 0x7cc   :  { %v10802_v55 = vrot.slane %v10794_v49, 2 }
 0x7cd   :  { %v10796_v23 = vrot.slane %v10793_v16, 2 }
 0x7ce   :  { %v10804_v62 = vmax.f32 %v10794_v49, %v10802_v55 }
 0x7cf   :  { %v10798_v4 = vmax.f32 %v10793_v16, %v10796_v23 }
 0x7d0   :  { %10805 = vst [vmem:[#allocation5 + $0x4] sm:$0x3] %v10804_v62  ;;  %10806 = vst [vmem:[#allocation5 + $0x2] sm:$0x30] %v10804_v62 }
 0x7d1   :  { %10799 = vst [vmem:[#allocation5] sm:$0x3] %v10798_v4  ;;  %10800 = vst [vmem:[#allocation5 - $0x2] sm:$0x30] %v10798_v4 }
 0x7d8   :  { %v10807_v21 = vld [vmem:[#allocation5] sm:$0xff] }
 0x7d9   :  { %v10808_v17 = vpack.c.bf16 %v10807_v21, %v10807_v21 }
 0x7db   :  { %11056 = vmatmul.mubr.bf16.vlgmr.msra.gmra.mrb[84].mxu1 %v10808_v17 }
 0x7dc   :  { %11065 = vmatpush1.bf16.msra.mxu1 %v15080_v18  ;;  %11096 = vmatprep.mubr.bf16.mxu1 %v15405_v26  ;;  %v15116_v18 = vld [vmem:[%s19992_s9 + $0x8] ss:$16 sps:$4 sm:$0xff]  }
 0x7dd   :  { %11066 = vmatprep.subr.bf16.mxu1 %v15085_v42 }
 0x7e0   :  { %11067 = vmatpush1.bf16.msra.mxu1 %v15083_v31  ;;  %v15121_v31 = vld [vmem:[%s19992_s9 + $0x2c] ss:$16 sps:$4 sm:$0xff]  }
 0x7e1   :  { %11068 = vmatprep.subr.bf16.mxu1 %v15088_v57  ;;  %v15119_v57 = vld [vmem:[%s19992_s9 + $0x28] ss:$16 sps:$4 sm:$0xff]  }
 0x7e4   :  { %11069 = vmatpush1.bf16.msra.mxu1 %v15086_v13  ;;  %v15124_v13 = vld [vmem:[%s19992_s9 + $0x4c] ss:$16 sps:$4 sm:$0xff]  }
 0x7e5   :  { %11070 = vmatprep.subr.bf16.mxu1 %v15091_v6 }
 0x7e8   :  { %11071 = vmatpush1.bf16.msra.mxu1 %v15089_v41 }
 0x7e9   :  { %11072 = vmatprep.subr.bf16.mxu1 %v15094_v46  ;;  %v15122_v46 = vld [vmem:[%s19992_s9 + $0x48] ss:$16 sps:$4 sm:$0xff]  }
 0x7ec   :  { %11073 = vmatpush1.bf16.msra.mxu1 %v15092_v53 }
 0x7ed   :  { %11074 = vmatprep.subr.bf16.mxu1 %v15097_v40  ;;  %v15127_v40 = vld [vmem:[%s19992_s9 + $0x6c] ss:$16 sps:$4 sm:$0xff]  }
 0x7f0   :  { %11075 = vmatpush1.bf16.msra.mxu1 %v15095_v5  ;;  %v15125_v5 = vld [vmem:[%s19992_s9 + $0x68] ss:$16 sps:$4 sm:$0xff]  }
 0x7f1   :  { %11076 = vmatprep.subr.bf16.mxu1 %v15100_v11  ;;  %v15128_v11 = vld [vmem:[%s19994_s11] ss:$16 sps:$4 sm:$0xff]  }
 0x7f4   :  { %11077 = vmatpush1.bf16.msra.mxu1 %v15098_v12  ;;  %v15130_v12 = vld [vmem:[%s19994_s11 + $0x4] ss:$16 sps:$4 sm:$0xff]  }
 0x7f5   :  { %11078 = vmatprep.subr.bf16.mxu1 %v15103_v14  ;;  %v15131_v14 = vld [vmem:[%s19994_s11 + $0x20] ss:$16 sps:$4 sm:$0xff]  }
 0x7f8   :  { %11079 = vmatpush1.bf16.msra.mxu1 %v15101_v50  ;;  %v15133_v50 = vld [vmem:[%s19994_s11 + $0x24] ss:$16 sps:$4 sm:$0xff]  }
 0x7f9   :  { %11298 = vmatprep.subr.bf16.mxu1 %v15106_v0  ;;  %v15136_v0 = vld [vmem:[%s19994_s11 + $0xc] ss:$16 sps:$4 sm:$0xff]  }
 0x7fb   :  { %11097 = vmatmul.mubr.bf16.vlgmr.msra.gmra.mrb[88].mxu1 %v10808_v17 }
 0x7fc   :  { %11330 = vmatprep.mubr.bf16.mxu1 %v15405_v26  ;;  %11299 = vmatpush1.bf16.msra.mxu1 %v15104_v36  ;;  %v11190_v36 = vld [vmem:[%s19995_s10] sm:$0xf] }
 0x7fd   :  { %11300 = vmatprep.subr.bf16.mxu1 %v15109_v9  ;;  %v11195_v9 = vrot.slane %v11190_v36, %v19598_v30 }
 0x800   :  { %11301 = vmatpush1.bf16.msra.mxu1 %v15107_v29  ;;  %v11199_v29 = vrot.slane %v11190_v36, %v19604_v8 }
 0x801   :  { %11302 = vmatprep.subr.bf16.mxu1 %v15112_v60 }
 0x804   :  { %11303 = vmatpush1.bf16.msra.mxu1 %v15110_v48 }
 0x805   :  { %11304 = vmatprep.subr.bf16.mxu1 %v15115_v10 }
 0x808   :  { %11305 = vmatpush1.bf16.msra.mxu1 %v15113_v25 }
 0x809   :  { %11351 = vmatprep.subr.bf16.mxu1 %v15118_v47 }
 0x8ae   :  { %v11057_v54 = vpop.f32.mrb[84].mxu1 }
 0x8af   :  { %v11058_v22 = vadd.f32 %v11057_v54, %v10846_v45  ;;  %v11059_v56 = vpop.f32.mrb[85].mxu1 }
 0x8b0   :  { %v11060_v58 = vadd.f32 %v11059_v56, %v10850_v34  ;;  %v11061_v28 = vpop.f32.mrb[86].mxu1 }
 0x8b1   :  { %v11105_v27 = vmax.f32 %v11058_v22, 0.0  ;;  %v11062_v59 = vpop.f32.mrb[87].mxu1 }
 0x8b2   :  { %v11106_v44 = vmax.f32 %v11060_v58, 0.0 }
 0x8b3   :  { %11109 = vst [vmem:[#allocation6] ss:$2 sm:$0x3] %v11105_v27  ;;  %v11117_v38 = vrot.slane %v11105_v27, 2  ;;  %v11136_v1 = vrot.slane %v11105_v27, 4  ;;  %v11152_v61 = vrot.slane %v11105_v27, 6 }
 0x8b4   :  { %11111 = vst [vmem:[#allocation6 + $0x1] ss:$2 sm:$0x3] %v11106_v44  ;;  %v11122_v32 = vrot.slane %v11106_v44, 2  ;;  %v11140_v35 = vrot.slane %v11106_v44, 4  ;;  %v11156_v51 = vrot.slane %v11106_v44, 6 }
 0x8b5   :  { %11120 = vst [vmem:[#allocation6 + $0x8] ss:$2 sm:$0x3] %v11117_v38  ;;  %11139 = vst [vmem:[#allocation6 + $0x10] ss:$2 sm:$0x3] %v11136_v1 }
 0x8b6   :  { %11155 = vst [vmem:[#allocation6 + $0x18] ss:$2 sm:$0x3] %v11152_v61  ;;  %11125 = vst [vmem:[#allocation6 + $0x9] ss:$2 sm:$0x3] %v11122_v32 }
 0x8b7   :  { %11143 = vst [vmem:[#allocation6 + $0x11] ss:$2 sm:$0x3] %v11140_v35  ;;  %11159 = vst [vmem:[#allocation6 + $0x19] ss:$2 sm:$0x3] %v11156_v51 }
 0x8ce   :  { %v11098_v63 = vpop.f32.mrb[88].mxu1 }
 0x8cf   :  { %v11099_v7 = vadd.f32 %v11098_v63, %v10854_v24  ;;  %v11100_v52 = vpop.f32.mrb[89].mxu1 }
 0x8d0   :  { %v11101_v33 = vadd.f32 %v11100_v52, %v10858_v15  ;;  %v11102_v2 = vpop.f32.mrb[90].mxu1 }
 0x8d1   :  { %v11107_v37 = vmax.f32 %v11099_v7, 0.0  ;;  %v11103_v43 = vpop.f32.mrb[91].mxu1  ;;  %v11203_v2 = vrot.slane %v11190_v36, %v19609_v20 }
 0x8d2   :  { %v11108_v49 = vmax.f32 %v11101_v33, 0.0 }
 0x8d3   :  { %11113 = vst [vmem:[#allocation6 + $0x4] ss:$2 sm:$0x3] %v11107_v37  ;;  %v11127_v16 = vrot.slane %v11107_v37, 2  ;;  %v11144_v55 = vrot.slane %v11107_v37, 4  ;;  %v11160_v23 = vrot.slane %v11107_v37, 6 }
 0x8d4   :  { %11115 = vst [vmem:[#allocation6 + $0x5] ss:$2 sm:$0x3] %v11108_v49  ;;  %v11132_v62 = vrot.slane %v11108_v49, 2  ;;  %v11148_v19 = vrot.slane %v11108_v49, 4  ;;  %v11164_v4 = vrot.slane %v11108_v49, 6  ;;  %v11207_v49 = vrot.slane %v11190_v36, %v19612_v3 }
 0x8d5   :  { %11130 = vst [vmem:[#allocation6 + $0xc] ss:$2 sm:$0x3] %v11127_v16  ;;  %11147 = vst [vmem:[#allocation6 + $0x14] ss:$2 sm:$0x3] %v11144_v55 }
 0x8d6   :  { %11163 = vst [vmem:[#allocation6 + $0x1c] ss:$2 sm:$0x3] %v11160_v23  ;;  %11135 = vst [vmem:[#allocation6 + $0xd] ss:$2 sm:$0x3] %v11132_v62 }
 0x8d7   :  { %11151 = vst [vmem:[#allocation6 + $0x15] ss:$2 sm:$0x3] %v11148_v19  ;;  %11167 = vst [vmem:[#allocation6 + $0x1d] ss:$2 sm:$0x3] %v11164_v4 }
 0x8db   :  { %v11168_v21 = vld [vmem:[#allocation6] sm:$0xff] }
 0x8dd   :  { %v11169_v17 = vld [vmem:[#allocation6 + $0x8] sm:$0xff] }
 0x8de   :  { %v11172_v42 = vpack.c.bf16 %v11169_v17, %v11168_v21  ;;  %v11170_v6 = vld [vmem:[#allocation6 + $0x10] sm:$0xff]  ;;  %v11171_v41 = vld [vmem:[#allocation6 + $0x18] sm:$0xff] }
 0x8df   :  { %v11173_v53 = vpack.c.bf16 %v11171_v41, %v11170_v6 }
 0x8e0   :  { %12901 = vmatmul.mubr.msk.bf16.vlgmr.msra.gmra.mrb[92].mxu1 %vm9857_vm8, %v11172_v42 }
 0x8e1   :  { %11352 = vmatpush1.bf16.msra.mxu1 %v15116_v18  ;;  %11340 = vmatprep.mubr.bf16.mxu1 %v15405_v26 }
 0x8e2   :  { %11353 = vmatprep.subr.bf16.mxu1 %v15121_v31 }
 0x8e5   :  { %11354 = vmatpush1.bf16.msra.mxu1 %v15119_v57 }
 0x8e6   :  { %11355 = vmatprep.subr.bf16.mxu1 %v15124_v13 }
 0x8e8   :  { %12902 = vmatmul.mubr.msk.bf16.gmra.mrb[96].mxu1 %vm9857_vm8, %v11173_v53 }
 0x8e9   :  { %11356 = vmatpush1.bf16.msra.mxu1 %v15122_v46  ;;  %11383 = vmatprep.mubr.bf16.mxu1 %v15405_v26 }
 0x8ea   :  { %11357 = vmatprep.subr.bf16.mxu1 %v15127_v40 }
 0x8ed   :  { %11358 = vmatpush1.bf16.msra.mxu1 %v15125_v5 }
 0x8ee   :  { %11649 = vmatprep.subr.bf16.mxu1 %v15130_v12 }
 0x8f0   :  { %12903 = vmatmul.mubr.msk.bf16.vlgmr.msra.gmra.mrb[100].mxu1 %vm9857_vm8, %v11172_v42 }
 0x8f1   :  { %11393 = vmatprep.mubr.bf16.mxu1 %v15405_v26  ;;  %11650 = vmatpush1.bf16.msra.mxu1 %v15128_v11 }
 0x8f2   :  { %11651 = vmatprep.subr.bf16.mxu1 %v15133_v50 }
 0x8f5   :  { %11652 = vmatpush1.bf16.msra.mxu1 %v15131_v14 }
 0x8f6   :  { %11762 = vmatprep.subr.bf16.mxu1 %v15136_v0 }
 0x8f8   :  { %12904 = vmatmul.mubr.msk.bf16.gmra.mrb[104].mxu1 %vm9857_vm8, %v11173_v53  ;;  %vm21078_vm8 = vcmask 261120  }
 0x8f9   :  { %11681 = vmatprep.mubr.bf16.mxu1 %v15405_v26  ;;  %vm21079_vm0 = vmmov %vm21078_vm8 }
 0x8fa   :  { %vm21080_vm3 = vmmov %vm21079_vm0 }
 0x8fb   :  { %vm21081_vm12 = vmmov %vm21079_vm0 }
 0x8fc   :  { %vm21082_vm9 = vmmov %vm21079_vm0 }
 0x8fd   :  { %vm21083_vm6 = vmmov %vm21079_vm0 }
 0x8fe   :  { %vm21084_vm2 = vmmov %vm21079_vm0 }
 0x8ff   :  { %vm21085_vm5 = vmmov %vm21079_vm0 }
 0x900   :  { %vm21086_vm14 = vmmov %vm21079_vm0 }
 0x901   :  { %vm21087_vm10 = vmmov %vm21079_vm0 }
 0x902   :  { %vm21088_vm1 = vmmov %vm21079_vm0 }
 0x903   :  { %vm21089_vm4 = vmmov %vm21079_vm0 }
 0x904   :  { %vm21090_vm11 = vmmov %vm21079_vm0 }
 0x905   :  { %vm21091_vm13 = vmmov %vm21079_vm0 }
 0x906   :  { %vm21092_vm15 = vmmov %vm21079_vm0 }
 0x907   :  { %vm21093_vm7 = vmmov %vm21079_vm0 }
 0x9b3   :  { %v11332_v60 = vpop.f32.mrb[92].mxu1 }
 0x9b4   :  { %v11333_v48 = vadd.f32 %v11332_v60, %v11195_v9  ;;  %v11334_v10 = vpop.f32.mrb[93].mxu1 }
 0x9b5   :  { %v11335_v25 = vadd.f32 %v11334_v10, %v11199_v29  ;;  %v11336_v47 = vpop.f32.mrb[94].mxu1 }
 0x9b6   :  { %v11404_v39 = vmax.f32 %v11333_v48, 0.0  ;;  %v11337_v45 = vadd.f32 %v11336_v47, %v11195_v9  ;;  %v11338_v34 = vpop.f32.mrb[95].mxu1 }
 0x9b7   :  { %v11405_v54 = vmax.f32 %v11335_v25, 0.0  ;;  %v11339_v22 = vadd.f32 %v11338_v34, %v11199_v29  ;;  %v15134_v25 = vld [vmem:[%s19994_s11 + $0x8] ss:$16 sps:$4 sm:$0xff]  }
 0x9b8   :  { %11420 = vst [vmem:[#allocation7] ss:$2 sm:$0xf] %v11404_v39  ;;  %v11428_v56 = vrot.slane %v11404_v39, 4  ;;  %v11408_v58 = vmax.f32 %v11337_v45, 0.0 }
 0x9b9   :  { %11422 = vst [vmem:[#allocation7 + $0x1] ss:$2 sm:$0xf] %v11405_v54  ;;  %v11433_v28 = vrot.slane %v11405_v54, 4  ;;  %v11409_v27 = vmax.f32 %v11339_v22, 0.0 }
 0x9ba   :  { %11431 = vst [vmem:[#allocation7 + $0x10] ss:$2 sm:$0xf] %v11428_v56  ;;  %11448 = vst [vmem:[#allocation7 + $0x20] ss:$2 sm:$0xf] %v11408_v58 }
 0x9bb   :  { %v11456_v59 = vrot.slane %v11408_v58, 4  ;;  %11436 = vst [vmem:[#allocation7 + $0x11] ss:$2 sm:$0xf] %v11433_v28  ;;  %v11461_v44 = vrot.slane %v11409_v27, 4  ;;  %v11342_v38 = vpop.f32.mrb[96].mxu1 }
 0x9bc   :  { %11450 = vst [vmem:[#allocation7 + $0x21] ss:$2 sm:$0xf] %v11409_v27  ;;  %v11343_v1 = vadd.f32 %v11342_v38, %v11195_v9  ;;  %v11344_v61 = vpop.f32.mrb[97].mxu1  ;;  %v15139_v22 = vld [vmem:[%s19994_s11 + $0x2c] ss:$16 sps:$4 sm:$0xff]  }
 0x9bd   :  { %11459 = vst [vmem:[#allocation7 + $0x30] ss:$2 sm:$0xf] %v11456_v59  ;;  %11464 = vst [vmem:[#allocation7 + $0x31] ss:$2 sm:$0xf] %v11461_v44  ;;  %v11345_v32 = vadd.f32 %v11344_v61, %v11199_v29 }
 0x9be   :  { %v11346_v35 = vpop.f32.mrb[98].mxu1  ;;  %v11412_v51 = vmax.f32 %v11343_v1, 0.0  ;;  %v15137_v28 = vld [vmem:[%s19994_s11 + $0x28] ss:$16 sps:$4 sm:$0xff]  }
 0x9bf   :  { %v11347_v24 = vadd.f32 %v11346_v35, %v11195_v9  ;;  %v11348_v15 = vpop.f32.mrb[99].mxu1  ;;  %v11413_v63 = vmax.f32 %v11345_v32, 0.0 }
 0x9c0   :  { %v11349_v7 = vadd.f32 %v11348_v15, %v11199_v29  ;;  %11476 = vst [vmem:[#allocation7 + $0x40] ss:$2 sm:$0xf] %v11412_v51  ;;  %v11484_v52 = vrot.slane %v11412_v51, 4  ;;  %v11531_v47 = vld [vmem:[#allocation7] sm:$0xff] }
 0x9c1   :  { %v11416_v33 = vmax.f32 %v11347_v24, 0.0  ;;  %11478 = vst [vmem:[#allocation7 + $0x41] ss:$2 sm:$0xf] %v11413_v63  ;;  %v11489_v37 = vrot.slane %v11413_v63, 4 }
 0x9c2   :  { %v11417_v43 = vmax.f32 %v11349_v7, 0.0  ;;  %11487 = vst [vmem:[#allocation7 + $0x50] ss:$2 sm:$0xf] %v11484_v52  ;;  %v11533_v59 = vld [vmem:[#allocation7 + $0x10] sm:$0xff] }
 0x9c3   :  { %11504 = vst [vmem:[#allocation7 + $0x60] ss:$2 sm:$0xf] %v11416_v33  ;;  %v11512_v16 = vrot.slane %v11416_v33, 4  ;;  %v11385_v23 = vpop.f32.mrb[100].mxu1  ;;  %v11535_v1 = vld [vmem:[#allocation7 + $0x20] sm:$0xff] }
 0x9c4   :  { %11492 = vst [vmem:[#allocation7 + $0x51] ss:$2 sm:$0xf] %v11489_v37  ;;  %11506 = vst [vmem:[#allocation7 + $0x61] ss:$2 sm:$0xf] %v11417_v43  ;;  %v11386_v62 = vadd.f32 %v11385_v23, %v11203_v2 }
 0x9c5   :  { %v11517_v55 = vrot.slane %v11417_v43, 4  ;;  %11515 = vst [vmem:[#allocation7 + $0x70] ss:$2 sm:$0xf] %v11512_v16  ;;  %v11387_v19 = vpop.f32.mrb[101].mxu1  ;;  %v11537_v35 = vld [vmem:[#allocation7 + $0x30] sm:$0xff] }
 0x9c6   :  { %v11388_v4 = vadd.f32 %v11387_v19, %v11207_v49  ;;  %v11389_v18 = vpop.f32.mrb[102].mxu1  ;;  %v11406_v21 = vmax.f32 %v11386_v62, 0.0  ;;  %v19710_v23 = vld [vmem:[%s19996_s12] sm:$0xf] }
 0x9c7   :  { %11520 = vst [vmem:[#allocation7 + $0x71] ss:$2 sm:$0xf] %v11517_v55  ;;  %v11390_v17 = vadd.f32 %v11389_v18, %v11203_v2  ;;  %v11391_v42 = vpop.f32.mrb[103].mxu1  ;;  %v19714_v62 = vrot.slane %v19710_v23, %v19598_v30  ;;  %v19718_v19 = vrot.slane %v19710_v23, %v19604_v8 }
 0x9c8   :  { %v11407_v31 = vmax.f32 %v11388_v4, 0.0  ;;  %v11392_v57 = vadd.f32 %v11391_v42, %v11207_v49  ;;  %11424 = vst [vmem:[#allocation7 + $0x8] ss:$2 sm:$0xf] %v11406_v21  ;;  %v11438_v13 = vrot.slane %v11406_v21, 4  ;;  %v11539_v15 = vld [vmem:[#allocation7 + $0x40] sm:$0xff] }
 0x9c9   :  { %v11410_v6 = vmax.f32 %v11390_v17, 0.0 }
 0x9ca   :  { %11426 = vst [vmem:[#allocation7 + $0x9] ss:$2 sm:$0xf] %v11407_v31  ;;  %v11443_v41 = vrot.slane %v11407_v31, 4  ;;  %v11411_v46 = vmax.f32 %v11392_v57, 0.0 }
 0x9cb   :  { %11441 = vst [vmem:[#allocation7 + $0x18] ss:$2 sm:$0xf] %v11438_v13  ;;  %11452 = vst [vmem:[#allocation7 + $0x28] ss:$2 sm:$0xf] %v11410_v6 }
 0x9cc   :  { %v11466_v53 = vrot.slane %v11410_v6, 4  ;;  %11446 = vst [vmem:[#allocation7 + $0x19] ss:$2 sm:$0xf] %v11443_v41  ;;  %v11471_v40 = vrot.slane %v11411_v46, 4  ;;  %v11395_v5 = vpop.f32.mrb[104].mxu1 }
 0x9cd   :  { %11454 = vst [vmem:[#allocation7 + $0x29] ss:$2 sm:$0xf] %v11411_v46  ;;  %v11396_v11 = vadd.f32 %v11395_v5, %v11203_v2  ;;  %v11397_v12 = vpop.f32.mrb[105].mxu1  ;;  %v11541_v52 = vld [vmem:[#allocation7 + $0x50] sm:$0xff]  ;;  %v11543_v37 = vld [vmem:[#allocation7 + $0x60] sm:$0xff] }
 0x9ce   :  { %11469 = vst [vmem:[#allocation7 + $0x38] ss:$2 sm:$0xf] %v11466_v53  ;;  %11474 = vst [vmem:[#allocation7 + $0x39] ss:$2 sm:$0xf] %v11471_v40  ;;  %v11398_v14 = vadd.f32 %v11397_v12, %v11207_v49 }
 0x9cf   :  { %v11399_v50 = vpop.f32.mrb[106].mxu1  ;;  %v11414_v0 = vmax.f32 %v11396_v11, 0.0  ;;  %v11545_v16 = vld [vmem:[#allocation7 + $0x70] sm:$0xff] }
 0x9d0   :  { %v11400_v36 = vadd.f32 %v11399_v50, %v11203_v2  ;;  %v11401_v9 = vpop.f32.mrb[107].mxu1  ;;  %v11415_v29 = vmax.f32 %v11398_v14, 0.0 }
 0x9d1   :  { %v11402_v60 = vadd.f32 %v11401_v9, %v11207_v49  ;;  %11480 = vst [vmem:[#allocation7 + $0x48] ss:$2 sm:$0xf] %v11414_v0  ;;  %v11494_v48 = vrot.slane %v11414_v0, 4  ;;  %v11532_v39 = vld [vmem:[#allocation7 + $0x8] sm:$0xff] }
 0x9d2   :  { %v11418_v10 = vmax.f32 %v11400_v36, 0.0  ;;  %11482 = vst [vmem:[#allocation7 + $0x49] ss:$2 sm:$0xf] %v11415_v29  ;;  %v11499_v45 = vrot.slane %v11415_v29, 4  ;;  %v11547_v54 = vpack.c.bf16 %v11532_v39, %v11531_v47 }
 0x9d3   :  { %v11419_v34 = vmax.f32 %v11402_v60, 0.0  ;;  %11497 = vst [vmem:[#allocation7 + $0x58] ss:$2 sm:$0xf] %v11494_v48  ;;  %v11534_v27 = vld [vmem:[#allocation7 + $0x18] sm:$0xff] }
 0x9d4   :  { %11508 = vst [vmem:[#allocation7 + $0x68] ss:$2 sm:$0xf] %v11418_v10  ;;  %v11522_v56 = vrot.slane %v11418_v10, 4  ;;  %12913 = vmatmul.mubr.msk.bf16.vlgmr.msra.gmra.mrb[108].mxu1 %vm21078_vm8, %v11547_v54  ;;  %v11548_v44 = vpack.c.bf16 %v11534_v27, %v11533_v59  ;;  %v11536_v38 = vld [vmem:[#allocation7 + $0x28] sm:$0xff] }
 0x9d5   :  { %11502 = vst [vmem:[#allocation7 + $0x59] ss:$2 sm:$0xf] %v11499_v45  ;;  %11510 = vst [vmem:[#allocation7 + $0x69] ss:$2 sm:$0xf] %v11419_v34  ;;  %11763 = vmatpush1.bf16.msra.mxu1 %v15134_v25  ;;  %11691 = vmatprep.mubr.bf16.mxu1 %v15405_v26  ;;  %v11549_v61 = vpack.c.bf16 %v11536_v38, %v11535_v1 }
 0x9d6   :  { %v11527_v58 = vrot.slane %v11419_v34, 4  ;;  %11525 = vst [vmem:[#allocation7 + $0x78] ss:$2 sm:$0xf] %v11522_v56  ;;  %11764 = vmatprep.subr.bf16.mxu1 %v15139_v22  ;;  %v11538_v32 = vld [vmem:[#allocation7 + $0x38] sm:$0xff] }
 0x9d7   :  { %v11550_v51 = vpack.c.bf16 %v11538_v32, %v11537_v35 }
 0x9d8   :  { %11530 = vst [vmem:[#allocation7 + $0x79] ss:$2 sm:$0xf] %v11527_v58 }
 0x9d9   :  { %11765 = vmatpush1.bf16.msra.mxu1 %v15137_v28  ;;  %v11540_v24 = vld [vmem:[#allocation7 + $0x48] sm:$0xff] }
 0x9da   :  { %v11551_v63 = vpack.c.bf16 %v11540_v24, %v11539_v15 }
 0x9dc   :  { %12914 = vmatmul.mubr.msk.bf16.gmra.mrb[112].mxu1 %vm21079_vm0, %v11548_v44  ;;  %v11542_v7 = vld [vmem:[#allocation7 + $0x58] sm:$0xff]  ;;  %v11544_v2 = vld [vmem:[#allocation7 + $0x68] sm:$0xff] }
 0x9dd   :  { %11701 = vmatprep.mubr.bf16.mxu1 %v15405_v26  ;;  %v11552_v33 = vpack.c.bf16 %v11542_v7, %v11541_v52  ;;  %v11553_v43 = vpack.c.bf16 %v11544_v2, %v11543_v37 }
 0x9df   :  { %v11546_v49 = vld [vmem:[#allocation7 + $0x78] sm:$0xff] }
 0x9e0   :  { %v11554_v55 = vpack.c.bf16 %v11546_v49, %v11545_v16 }
 0x9e4   :  { %12915 = vmatmul.mubr.msk.bf16.gmra.mrb[116].mxu1 %vm21080_vm3, %v11549_v61 }
 0x9e5   :  { %11711 = vmatprep.mubr.bf16.mxu1 %v15405_v26 }
 0x9ec   :  { %12916 = vmatmul.mubr.msk.bf16.gmra.mrb[120].mxu1 %vm21081_vm12, %v11550_v51 }
 0x9ed   :  { %11721 = vmatprep.mubr.bf16.mxu1 %v15405_v26 }
 0x9f4   :  { %12917 = vmatmul.mubr.msk.bf16.gmra.mrb[124].mxu1 %vm21082_vm9, %v11551_v63 }
 0x9f5   :  { %11731 = vmatprep.mubr.bf16.mxu1 %v15405_v26 }
 0x9fc   :  { %12918 = vmatmul.mubr.msk.bf16.gmra.mrb[128].mxu1 %vm21083_vm6, %v11552_v33 }
 0x9fd   :  { %11741 = vmatprep.mubr.bf16.mxu1 %v15405_v26 }
 0xa04   :  { %12919 = vmatmul.mubr.msk.bf16.gmra.mrb[132].mxu1 %vm21084_vm2, %v11553_v43 }
 0xa05   :  { %11751 = vmatprep.mubr.bf16.mxu1 %v15405_v26 }
 0xa0c   :  { %12920 = vmatmul.mubr.msk.bf16.gmra.mrb[136].mxu1 %vm21085_vm5, %v11554_v55 }
 0xa0d   :  { %11794 = vmatprep.mubr.bf16.mxu1 %v15405_v26 }
 0xa14   :  { %12921 = vmatmul.mubr.msk.bf16.vlgmr.msra.gmra.mrb[140].mxu1 %vm21086_vm14, %v11547_v54 }
 0xa15   :  { %11804 = vmatprep.mubr.bf16.mxu1 %v15405_v26 }
 0xa1c   :  { %12922 = vmatmul.mubr.msk.bf16.gmra.mrb[144].mxu1 %vm21087_vm10, %v11548_v44 }
 0xa1d   :  { %11814 = vmatprep.mubr.bf16.mxu1 %v15405_v26 }
 0xa24   :  { %12923 = vmatmul.mubr.msk.bf16.gmra.mrb[148].mxu1 %vm21088_vm1, %v11549_v61 }
 0xa25   :  { %11824 = vmatprep.mubr.bf16.mxu1 %v15405_v26 }
 0xa2c   :  { %12924 = vmatmul.mubr.msk.bf16.gmra.mrb[152].mxu1 %vm21089_vm4, %v11550_v51 }
 0xa2d   :  { %11834 = vmatprep.mubr.bf16.mxu1 %v15405_v26 }
 0xa34   :  { %12925 = vmatmul.mubr.msk.bf16.gmra.mrb[156].mxu1 %vm21090_vm11, %v11551_v63 }
 0xa35   :  { %11844 = vmatprep.mubr.bf16.mxu1 %v15405_v26 }
 0xa3c   :  { %12926 = vmatmul.mubr.msk.bf16.gmra.mrb[160].mxu1 %vm21091_vm13, %v11552_v33 }
 0xa3d   :  { %11854 = vmatprep.mubr.bf16.mxu1 %v15405_v26 }
 0xa44   :  { %12927 = vmatmul.mubr.msk.bf16.gmra.mrb[164].mxu1 %vm21092_vm15, %v11553_v43 }
 0xa45   :  { %11864 = vmatprep.mubr.bf16.mxu1 %v15405_v26 }
 0xa4c   :  { %12928 = vmatmul.mubr.msk.bf16.gmra.mrb[168].mxu1 %vm21093_vm7, %v11554_v55 }
 0xaa7   :  { %v11683_v4 = vpop.f32.mrb[108].mxu1 }
 0xaa8   :  { %v11684_v18 = vadd.f32 %v11683_v4, %v19714_v62  ;;  %v11685_v21 = vpop.f32.mrb[109].mxu1 }
 0xaa9   :  { %v11686_v26 = vadd.f32 %v11685_v21, %v19718_v19  ;;  %v11687_v17 = vpop.f32.mrb[110].mxu1 }
 0xaaa   :  { %v11875_v42 = vsub.f32 0.0, %v11684_v18  ;;  %v11688_v31 = vadd.f32 %v11687_v17, %v19714_v62  ;;  %v11689_v57 = vpop.f32.mrb[111].mxu1 }
 0xaab   :  { %v11876_v13 = vsub.f32 0.0, %v11686_v26  ;;  %v11690_v6 = vadd.f32 %v11689_v57, %v19718_v19 }
 0xaac   :  { %v11939_v30 = vmul.f32 1.442695, %v11875_v42  ;;  %v11879_v41 = vsub.f32 0.0, %v11688_v31 }
 0xaad   :  { %v11941_v46 = vmul.f32 1.442695, %v11876_v13  ;;  %v11880_v53 = vsub.f32 0.0, %v11690_v6 }
 0xaae   :  { %15140 = vpow2.f32 %v11939_v30  ;;  %v11947_v8 = vmul.f32 1.442695, %v11879_v41 }
 0xaaf   :  { %15142 = vpow2.f32 %v11941_v46  ;;  %v11949_v40 = vmul.f32 1.442695, %v11880_v53  ;;  %v11693_v5 = vpop.f32.mrb[112].mxu1 }
 0xab0   :  { %15144 = vpow2.f32 %v11947_v8  ;;  %v11694_v11 = vadd.f32 %v11693_v5, %v19714_v62  ;;  %v11695_v12 = vpop.f32.mrb[113].mxu1 }
 0xab1   :  { %15146 = vpow2.f32 %v11949_v40  ;;  %v11696_v14 = vadd.f32 %v11695_v12, %v19718_v19  ;;  %v11697_v50 = vpop.f32.mrb[114].mxu1 }
 0xab2   :  { %v11883_v0 = vsub.f32 0.0, %v11694_v11  ;;  %v11698_v36 = vadd.f32 %v11697_v50, %v19714_v62  ;;  %v11699_v9 = vpop.f32.mrb[115].mxu1 }
 0xab3   :  { %v11884_v29 = vsub.f32 0.0, %v11696_v14  ;;  %v11700_v60 = vadd.f32 %v11699_v9, %v19718_v19 }
 0xab4   :  { %v11955_v48 = vmul.f32 1.442695, %v11883_v0  ;;  %v11887_v10 = vsub.f32 0.0, %v11698_v36 }
 0xab5   :  { %v11957_v25 = vmul.f32 1.442695, %v11884_v29  ;;  %v11888_v47 = vsub.f32 0.0, %v11700_v60 }
 0xab6   :  { %15148 = vpow2.f32 %v11955_v48  ;;  %v11963_v39 = vmul.f32 1.442695, %v11887_v10 }
 0xab7   :  { %15150 = vpow2.f32 %v11957_v25  ;;  %v11965_v45 = vmul.f32 1.442695, %v11888_v47  ;;  %v11703_v34 = vpop.f32.mrb[116].mxu1 }
 0xab8   :  { %v15141_v54 = vpop.eup %15140  ;;  %15152 = vpow2.f32 %v11963_v39  ;;  %v11704_v22 = vadd.f32 %v11703_v34, %v19714_v62  ;;  %v11705_v56 = vpop.f32.mrb[117].mxu1 }
 0xab9   :  { %v15143_v58 = vpop.eup %15142  ;;  %v12067_v28 = vadd.f32 1.0, %v15141_v54  ;;  %15154 = vpow2.f32 %v11965_v45  ;;  %v11706_v27 = vadd.f32 %v11705_v56, %v19718_v19  ;;  %v11707_v59 = vpop.f32.mrb[118].mxu1 }
 0xaba   :  { %v15145_v44 = vpop.eup %15144  ;;  %v12068_v38 = vadd.f32 1.0, %v15143_v58  ;;  %v11891_v1 = vsub.f32 0.0, %v11704_v22  ;;  %v11708_v61 = vadd.f32 %v11707_v59, %v19714_v62  ;;  %v11709_v32 = vpop.f32.mrb[119].mxu1 }
 0xabb   :  { %v15147_v35 = vpop.eup %15146  ;;  %15156 = vrcp.f32 %v12067_v28  ;;  %v12071_v51 = vadd.f32 1.0, %v15145_v44  ;;  %v11892_v24 = vsub.f32 0.0, %v11706_v27  ;;  %v11710_v15 = vadd.f32 %v11709_v32, %v19718_v19 }
 0xabc   :  { %15158 = vrcp.f32 %v12068_v38  ;;  %v12072_v63 = vadd.f32 1.0, %v15147_v35  ;;  %v11971_v7 = vmul.f32 1.442695, %v11891_v1  ;;  %v11895_v52 = vsub.f32 0.0, %v11708_v61 }
 0xabd   :  { %15160 = vrcp.f32 %v12071_v51  ;;  %v11973_v33 = vmul.f32 1.442695, %v11892_v24  ;;  %v11896_v2 = vsub.f32 0.0, %v11710_v15 }
 0xabe   :  { %15162 = vrcp.f32 %v12072_v63  ;;  %v11979_v37 = vmul.f32 1.442695, %v11895_v52 }
 0xabf   :  { %15164 = vpow2.f32 %v11971_v7  ;;  %v11981_v43 = vmul.f32 1.442695, %v11896_v2  ;;  %v11713_v49 = vpop.f32.mrb[120].mxu1 }
 0xac0   :  { %v15149_v16 = vpop.eup %15148  ;;  %15166 = vpow2.f32 %v11973_v33  ;;  %v11714_v55 = vadd.f32 %v11713_v49, %v19714_v62  ;;  %v11715_v4 = vpop.f32.mrb[121].mxu1 }
 0xac1   :  { %v15151_v18 = vpop.eup %15150  ;;  %v12075_v21 = vadd.f32 1.0, %v15149_v16  ;;  %15168 = vpow2.f32 %v11979_v37  ;;  %v11716_v26 = vadd.f32 %v11715_v4, %v19718_v19  ;;  %v11717_v17 = vpop.f32.mrb[122].mxu1 }
 0xac2   :  { %v15153_v42 = vpop.eup %15152  ;;  %v12076_v31 = vadd.f32 1.0, %v15151_v18  ;;  %15170 = vpow2.f32 %v11981_v43  ;;  %v11899_v57 = vsub.f32 0.0, %v11714_v55  ;;  %v11718_v13 = vadd.f32 %v11717_v17, %v19714_v62  ;;  %v11719_v6 = vpop.f32.mrb[123].mxu1 }
 0xac3   :  { %v15155_v30 = vpop.eup %15154  ;;  %15172 = vrcp.f32 %v12075_v21  ;;  %v12079_v41 = vadd.f32 1.0, %v15153_v42  ;;  %v11900_v46 = vsub.f32 0.0, %v11716_v26  ;;  %v11720_v53 = vadd.f32 %v11719_v6, %v19718_v19 }
 0xac4   :  { %15174 = vrcp.f32 %v12076_v31  ;;  %v12080_v8 = vadd.f32 1.0, %v15155_v30  ;;  %v11987_v40 = vmul.f32 1.442695, %v11899_v57  ;;  %v11903_v5 = vsub.f32 0.0, %v11718_v13 }
 0xac5   :  { %v15157_v11 = vpop.eup %15156  ;;  %15176 = vrcp.f32 %v12079_v41  ;;  %v11989_v12 = vmul.f32 1.442695, %v11900_v46  ;;  %v11904_v14 = vsub.f32 0.0, %v11720_v53 }
 0xac6   :  { %v15159_v50 = vpop.eup %15158  ;;  %12195 = vst [vmem:[%s19997_s13] ss:$2 sm:$0xff] %v15157_v11  ;;  %15178 = vrcp.f32 %v12080_v8  ;;  %v11995_v0 = vmul.f32 1.442695, %v11903_v5 }
 0xac7   :  { %v15161_v36 = vpop.eup %15160  ;;  %12929 = vst [vmem:[%s19997_s13 + $0x1] ss:$2 sm:$0xff] %v15159_v50  ;;  %15180 = vpow2.f32 %v11987_v40  ;;  %v11997_v9 = vmul.f32 1.442695, %v11904_v14  ;;  %v11723_v29 = vpop.f32.mrb[124].mxu1 }
 0xac8   :  { %v15163_v60 = vpop.eup %15162  ;;  %12932 = vst [vmem:[%s19997_s13 + $0x20] ss:$2 sm:$0xff] %v15161_v36  ;;  %15182 = vpow2.f32 %v11989_v12  ;;  %v11724_v48 = vadd.f32 %v11723_v29, %v19714_v62  ;;  %v11725_v10 = vpop.f32.mrb[125].mxu1 }
 0xac9   :  { %v15165_v25 = vpop.eup %15164  ;;  %12933 = vst [vmem:[%s19997_s13 + $0x21] ss:$2 sm:$0xff] %v15163_v60  ;;  %15184 = vpow2.f32 %v11995_v0  ;;  %v11726_v47 = vadd.f32 %v11725_v10, %v19718_v19  ;;  %v11727_v39 = vpop.f32.mrb[126].mxu1 }
 0xaca   :  { %v15167_v45 = vpop.eup %15166  ;;  %v12083_v34 = vadd.f32 1.0, %v15165_v25  ;;  %15186 = vpow2.f32 %v11997_v9  ;;  %v11907_v54 = vsub.f32 0.0, %v11724_v48  ;;  %v11728_v22 = vadd.f32 %v11727_v39, %v19714_v62  ;;  %v11729_v56 = vpop.f32.mrb[127].mxu1 }
 0xacb   :  { %v15169_v58 = vpop.eup %15168  ;;  %v12084_v28 = vadd.f32 1.0, %v15167_v45  ;;  %v11908_v27 = vsub.f32 0.0, %v11726_v47  ;;  %v11730_v59 = vadd.f32 %v11729_v56, %v19718_v19 }
 0xacc   :  { %v15171_v44 = vpop.eup %15170  ;;  %15188 = vrcp.f32 %v12083_v34  ;;  %v12087_v38 = vadd.f32 1.0, %v15169_v58  ;;  %v12003_v1 = vmul.f32 1.442695, %v11907_v54  ;;  %v11911_v61 = vsub.f32 0.0, %v11728_v22 }
 0xacd   :  { %v15173_v32 = vpop.eup %15172  ;;  %15190 = vrcp.f32 %v12084_v28  ;;  %v12088_v35 = vadd.f32 1.0, %v15171_v44  ;;  %v12005_v51 = vmul.f32 1.442695, %v11908_v27  ;;  %v11912_v24 = vsub.f32 0.0, %v11730_v59 }
 0xace   :  { %v15175_v15 = vpop.eup %15174  ;;  %12936 = vst [vmem:[%s19997_s13 + $0x40] ss:$2 sm:$0xff] %v15173_v32  ;;  %15192 = vrcp.f32 %v12087_v38  ;;  %v12011_v63 = vmul.f32 1.442695, %v11911_v61 }
 0xacf   :  { %v15177_v7 = vpop.eup %15176  ;;  %12937 = vst [vmem:[%s19997_s13 + $0x41] ss:$2 sm:$0xff] %v15175_v15  ;;  %15194 = vrcp.f32 %v12088_v35  ;;  %v12013_v52 = vmul.f32 1.442695, %v11912_v24  ;;  %v11733_v33 = vpop.f32.mrb[128].mxu1 }
 0xad0   :  { %v15179_v2 = vpop.eup %15178  ;;  %12940 = vst [vmem:[%s19997_s13 + $0x60] ss:$2 sm:$0xff] %v15177_v7  ;;  %15196 = vpow2.f32 %v12003_v1  ;;  %v11734_v37 = vadd.f32 %v11733_v33, %v19714_v62  ;;  %v11735_v43 = vpop.f32.mrb[129].mxu1 }
 0xad1   :  { %v15181_v49 = vpop.eup %15180  ;;  %12941 = vst [vmem:[%s19997_s13 + $0x61] ss:$2 sm:$0xff] %v15179_v2  ;;  %15198 = vpow2.f32 %v12005_v51  ;;  %v11736_v16 = vadd.f32 %v11735_v43, %v19718_v19  ;;  %v11737_v55 = vpop.f32.mrb[130].mxu1 }
 0xad2   :  { %v15183_v4 = vpop.eup %15182  ;;  %v12091_v18 = vadd.f32 1.0, %v15181_v49  ;;  %15200 = vpow2.f32 %v12011_v63  ;;  %v11915_v21 = vsub.f32 0.0, %v11734_v37  ;;  %v11738_v26 = vadd.f32 %v11737_v55, %v19714_v62  ;;  %v11739_v17 = vpop.f32.mrb[131].mxu1 }
 0xad3   :  { %v15185_v42 = vpop.eup %15184  ;;  %v12092_v31 = vadd.f32 1.0, %v15183_v4  ;;  %15202 = vpow2.f32 %v12013_v52  ;;  %v11916_v57 = vsub.f32 0.0, %v11736_v16  ;;  %v11740_v13 = vadd.f32 %v11739_v17, %v19718_v19 }
 0xad4   :  { %v15187_v6 = vpop.eup %15186  ;;  %15204 = vrcp.f32 %v12091_v18  ;;  %v12095_v30 = vadd.f32 1.0, %v15185_v42  ;;  %v12019_v41 = vmul.f32 1.442695, %v11915_v21  ;;  %v11919_v46 = vsub.f32 0.0, %v11738_v26 }
 0xad5   :  { %15206 = vrcp.f32 %v12092_v31  ;;  %v12096_v53 = vadd.f32 1.0, %v15187_v6  ;;  %v12021_v8 = vmul.f32 1.442695, %v11916_v57  ;;  %v11920_v40 = vsub.f32 0.0, %v11740_v13 }
 0xad6   :  { %v15189_v5 = vpop.eup %15188  ;;  %15208 = vrcp.f32 %v12095_v30  ;;  %v12027_v11 = vmul.f32 1.442695, %v11919_v46  ;;  %v19797_v49 = vrot.slane %v19710_v23, %v19609_v20  ;;  %v19806_v20 = vrot.slane %v19710_v23, %v19612_v3 }
 0xad7   :  { %v15191_v12 = vpop.eup %15190  ;;  %12944 = vst [vmem:[%s19997_s13 + $0x80] ss:$2 sm:$0xff] %v15189_v5  ;;  %15210 = vrcp.f32 %v12096_v53  ;;  %v12029_v14 = vmul.f32 1.442695, %v11920_v40  ;;  %v11743_v50 = vpop.f32.mrb[132].mxu1 }
 0xad8   :  { %v15193_v0 = vpop.eup %15192  ;;  %12945 = vst [vmem:[%s19997_s13 + $0x81] ss:$2 sm:$0xff] %v15191_v12  ;;  %15212 = vpow2.f32 %v12019_v41  ;;  %v11744_v36 = vadd.f32 %v11743_v50, %v19714_v62  ;;  %v11745_v9 = vpop.f32.mrb[133].mxu1 }
 0xad9   :  { %v15195_v29 = vpop.eup %15194  ;;  %12948 = vst [vmem:[%s19997_s13 + $0xa0] ss:$2 sm:$0xff] %v15193_v0  ;;  %15214 = vpow2.f32 %v12021_v8  ;;  %v11746_v60 = vadd.f32 %v11745_v9, %v19718_v19  ;;  %v11747_v48 = vpop.f32.mrb[134].mxu1 }
 0xada   :  { %v15197_v10 = vpop.eup %15196  ;;  %12949 = vst [vmem:[%s19997_s13 + $0xa1] ss:$2 sm:$0xff] %v15195_v29  ;;  %15216 = vpow2.f32 %v12027_v11  ;;  %v11923_v25 = vsub.f32 0.0, %v11744_v36  ;;  %v11748_v47 = vadd.f32 %v11747_v48, %v19714_v62  ;;  %v11749_v39 = vpop.f32.mrb[135].mxu1 }
 0xadb   :  { %v15199_v45 = vpop.eup %15198  ;;  %v12099_v34 = vadd.f32 1.0, %v15197_v10  ;;  %15218 = vpow2.f32 %v12029_v14  ;;  %v11924_v54 = vsub.f32 0.0, %v11746_v60  ;;  %v11750_v22 = vadd.f32 %v11749_v39, %v19718_v19 }
 0xadc   :  { %v15201_v56 = vpop.eup %15200  ;;  %v12100_v58 = vadd.f32 1.0, %v15199_v45  ;;  %v11927_v28 = vsub.f32 0.0, %v11748_v47  ;;  %v12035_v44 = vmul.f32 1.442695, %v11923_v25 }
 0xadd   :  { %v15203_v27 = vpop.eup %15202  ;;  %15220 = vrcp.f32 %v12099_v34  ;;  %v12103_v59 = vadd.f32 1.0, %v15201_v56  ;;  %v11928_v38 = vsub.f32 0.0, %v11750_v22  ;;  %v12037_v32 = vmul.f32 1.442695, %v11924_v54 }
 0xade   :  { %v15205_v1 = vpop.eup %15204  ;;  %15222 = vrcp.f32 %v12100_v58  ;;  %v12104_v61 = vadd.f32 1.0, %v15203_v27  ;;  %v12043_v51 = vmul.f32 1.442695, %v11927_v28 }
 0xadf   :  { %v15207_v35 = vpop.eup %15206  ;;  %12952 = vst [vmem:[%s19997_s13 + $0xc0] ss:$2 sm:$0xff] %v15205_v1  ;;  %15224 = vrcp.f32 %v12103_v59  ;;  %v11753_v24 = vpop.f32.mrb[136].mxu1  ;;  %v12045_v63 = vmul.f32 1.442695, %v11928_v38 }
 0xae0   :  { %v15209_v15 = vpop.eup %15208  ;;  %12953 = vst [vmem:[%s19997_s13 + $0xc1] ss:$2 sm:$0xff] %v15207_v35  ;;  %15226 = vrcp.f32 %v12104_v61  ;;  %v11754_v7 = vadd.f32 %v11753_v24, %v19714_v62  ;;  %v11755_v52 = vpop.f32.mrb[137].mxu1 }
 0xae1   :  { %v15211_v33 = vpop.eup %15210  ;;  %12956 = vst [vmem:[%s19997_s13 + $0xe0] ss:$2 sm:$0xff] %v15209_v15  ;;  %15228 = vpow2.f32 %v12035_v44  ;;  %v11756_v2 = vadd.f32 %v11755_v52, %v19718_v19  ;;  %v11757_v37 = vpop.f32.mrb[138].mxu1 }
 0xae2   :  { %v15213_v43 = vpop.eup %15212  ;;  %12957 = vst [vmem:[%s19997_s13 + $0xe1] ss:$2 sm:$0xff] %v15211_v33  ;;  %15230 = vpow2.f32 %v12037_v32  ;;  %v11931_v16 = vsub.f32 0.0, %v11754_v7  ;;  %v11758_v55 = vadd.f32 %v11757_v37, %v19714_v62  ;;  %v11759_v4 = vpop.f32.mrb[139].mxu1 }
 0xae3   :  { %v15215_v18 = vpop.eup %15214  ;;  %v12107_v21 = vadd.f32 1.0, %v15213_v43  ;;  %15232 = vpow2.f32 %v12043_v51  ;;  %v11932_v26 = vsub.f32 0.0, %v11756_v2  ;;  %v11760_v17 = vadd.f32 %v11759_v4, %v19718_v19 }
 0xae4   :  { %v15217_v42 = vpop.eup %15216  ;;  %v12108_v31 = vadd.f32 1.0, %v15215_v18  ;;  %15234 = vpow2.f32 %v12045_v63  ;;  %v11935_v57 = vsub.f32 0.0, %v11758_v55  ;;  %v12051_v30 = vmul.f32 1.442695, %v11931_v16 }
 0xae5   :  { %v15219_v13 = vpop.eup %15218  ;;  %15236 = vrcp.f32 %v12107_v21  ;;  %v12111_v6 = vadd.f32 1.0, %v15217_v42  ;;  %v11936_v62 = vsub.f32 0.0, %v11760_v17  ;;  %v12053_v46 = vmul.f32 1.442695, %v11932_v26 }
 0xae6   :  { %15238 = vrcp.f32 %v12108_v31  ;;  %v12112_v41 = vadd.f32 1.0, %v15219_v13  ;;  %v12059_v8 = vmul.f32 1.442695, %v11935_v57 }
 0xae7   :  { %v15221_v53 = vpop.eup %15220  ;;  %15240 = vrcp.f32 %v12111_v6  ;;  %v11796_v19 = vpop.f32.mrb[140].mxu1  ;;  %v12061_v3 = vmul.f32 1.442695, %v11936_v62 }
 0xae8   :  { %v15223_v40 = vpop.eup %15222  ;;  %12960 = vst [vmem:[%s19997_s13 + $0x100] ss:$2 sm:$0xff] %v15221_v53  ;;  %15242 = vrcp.f32 %v12112_v41  ;;  %v11797_v23 = vadd.f32 %v11796_v19, %v19797_v49  ;;  %v11798_v5 = vpop.f32.mrb[141].mxu1 }
 0xae9   :  { %v15225_v11 = vpop.eup %15224  ;;  %12961 = vst [vmem:[%s19997_s13 + $0x101] ss:$2 sm:$0xff] %v15223_v40  ;;  %15244 = vpow2.f32 %v12051_v30  ;;  %v11799_v12 = vadd.f32 %v11798_v5, %v19806_v20  ;;  %v11800_v14 = vpop.f32.mrb[142].mxu1 }
 0xaea   :  { %v15227_v50 = vpop.eup %15226  ;;  %12964 = vst [vmem:[%s19997_s13 + $0x120] ss:$2 sm:$0xff] %v15225_v11  ;;  %15246 = vpow2.f32 %v12053_v46  ;;  %v11877_v0 = vsub.f32 0.0, %v11797_v23  ;;  %v11801_v36 = vadd.f32 %v11800_v14, %v19797_v49  ;;  %v11802_v9 = vpop.f32.mrb[143].mxu1 }
 0xaeb   :  { %v15229_v29 = vpop.eup %15228  ;;  %12965 = vst [vmem:[%s19997_s13 + $0x121] ss:$2 sm:$0xff] %v15227_v50  ;;  %15248 = vpow2.f32 %v12059_v8  ;;  %v11878_v60 = vsub.f32 0.0, %v11799_v12  ;;  %v11803_v48 = vadd.f32 %v11802_v9, %v19806_v20 }
 0xaec   :  { %v15231_v10 = vpop.eup %15230  ;;  %v12115_v25 = vadd.f32 1.0, %v15229_v29  ;;  %15250 = vpow2.f32 %v12061_v3  ;;  %v11881_v47 = vsub.f32 0.0, %v11801_v36  ;;  %v11943_v56 = vmul.f32 1.442695, %v11877_v0 }
 0xaed   :  { %v15233_v39 = vpop.eup %15232  ;;  %v12116_v45 = vadd.f32 1.0, %v15231_v10  ;;  %v11882_v34 = vsub.f32 0.0, %v11803_v48  ;;  %v11945_v27 = vmul.f32 1.442695, %v11878_v60 }
 0xaee   :  { %v15235_v54 = vpop.eup %15234  ;;  %15252 = vrcp.f32 %v12115_v25  ;;  %v12119_v22 = vadd.f32 1.0, %v15233_v39  ;;  %v11951_v38 = vmul.f32 1.442695, %v11881_v47 }
 0xaef   :  { %v15237_v58 = vpop.eup %15236  ;;  %15254 = vrcp.f32 %v12116_v45  ;;  %v12120_v28 = vadd.f32 1.0, %v15235_v54  ;;  %v11806_v59 = vpop.f32.mrb[144].mxu1  ;;  %v11953_v35 = vmul.f32 1.442695, %v11882_v34 }
 0xaf0   :  { %v15239_v44 = vpop.eup %15238  ;;  %12968 = vst [vmem:[%s19997_s13 + $0x140] ss:$2 sm:$0xff] %v15237_v58  ;;  %15256 = vrcp.f32 %v12119_v22  ;;  %v11807_v1 = vadd.f32 %v11806_v59, %v19797_v49  ;;  %v11808_v61 = vpop.f32.mrb[145].mxu1 }
 0xaf1   :  { %v15241_v32 = vpop.eup %15240  ;;  %12969 = vst [vmem:[%s19997_s13 + $0x141] ss:$2 sm:$0xff] %v15239_v44  ;;  %15258 = vrcp.f32 %v12120_v28  ;;  %v11809_v51 = vadd.f32 %v11808_v61, %v19806_v20  ;;  %v11810_v24 = vpop.f32.mrb[146].mxu1 }
 0xaf2   :  { %v15243_v15 = vpop.eup %15242  ;;  %12972 = vst [vmem:[%s19997_s13 + $0x160] ss:$2 sm:$0xff] %v15241_v32  ;;  %15260 = vpow2.f32 %v11943_v56  ;;  %v11885_v63 = vsub.f32 0.0, %v11807_v1  ;;  %v11811_v7 = vadd.f32 %v11810_v24, %v19797_v49  ;;  %v11812_v52 = vpop.f32.mrb[147].mxu1 }
 0xaf3   :  { %v15245_v33 = vpop.eup %15244  ;;  %12973 = vst [vmem:[%s19997_s13 + $0x161] ss:$2 sm:$0xff] %v15243_v15  ;;  %15262 = vpow2.f32 %v11945_v27  ;;  %v11886_v2 = vsub.f32 0.0, %v11809_v51  ;;  %v11813_v37 = vadd.f32 %v11812_v52, %v19806_v20 }
 0xaf4   :  { %v15247_v43 = vpop.eup %15246  ;;  %v12123_v16 = vadd.f32 1.0, %v15245_v33  ;;  %15264 = vpow2.f32 %v11951_v38  ;;  %v11889_v55 = vsub.f32 0.0, %v11811_v7  ;;  %v11959_v42 = vmul.f32 1.442695, %v11885_v63 }
 0xaf5   :  { %v15249_v4 = vpop.eup %15248  ;;  %v12124_v18 = vadd.f32 1.0, %v15247_v43  ;;  %15266 = vpow2.f32 %v11953_v35  ;;  %v11890_v21 = vsub.f32 0.0, %v11813_v37  ;;  %v11961_v57 = vmul.f32 1.442695, %v11886_v2 }
 0xaf6   :  { %v15251_v26 = vpop.eup %15250  ;;  %15268 = vrcp.f32 %v12123_v16  ;;  %v12127_v17 = vadd.f32 1.0, %v15249_v4  ;;  %v11967_v30 = vmul.f32 1.442695, %v11889_v55 }
 0xaf7   :  { %15270 = vrcp.f32 %v12124_v18  ;;  %v12128_v31 = vadd.f32 1.0, %v15251_v26  ;;  %v11816_v13 = vpop.f32.mrb[148].mxu1  ;;  %v11969_v53 = vmul.f32 1.442695, %v11890_v21 }
 0xaf8   :  { %v15253_v6 = vpop.eup %15252  ;;  %15272 = vrcp.f32 %v12127_v17  ;;  %v11817_v62 = vadd.f32 %v11816_v13, %v19797_v49  ;;  %v11818_v41 = vpop.f32.mrb[149].mxu1 }
 0xaf9   :  { %v15255_v46 = vpop.eup %15254  ;;  %12976 = vst [vmem:[%s19997_s13 + $0x180] ss:$2 sm:$0xff] %v15253_v6  ;;  %15274 = vrcp.f32 %v12128_v31  ;;  %v11819_v8 = vadd.f32 %v11818_v41, %v19806_v20  ;;  %v11820_v19 = vpop.f32.mrb[150].mxu1 }
 0xafa   :  { %v15257_v40 = vpop.eup %15256  ;;  %12977 = vst [vmem:[%s19997_s13 + $0x181] ss:$2 sm:$0xff] %v15255_v46  ;;  %15276 = vpow2.f32 %v11959_v42  ;;  %v11893_v3 = vsub.f32 0.0, %v11817_v62  ;;  %v11821_v23 = vadd.f32 %v11820_v19, %v19797_v49  ;;  %v11822_v5 = vpop.f32.mrb[151].mxu1 }
 0xafb   :  { %v15259_v11 = vpop.eup %15258  ;;  %12980 = vst [vmem:[%s19997_s13 + $0x1a0] ss:$2 sm:$0xff] %v15257_v40  ;;  %15278 = vpow2.f32 %v11961_v57  ;;  %v11894_v12 = vsub.f32 0.0, %v11819_v8  ;;  %v11823_v14 = vadd.f32 %v11822_v5, %v19806_v20 }
 0xafc   :  { %v15261_v50 = vpop.eup %15260  ;;  %12981 = vst [vmem:[%s19997_s13 + $0x1a1] ss:$2 sm:$0xff] %v15259_v11  ;;  %15280 = vpow2.f32 %v11967_v30  ;;  %v11975_v0 = vmul.f32 1.442695, %v11893_v3  ;;  %v11897_v36 = vsub.f32 0.0, %v11821_v23 }
 0xafd   :  { %v15263_v9 = vpop.eup %15262  ;;  %v12069_v29 = vadd.f32 1.0, %v15261_v50  ;;  %15282 = vpow2.f32 %v11969_v53  ;;  %v11898_v60 = vsub.f32 0.0, %v11823_v14  ;;  %v11977_v39 = vmul.f32 1.442695, %v11894_v12 }
 0xafe   :  { %v15265_v48 = vpop.eup %15264  ;;  %v12070_v10 = vadd.f32 1.0, %v15263_v9  ;;  %15284 = vpow2.f32 %v11975_v0  ;;  %v11983_v22 = vmul.f32 1.442695, %v11897_v36 }
 0xaff   :  { %v15267_v25 = vpop.eup %15266  ;;  %15286 = vrcp.f32 %v12069_v29  ;;  %v12073_v47 = vadd.f32 1.0, %v15265_v48  ;;  %v11826_v45 = vpop.f32.mrb[152].mxu1  ;;  %v11985_v27 = vmul.f32 1.442695, %v11898_v60 }
 0xb00   :  { %v15269_v34 = vpop.eup %15268  ;;  %15288 = vrcp.f32 %v12070_v10  ;;  %v12074_v54 = vadd.f32 1.0, %v15267_v25  ;;  %v11827_v56 = vadd.f32 %v11826_v45, %v19797_v49  ;;  %v11828_v58 = vpop.f32.mrb[153].mxu1 }
 0xb01   :  { %v15271_v28 = vpop.eup %15270  ;;  %12984 = vst [vmem:[%s19997_s13 + $0x1c0] ss:$2 sm:$0xff] %v15269_v34  ;;  %15290 = vrcp.f32 %v12073_v47  ;;  %v11829_v59 = vadd.f32 %v11828_v58, %v19806_v20  ;;  %v11830_v44 = vpop.f32.mrb[154].mxu1 }
 0xb02   :  { %v15273_v38 = vpop.eup %15272  ;;  %12985 = vst [vmem:[%s19997_s13 + $0x1c1] ss:$2 sm:$0xff] %v15271_v28  ;;  %15292 = vrcp.f32 %v12074_v54  ;;  %v11901_v1 = vsub.f32 0.0, %v11827_v56  ;;  %v11831_v61 = vadd.f32 %v11830_v44, %v19797_v49  ;;  %v11832_v32 = vpop.f32.mrb[155].mxu1 }
 0xb03   :  { %v15275_v35 = vpop.eup %15274  ;;  %12988 = vst [vmem:[%s19997_s13 + $0x1e0] ss:$2 sm:$0xff] %v15273_v38  ;;  %15294 = vpow2.f32 %v11977_v39  ;;  %v11833_v51 = vadd.f32 %v11832_v32, %v19806_v20  ;;  %v11902_v63 = vsub.f32 0.0, %v11829_v59 }
 0xb04   :  { %v15277_v24 = vpop.eup %15276  ;;  %12989 = vst [vmem:[%s19997_s13 + $0x1e1] ss:$2 sm:$0xff] %v15275_v35  ;;  %15296 = vpow2.f32 %v11983_v22  ;;  %v11991_v15 = vmul.f32 1.442695, %v11901_v1  ;;  %v11905_v33 = vsub.f32 0.0, %v11831_v61 }
 0xb05   :  { %v15279_v7 = vpop.eup %15278  ;;  %v12077_v52 = vadd.f32 1.0, %v15277_v24  ;;  %15298 = vpow2.f32 %v11985_v27  ;;  %v11906_v43 = vsub.f32 0.0, %v11833_v51  ;;  %v11993_v26 = vmul.f32 1.442695, %v11902_v63 }
 0xb06   :  { %v15281_v2 = vpop.eup %15280  ;;  %v12078_v37 = vadd.f32 1.0, %v15279_v7  ;;  %15300 = vpow2.f32 %v11991_v15  ;;  %v11999_v13 = vmul.f32 1.442695, %v11905_v33 }
 0xb07   :  { %v15283_v16 = vpop.eup %15282  ;;  %15302 = vrcp.f32 %v12077_v52  ;;  %v12081_v55 = vadd.f32 1.0, %v15281_v2  ;;  %v11836_v4 = vpop.f32.mrb[156].mxu1  ;;  %v12001_v41 = vmul.f32 1.442695, %v11906_v43 }
 0xb08   :  { %v15285_v18 = vpop.eup %15284  ;;  %15304 = vrcp.f32 %v12078_v37  ;;  %v12082_v21 = vadd.f32 1.0, %v15283_v16  ;;  %v11837_v17 = vadd.f32 %v11836_v4, %v19797_v49  ;;  %v11838_v42 = vpop.f32.mrb[157].mxu1 }
 0xb09   :  { %v15287_v31 = vpop.eup %15286  ;;  %15306 = vrcp.f32 %v12081_v55  ;;  %v12085_v57 = vadd.f32 1.0, %v15285_v18  ;;  %v11839_v6 = vadd.f32 %v11838_v42, %v19806_v20  ;;  %v11840_v30 = vpop.f32.mrb[158].mxu1 }
 0xb0a   :  { %v15289_v62 = vpop.eup %15288  ;;  %12930 = vst [vmem:[%s19997_s13 + $0x10] ss:$2 sm:$0xff] %v15287_v31  ;;  %15308 = vrcp.f32 %v12082_v21  ;;  %v11909_v46 = vsub.f32 0.0, %v11837_v17  ;;  %v11841_v53 = vadd.f32 %v11840_v30, %v19797_v49  ;;  %v11842_v8 = vpop.f32.mrb[159].mxu1 }
 0xb0b   :  { %v15291_v19 = vpop.eup %15290  ;;  %12931 = vst [vmem:[%s19997_s13 + $0x11] ss:$2 sm:$0xff] %v15289_v62  ;;  %15310 = vrcp.f32 %v12085_v57  ;;  %v11843_v40 = vadd.f32 %v11842_v8, %v19806_v20  ;;  %v11910_v5 = vsub.f32 0.0, %v11839_v6 }
 0xb0c   :  { %v15293_v3 = vpop.eup %15292  ;;  %12934 = vst [vmem:[%s19997_s13 + $0x30] ss:$2 sm:$0xff] %v15291_v19  ;;  %15312 = vpow2.f32 %v11993_v26  ;;  %v12007_v23 = vmul.f32 1.442695, %v11909_v46  ;;  %v11913_v12 = vsub.f32 0.0, %v11841_v53 }
 0xb0d   :  { %v15295_v11 = vpop.eup %15294  ;;  %12935 = vst [vmem:[%s19997_s13 + $0x31] ss:$2 sm:$0xff] %v15293_v3  ;;  %15314 = vpow2.f32 %v11999_v13  ;;  %v11914_v0 = vsub.f32 0.0, %v11843_v40  ;;  %v12009_v10 = vmul.f32 1.442695, %v11910_v5 }
 0xb0e   :  { %v15297_v14 = vpop.eup %15296  ;;  %v12086_v50 = vadd.f32 1.0, %v15295_v11  ;;  %15316 = vpow2.f32 %v12001_v41  ;;  %v12015_v34 = vmul.f32 1.442695, %v11913_v12 }
 0xb0f   :  { %v15299_v36 = vpop.eup %15298  ;;  %v12089_v9 = vadd.f32 1.0, %v15297_v14  ;;  %15318 = vpow2.f32 %v12007_v23  ;;  %v11846_v29 = vpop.f32.mrb[160].mxu1  ;;  %v12017_v58 = vmul.f32 1.442695, %v11914_v0 }
 0xb10   :  { %v15301_v60 = vpop.eup %15300  ;;  %15320 = vrcp.f32 %v12086_v50  ;;  %v12090_v48 = vadd.f32 1.0, %v15299_v36  ;;  %v11847_v25 = vadd.f32 %v11846_v29, %v19797_v49  ;;  %v11848_v47 = vpop.f32.mrb[161].mxu1 }
 0xb11   :  { %v15303_v39 = vpop.eup %15302  ;;  %15322 = vrcp.f32 %v12089_v9  ;;  %v12093_v45 = vadd.f32 1.0, %v15301_v60  ;;  %v11849_v54 = vadd.f32 %v11848_v47, %v19806_v20  ;;  %v11850_v22 = vpop.f32.mrb[162].mxu1 }
 0xb12   :  { %v15305_v56 = vpop.eup %15304  ;;  %12938 = vst [vmem:[%s19997_s13 + $0x50] ss:$2 sm:$0xff] %v15303_v39  ;;  %15324 = vrcp.f32 %v12090_v48  ;;  %v11917_v28 = vsub.f32 0.0, %v11847_v25  ;;  %v11851_v27 = vadd.f32 %v11850_v22, %v19797_v49  ;;  %v11852_v59 = vpop.f32.mrb[163].mxu1 }
 0xb13   :  { %v15307_v44 = vpop.eup %15306  ;;  %12939 = vst [vmem:[%s19997_s13 + $0x51] ss:$2 sm:$0xff] %v15305_v56  ;;  %15326 = vrcp.f32 %v12093_v45  ;;  %v11918_v38 = vsub.f32 0.0, %v11849_v54  ;;  %v11853_v1 = vadd.f32 %v11852_v59, %v19806_v20 }
 0xb14   :  { %v15309_v61 = vpop.eup %15308  ;;  %12942 = vst [vmem:[%s19997_s13 + $0x70] ss:$2 sm:$0xff] %v15307_v44  ;;  %15328 = vpow2.f32 %v12009_v10  ;;  %v12023_v32 = vmul.f32 1.442695, %v11917_v28  ;;  %v11921_v35 = vsub.f32 0.0, %v11851_v27 }
 0xb15   :  { %v15311_v51 = vpop.eup %15310  ;;  %12943 = vst [vmem:[%s19997_s13 + $0x71] ss:$2 sm:$0xff] %v15309_v61  ;;  %15330 = vpow2.f32 %v12015_v34  ;;  %v12025_v24 = vmul.f32 1.442695, %v11918_v38  ;;  %v11922_v15 = vsub.f32 0.0, %v11853_v1 }
 0xb16   :  { %v15313_v63 = vpop.eup %15312  ;;  %12946 = vst [vmem:[%s19997_s13 + $0x90] ss:$2 sm:$0xff] %v15311_v51  ;;  %15332 = vpow2.f32 %v12017_v58  ;;  %v12031_v43 = vmul.f32 1.442695, %v11921_v35 }
 0xb17   :  { %v15315_v7 = vpop.eup %15314  ;;  %v12094_v52 = vadd.f32 1.0, %v15313_v63  ;;  %15334 = vpow2.f32 %v12023_v32  ;;  %v11856_v33 = vpop.f32.mrb[164].mxu1  ;;  %v12033_v21 = vmul.f32 1.442695, %v11922_v15 }
 0xb18   :  { %v15317_v2 = vpop.eup %15316  ;;  %v12097_v37 = vadd.f32 1.0, %v15315_v7  ;;  %15336 = vpow2.f32 %v12025_v24  ;;  %v11857_v16 = vadd.f32 %v11856_v33, %v19797_v49  ;;  %v11858_v55 = vpop.f32.mrb[165].mxu1 }
 0xb19   :  { %v15319_v4 = vpop.eup %15318  ;;  %15338 = vrcp.f32 %v12094_v52  ;;  %v12098_v18 = vadd.f32 1.0, %v15317_v2  ;;  %v11859_v26 = vadd.f32 %v11858_v55, %v19806_v20  ;;  %v11860_v17 = vpop.f32.mrb[166].mxu1 }
 0xb1a   :  { %v15321_v42 = vpop.eup %15320  ;;  %15340 = vrcp.f32 %v12097_v37  ;;  %v12101_v31 = vadd.f32 1.0, %v15319_v4  ;;  %v11925_v57 = vsub.f32 0.0, %v11857_v16  ;;  %v11861_v13 = vadd.f32 %v11860_v17, %v19797_v49  ;;  %v11862_v6 = vpop.f32.mrb[167].mxu1 }
 0xb1b   :  { %v15323_v30 = vpop.eup %15322  ;;  %12947 = vst [vmem:[%s19997_s13 + $0x91] ss:$2 sm:$0xff] %v15321_v42  ;;  %15342 = vrcp.f32 %v12098_v18  ;;  %v11926_v62 = vsub.f32 0.0, %v11859_v26  ;;  %v11863_v41 = vadd.f32 %v11862_v6, %v19806_v20 }
 0xb1c   :  { %v15325_v46 = vpop.eup %15324  ;;  %12950 = vst [vmem:[%s19997_s13 + $0xb0] ss:$2 sm:$0xff] %v15323_v30  ;;  %15344 = vrcp.f32 %v12101_v31  ;;  %v12039_v53 = vmul.f32 1.442695, %v11925_v57  ;;  %v11929_v8 = vsub.f32 0.0, %v11861_v13 }
 0xb1d   :  { %v15327_v19 = vpop.eup %15326  ;;  %12951 = vst [vmem:[%s19997_s13 + $0xb1] ss:$2 sm:$0xff] %v15325_v46  ;;  %15346 = vpow2.f32 %v12031_v43  ;;  %v12041_v40 = vmul.f32 1.442695, %v11926_v62  ;;  %v11930_v3 = vsub.f32 0.0, %v11863_v41 }
 0xb1e   :  { %v15329_v23 = vpop.eup %15328  ;;  %12954 = vst [vmem:[%s19997_s13 + $0xd0] ss:$2 sm:$0xff] %v15327_v19  ;;  %15348 = vpow2.f32 %v12033_v21  ;;  %v12047_v0 = vmul.f32 1.442695, %v11929_v8 }
 0xb1f   :  { %v15331_v5 = vpop.eup %15330  ;;  %v12102_v11 = vadd.f32 1.0, %v15329_v23  ;;  %15350 = vpow2.f32 %v12039_v53  ;;  %v11866_v12 = vpop.f32.mrb[168].mxu1  ;;  %v12049_v48 = vmul.f32 1.442695, %v11930_v3 }
 0xb20   :  { %v15333_v14 = vpop.eup %15332  ;;  %v12105_v50 = vadd.f32 1.0, %v15331_v5  ;;  %15352 = vpow2.f32 %v12041_v40  ;;  %v11867_v36 = vadd.f32 %v11866_v12, %v19797_v49  ;;  %v11868_v9 = vpop.f32.mrb[169].mxu1 }
 0xb21   :  { %v15335_v29 = vpop.eup %15334  ;;  %15354 = vrcp.f32 %v12102_v11  ;;  %v12106_v60 = vadd.f32 1.0, %v15333_v14  ;;  %v11869_v10 = vadd.f32 %v11868_v9, %v19806_v20  ;;  %v11870_v25 = vpop.f32.mrb[170].mxu1 }
 0xb22   :  { %v15337_v47 = vpop.eup %15336  ;;  %15356 = vrcp.f32 %v12105_v50  ;;  %v12109_v39 = vadd.f32 1.0, %v15335_v29  ;;  %v11933_v45 = vsub.f32 0.0, %v11867_v36  ;;  %v11871_v34 = vadd.f32 %v11870_v25, %v19797_v49  ;;  %v11872_v54 = vpop.f32.mrb[171].mxu1 }
 0xb23   :  { %v15339_v22 = vpop.eup %15338  ;;  %15358 = vrcp.f32 %v12106_v60  ;;  %v12110_v56 = vadd.f32 1.0, %v15337_v47  ;;  %v11934_v58 = vsub.f32 0.0, %v11869_v10  ;;  %v11873_v28 = vadd.f32 %v11872_v54, %v19806_v20 }
 0xb24   :  { %v15341_v27 = vpop.eup %15340  ;;  %12955 = vst [vmem:[%s19997_s13 + $0xd1] ss:$2 sm:$0xff] %v15339_v22  ;;  %15360 = vrcp.f32 %v12109_v39  ;;  %v12055_v59 = vmul.f32 1.442695, %v11933_v45  ;;  %v11937_v20 = vsub.f32 0.0, %v11871_v34 }
 0xb25   :  { %v15343_v44 = vpop.eup %15342  ;;  %12958 = vst [vmem:[%s19997_s13 + $0xf0] ss:$2 sm:$0xff] %v15341_v27  ;;  %15362 = vrcp.f32 %v12110_v56  ;;  %v12057_v49 = vmul.f32 1.442695, %v11934_v58  ;;  %v11938_v61 = vsub.f32 0.0, %v11873_v28 }
 0xb26   :  { %v15345_v38 = vpop.eup %15344  ;;  %12959 = vst [vmem:[%s19997_s13 + $0xf1] ss:$2 sm:$0xff] %v15343_v44  ;;  %15364 = vpow2.f32 %v12047_v0  ;;  %v12063_v7 = vmul.f32 1.442695, %v11937_v20 }
 0xb27   :  { %v15347_v1 = vpop.eup %15346  ;;  %12962 = vst [vmem:[%s19997_s13 + $0x110] ss:$2 sm:$0xff] %v15345_v38  ;;  %15366 = vpow2.f32 %v12049_v48  ;;  %v12065_v2 = vmul.f32 1.442695, %v11938_v61 }
 0xb28   :  { %v15349_v32 = vpop.eup %15348  ;;  %v12113_v35 = vadd.f32 1.0, %v15347_v1  ;;  %15368 = vpow2.f32 %v12055_v59 }
 0xb29   :  { %v15351_v51 = vpop.eup %15350  ;;  %v12114_v24 = vadd.f32 1.0, %v15349_v32  ;;  %15370 = vpow2.f32 %v12057_v49 }
 0xb2a   :  { %v15353_v15 = vpop.eup %15352  ;;  %15372 = vrcp.f32 %v12113_v35  ;;  %v12117_v63 = vadd.f32 1.0, %v15351_v51 }
 0xb2b   :  { %v15355_v52 = vpop.eup %15354  ;;  %15374 = vrcp.f32 %v12114_v24  ;;  %v12118_v33 = vadd.f32 1.0, %v15353_v15 }
 0xb2c   :  { %v15357_v37 = vpop.eup %15356  ;;  %12963 = vst [vmem:[%s19997_s13 + $0x111] ss:$2 sm:$0xff] %v15355_v52  ;;  %15376 = vrcp.f32 %v12117_v63 }
 0xb2d   :  { %v15359_v43 = vpop.eup %15358  ;;  %12966 = vst [vmem:[%s19997_s13 + $0x130] ss:$2 sm:$0xff] %v15357_v37  ;;  %15378 = vrcp.f32 %v12118_v33 }
 0xb2e   :  { %v15361_v16 = vpop.eup %15360  ;;  %12967 = vst [vmem:[%s19997_s13 + $0x131] ss:$2 sm:$0xff] %v15359_v43  ;;  %15380 = vpow2.f32 %v12063_v7 }
 0xb2f   :  { %v15363_v55 = vpop.eup %15362  ;;  %12970 = vst [vmem:[%s19997_s13 + $0x150] ss:$2 sm:$0xff] %v15361_v16  ;;  %15382 = vpow2.f32 %v12065_v2 }
 0xb30   :  { %v15365_v4 = vpop.eup %15364  ;;  %12971 = vst [vmem:[%s19997_s13 + $0x151] ss:$2 sm:$0xff] %v15363_v55 }
 0xb31   :  { %v15367_v18 = vpop.eup %15366  ;;  %v12121_v21 = vadd.f32 1.0, %v15365_v4 }
 0xb32   :  { %v15369_v26 = vpop.eup %15368  ;;  %v12122_v17 = vadd.f32 1.0, %v15367_v18 }
 0xb33   :  { %v15371_v42 = vpop.eup %15370  ;;  %15384 = vrcp.f32 %v12121_v21  ;;  %v12125_v31 = vadd.f32 1.0, %v15369_v26 }
 0xb34   :  { %v15373_v57 = vpop.eup %15372  ;;  %15386 = vrcp.f32 %v12122_v17  ;;  %v12126_v13 = vadd.f32 1.0, %v15371_v42 }
 0xb35   :  { %v15375_v6 = vpop.eup %15374  ;;  %12974 = vst [vmem:[%s19997_s13 + $0x170] ss:$2 sm:$0xff] %v15373_v57  ;;  %15388 = vrcp.f32 %v12125_v31 }
 0xb36   :  { %v15377_v30 = vpop.eup %15376  ;;  %12975 = vst [vmem:[%s19997_s13 + $0x171] ss:$2 sm:$0xff] %v15375_v6  ;;  %15390 = vrcp.f32 %v12126_v13 }
 0xb37   :  { %v15379_v62 = vpop.eup %15378  ;;  %12978 = vst [vmem:[%s19997_s13 + $0x190] ss:$2 sm:$0xff] %v15377_v30 }
 0xb38   :  { %v15381_v41 = vpop.eup %15380  ;;  %12979 = vst [vmem:[%s19997_s13 + $0x191] ss:$2 sm:$0xff] %v15379_v62 }
 0xb39   :  { %v15383_v46 = vpop.eup %15382  ;;  %v12129_v53 = vadd.f32 1.0, %v15381_v41 }
 0xb3a   :  { %v12130_v8 = vadd.f32 1.0, %v15383_v46 }
 0xb3b   :  { %15392 = vrcp.f32 %v12129_v53 }
 0xb3c   :  { %15394 = vrcp.f32 %v12130_v8 }
 0xb3d   :  { %v15385_v19 = vpop.eup %15384 }
 0xb3e   :  { %v15387_v40 = vpop.eup %15386  ;;  %12982 = vst [vmem:[%s19997_s13 + $0x1b0] ss:$2 sm:$0xff] %v15385_v19 }
 0xb3f   :  { %v15389_v3 = vpop.eup %15388  ;;  %12983 = vst [vmem:[%s19997_s13 + $0x1b1] ss:$2 sm:$0xff] %v15387_v40 }
 0xb40   :  { %v15391_v23 = vpop.eup %15390  ;;  %12986 = vst [vmem:[%s19997_s13 + $0x1d0] ss:$2 sm:$0xff] %v15389_v3 }
 0xb41   :  { %12987 = vst [vmem:[%s19997_s13 + $0x1d1] ss:$2 sm:$0xff] %v15391_v23 }
 0xb45   :  { %v15393_v5 = vpop.eup %15392 }
 0xb46   :  { %v15395_v11 = vpop.eup %15394  ;;  %12990 = vst [vmem:[%s19997_s13 + $0x1f0] ss:$2 sm:$0xff] %v15393_v5 }
 0xb47   :  { %12991 = vst [vmem:[%s19997_s13 + $0x1f1] ss:$2 sm:$0xff] %v15395_v11 }

</bundles_post_ra>
